<compile_context>
chip_gen: v7x
topology: tpu7x:2x2x1
jax: 0.10.0
libtpu: 0.0.40
codegen_flags: <defaults>
</compile_context>

<pallas_src>
import functools

import jax
import jax.numpy as jnp
from jax.experimental import pallas as pl
from jax.experimental.pallas import tpu as pltpu


# ----------------------------- Pallas kernel --------------------------------

def _board_eval_kernel(x_ref,
                       w1_ref, b1_ref,
                       w2_ref, b2_ref,
                       w3_ref, b3_ref,
                       w4_ref, b4_ref,
                       o_ref):
    """Whole forward pass for one batch tile. All weights resident in VMEM.

    w1/w2/w3 are bf16 (MXU operands); biases, w4 and all accumulation are f32.
    """
    x = x_ref[...].astype(jnp.bfloat16)                              # (tb, Dp)

    # fc1 + relu      (dropout = identity in eval mode)
    h1 = jnp.dot(x, w1_ref[...], preferred_element_type=jnp.float32) + b1_ref[...]
    h1 = jnp.maximum(h1, 0.0)                                        # (tb, 1024) f32

    # fc2 + relu, then residual add (out += residual)
    h2 = jnp.dot(h1.astype(jnp.bfloat16), w2_ref[...],
                 preferred_element_type=jnp.float32) + b2_ref[...]
    h2 = jnp.maximum(h2, 0.0) + h1                                   # (tb, 1024) f32

    # fc3 + relu
    h3 = jnp.dot(h2.astype(jnp.bfloat16), w3_ref[...],
                 preferred_element_type=jnp.float32) + b3_ref[...]
    h3 = jnp.maximum(h3, 0.0)                                        # (tb, 512) f32

    # fc4 + sigmoid on the VPU/XLU: (tb,512)*(1,512) -> reduce over lanes.
    # Avoids an N=1 MXU matmul and the (512,1)->(512,128) padded weight tile.
    logit = jnp.sum(h3 * w4_ref[...], axis=-1, keepdims=True) + b4_ref[...]
    o_ref[...] = jax.nn.sigmoid(logit).astype(o_ref.dtype)           # (tb, 1)

    # TODO(synk): training-mode dropout (p=0.3) would need pltpu.prng_* masks;
    # eval-mode (identity) semantics are implemented here.


# ------------------------------ Wrapper --------------------------------------

def board_evaluator_forward(x, params):
    """x: (B, D_in) f32.  params: dict of f32 (in,out) weights and (1,out) biases."""
    B, D_in = x.shape
    H1 = params["w1"].shape[1]
    H2 = params["w2"].shape[1]
    H3 = params["w3"].shape[1]

    # --- layout / dtype prep (zero-padding does not change the math) ---------
    Dp = ((D_in + 127) // 128) * 128
    x_p = x if Dp == D_in else jnp.pad(x, ((0, 0), (0, Dp - D_in)))
    w1 = jnp.pad(params["w1"], ((0, Dp - D_in), (0, 0))).astype(jnp.bfloat16)
    w2 = params["w2"].astype(jnp.bfloat16)
    w3 = params["w3"].astype(jnp.bfloat16)
    w4 = params["w4"].reshape(1, H3).astype(jnp.float32)   # row vector, VPU dot
    b1 = params["b1"].astype(jnp.float32)
    b2 = params["b2"].astype(jnp.float32)
    b3 = params["b3"].astype(jnp.float32)
    b4 = params["b4"].reshape(1, 1).astype(jnp.float32)

    # --- batch tiling: single tile for small B, big tiles otherwise ----------
    if B <= 256:
        batch_tile = B
    elif B % 256 == 0:
        batch_tile = 256
    else:
        batch_tile = 128
    assert B % batch_tile == 0 and batch_tile % 8 == 0, \
        "batch must be a multiple of 8 and divisible by the chosen tile"
    grid = (B // batch_tile,)

    # Weights/biases use full-array blocks (constant index_map) so they are
    # loaded once into VMEM and reused across batch tiles.
    # TODO(synk): pipeline_mode=pl.Buffered(1) on the weight specs would save
    # their second pipeline buffer (~3 MiB); skipped for broad compile support.
    def full_spec(shape):
        return pl.BlockSpec(shape, lambda i: (0, 0))

    flops = 2 * B * (Dp * H1 + H1 * H2 + H2 * H3 + H3)
    bytes_accessed = int(
        B * Dp * 4                                   # x (f32)
        + (Dp * H1 + H1 * H2 + H2 * H3) * 2          # bf16 weights
        + (H3 + H1 + H2 + H3 + 1) * 4                # w4 + biases (f32)
        + B * 4                                      # output
    )

    out = pl.pallas_call(
        _board_eval_kernel,
        out_shape=jax.ShapeDtypeStruct((B, 1), jnp.float32),
        grid_spec=pltpu.PrefetchScalarGridSpec(
            num_scalar_prefetch=0,
            grid=grid,
            in_specs=[
                pl.BlockSpec((batch_tile, Dp), lambda i: (i, 0)),     # x tile
                full_spec((Dp, H1)), full_spec((1, H1)),              # fc1
                full_spec((H1, H2)), full_spec((1, H2)),              # fc2
                full_spec((H2, H3)), full_spec((1, H3)),              # fc3
                full_spec((1, H3)),  full_spec((1, 1)),               # fc4
            ],
            out_specs=pl.BlockSpec((batch_tile, 1), lambda i: (i, 0)),
        ),
        compiler_params=pltpu.CompilerParams(
            dimension_semantics=("parallel",),
            vmem_limit_bytes=32 << 20,
        ),
        cost_estimate=pl.CostEstimate(
            flops=flops, transcendentals=B, bytes_accessed=bytes_accessed),
    )(x_p,
      w1, b1, w2, b2, w3, b3, w4, b4)
    return out


# --------------------------- Param init (deterministic) ----------------------

def init_params(key, input_size, h1=1024, h2=1024, h3=512):
    """nn.Linear-style uniform(-1/sqrt(fan_in), 1/sqrt(fan_in)) init (f32)."""
    def linear(key, fan_in, fan_out):
        kw, kb = jax.random.split(key)
        bound = 1.0 / jnp.sqrt(jnp.float32(fan_in))
        w = jax.random.uniform(kw, (fan_in, fan_out), jnp.float32, -bound, bound)
        b = jax.random.uniform(kb, (1, fan_out), jnp.float32, -bound, bound)
        return w, b

    k1, k2, k3, k4 = jax.random.split(key, 4)
    w1, b1 = linear(k1, input_size, h1)
    w2, b2 = linear(k2, h1, h2)
    w3, b3 = linear(k3, h2, h3)
    w4, b4 = linear(k4, h3, 1)
    return dict(w1=w1, b1=b1, w2=w2, b2=b2, w3=w3, b3=b3, w4=w4, b4=b4)


# ------------------------------ Reference (pure JAX) --------------------------

def reference_forward(x, p):
    """Mirrors the kernel's numerics: bf16 MXU operands, f32 accumulation."""
    c = lambda a: a.astype(jnp.bfloat16)
    h1 = jnp.maximum(
        jnp.dot(c(x), c(p["w1"]), preferred_element_type=jnp.float32) + p["b1"], 0.0)
    h2 = jnp.maximum(
        jnp.dot(c(h1), c(p["w2"]), preferred_element_type=jnp.float32) + p["b2"], 0.0) + h1
    h3 = jnp.maximum(
        jnp.dot(c(h2), c(p["w3"]), preferred_element_type=jnp.float32) + p["b3"], 0.0)
    logit = jnp.dot(h3, p["w4"], preferred_element_type=jnp.float32) + p["b4"]
    return jax.nn.sigmoid(logit)


# ------------------------------------ Main ------------------------------------

if __name__ == "__main__":
    # Synthetic config: board_size=14, pieces_per_player=2
    number_of_positions = 14 + 2
    neurons_per_position = 4 + 2
    input_size = 1 + number_of_positions * neurons_per_position   # 97

    batch = 128   # single 128-row tile -> full MXU M dimension, grid of 1

    key = jax.random.PRNGKey(0)
    k_params, k_x = jax.random.split(key)
    params = init_params(k_params, input_size)
    x = jax.random.normal(k_x, (batch, input_size), jnp.float32)

    fwd = jax.jit(board_evaluator_forward)
    y = fwd(x, params)
    y = jax.block_until_ready(y)

    y_ref = reference_forward(x, params)
    assert y.shape == (batch, 1)
    assert jnp.allclose(y, y_ref, atol=2e-3, rtol=2e-3), "mismatch vs reference"

    print("KERNEL_OK")
</pallas_src>

<mosaic_0001>
module attributes {stable_mosaic.version = 11 : i64} {
  func.func @_board_eval_kernel(%arg0: i32, %arg1: memref<128x128xf32, #tpu.memory_space<vmem>>, %arg2: memref<128x1024xbf16, #tpu.memory_space<vmem>>, %arg3: memref<1x1024xf32, #tpu.memory_space<vmem>>, %arg4: memref<1024x1024xbf16, #tpu.memory_space<vmem>>, %arg5: memref<1x1024xf32, #tpu.memory_space<vmem>>, %arg6: memref<1024x512xbf16, #tpu.memory_space<vmem>>, %arg7: memref<1x512xf32, #tpu.memory_space<vmem>>, %arg8: memref<1x512xf32, #tpu.memory_space<vmem>>, %arg9: memref<1x1xf32, #tpu.memory_space<vmem>>, %arg10: memref<128x1xf32, #tpu.memory_space<vmem>>) attributes {dimension_semantics = [#tpu.dimension_semantics<parallel>], iteration_bounds = array<i64: 1>, scalar_prefetch = 0 : i64, scratch_operands = 0 : i64, tpu.core_type = #tpu.core_type<tc>, window_params = [{transform_indices = @transform_0, window_bounds = array<i64: 128, 128>}, {pipeline_mode = #tpu.pipeline_mode<synchronous>, transform_indices = @transform_1, window_bounds = array<i64: 128, 1024>}, {pipeline_mode = #tpu.pipeline_mode<synchronous>, transform_indices = @transform_2, window_bounds = array<i64: 1, 1024>}, {pipeline_mode = #tpu.pipeline_mode<synchronous>, transform_indices = @transform_3, window_bounds = array<i64: 1024, 1024>}, {pipeline_mode = #tpu.pipeline_mode<synchronous>, transform_indices = @transform_4, window_bounds = array<i64: 1, 1024>}, {pipeline_mode = #tpu.pipeline_mode<synchronous>, transform_indices = @transform_5, window_bounds = array<i64: 1024, 512>}, {pipeline_mode = #tpu.pipeline_mode<synchronous>, transform_indices = @transform_6, window_bounds = array<i64: 1, 512>}, {pipeline_mode = #tpu.pipeline_mode<synchronous>, transform_indices = @transform_7, window_bounds = array<i64: 1, 512>}, {pipeline_mode = #tpu.pipeline_mode<synchronous>, transform_indices = @transform_8, window_bounds = array<i64: 1, 1>}, {transform_indices = @transform_9, window_bounds = array<i64: 128, 1>}]} {
    %c0 = arith.constant 0 : index
    %c0_0 = arith.constant 0 : index
    %0 = vector.load %arg1[%c0, %c0_0] : memref<128x128xf32, #tpu.memory_space<vmem>>, vector<128x128xf32>
    %1 = arith.truncf %0 : vector<128x128xf32> to vector<128x128xbf16>
    %c0_1 = arith.constant 0 : index
    %c0_2 = arith.constant 0 : index
    %2 = vector.load %arg2[%c0_1, %c0_2] : memref<128x1024xbf16, #tpu.memory_space<vmem>>, vector<128x1024xbf16>
    %cst = arith.constant dense<0.000000e+00> : vector<128x1024xf32>
    %3 = tpu.matmul %1, %2, %cst {dimension_numbers = #tpu.dot_dimension_numbers<[1], [0], [0], [1], [0, 0, 1, 1], [], []>} : vector<128x128xbf16>, vector<128x1024xbf16>, vector<128x1024xf32> -> vector<128x1024xf32>
    %c0_3 = arith.constant 0 : index
    %c0_4 = arith.constant 0 : index
    %4 = vector.load %arg3[%c0_3, %c0_4] : memref<1x1024xf32, #tpu.memory_space<vmem>>, vector<1x1024xf32>
    %5 = vector.broadcast %4 : vector<1x1024xf32> to vector<128x1024xf32>
    %6 = arith.addf %3, %5 : vector<128x1024xf32>
    %cst_5 = arith.constant 0.000000e+00 : f32
    %7 = vector.broadcast %cst_5 : f32 to vector<128x1024xf32>
    %8 = arith.maximumf %6, %7 : vector<128x1024xf32>
    %9 = arith.truncf %8 : vector<128x1024xf32> to vector<128x1024xbf16>
    %c0_6 = arith.constant 0 : index
    %c0_7 = arith.constant 0 : index
    %10 = vector.load %arg4[%c0_6, %c0_7] : memref<1024x1024xbf16, #tpu.memory_space<vmem>>, vector<1024x1024xbf16>
    %cst_8 = arith.constant dense<0.000000e+00> : vector<128x1024xf32>
    %11 = tpu.matmul %9, %10, %cst_8 {dimension_numbers = #tpu.dot_dimension_numbers<[1], [0], [0], [1], [0, 0, 1, 1], [], []>} : vector<128x1024xbf16>, vector<1024x1024xbf16>, vector<128x1024xf32> -> vector<128x1024xf32>
    %c0_9 = arith.constant 0 : index
    %c0_10 = arith.constant 0 : index
    %12 = vector.load %arg5[%c0_9, %c0_10] : memref<1x1024xf32, #tpu.memory_space<vmem>>, vector<1x1024xf32>
    %13 = vector.broadcast %12 : vector<1x1024xf32> to vector<128x1024xf32>
    %14 = arith.addf %11, %13 : vector<128x1024xf32>
    %cst_11 = arith.constant 0.000000e+00 : f32
    %15 = vector.broadcast %cst_11 : f32 to vector<128x1024xf32>
    %16 = arith.maximumf %14, %15 : vector<128x1024xf32>
    %17 = arith.addf %16, %8 : vector<128x1024xf32>
    %18 = arith.truncf %17 : vector<128x1024xf32> to vector<128x1024xbf16>
    %c0_12 = arith.constant 0 : index
    %c0_13 = arith.constant 0 : index
    %19 = vector.load %arg6[%c0_12, %c0_13] : memref<1024x512xbf16, #tpu.memory_space<vmem>>, vector<1024x512xbf16>
    %cst_14 = arith.constant dense<0.000000e+00> : vector<128x512xf32>
    %20 = tpu.matmul %18, %19, %cst_14 {dimension_numbers = #tpu.dot_dimension_numbers<[1], [0], [0], [1], [0, 0, 1, 1], [], []>} : vector<128x1024xbf16>, vector<1024x512xbf16>, vector<128x512xf32> -> vector<128x512xf32>
    %c0_15 = arith.constant 0 : index
    %c0_16 = arith.constant 0 : index
    %21 = vector.load %arg7[%c0_15, %c0_16] : memref<1x512xf32, #tpu.memory_space<vmem>>, vector<1x512xf32>
    %22 = vector.broadcast %21 : vector<1x512xf32> to vector<128x512xf32>
    %23 = arith.addf %20, %22 : vector<128x512xf32>
    %cst_17 = arith.constant 0.000000e+00 : f32
    %24 = vector.broadcast %cst_17 : f32 to vector<128x512xf32>
    %25 = arith.maximumf %23, %24 : vector<128x512xf32>
    %c0_18 = arith.constant 0 : index
    %c0_19 = arith.constant 0 : index
    %26 = vector.load %arg8[%c0_18, %c0_19] : memref<1x512xf32, #tpu.memory_space<vmem>>, vector<1x512xf32>
    %27 = vector.broadcast %26 : vector<1x512xf32> to vector<128x512xf32>
    %28 = arith.mulf %25, %27 : vector<128x512xf32>
    %cst_20 = arith.constant dense<0.000000e+00> : vector<128xf32>
    %29 = vector.multi_reduction <add>, %28, %cst_20 [1] : vector<128x512xf32> to vector<128xf32>
    %30 = vector.shape_cast %29 : vector<128xf32> to vector<128x1xf32>
    %c0_21 = arith.constant 0 : index
    %c0_22 = arith.constant 0 : index
    %31 = vector.load %arg9[%c0_21, %c0_22] : memref<1x1xf32, #tpu.memory_space<vmem>>, vector<1x1xf32>
    %32 = vector.broadcast %31 : vector<1x1xf32> to vector<128x1xf32>
    %33 = arith.addf %30, %32 : vector<128x1xf32>
    %34 = arith.negf %33 : vector<128x1xf32>
    %35 = math.exp %34 : vector<128x1xf32>
    %cst_23 = arith.constant 1.000000e+00 : f32
    %36 = vector.broadcast %cst_23 : f32 to vector<128x1xf32>
    %37 = arith.addf %36, %35 : vector<128x1xf32>
    %38 = arith.divf %36, %37 : vector<128x1xf32>
    %c0_24 = arith.constant 0 : index
    %c0_25 = arith.constant 0 : index
    %39 = vector.load %arg10[%c0_24, %c0_25] : memref<128x1xf32, #tpu.memory_space<vmem>>, vector<128x1xf32>
    tpu.vector_store %arg10[%c0_24, %c0_25], %38 {strides = array<i32>} : memref<128x1xf32, #tpu.memory_space<vmem>>, vector<128x1xf32>,
    return
  }
  func.func @transform_0(%arg0: i32) -> (i32, i32) {
    %c0_i32 = arith.constant 0 : i32
    %c0_i32_0 = arith.constant 0 : i32
    return %arg0, %c0_i32 : i32, i32
  }
  func.func @transform_1(%arg0: i32) -> (i32, i32) {
    %c0_i32 = arith.constant 0 : i32
    %c0_i32_0 = arith.constant 0 : i32
    %c0_i32_1 = arith.constant 0 : i32
    return %c0_i32, %c0_i32_0 : i32, i32
  }
  func.func @transform_2(%arg0: i32) -> (i32, i32) {
    %c0_i32 = arith.constant 0 : i32
    %c0_i32_0 = arith.constant 0 : i32
    %c0_i32_1 = arith.constant 0 : i32
    return %c0_i32, %c0_i32_0 : i32, i32
  }
  func.func @transform_3(%arg0: i32) -> (i32, i32) {
    %c0_i32 = arith.constant 0 : i32
    %c0_i32_0 = arith.constant 0 : i32
    %c0_i32_1 = arith.constant 0 : i32
    return %c0_i32, %c0_i32_0 : i32, i32
  }
  func.func @transform_4(%arg0: i32) -> (i32, i32) {
    %c0_i32 = arith.constant 0 : i32
    %c0_i32_0 = arith.constant 0 : i32
    %c0_i32_1 = arith.constant 0 : i32
    return %c0_i32, %c0_i32_0 : i32, i32
  }
  func.func @transform_5(%arg0: i32) -> (i32, i32) {
    %c0_i32 = arith.constant 0 : i32
    %c0_i32_0 = arith.constant 0 : i32
    %c0_i32_1 = arith.constant 0 : i32
    return %c0_i32, %c0_i32_0 : i32, i32
  }
  func.func @transform_6(%arg0: i32) -> (i32, i32) {
    %c0_i32 = arith.constant 0 : i32
    %c0_i32_0 = arith.constant 0 : i32
    %c0_i32_1 = arith.constant 0 : i32
    return %c0_i32, %c0_i32_0 : i32, i32
  }
  func.func @transform_7(%arg0: i32) -> (i32, i32) {
    %c0_i32 = arith.constant 0 : i32
    %c0_i32_0 = arith.constant 0 : i32
    %c0_i32_1 = arith.constant 0 : i32
    return %c0_i32, %c0_i32_0 : i32, i32
  }
  func.func @transform_8(%arg0: i32) -> (i32, i32) {
    %c0_i32 = arith.constant 0 : i32
    %c0_i32_0 = arith.constant 0 : i32
    %c0_i32_1 = arith.constant 0 : i32
    return %c0_i32, %c0_i32_0 : i32, i32
  }
  func.func @transform_9(%arg0: i32) -> (i32, i32) {
    %c0_i32 = arith.constant 0 : i32
    %c0_i32_0 = arith.constant 0 : i32
    return %arg0, %c0_i32 : i32, i32
  }
}

</mosaic_0001>

<bundles_post_ra>
// kernel: board_evaluator_forward.1
= control target key start
LH: loop header
LB: loop body
LE: loop exit
PB: predicated region body
PF: predicated region fallthrough
CT: control target
= control target key end

     0   :  { %v11271_v3 = vmov 0   ;;  %vm9182_vm0 = vcmask 7168   ;;  %s16791_s1 = inlined_call_operand.vmem [shape: bf16[128,1024], index: 1, kind: input, shape index: {}]   ;;  %s16792_s0 = inlined_call_operand.vmem [shape: f32[128,128], index: 0, kind: input, shape index: {}]   ;;  %s16793_s3 = inlined_call_operand.vmem [shape: bf16[1024,1024], index: 3, kind: input, shape index: {}]   ;;  %s16794_s2 = inlined_call_operand.vmem [shape: f32[1,1024], index: 2, kind: input, shape index: {}]   ;;  %s16795_s5 = inlined_call_operand.vmem [shape: bf16[1024,512], index: 5, kind: input, shape index: {}]   ;;  %s16796_s4 = inlined_call_operand.vmem [shape: f32[1,1024], index: 4, kind: input, shape index: {}]   ;;  %s16797_s8 = inlined_call_operand.<no memory space> [shape: f32[1,1], index: 8, kind: input, shape index: {}]   ;;  %s16798_s6 = inlined_call_operand.vmem [shape: f32[1,512], index: 6, kind: input, shape index: {}]   ;;  %s16799_s7 = inlined_call_operand.vmem [shape: f32[1,512], index: 7, kind: input, shape index: {}]   ;;  %s16800_s9 = inlined_call_operand.vmem [shape: f32[128,1], index: 9, kind: output, shape index: {}]  }
   0x1   :  { %v59_v0 = vld [vmem:[%s16791_s1] sm:$0xff]  ;;  %517 = vmatprep.mubr.bf16.mxu0 %v11271_v3  ;;  %630 = vmatprep.mubr.bf16.mxu1 %v11271_v3  ;;  %v60_v15 = vld [vmem:[%s16791_s1 + $0x8] sm:$0xff]  ;;  %v61_v57 = vld [vmem:[%s16791_s1 + $0x10] sm:$0xff] }
   0x2   :  { %v63_v1 = vld [vmem:[%s16791_s1 + $0x20] sm:$0xff]  ;;  %v64_v16 = vld [vmem:[%s16791_s1 + $0x28] sm:$0xff]  ;;  %v65_v58 = vld [vmem:[%s16791_s1 + $0x30] sm:$0xff] }
   0x3   :  { %v67_v2 = vld [vmem:[%s16791_s1 + $0x40] sm:$0xff]  ;;  %v9204_v4 = vcombine.high %v59_v0, %v63_v1  ;;  %v9203_v5 = vcombine.low %v59_v0, %v63_v1  ;;  %v9206_v19 = vcombine.high %v60_v15, %v64_v16  ;;  %v9205_v20 = vcombine.low %v60_v15, %v64_v16  ;;  %v68_v21 = vld [vmem:[%s16791_s1 + $0x48] sm:$0xff]  ;;  %v37_v15 = vld [vmem:[%s16792_s0 + $0x10] sm:$0xff] }
   0x4   :  { %v71_v6 = vld [vmem:[%s16791_s1 + $0x60] sm:$0xff]  ;;  %v72_v22 = vld [vmem:[%s16791_s1 + $0x68] sm:$0xff]  ;;  %v9208_v0 = vcombine.high %v61_v57, %v65_v58  ;;  %v38_v16 = vld [vmem:[%s16792_s0 + $0x18] sm:$0xff] }
   0x5   :  { %v9212_v7 = vcombine.high %v67_v2, %v71_v6  ;;  %v75_v8 = vld [vmem:[%s16791_s1 + $0x80] sm:$0xff]  ;;  %485 = vmatprep.subr.bf16.mxu0 %v9204_v4  ;;  %v9211_v10 = vcombine.low %v67_v2, %v71_v6  ;;  %v9214_v24 = vcombine.high %v68_v21, %v72_v22  ;;  %v76_v25 = vld [vmem:[%s16791_s1 + $0x88] sm:$0xff]  ;;  %598 = vmatprep.subr.bf16.mxu1 %v9206_v19  ;;  %v73_v6 = vld [vmem:[%s16791_s1 + $0x70] sm:$0xff] }
   0x6   :  { %v79_v9 = vld [vmem:[%s16791_s1 + $0xa0] sm:$0xff]  ;;  %486 = vmatpush1.bf16.msra.mxu0 %v9203_v5  ;;  %v80_v26 = vld [vmem:[%s16791_s1 + $0xa8] sm:$0xff]  ;;  %599 = vmatpush1.bf16.msra.mxu1 %v9205_v20  ;;  %v9213_v28 = vcombine.low %v68_v21, %v72_v22  ;;  %v69_v5 = vld [vmem:[%s16791_s1 + $0x50] sm:$0xff]  ;;  %v11463_v22 = vpack.c.bf16 %v38_v16, %v37_v15 }
   0x7   :  { %487 = vmatprep.subr.bf16.mxu0 %v9212_v7  ;;  %v9220_v11 = vcombine.high %v75_v8, %v79_v9  ;;  %v83_v12 = vld [vmem:[%s16791_s1 + $0xc0] sm:$0xff]  ;;  %v9219_v14 = vcombine.low %v75_v8, %v79_v9  ;;  %600 = vmatprep.subr.bf16.mxu1 %v9214_v24  ;;  %v9222_v31 = vcombine.high %v76_v25, %v80_v26  ;;  %v84_v33 = vld [vmem:[%s16791_s1 + $0xc8] sm:$0xff]  ;;  %v85_v21 = vld [vmem:[%s16791_s1 + $0xd0] sm:$0xff] }
   0x8   :  { %v87_v13 = vld [vmem:[%s16791_s1 + $0xe0] sm:$0xff]  ;;  %v88_v34 = vld [vmem:[%s16791_s1 + $0xe8] sm:$0xff]  ;;  %v9221_v36 = vcombine.low %v76_v25, %v80_v26  ;;  %v9207_v9 = vcombine.low %v61_v57, %v65_v58  ;;  %v70_v24 = vld [vmem:[%s16791_s1 + $0x58] sm:$0xff] }
   0x9   :  { %v9228_v17 = vcombine.high %v83_v12, %v87_v13  ;;  %v91_v18 = vld [vmem:[%s16791_s1 + $0x100] sm:$0xff]  ;;  %v9227_v27 = vcombine.low %v83_v12, %v87_v13  ;;  %v9230_v39 = vcombine.high %v84_v33, %v88_v34  ;;  %v92_v41 = vld [vmem:[%s16791_s1 + $0x108] sm:$0xff]  ;;  %v9229_v44 = vcombine.low %v84_v33, %v88_v34  ;;  %v66_v12 = vld [vmem:[%s16791_s1 + $0x38] sm:$0xff] }
   0xa   :  { %488 = vmatpush1.bf16.msra.mxu0 %v9211_v10  ;;  %v95_v23 = vld [vmem:[%s16791_s1 + $0x120] sm:$0xff]  ;;  %601 = vmatpush1.bf16.msra.mxu1 %v9213_v28  ;;  %v96_v42 = vld [vmem:[%s16791_s1 + $0x128] sm:$0xff]  ;;  %v9216_v10 = vcombine.high %v69_v5, %v73_v6  ;;  %v77_v13 = vld [vmem:[%s16791_s1 + $0x90] sm:$0xff] }
   0xb   :  { %489 = vmatprep.subr.bf16.mxu0 %v9220_v11  ;;  %v9236_v29 = vcombine.high %v91_v18, %v95_v23  ;;  %v99_v30 = vld [vmem:[%s16791_s1 + $0x140] sm:$0xff]  ;;  %v9235_v35 = vcombine.low %v91_v18, %v95_v23  ;;  %602 = vmatprep.subr.bf16.mxu1 %v9222_v31  ;;  %v9238_v47 = vcombine.high %v92_v41, %v96_v42  ;;  %v100_v49 = vld [vmem:[%s16791_s1 + $0x148] sm:$0xff]  ;;  %v62_v11 = vld [vmem:[%s16791_s1 + $0x18] sm:$0xff] }
   0xc   :  { %v103_v32 = vld [vmem:[%s16791_s1 + $0x160] sm:$0xff]  ;;  %v104_v50 = vld [vmem:[%s16791_s1 + $0x168] sm:$0xff]  ;;  %v9237_v52 = vcombine.low %v92_v41, %v96_v42  ;;  %v9215_v18 = vcombine.low %v69_v5, %v73_v6  ;;  %v9210_v19 = vcombine.high %v62_v11, %v66_v12  ;;  %v89_v23 = vld [vmem:[%s16791_s1 + $0xf0] sm:$0xff] }
   0xd   :  { %v9244_v37 = vcombine.high %v99_v30, %v103_v32  ;;  %v107_v38 = vld [vmem:[%s16791_s1 + $0x180] sm:$0xff]  ;;  %v9243_v43 = vcombine.low %v99_v30, %v103_v32  ;;  %v9246_v54 = vcombine.high %v100_v49, %v104_v50  ;;  %v108_v55 = vld [vmem:[%s16791_s1 + $0x188] sm:$0xff]  ;;  %v9245_v62 = vcombine.low %v100_v49, %v104_v50  ;;  %v74_v25 = vld [vmem:[%s16791_s1 + $0x78] sm:$0xff] }
   0xe   :  { %490 = vmatpush1.bf16.msra.mxu0 %v9219_v14  ;;  %v111_v40 = vld [vmem:[%s16791_s1 + $0x1a0] sm:$0xff]  ;;  %603 = vmatpush1.bf16.msra.mxu1 %v9221_v36  ;;  %v112_v56 = vld [vmem:[%s16791_s1 + $0x1a8] sm:$0xff]  ;;  %v81_v14 = vld [vmem:[%s16791_s1 + $0xb0] sm:$0xff]  ;;  %v9232_v28 = vcombine.high %v85_v21, %v89_v23  ;;  %v9218_v30 = vcombine.high %v70_v24, %v74_v25  ;;  %v9231_v36 = vcombine.low %v85_v21, %v89_v23 }
   0xf   :  { %491 = vmatprep.subr.bf16.mxu0 %v9228_v17  ;;  %v9252_v45 = vcombine.high %v107_v38, %v111_v40  ;;  %v115_v46 = vld [vmem:[%s16791_s1 + $0x1c0] sm:$0xff]  ;;  %604 = vmatprep.subr.bf16.mxu1 %v9230_v39  ;;  %v9251_v51 = vcombine.low %v107_v38, %v111_v40  ;;  %v36_v61 = vld [vmem:[%s16792_s0 + $0x8] sm:$0xff]  ;;  %v9254_v63 = vcombine.high %v108_v55, %v112_v56  ;;  %v97_v31 = vld [vmem:[%s16791_s1 + $0x130] sm:$0xff] }
  0x10   :  { %v119_v48 = vld [vmem:[%s16791_s1 + $0x1e0] sm:$0xff]  ;;  %v116_v1 = vld [vmem:[%s16791_s1 + $0x1c8] sm:$0xff]  ;;  %v9253_v7 = vcombine.low %v108_v55, %v112_v56  ;;  %v9224_v20 = vcombine.high %v77_v13, %v81_v14  ;;  %v9223_v26 = vcombine.low %v77_v13, %v81_v14  ;;  %v78_v32 = vld [vmem:[%s16791_s1 + $0x98] sm:$0xff] }
  0x11   :  { %v9260_v53 = vcombine.high %v115_v46, %v119_v48  ;;  %v9259_v59 = vcombine.low %v115_v46, %v119_v48  ;;  %v35_v60 = vld [vmem:[%s16792_s0] sm:$0xff]  ;;  %v120_v2 = vld [vmem:[%s16791_s1 + $0x1e8] sm:$0xff]  ;;  %v82_v33 = vld [vmem:[%s16791_s1 + $0xb8] sm:$0xff] }
  0x12   :  { %492 = vmatpush1.bf16.msra.mxu0 %v9227_v27  ;;  %605 = vmatpush1.bf16.msra.mxu1 %v9229_v44  ;;  %v11432_v4 = vpack.c.bf16 %v36_v61, %v35_v60  ;;  %v9262_v8 = vcombine.high %v116_v1, %v120_v2  ;;  %v9261_v17 = vcombine.low %v116_v1, %v120_v2  ;;  %v39_v34 = vld [vmem:[%s16792_s0 + $0x20] sm:$0xff]  ;;  %v101_v39 = vld [vmem:[%s16791_s1 + $0x150] sm:$0xff]  ;;  %v90_v44 = vld [vmem:[%s16791_s1 + $0xf8] sm:$0xff] }
  0x13   :  { %493 = vmatprep.subr.bf16.mxu0 %v9236_v29  ;;  %606 = vmatprep.subr.bf16.mxu1 %v9238_v47  ;;  %v9209_v27 = vcombine.low %v62_v11, %v66_v12  ;;  %v93_v29 = vld [vmem:[%s16791_s1 + $0x110] sm:$0xff]  ;;  %v9226_v40 = vcombine.high %v78_v32, %v82_v33  ;;  %v9225_v46 = vcombine.low %v78_v32, %v82_v33  ;;  %v110_v6 = vld [vmem:[%s16791_s1 + $0x198] sm:$0xff]  ;;  %v44_v11 = vld [vmem:[%s16792_s0 + $0x48] sm:$0xff] }
  0x14   :  { %v9240_v38 = vcombine.high %v93_v29, %v97_v31  ;;  %v105_v42 = vld [vmem:[%s16791_s1 + $0x170] sm:$0xff]  ;;  %v1130_v21 = vld [vmem:[%s16793_s3 + $0x8] sm:$0xff]  ;;  %v50_v33 = vld [vmem:[%s16792_s0 + $0x78] sm:$0xff] }
  0x15   :  { %v9248_v47 = vcombine.high %v101_v39, %v105_v42  ;;  %v109_v48 = vld [vmem:[%s16791_s1 + $0x190] sm:$0xff]  ;;  %v9247_v55 = vcombine.low %v101_v39, %v105_v42  ;;  %v1134_v23 = vld [vmem:[%s16793_s3 + $0x28] sm:$0xff]  ;;  %v1145_v39 = vld [vmem:[%s16793_s3 + $0x80] sm:$0xff] }
  0x16   :  { %494 = vmatpush1.bf16.msra.mxu0 %v9235_v35  ;;  %607 = vmatpush1.bf16.msra.mxu1 %v9237_v52  ;;  %v40_v35 = vld [vmem:[%s16792_s0 + $0x28] sm:$0xff]  ;;  %v113_v50 = vld [vmem:[%s16791_s1 + $0x1b0] sm:$0xff]  ;;  %v98_v52 = vld [vmem:[%s16791_s1 + $0x138] sm:$0xff] }
  0x17   :  { %495 = vmatprep.subr.bf16.mxu0 %v9244_v37  ;;  %608 = vmatprep.subr.bf16.mxu1 %v9246_v54  ;;  %v9217_v37 = vcombine.low %v70_v24, %v74_v25  ;;  %v11499_v41 = vpack.c.bf16 %v40_v35, %v39_v34  ;;  %v42_v54 = vld [vmem:[%s16792_s0 + $0x38] sm:$0xff]  ;;  %v9256_v57 = vcombine.high %v109_v48, %v113_v50  ;;  %v117_v58 = vld [vmem:[%s16791_s1 + $0x1d0] sm:$0xff]  ;;  %v1137_v35 = vld [vmem:[%s16793_s3 + $0x40] sm:$0xff] }
  0x18   :  { %v121_v61 = vld [vmem:[%s16791_s1 + $0x1f0] sm:$0xff]  ;;  %v46_v25 = vld [vmem:[%s16792_s0 + $0x58] sm:$0xff] }
  0x19   :  { %v9264_v2 = vcombine.high %v117_v58, %v121_v61  ;;  %v9263_v12 = vcombine.low %v117_v58, %v121_v61  ;;  %v45_v24 = vld [vmem:[%s16792_s0 + $0x50] sm:$0xff]  ;;  %v1158_v58 = vld [vmem:[%s16793_s3 + $0xe8] sm:$0xff] }
  0x1a   :  { %496 = vmatpush1.bf16.msra.mxu0 %v9243_v43  ;;  %609 = vmatpush1.bf16.msra.mxu1 %v9245_v62  ;;  %v86_v43 = vld [vmem:[%s16791_s1 + $0xd8] sm:$0xff]  ;;  %v49_v32 = vld [vmem:[%s16792_s0 + $0x70] sm:$0xff] }
  0x1b   :  { %497 = vmatprep.subr.bf16.mxu0 %v9252_v45  ;;  %610 = vmatprep.subr.bf16.mxu1 %v9254_v63  ;;  %v9239_v45 = vcombine.low %v93_v29, %v97_v31  ;;  %v9234_v49 = vcombine.high %v86_v43, %v90_v44  ;;  %v9233_v56 = vcombine.low %v86_v43, %v90_v44  ;;  %v102_v62 = vld [vmem:[%s16791_s1 + $0x158] sm:$0xff]  ;;  %v47_v29 = vld [vmem:[%s16792_s0 + $0x60] sm:$0xff]  ;;  %v1138_v43 = vld [vmem:[%s16793_s3 + $0x48] sm:$0xff] }
  0x1c   :  { %v106_v63 = vld [vmem:[%s16791_s1 + $0x178] sm:$0xff]  ;;  %v11622_v34 = vpack.c.bf16 %v50_v33, %v49_v32  ;;  %v1142_v44 = vld [vmem:[%s16793_s3 + $0x68] sm:$0xff]  ;;  %v1193_v33 = vld [vmem:[%s16793_s3 + $0x200] sm:$0xff] }
  0x1d   :  { %v9250_v5 = vcombine.high %v102_v62, %v106_v63  ;;  %v9249_v13 = vcombine.low %v102_v62, %v106_v63  ;;  %v1169_v63 = vld [vmem:[%s16793_s3 + $0x140] sm:$0xff]  ;;  %v11743_v32 = vld [vmem:[%s16793_s3 + $0x408] sm:$0xff] }
  0x1e   :  { %498 = vmatpush1.bf16.msra.mxu0 %v9251_v51  ;;  %611 = vmatpush1.bf16.msra.mxu1 %v9253_v7  ;;  %v94_v51 = vld [vmem:[%s16791_s1 + $0x118] sm:$0xff] }
  0x1f   :  { %499 = vmatprep.subr.bf16.mxu0 %v9260_v53  ;;  %612 = vmatprep.subr.bf16.mxu1 %v9262_v8  ;;  %v41_v53 = vld [vmem:[%s16792_s0 + $0x30] sm:$0xff]  ;;  %v9241_v1 = vcombine.low %v94_v51, %v98_v52  ;;  %v114_v7 = vld [vmem:[%s16791_s1 + $0x1b8] sm:$0xff]  ;;  %v11557_v8 = vld [vmem:[%s16793_s3] sm:$0xff] }
  0x20   :  { %v11535_v60 = vpack.c.bf16 %v42_v54, %v41_v53  ;;  %v9258_v14 = vcombine.high %v110_v6, %v114_v7  ;;  %v9277_v54 = vcombine.low %v1138_v43, %v1142_v44 }
  0x22   :  { %500 = vmatpush1.bf16.msra.mxu0 %v9259_v59  ;;  %613 = vmatpush1.bf16.msra.mxu1 %v9261_v17  ;;  %v9242_v59 = vcombine.high %v94_v51, %v98_v52  ;;  %v118_v17 = vld [vmem:[%s16791_s1 + $0x1d8] sm:$0xff]  ;;  %v1146_v51 = vld [vmem:[%s16793_s3 + $0x88] sm:$0xff] }
  0x23   :  { %711 = vmatprep.subr.bf16.mxu0 %v9208_v0  ;;  %824 = vmatprep.subr.bf16.mxu1 %v9210_v19  ;;  %v9255_v0 = vcombine.low %v109_v48, %v113_v50  ;;  %v9257_v19 = vcombine.low %v110_v6, %v114_v7  ;;  %v1157_v48 = vld [vmem:[%s16793_s3 + $0xe0] sm:$0xff]  ;;  %v1150_v52 = vld [vmem:[%s16793_s3 + $0xa8] sm:$0xff] }
  0x24   :  { %v9285_v61 = vcombine.low %v1146_v51, %v1150_v52 }
  0x25   :  { %518 = vmatmul.mubr.bf16.vlgmr.msra.gmra.mrb[0].mxu0 %v11432_v4  ;;  %631 = vmatmul.mubr.bf16.vlgmr.msra.gmra.mrb[0].mxu1 %v11432_v4 }
  0x26   :  { %527 = vmatprep.mubr.bf16.mxu0 %v11271_v3  ;;  %712 = vmatpush1.bf16.msra.mxu0 %v9207_v9  ;;  %v11562_v9 = vld [vmem:[%s16793_s3 + $0x20] sm:$0xff] }
  0x27   :  { %713 = vmatprep.subr.bf16.mxu0 %v9216_v10  ;;  %640 = vmatprep.mubr.bf16.mxu1 %v11271_v3  ;;  %v43_v10 = vld [vmem:[%s16792_s0 + $0x40] sm:$0xff]  ;;  %v9268_v15 = vcombine.high %v11557_v8, %v11562_v9 }
  0x28   :  { %825 = vmatpush1.bf16.msra.mxu1 %v9209_v27  ;;  %v11574_v16 = vpack.c.bf16 %v44_v11, %v43_v10  ;;  %v9270_v27 = vcombine.high %v1130_v21, %v1134_v23  ;;  %v1170_v10 = vld [vmem:[%s16793_s3 + $0x148] sm:$0xff] }
  0x29   :  { %826 = vmatprep.subr.bf16.mxu1 %v9218_v30  ;;  %v48_v30 = vld [vmem:[%s16792_s0 + $0x68] sm:$0xff] }
  0x2a   :  { %714 = vmatpush1.bf16.msra.mxu0 %v9215_v18  ;;  %v122_v18 = vld [vmem:[%s16791_s1 + $0x1f8] sm:$0xff]  ;;  %v11610_v31 = vpack.c.bf16 %v48_v30, %v47_v29  ;;  %v1174_v11 = vld [vmem:[%s16793_s3 + $0x168] sm:$0xff]  ;;  %v11733_v29 = vld [vmem:[%s16793_s3 + $0x400] sm:$0xff] }
  0x2b   :  { %715 = vmatprep.subr.bf16.mxu0 %v9224_v20  ;;  %v9266_v20 = vcombine.high %v118_v17, %v122_v18  ;;  %v11738_v30 = vld [vmem:[%s16793_s3 + $0x420] sm:$0xff] }
  0x2c   :  { %827 = vmatpush1.bf16.msra.mxu1 %v9217_v37  ;;  %v9267_v37 = vcombine.low %v11557_v8, %v11562_v9 }
  0x2d   :  { %528 = vmatmul.mubr.bf16.gmra.mrb[4].mxu0 %v11463_v22  ;;  %828 = vmatprep.subr.bf16.mxu1 %v9226_v40  ;;  %v1149_v40 = vld [vmem:[%s16793_s3 + $0xa0] sm:$0xff] }
  0x2e   :  { %537 = vmatprep.mubr.bf16.mxu0 %v11271_v3  ;;  %716 = vmatpush1.bf16.msra.mxu0 %v9223_v26  ;;  %v9265_v26 = vcombine.low %v118_v17, %v122_v18  ;;  %v9283_v50 = vcombine.low %v1145_v39, %v1149_v40  ;;  %v1178_v18 = vld [vmem:[%s16793_s3 + $0x188] sm:$0xff] }
  0x2f   :  { %717 = vmatprep.subr.bf16.mxu0 %v9232_v28  ;;  %641 = vmatmul.mubr.bf16.gmra.mrb[4].mxu1 %v11463_v22  ;;  %v11598_v28 = vpack.c.bf16 %v46_v25, %v45_v24 }
  0x30   :  { %650 = vmatprep.mubr.bf16.mxu1 %v11271_v3  ;;  %829 = vmatpush1.bf16.msra.mxu1 %v9225_v46  ;;  %v9269_v46 = vcombine.low %v1130_v21, %v1134_v23  ;;  %v1189_v21 = vld [vmem:[%s16793_s3 + $0x1e0] sm:$0xff]  ;;  %v9309_v23 = vcombine.low %v1170_v10, %v1174_v11 }
  0x31   :  { %830 = vmatprep.subr.bf16.mxu1 %v9234_v49  ;;  %v9278_v49 = vcombine.high %v1138_v43, %v1142_v44  ;;  %v1194_v44 = vld [vmem:[%s16793_s3 + $0x208] sm:$0xff] }
  0x32   :  { %718 = vmatpush1.bf16.msra.mxu0 %v9231_v36  ;;  %v1141_v36 = vld [vmem:[%s16793_s3 + $0x60] sm:$0xff] }
  0x33   :  { %719 = vmatprep.subr.bf16.mxu0 %v9240_v38  ;;  %v9276_v38 = vcombine.high %v1137_v35, %v1141_v36  ;;  %v9275_v42 = vcombine.low %v1137_v35, %v1141_v36  ;;  %v1197_v35 = vld [vmem:[%s16793_s3 + $0x220] sm:$0xff]  ;;  %v11754_v36 = vld [vmem:[%s16793_s3 + $0x428] sm:$0xff] }
  0x34   :  { %831 = vmatpush1.bf16.msra.mxu1 %v9233_v56  ;;  %v9332_v43 = vcombine.high %v1193_v33, %v1197_v35 }
  0x35   :  { %538 = vmatmul.mubr.bf16.gmra.mrb[8].mxu0 %v11499_v41  ;;  %832 = vmatprep.subr.bf16.mxu1 %v9242_v59  ;;  %v1165_v59 = vld [vmem:[%s16793_s3 + $0x120] sm:$0xff] }
  0x36   :  { %547 = vmatprep.mubr.bf16.mxu0 %v11271_v3  ;;  %720 = vmatpush1.bf16.msra.mxu0 %v9239_v45  ;;  %v9284_v45 = vcombine.high %v1145_v39, %v1149_v40  ;;  %v9397_v39 = vcombine.low %v11743_v32, %v11754_v36 }
  0x37   :  { %721 = vmatprep.subr.bf16.mxu0 %v9248_v47  ;;  %651 = vmatmul.mubr.bf16.gmra.mrb[8].mxu1 %v11499_v41  ;;  %v1153_v47 = vld [vmem:[%s16793_s3 + $0xc0] sm:$0xff] }
  0x38   :  { %660 = vmatprep.mubr.bf16.mxu1 %v11271_v3  ;;  %833 = vmatpush1.bf16.msra.mxu1 %v9241_v1  ;;  %v9292_v53 = vcombine.high %v1153_v47, %v1157_v48  ;;  %v9291_v56 = vcombine.low %v1153_v47, %v1157_v48  ;;  %v1205_v47 = vld [vmem:[%s16793_s3 + $0x260] sm:$0xff] }
  0x39   :  { %834 = vmatprep.subr.bf16.mxu1 %v9250_v5  ;;  %v1166_v5 = vld [vmem:[%s16793_s3 + $0x128] sm:$0xff] }
  0x3a   :  { %722 = vmatpush1.bf16.msra.mxu0 %v9247_v55  ;;  %v9286_v55 = vcombine.high %v1146_v51, %v1150_v52  ;;  %v1202_v51 = vld [vmem:[%s16793_s3 + $0x248] sm:$0xff] }
  0x3b   :  { %723 = vmatprep.subr.bf16.mxu0 %v9256_v57  ;;  %v1154_v57 = vld [vmem:[%s16793_s3 + $0xc8] sm:$0xff] }
  0x3c   :  { %835 = vmatpush1.bf16.msra.mxu1 %v9249_v13  ;;  %v9294_v62 = vcombine.high %v1154_v57, %v1158_v58  ;;  %v9293_v7 = vcombine.low %v1154_v57, %v1158_v58  ;;  %v1206_v52 = vld [vmem:[%s16793_s3 + $0x268] sm:$0xff] }
  0x3d   :  { %548 = vmatmul.mubr.bf16.gmra.mrb[12].mxu0 %v11535_v60  ;;  %836 = vmatprep.subr.bf16.mxu1 %v9258_v14  ;;  %v9342_v57 = vcombine.high %v1202_v51, %v1206_v52 }
  0x3e   :  { %557 = vmatprep.mubr.bf16.mxu0 %v11271_v3  ;;  %724 = vmatpush1.bf16.msra.mxu0 %v9255_v0  ;;  %v1173_v0 = vld [vmem:[%s16793_s3 + $0x160] sm:$0xff] }
  0x3f   :  { %725 = vmatprep.subr.bf16.mxu0 %v9264_v2  ;;  %661 = vmatmul.mubr.bf16.gmra.mrb[12].mxu1 %v11535_v60  ;;  %v1162_v2 = vld [vmem:[%s16793_s3 + $0x108] sm:$0xff]  ;;  %v9308_v8 = vcombine.high %v1169_v63, %v1173_v0  ;;  %v9307_v14 = vcombine.low %v1169_v63, %v1173_v0  ;;  %v9341_v63 = vcombine.low %v1202_v51, %v1206_v52 }
  0x40   :  { %670 = vmatprep.mubr.bf16.mxu1 %v11271_v3  ;;  %837 = vmatpush1.bf16.msra.mxu1 %v9257_v19  ;;  %v9302_v9 = vcombine.high %v1162_v2, %v1166_v5  ;;  %v9301_v13 = vcombine.low %v1162_v2, %v1166_v5  ;;  %v1182_v19 = vld [vmem:[%s16793_s3 + $0x1a8] sm:$0xff] }
  0x41   :  { %838 = vmatprep.subr.bf16.mxu1 %v9266_v20  ;;  %v1185_v20 = vld [vmem:[%s16793_s3 + $0x1c0] sm:$0xff]  ;;  %v9318_v25 = vcombine.high %v1178_v18, %v1182_v19  ;;  %v1218_v2 = vld [vmem:[%s16793_s3 + $0x2c8] sm:$0xff] }
  0x42   :  { %726 = vmatpush1.bf16.msra.mxu0 %v9263_v12  ;;  %v1181_v12 = vld [vmem:[%s16793_s3 + $0x1a0] sm:$0xff]  ;;  %v9323_v40 = vcombine.low %v1185_v20, %v1189_v21  ;;  %v1222_v5 = vld [vmem:[%s16793_s3 + $0x2e8] sm:$0xff] }
  0x43   :  { %4243 = vmatprep.subr.bf16.mxu0 %v9268_v15  ;;  %v9310_v15 = vcombine.high %v1170_v10, %v1174_v11  ;;  %v9358_v10 = vcombine.high %v1218_v2, %v1222_v5 }
  0x44   :  { %839 = vmatpush1.bf16.msra.mxu1 %v9265_v26  ;;  %v1190_v26 = vld [vmem:[%s16793_s3 + $0x1e8] sm:$0xff] }
  0x45   :  { %558 = vmatmul.mubr.bf16.gmra.mrb[16].mxu0 %v11574_v16  ;;  %4695 = vmatprep.subr.bf16.mxu1 %v9270_v27  ;;  %v9324_v27 = vcombine.high %v1185_v20, %v1189_v21  ;;  %v1238_v20 = vld [vmem:[%s16793_s3 + $0x368] sm:$0xff]  ;;  %v1241_v21 = vld [vmem:[%s16793_s3 + $0x380] sm:$0xff] }
  0x46   :  { %567 = vmatprep.mubr.bf16.mxu0 %v11271_v3 }
  0x47   :  { %671 = vmatmul.mubr.bf16.gmra.mrb[16].mxu1 %v11574_v16 }
  0x48   :  { %680 = vmatprep.mubr.bf16.mxu1 %v11271_v3 }
  0x4d   :  { %568 = vmatmul.mubr.bf16.gmra.mrb[20].mxu0 %v11598_v28 }
  0x4e   :  { %577 = vmatprep.mubr.bf16.mxu0 %v11271_v3 }
  0x4f   :  { %681 = vmatmul.mubr.bf16.gmra.mrb[20].mxu1 %v11598_v28 }
  0x50   :  { %690 = vmatprep.mubr.bf16.mxu1 %v11271_v3 }
  0x55   :  { %578 = vmatmul.mubr.bf16.gmra.mrb[24].mxu0 %v11610_v31 }
  0x56   :  { %587 = vmatprep.mubr.bf16.mxu0 %v11271_v3 }
  0x57   :  { %691 = vmatmul.mubr.bf16.gmra.mrb[24].mxu1 %v11610_v31 }
  0x58   :  { %700 = vmatprep.mubr.bf16.mxu1 %v11271_v3 }
  0x5d   :  { %588 = vmatmul.mubr.bf16.gmra.mrb[28].mxu0 %v11622_v34 }
  0x5e   :  { %743 = vmatprep.mubr.bf16.mxu0 %v11271_v3 }
  0x5f   :  { %701 = vmatmul.mubr.bf16.gmra.mrb[28].mxu1 %v11622_v34 }
  0x60   :  { %856 = vmatprep.mubr.bf16.mxu1 %v11271_v3 }
  0x65   :  { %744 = vmatmul.mubr.bf16.vlgmr.msra.gmra.mrb[32].mxu0 %v11432_v4 }
  0x66   :  { %753 = vmatprep.mubr.bf16.mxu0 %v11271_v3  ;;  %4244 = vmatpush1.bf16.msra.mxu0 %v9267_v37  ;;  %v9317_v37 = vcombine.low %v1178_v18, %v1182_v19  ;;  %v1234_v19 = vld [vmem:[%s16793_s3 + $0x348] sm:$0xff] }
  0x67   :  { %4245 = vmatprep.subr.bf16.mxu0 %v9276_v38  ;;  %857 = vmatmul.mubr.bf16.vlgmr.msra.gmra.mrb[32].mxu1 %v11432_v4  ;;  %v1161_v4 = vld [vmem:[%s16793_s3 + $0x100] sm:$0xff]  ;;  %v9395_v38 = vcombine.low %v11733_v29, %v11738_v30 }
  0x68   :  { %4696 = vmatpush1.bf16.msra.mxu1 %v9269_v46  ;;  %866 = vmatprep.mubr.bf16.mxu1 %v11271_v3  ;;  %v9300_v1 = vcombine.high %v1161_v4, %v1165_v59  ;;  %v9299_v6 = vcombine.low %v1161_v4, %v1165_v59  ;;  %v1201_v46 = vld [vmem:[%s16793_s3 + $0x240] sm:$0xff]  ;;  %v1210_v4 = vld [vmem:[%s16793_s3 + $0x288] sm:$0xff] }
  0x69   :  { %4697 = vmatprep.subr.bf16.mxu1 %v9278_v49  ;;  %v9331_v49 = vcombine.low %v1193_v33, %v1197_v35  ;;  %v1214_v59 = vld [vmem:[%s16793_s3 + $0x2a8] sm:$0xff]  ;;  %v1249_v35 = vld [vmem:[%s16793_s3 + $0x3c0] sm:$0xff] }
  0x6a   :  { %4246 = vmatpush1.bf16.msra.mxu0 %v9275_v42  ;;  %v1246_v33 = vld [vmem:[%s16793_s3 + $0x3a8] sm:$0xff] }
  0x6b   :  { %4247 = vmatprep.subr.bf16.mxu0 %v9284_v45  ;;  %v1198_v45 = vld [vmem:[%s16793_s3 + $0x228] sm:$0xff] }
  0x6c   :  { %4698 = vmatpush1.bf16.msra.mxu1 %v9277_v54  ;;  %v1213_v54 = vld [vmem:[%s16793_s3 + $0x2a0] sm:$0xff] }
  0x6d   :  { %754 = vmatmul.mubr.bf16.gmra.mrb[36].mxu0 %v11463_v22  ;;  %4699 = vmatprep.subr.bf16.mxu1 %v9286_v55  ;;  %v9333_v55 = vcombine.low %v1194_v44, %v1198_v45 }
  0x6e   :  { %763 = vmatprep.mubr.bf16.mxu0 %v11271_v3  ;;  %4248 = vmatpush1.bf16.msra.mxu0 %v9283_v50  ;;  %v9334_v50 = vcombine.high %v1194_v44, %v1198_v45  ;;  %v1254_v45 = vld [vmem:[%s16793_s3 + $0x3e8] sm:$0xff] }
  0x6f   :  { %4249 = vmatprep.subr.bf16.mxu0 %v9292_v53  ;;  %867 = vmatmul.mubr.bf16.gmra.mrb[36].mxu1 %v11463_v22  ;;  %v1177_v22 = vld [vmem:[%s16793_s3 + $0x180] sm:$0xff] }
  0x70   :  { %4700 = vmatpush1.bf16.msra.mxu1 %v9285_v61  ;;  %876 = vmatprep.mubr.bf16.mxu1 %v11271_v3  ;;  %v9316_v17 = vcombine.high %v1177_v22, %v1181_v12  ;;  %v9315_v24 = vcombine.low %v1177_v22, %v1181_v12  ;;  %v1209_v53 = vld [vmem:[%s16793_s3 + $0x280] sm:$0xff]  ;;  %v1226_v22 = vld [vmem:[%s16793_s3 + $0x308] sm:$0xff] }
  0x71   :  { %4701 = vmatprep.subr.bf16.mxu1 %v9294_v62  ;;  %v9348_v58 = vcombine.high %v1209_v53, %v1213_v54  ;;  %v1217_v61 = vld [vmem:[%s16793_s3 + $0x2c0] sm:$0xff]  ;;  %v9347_v0 = vcombine.low %v1209_v53, %v1213_v54  ;;  %v1230_v12 = vld [vmem:[%s16793_s3 + $0x328] sm:$0xff] }
  0x72   :  { %4250 = vmatpush1.bf16.msra.mxu0 %v9291_v56  ;;  %v9339_v56 = vcombine.low %v1201_v46, %v1205_v47  ;;  %v1221_v62 = vld [vmem:[%s16793_s3 + $0x2e0] sm:$0xff]  ;;  %v9366_v18 = vcombine.high %v1226_v22, %v1230_v12 }
  0x73   :  { %4251 = vmatprep.subr.bf16.mxu0 %v9300_v1  ;;  %v9350_v1 = vcombine.high %v1210_v4, %v1214_v59 }
  0x74   :  { %4702 = vmatpush1.bf16.msra.mxu1 %v9293_v7  ;;  %v1229_v7 = vld [vmem:[%s16793_s3 + $0x320] sm:$0xff] }
  0x75   :  { %764 = vmatmul.mubr.bf16.gmra.mrb[40].mxu0 %v11499_v41  ;;  %4703 = vmatprep.subr.bf16.mxu1 %v9302_v9  ;;  %v9355_v9 = vcombine.low %v1217_v61, %v1221_v62 }
  0x76   :  { %773 = vmatprep.mubr.bf16.mxu0 %v11271_v3  ;;  %4252 = vmatpush1.bf16.msra.mxu0 %v9299_v6  ;;  %v1225_v6 = vld [vmem:[%s16793_s3 + $0x300] sm:$0xff] }
  0x77   :  { %4253 = vmatprep.subr.bf16.mxu0 %v9308_v8  ;;  %877 = vmatmul.mubr.bf16.gmra.mrb[40].mxu1 %v11499_v41  ;;  %v1186_v41 = vld [vmem:[%s16793_s3 + $0x1c8] sm:$0xff]  ;;  %v9349_v8 = vcombine.low %v1210_v4, %v1214_v59  ;;  %v9364_v11 = vcombine.high %v1225_v6, %v1229_v7 }
  0x78   :  { %4704 = vmatpush1.bf16.msra.mxu1 %v9301_v13  ;;  %886 = vmatprep.mubr.bf16.mxu1 %v11271_v3  ;;  %v9326_v42 = vcombine.high %v1186_v41, %v1190_v26  ;;  %v9325_v48 = vcombine.low %v1186_v41, %v1190_v26  ;;  %v1233_v13 = vld [vmem:[%s16793_s3 + $0x340] sm:$0xff]  ;;  %v9374_v41 = vcombine.high %v1234_v19, %v1238_v20 }
  0x79   :  { %4705 = vmatprep.subr.bf16.mxu1 %v9310_v15  ;;  %v9357_v15 = vcombine.low %v1218_v2, %v1222_v5  ;;  %v1269_v5 = vld [vmem:[%s16793_s3 + $0x460] sm:$0xff] }
  0x7a   :  { %4254 = vmatpush1.bf16.msra.mxu0 %v9307_v14  ;;  %v1237_v14 = vld [vmem:[%s16793_s3 + $0x360] sm:$0xff] }
  0x7b   :  { %4255 = vmatprep.subr.bf16.mxu0 %v9316_v17  ;;  %v9363_v17 = vcombine.low %v1225_v6, %v1229_v7  ;;  %v1266_v6 = vld [vmem:[%s16793_s3 + $0x448] sm:$0xff] }
  0x7c   :  { %4706 = vmatpush1.bf16.msra.mxu1 %v9309_v23  ;;  %v1245_v23 = vld [vmem:[%s16793_s3 + $0x3a0] sm:$0xff]  ;;  %v1270_v7 = vld [vmem:[%s16793_s3 + $0x468] sm:$0xff] }
  0x7d   :  { %774 = vmatmul.mubr.bf16.gmra.mrb[44].mxu0 %v11535_v60  ;;  %4707 = vmatprep.subr.bf16.mxu1 %v9318_v25  ;;  %v9371_v25 = vcombine.low %v1233_v13, %v1237_v14  ;;  %v9380_v26 = vcombine.high %v1241_v21, %v1245_v23 }
  0x7e   :  { %783 = vmatprep.mubr.bf16.mxu0 %v11271_v3  ;;  %4256 = vmatpush1.bf16.msra.mxu0 %v9315_v24  ;;  %v9365_v24 = vcombine.low %v1226_v22, %v1230_v12 }
  0x7f   :  { %4257 = vmatprep.subr.bf16.mxu0 %v9324_v27  ;;  %887 = vmatmul.mubr.bf16.gmra.mrb[44].mxu1 %v11535_v60  ;;  %v9340_v60 = vcombine.high %v1201_v46, %v1205_v47  ;;  %v1242_v27 = vld [vmem:[%s16793_s3 + $0x388] sm:$0xff] }
  0x80   :  { %4708 = vmatpush1.bf16.msra.mxu1 %v9317_v37  ;;  %896 = vmatprep.mubr.bf16.mxu1 %v11271_v3  ;;  %v1253_v37 = vld [vmem:[%s16793_s3 + $0x3e0] sm:$0xff]  ;;  %v9381_v46 = vcombine.low %v1242_v27, %v1246_v33 }
  0x81   :  { %4709 = vmatprep.subr.bf16.mxu1 %v9326_v42  ;;  %v9379_v42 = vcombine.low %v1241_v21, %v1245_v23  ;;  %v9388_v44 = vcombine.high %v1249_v35, %v1253_v37  ;;  %v9387_v47 = vcombine.low %v1249_v35, %v1253_v37  ;;  %v1278_v21 = vld [vmem:[%s16793_s3 + $0x4a8] sm:$0xff]  ;;  %v9405_v35 = vcombine.low %v1266_v6, %v1270_v7 }
  0x82   :  { %4258 = vmatpush1.bf16.msra.mxu0 %v9323_v40  ;;  %v9373_v40 = vcombine.low %v1234_v19, %v1238_v20  ;;  %v1277_v19 = vld [vmem:[%s16793_s3 + $0x4a0] sm:$0xff]  ;;  %v1274_v20 = vld [vmem:[%s16793_s3 + $0x488] sm:$0xff] }
  0x83   :  { %4259 = vmatprep.subr.bf16.mxu0 %v9332_v43  ;;  %v9382_v43 = vcombine.high %v1242_v27, %v1246_v33 }
  0x84   :  { %4710 = vmatpush1.bf16.msra.mxu1 %v9325_v48  ;;  %v9396_v48 = vcombine.high %v11733_v29, %v11738_v30 }
  0x85   :  { %784 = vmatmul.mubr.bf16.gmra.mrb[48].mxu0 %v11574_v16  ;;  %4711 = vmatprep.subr.bf16.mxu1 %v9334_v50  ;;  %v9398_v50 = vcombine.high %v11743_v32, %v11754_v36  ;;  %v1285_v32 = vld [vmem:[%s16793_s3 + $0x4e0] sm:$0xff]  ;;  %v1282_v36 = vld [vmem:[%s16793_s3 + $0x4c8] sm:$0xff] }
  0x86   :  { %793 = vmatprep.mubr.bf16.mxu0 %v11271_v3  ;;  %4260 = vmatpush1.bf16.msra.mxu0 %v9331_v49 }
  0x87   :  { %4261 = vmatprep.subr.bf16.mxu0 %v9340_v60  ;;  %897 = vmatmul.mubr.bf16.gmra.mrb[48].mxu1 %v11574_v16  ;;  %v9356_v16 = vcombine.high %v1217_v61, %v1221_v62  ;;  %v125_v60 = vlaneseq }
  0x88   :  { %4712 = vmatpush1.bf16.msra.mxu1 %v9333_v55  ;;  %906 = vmatprep.mubr.bf16.mxu1 %v11271_v3 }
  0x89   :  { %4713 = vmatprep.subr.bf16.mxu1 %v9342_v57  ;;  %v11870_v51 = vshrl.u32 %v125_v60, 7  ;;  %v12010_v60 = vld [vmem:[%s16793_s3 + $0x500] sm:$0xff] }
  0x8a   :  { %4262 = vmatpush1.bf16.msra.mxu0 %v9339_v56 }
  0x8b   :  { %4263 = vmatprep.subr.bf16.mxu0 %v9348_v58  ;;  %17085 = vst [vmem:[#allocation3_spill] sm:$0xff] %v11870_v51  ;;  %v11873_v52 = vsub.s32 1, %v11870_v51  ;;  %v11881_v53 = vsub.s32 0, %v11870_v51 }
  0x8c   :  { %4714 = vmatpush1.bf16.msra.mxu1 %v9341_v63 }
  0x8d   :  { %794 = vmatmul.mubr.bf16.gmra.mrb[52].mxu0 %v11598_v28  ;;  %4715 = vmatprep.subr.bf16.mxu1 %v9350_v1  ;;  %17086 = vst [vmem:[#allocation4_spill] sm:$0xff] %v11873_v52  ;;  %17087 = vst [vmem:[#allocation5_spill] sm:$0xff] %v11881_v53  ;;  %v1265_v1 = vld [vmem:[%s16793_s3 + $0x440] sm:$0xff] }
  0x8e   :  { %803 = vmatprep.mubr.bf16.mxu0 %v11271_v3  ;;  %4264 = vmatpush1.bf16.msra.mxu0 %v9347_v0  ;;  %v9403_v33 = vcombine.low %v1265_v1, %v1269_v5 }
  0x8f   :  { %4265 = vmatprep.subr.bf16.mxu0 %v9356_v16  ;;  %907 = vmatmul.mubr.bf16.gmra.mrb[52].mxu1 %v11598_v28  ;;  %v9372_v28 = vcombine.high %v1233_v13, %v1237_v14  ;;  %v9404_v13 = vcombine.high %v1265_v1, %v1269_v5  ;;  %v9406_v14 = vcombine.high %v1266_v6, %v1270_v7  ;;  %v1290_v1 = vld [vmem:[%s16793_s3 + $0x508] sm:$0xff] }
  0x90   :  { %4716 = vmatpush1.bf16.msra.mxu1 %v9349_v8  ;;  %916 = vmatprep.mubr.bf16.mxu1 %v11271_v3  ;;  %v1294_v5 = vld [vmem:[%s16793_s3 + $0x528] sm:$0xff] }
  0x91   :  { %4717 = vmatprep.subr.bf16.mxu1 %v9358_v10 }
  0x92   :  { %4266 = vmatpush1.bf16.msra.mxu0 %v9355_v9 }
  0x93   :  { %4267 = vmatprep.subr.bf16.mxu0 %v9364_v11 }
  0x94   :  { %4718 = vmatpush1.bf16.msra.mxu1 %v9357_v15  ;;  %v11936_v15 = vld [vmem:[%s16793_s3 + $0x480] sm:$0xff] }
  0x95   :  { %804 = vmatmul.mubr.bf16.gmra.mrb[56].mxu0 %v11610_v31  ;;  %4719 = vmatprep.subr.bf16.mxu1 %v9366_v18 }
  0x96   :  { %813 = vmatprep.mubr.bf16.mxu0 %v11271_v3  ;;  %4268 = vmatpush1.bf16.msra.mxu0 %v9363_v17 }
  0x97   :  { %4269 = vmatprep.subr.bf16.mxu0 %v9372_v28  ;;  %917 = vmatmul.mubr.bf16.gmra.mrb[56].mxu1 %v11610_v31  ;;  %v1250_v31 = vld [vmem:[%s16793_s3 + $0x3c8] sm:$0xff] }
  0x98   :  { %4720 = vmatpush1.bf16.msra.mxu1 %v9365_v24  ;;  %926 = vmatprep.mubr.bf16.mxu1 %v11271_v3  ;;  %v9390_v3 = vcombine.high %v1250_v31, %v1254_v45  ;;  %v9389_v49 = vcombine.low %v1250_v31, %v1254_v45  ;;  %v9411_v45 = vcombine.low %v11936_v15, %v1277_v19 }
  0x99   :  { %4721 = vmatprep.subr.bf16.mxu1 %v9374_v41 }
  0x9a   :  { %4270 = vmatpush1.bf16.msra.mxu0 %v9371_v25 }
  0x9b   :  { %4271 = vmatprep.subr.bf16.mxu0 %v9380_v26 }
  0x9c   :  { %4722 = vmatpush1.bf16.msra.mxu1 %v9373_v40  ;;  %v9412_v40 = vcombine.high %v11936_v15, %v1277_v19 }
  0x9d   :  { %814 = vmatmul.mubr.bf16.gmra.mrb[60].mxu0 %v11622_v34  ;;  %4723 = vmatprep.subr.bf16.mxu1 %v9382_v43  ;;  %v1281_v43 = vld [vmem:[%s16793_s3 + $0x4c0] sm:$0xff] }
  0x9e   :  { %4272 = vmatpush1.bf16.msra.mxu0 %v9379_v42  ;;  %v9414_v42 = vcombine.high %v1274_v20, %v1278_v21  ;;  %v9419_v15 = vcombine.low %v1281_v43, %v1285_v32 }
  0x9f   :  { %4273 = vmatprep.subr.bf16.mxu0 %v9388_v44  ;;  %927 = vmatmul.mubr.bf16.gmra.mrb[60].mxu1 %v11622_v34  ;;  %v11878_v34 = vld [vmem:[%s16794_s2] sm:$0xff] }
  0xa0   :  { %4724 = vmatpush1.bf16.msra.mxu1 %v9381_v46  ;;  %v11885_v54 = vrot.slane %v11878_v34, %v11873_v52  ;;  %v11889_v55 = vrot.slane %v11878_v34, %v11881_v53  ;;  %v9413_v46 = vcombine.low %v1274_v20, %v1278_v21  ;;  %v9430_v21 = vcombine.high %v1290_v1, %v1294_v5 }
  0xa1   :  { %4725 = vmatprep.subr.bf16.mxu1 %v9390_v3 }
  0xa2   :  { %4274 = vmatpush1.bf16.msra.mxu0 %v9387_v47 }
  0xa3   :  { %4356 = vmatprep.subr.bf16.mxu0 %v9396_v48 }
  0xa4   :  { %4726 = vmatpush1.bf16.msra.mxu1 %v9389_v49  ;;  %v9420_v49 = vcombine.high %v1281_v43, %v1285_v32  ;;  %v1302_v43 = vld [vmem:[%s16793_s3 + $0x568] sm:$0xff] }
  0xa5   :  { %4808 = vmatprep.subr.bf16.mxu1 %v9398_v50 }
  0xf8   :  { %v519_v56 = vpop.f32.mrb[0].mxu0  ;;  %v11925_v11 = vpop.f32.mrb[0].mxu1 }
  0xf9   :  { %v521_v57 = vpop.f32.mrb[1].mxu0  ;;  %v11895_v59 = vadd.f32 %v519_v56, %v11889_v55  ;;  %v11938_v17 = vpop.f32.mrb[1].mxu1 }
  0xfa   :  { %v11892_v58 = vadd.f32 %v521_v57, %v11885_v54  ;;  %v523_v4 = vpop.f32.mrb[2].mxu0  ;;  %v11954_v23 = vpop.f32.mrb[2].mxu1 }
  0xfb   :  { %17089 = vst [vmem:[#allocation7_spill] sm:$0xff] %v11895_v59  ;;  %v11898_v61 = vadd.f32 %v523_v4, %v11889_v55  ;;  %v525_v62 = vpop.f32.mrb[3].mxu0  ;;  %v16812_v8 = vmax.f32 %v11895_v59, 0.0  ;;  %v11964_v26 = vpop.f32.mrb[3].mxu1 }
  0xfc   :  { %17088 = vst [vmem:[#allocation6_spill] sm:$0xff] %v11892_v58  ;;  %v11901_v63 = vadd.f32 %v525_v62, %v11885_v54  ;;  %v16811_v16 = vmax.f32 %v11892_v58, 0.0  ;;  %v1293_v62 = vld [vmem:[%s16793_s3 + $0x520] sm:$0xff] }
  0xfd   :  { %17090 = vst [vmem:[#allocation8_spill] sm:$0xff] %v11898_v61  ;;  %v16810_v0 = vmax.f32 %v11898_v61, 0.0  ;;  %v9428_v20 = vcombine.high %v12010_v60, %v1293_v62 }
  0xfe   :  { %17091 = vst [vmem:[#allocation9_spill] sm:$0xff] %v11901_v63  ;;  %v16809_v2 = vmax.f32 %v11901_v63, 0.0 }
  0xff   :  { %v11931_v22 = vpack.c.bf16 %v16810_v0, %v16812_v8 }
 0x100   :  { %v11923_v9 = vpack.c.bf16 %v16809_v2, %v16811_v16  ;;  %v529_v10 = vpop.f32.mrb[4].mxu0 }
 0x101   :  { %17093 = vst [vmem:[#allocation11_spill] sm:$0xff] %v11931_v22  ;;  %v531_v12 = vpop.f32.mrb[5].mxu0  ;;  %v11957_v24 = vadd.f32 %v529_v10, %v11889_v55 }
 0x102   :  { %17092 = vst [vmem:[#allocation10_spill] sm:$0xff] %v11923_v9  ;;  %v11941_v18 = vadd.f32 %v531_v12, %v11885_v54  ;;  %v533_v28 = vpop.f32.mrb[6].mxu0  ;;  %4275 = vmatprep.mubr.bf16.mxu0 %v11923_v9  ;;  %4727 = vmatprep.mubr.bf16.mxu1 %v11923_v9  ;;  %v11999_v47 = vpop.f32.mrb[4].mxu1  ;;  %v12692_v9 = vld [vmem:[%s16793_s3 + $0x940] sm:$0xff] }
 0x103   :  { %17095 = vst [vmem:[#allocation13_spill] sm:$0xff] %v11957_v24  ;;  %v11960_v25 = vadd.f32 %v533_v28, %v11889_v55  ;;  %v535_v41 = vpop.f32.mrb[7].mxu0  ;;  %4276 = vmatmul.mubr.bf16.vlgmr.msra.gmra.mrb[64].mxu0 %v11931_v22  ;;  %4728 = vmatmul.mubr.bf16.vlgmr.msra.gmra.mrb[64].mxu1 %v11931_v22  ;;  %v12012_v56 = vpop.f32.mrb[5].mxu1 }
 0x104   :  { %17094 = vst [vmem:[#allocation12_spill] sm:$0xff] %v11941_v18  ;;  %v11967_v27 = vadd.f32 %v535_v41, %v11885_v54  ;;  %4357 = vmatpush1.bf16.msra.mxu0 %v9395_v38  ;;  %4809 = vmatpush1.bf16.msra.mxu1 %v9397_v39  ;;  %v16807_v29 = vmax.f32 %v11941_v18, 0.0  ;;  %v1286_v38 = vld [vmem:[%s16793_s3 + $0x4e8] sm:$0xff]  ;;  %v16808_v39 = vmax.f32 %v11957_v24, 0.0  ;;  %v12028_v6 = vpop.f32.mrb[6].mxu1  ;;  %v1297_v41 = vld [vmem:[%s16793_s3 + $0x540] sm:$0xff] }
 0x105   :  { %17096 = vst [vmem:[#allocation14_spill] sm:$0xff] %v11960_v25  ;;  %v16806_v37 = vmax.f32 %v11960_v25, 0.0  ;;  %4358 = vmatprep.subr.bf16.mxu0 %v9404_v13  ;;  %4810 = vmatprep.subr.bf16.mxu1 %v9406_v14  ;;  %v9422_v50 = vcombine.high %v1282_v36, %v1286_v38  ;;  %v12038_v13 = vpop.f32.mrb[7].mxu1  ;;  %v9421_v28 = vcombine.low %v1282_v36, %v1286_v38  ;;  %v1345_v18 = vld [vmem:[%s16793_s3 + $0x6c0] sm:$0xff] }
 0x106   :  { %17097 = vst [vmem:[#allocation15_spill] sm:$0xff] %v11967_v27  ;;  %v16805_v30 = vmax.f32 %v11967_v27, 0.0 }
 0x107   :  { %v12005_v3 = vpack.c.bf16 %v16806_v37, %v16808_v39 }
 0x108   :  { %v11996_v44 = vpack.c.bf16 %v16805_v30, %v16807_v29  ;;  %4359 = vmatpush1.bf16.msra.mxu0 %v9403_v33  ;;  %v539_v31 = vpop.f32.mrb[8].mxu0  ;;  %4811 = vmatpush1.bf16.msra.mxu1 %v9405_v35  ;;  %v1313_v29 = vld [vmem:[%s16793_s3 + $0x5c0] sm:$0xff] }
 0x109   :  { %17099 = vst [vmem:[#allocation17_spill] sm:$0xff] %v12005_v3  ;;  %v541_v48 = vpop.f32.mrb[9].mxu0  ;;  %4360 = vmatprep.subr.bf16.mxu0 %v9412_v40  ;;  %4812 = vmatprep.subr.bf16.mxu1 %v9414_v42  ;;  %v12031_v7 = vadd.f32 %v539_v31, %v11889_v55  ;;  %v1301_v40 = vld [vmem:[%s16793_s3 + $0x560] sm:$0xff]  ;;  %v1298_v42 = vld [vmem:[%s16793_s3 + $0x548] sm:$0xff]  ;;  %v9427_v31 = vcombine.low %v12010_v60, %v1293_v62 }
 0x10a   :  { %17098 = vst [vmem:[#allocation16_spill] sm:$0xff] %v11996_v44  ;;  %v12015_v57 = vadd.f32 %v541_v48, %v11885_v54  ;;  %v543_v4 = vpop.f32.mrb[10].mxu0  ;;  %4285 = vmatprep.mubr.bf16.mxu0 %v11996_v44  ;;  %4737 = vmatprep.mubr.bf16.mxu1 %v11996_v44  ;;  %v9437_v30 = vcombine.low %v1298_v42, %v1302_v43 }
 0x10b   :  { %17101 = vst [vmem:[#allocation19_spill] sm:$0xff] %v12031_v7  ;;  %v12034_v10 = vadd.f32 %v543_v4, %v11889_v55  ;;  %v545_v12 = vpop.f32.mrb[11].mxu0  ;;  %4286 = vmatmul.mubr.bf16.gmra.mrb[68].mxu0 %v12005_v3  ;;  %4738 = vmatmul.mubr.bf16.gmra.mrb[68].mxu1 %v12005_v3  ;;  %v16804_v32 = vmax.f32 %v12031_v7, 0.0  ;;  %v9438_v4 = vcombine.high %v1298_v42, %v1302_v43  ;;  %v1318_v42 = vld [vmem:[%s16793_s3 + $0x5e8] sm:$0xff] }
 0x10c   :  { %17100 = vst [vmem:[#allocation18_spill] sm:$0xff] %v12015_v57  ;;  %v12041_v14 = vadd.f32 %v545_v12, %v11885_v54  ;;  %4361 = vmatpush1.bf16.msra.mxu0 %v9411_v45  ;;  %4813 = vmatpush1.bf16.msra.mxu1 %v9413_v46  ;;  %v16803_v33 = vmax.f32 %v12015_v57, 0.0  ;;  %v9429_v45 = vcombine.low %v1290_v1, %v1294_v5  ;;  %v12067_v46 = vpop.f32.mrb[8].mxu1  ;;  %v12078_v12 = vld [vmem:[%s16793_s3 + $0x580] sm:$0xff] }
 0x10d   :  { %17102 = vst [vmem:[#allocation20_spill] sm:$0xff] %v12034_v10  ;;  %v16802_v19 = vmax.f32 %v12034_v10, 0.0  ;;  %4362 = vmatprep.subr.bf16.mxu0 %v9420_v49  ;;  %4814 = vmatprep.subr.bf16.mxu1 %v9422_v50  ;;  %v9436_v50 = vcombine.high %v1297_v41, %v1301_v40  ;;  %v12080_v60 = vpop.f32.mrb[9].mxu1  ;;  %v1309_v5 = vld [vmem:[%s16793_s3 + $0x5a0] sm:$0xff] }
 0x10e   :  { %17103 = vst [vmem:[#allocation21_spill] sm:$0xff] %v12041_v14  ;;  %v16801_v35 = vmax.f32 %v12041_v14, 0.0  ;;  %v1329_v14 = vld [vmem:[%s16793_s3 + $0x640] sm:$0xff] }
 0x10f   :  { %v12073_v48 = vpack.c.bf16 %v16802_v19, %v16804_v32  ;;  %v9435_v32 = vcombine.low %v1297_v41, %v1301_v40  ;;  %v1317_v41 = vld [vmem:[%s16793_s3 + $0x5e0] sm:$0xff]  ;;  %v1314_v40 = vld [vmem:[%s16793_s3 + $0x5c8] sm:$0xff] }
 0x110   :  { %v12064_v36 = vpack.c.bf16 %v16801_v35, %v16803_v33  ;;  %4363 = vmatpush1.bf16.msra.mxu0 %v9419_v15  ;;  %v549_v38 = vpop.f32.mrb[12].mxu0  ;;  %4815 = vmatpush1.bf16.msra.mxu1 %v9421_v28  ;;  %v1306_v15 = vld [vmem:[%s16793_s3 + $0x588] sm:$0xff]  ;;  %v9452_v8 = vcombine.high %v1313_v29, %v1317_v41 }
 0x111   :  { %17105 = vst [vmem:[#allocation23_spill] sm:$0xff] %v12073_v48  ;;  %v551_v49 = vpop.f32.mrb[13].mxu0  ;;  %4364 = vmatprep.subr.bf16.mxu0 %v9428_v20  ;;  %4816 = vmatprep.subr.bf16.mxu1 %v9430_v21  ;;  %v1310_v28 = vld [vmem:[%s16793_s3 + $0x5a8] sm:$0xff]  ;;  %v12096_v20 = vpop.f32.mrb[10].mxu1  ;;  %v12099_v21 = vadd.f32 %v549_v38, %v11889_v55 }
 0x112   :  { %17104 = vst [vmem:[#allocation22_spill] sm:$0xff] %v12064_v36  ;;  %v12083_v62 = vadd.f32 %v551_v49, %v11885_v54  ;;  %v553_v1 = vpop.f32.mrb[14].mxu0  ;;  %4295 = vmatprep.mubr.bf16.mxu0 %v12064_v36  ;;  %4747 = vmatprep.mubr.bf16.mxu1 %v12064_v36  ;;  %v12106_v19 = vpop.f32.mrb[11].mxu1  ;;  %v9446_v37 = vcombine.high %v1306_v15, %v1310_v28  ;;  %v12608_v36 = vld [vmem:[%s16793_s3 + $0x8c0] sm:$0xff] }
 0x113   :  { %17107 = vst [vmem:[#allocation25_spill] sm:$0xff] %v12099_v21  ;;  %v12102_v49 = vadd.f32 %v553_v1, %v11889_v55  ;;  %v555_v35 = vpop.f32.mrb[15].mxu0  ;;  %4296 = vmatmul.mubr.bf16.gmra.mrb[72].mxu0 %v12073_v48  ;;  %4748 = vmatmul.mubr.bf16.gmra.mrb[72].mxu1 %v12073_v48  ;;  %v9444_v1 = vcombine.high %v12078_v12, %v1309_v5  ;;  %v16816_v43 = vmax.f32 %v12099_v21, 0.0  ;;  %v12135_v2 = vpop.f32.mrb[12].mxu1 }
 0x114   :  { %17106 = vst [vmem:[#allocation24_spill] sm:$0xff] %v12083_v62  ;;  %v12109_v33 = vadd.f32 %v555_v35, %v11885_v54  ;;  %4365 = vmatpush1.bf16.msra.mxu0 %v9427_v31  ;;  %4817 = vmatpush1.bf16.msra.mxu1 %v9429_v45  ;;  %v16815_v39 = vmax.f32 %v12083_v62, 0.0  ;;  %v9453_v62 = vcombine.low %v1314_v40, %v1318_v42 }
 0x115   :  { %17108 = vst [vmem:[#allocation26_spill] sm:$0xff] %v12102_v49  ;;  %v16814_v38 = vmax.f32 %v12102_v49, 0.0  ;;  %4366 = vmatprep.subr.bf16.mxu0 %v9436_v50  ;;  %4818 = vmatprep.subr.bf16.mxu1 %v9438_v4  ;;  %v9443_v50 = vcombine.low %v12078_v12, %v1309_v5  ;;  %v9445_v4 = vcombine.low %v1306_v15, %v1310_v28  ;;  %v1322_v15 = vld [vmem:[%s16793_s3 + $0x608] sm:$0xff] }
 0x116   :  { %17109 = vst [vmem:[#allocation27_spill] sm:$0xff] %v12109_v33  ;;  %v16813_v35 = vmax.f32 %v12109_v33, 0.0  ;;  %v1326_v28 = vld [vmem:[%s16793_s3 + $0x628] sm:$0xff]  ;;  %v9451_v49 = vcombine.low %v1313_v29, %v1317_v41  ;;  %v1333_v29 = vld [vmem:[%s16793_s3 + $0x660] sm:$0xff] }
 0x117   :  { %v12141_v0 = vpack.c.bf16 %v16814_v38, %v16816_v43  ;;  %v9462_v21 = vcombine.high %v1322_v15, %v1326_v28 }
 0x118   :  { %v12132_v31 = vpack.c.bf16 %v16813_v35, %v16815_v39  ;;  %4367 = vmatpush1.bf16.msra.mxu0 %v9435_v32  ;;  %v559_v45 = vpop.f32.mrb[16].mxu0  ;;  %4819 = vmatpush1.bf16.msra.mxu1 %v9437_v30  ;;  %v9454_v35 = vcombine.high %v1314_v40, %v1318_v42  ;;  %v12146_v30 = vld [vmem:[%s16793_s3 + $0x600] sm:$0xff]  ;;  %v12148_v32 = vpop.f32.mrb[13].mxu1 }
 0x119   :  { %17111 = vst [vmem:[#allocation29_spill] sm:$0xff] %v12141_v0  ;;  %v561_v16 = vpop.f32.mrb[17].mxu0  ;;  %4368 = vmatprep.subr.bf16.mxu0 %v9444_v1  ;;  %4820 = vmatprep.subr.bf16.mxu1 %v9446_v37  ;;  %v1325_v37 = vld [vmem:[%s16793_s3 + $0x620] sm:$0xff]  ;;  %v12164_v1 = vpop.f32.mrb[14].mxu1 }
 0x11a   :  { %17110 = vst [vmem:[#allocation28_spill] sm:$0xff] %v12132_v31  ;;  %v12151_v12 = vadd.f32 %v561_v16, %v11885_v54  ;;  %v563_v5 = vpop.f32.mrb[18].mxu0  ;;  %4305 = vmatprep.mubr.bf16.mxu0 %v12132_v31  ;;  %4757 = vmatprep.mubr.bf16.mxu1 %v12132_v31  ;;  %v12167_v16 = vadd.f32 %v559_v45, %v11889_v55  ;;  %v12174_v43 = vpop.f32.mrb[15].mxu1 }
 0x11b   :  { %v12170_v38 = vadd.f32 %v563_v5, %v11889_v55  ;;  %v565_v39 = vpop.f32.mrb[19].mxu0  ;;  %4306 = vmatmul.mubr.bf16.gmra.mrb[76].mxu0 %v12141_v0  ;;  %4758 = vmatmul.mubr.bf16.gmra.mrb[76].mxu1 %v12141_v0  ;;  %v9460_v5 = vcombine.high %v12146_v30, %v1325_v37  ;;  %v12203_v45 = vpop.f32.mrb[16].mxu1  ;;  %v1410_v0 = vld [vmem:[%s16793_s3 + $0x8c8] sm:$0xff] }
 0x11c   :  { %17112 = vst [vmem:[#allocation30_spill] sm:$0xff] %v12151_v12  ;;  %17113 = vst [vmem:[#allocation31_spill] sm:$0xff] %v12167_v16  ;;  %v12177_v33 = vadd.f32 %v565_v39, %v11885_v54  ;;  %4369 = vmatpush1.bf16.msra.mxu0 %v9443_v50  ;;  %4821 = vmatpush1.bf16.msra.mxu1 %v9445_v4  ;;  %v16828_v10 = vmax.f32 %v12151_v12, 0.0  ;;  %v16829_v41 = vmax.f32 %v12167_v16, 0.0 }
 0x11d   :  { %17114 = vst [vmem:[#allocation32_spill] sm:$0xff] %v12170_v38  ;;  %4370 = vmatprep.subr.bf16.mxu0 %v9452_v8  ;;  %4822 = vmatprep.subr.bf16.mxu1 %v9454_v35  ;;  %v1330_v8 = vld [vmem:[%s16793_s3 + $0x648] sm:$0xff]  ;;  %v9459_v50 = vcombine.low %v12146_v30, %v1325_v37  ;;  %v9461_v4 = vcombine.low %v1322_v15, %v1326_v28  ;;  %v17117_v57 = vmax.f32 %v12170_v38, 0.0 }
 0x11e   :  { %17115 = vst [vmem:[#allocation33_spill] sm:$0xff] %v12177_v33  ;;  %v16827_v39 = vmax.f32 %v12177_v33, 0.0  ;;  %v1334_v35 = vld [vmem:[%s16793_s3 + $0x668] sm:$0xff]  ;;  %v9468_v33 = vcombine.high %v1329_v14, %v1333_v29  ;;  %v9467_v12 = vcombine.low %v1329_v14, %v1333_v29  ;;  %v1349_v14 = vld [vmem:[%s16793_s3 + $0x6e0] sm:$0xff] }
 0x11f   :  { %v12209_v7 = vpack.c.bf16 %v17117_v57, %v16829_v41  ;;  %v1341_v57 = vld [vmem:[%s16793_s3 + $0x6a0] sm:$0xff]  ;;  %v1342_v15 = vld [vmem:[%s16793_s3 + $0x6a8] sm:$0xff]  ;;  %v9469_v16 = vcombine.low %v1330_v8, %v1334_v35 }
 0x120   :  { %v12200_v40 = vpack.c.bf16 %v16827_v39, %v16828_v10  ;;  %4371 = vmatpush1.bf16.msra.mxu0 %v9451_v49  ;;  %v569_v42 = vpop.f32.mrb[20].mxu0  ;;  %4823 = vmatpush1.bf16.msra.mxu1 %v9453_v62  ;;  %v9470_v39 = vcombine.high %v1330_v8, %v1334_v35  ;;  %v12214_v62 = vld [vmem:[%s16793_s3 + $0x680] sm:$0xff]  ;;  %v12216_v49 = vpop.f32.mrb[17].mxu1 }
 0x121   :  { %17118 = vst [vmem:[#allocation35_spill] sm:$0xff] %v12209_v7  ;;  %v571_v27 = vpop.f32.mrb[21].mxu0  ;;  %4372 = vmatprep.subr.bf16.mxu0 %v9460_v5  ;;  %4824 = vmatprep.subr.bf16.mxu1 %v9462_v21  ;;  %v1338_v21 = vld [vmem:[%s16793_s3 + $0x688] sm:$0xff]  ;;  %v12232_v28 = vpop.f32.mrb[18].mxu1 }
 0x122   :  { %17116 = vst [vmem:[#allocation34_spill] sm:$0xff] %v12200_v40  ;;  %v12219_v30 = vadd.f32 %v571_v27, %v11885_v54  ;;  %v573_v37 = vpop.f32.mrb[22].mxu0  ;;  %4315 = vmatprep.mubr.bf16.mxu0 %v12200_v40  ;;  %4767 = vmatprep.mubr.bf16.mxu1 %v12200_v40  ;;  %v12235_v27 = vadd.f32 %v569_v42, %v11889_v55  ;;  %v12242_v41 = vpop.f32.mrb[19].mxu1  ;;  %v12272_v42 = vsub.s32 3, %v11870_v51  ;;  %v12522_v40 = vld [vmem:[%s16793_s3 + $0x840] sm:$0xff] }
 0x123   :  { %v12238_v5 = vadd.f32 %v573_v37, %v11889_v55  ;;  %v575_v10 = vpop.f32.mrb[23].mxu0  ;;  %4316 = vmatmul.mubr.bf16.gmra.mrb[80].mxu0 %v12209_v7  ;;  %4768 = vmatmul.mubr.bf16.gmra.mrb[80].mxu1 %v12209_v7  ;;  %v9476_v37 = vcombine.high %v12214_v62, %v1341_v57  ;;  %v9478_v25 = vcombine.high %v1338_v21, %v1342_v15  ;;  %v12274_v63 = vpop.f32.mrb[20].mxu1 }
 0x124   :  { %17119 = vst [vmem:[#allocation36_spill] sm:$0xff] %v12219_v30  ;;  %17120 = vst [vmem:[#allocation37_spill] sm:$0xff] %v12235_v27  ;;  %v12245_v38 = vadd.f32 %v575_v10, %v11885_v54  ;;  %4373 = vmatpush1.bf16.msra.mxu0 %v9459_v50  ;;  %4825 = vmatpush1.bf16.msra.mxu1 %v9461_v4  ;;  %v16841_v24 = vmax.f32 %v12219_v30, 0.0  ;;  %v16842_v29 = vmax.f32 %v12235_v27, 0.0 }
 0x125   :  { %17121 = vst [vmem:[#allocation38_spill] sm:$0xff] %v12238_v5  ;;  %4374 = vmatprep.subr.bf16.mxu0 %v9468_v33  ;;  %4826 = vmatprep.subr.bf16.mxu1 %v9470_v39  ;;  %v1346_v33 = vld [vmem:[%s16793_s3 + $0x6c8] sm:$0xff]  ;;  %v9475_v50 = vcombine.low %v12214_v62, %v1341_v57  ;;  %v9477_v4 = vcombine.low %v1338_v21, %v1342_v15  ;;  %17124 = vst [vmem:[#allocation41_spill] sm:$0xff] %v12272_v42  ;;  %v17125_v61 = vmax.f32 %v12238_v5, 0.0  ;;  %v12287_v62 = vpop.f32.mrb[21].mxu1 }
 0x126   :  { %17122 = vst [vmem:[#allocation39_spill] sm:$0xff] %v12245_v38  ;;  %v16840_v10 = vmax.f32 %v12245_v38, 0.0  ;;  %v1350_v39 = vld [vmem:[%s16793_s3 + $0x6e8] sm:$0xff]  ;;  %v12307_v15 = vpop.f32.mrb[22].mxu1  ;;  %v9483_v5 = vcombine.low %v1345_v18, %v1349_v14 }
 0x127   :  { %v12280_v30 = vpack.c.bf16 %v17125_v61, %v16842_v29  ;;  %v12297_v61 = vld [vmem:[%s16793_s3 + $0x720] sm:$0xff]  ;;  %v12317_v27 = vpop.f32.mrb[23].mxu1  ;;  %v9485_v59 = vcombine.low %v1346_v33, %v1350_v39 }
 0x128   :  { %v12268_v8 = vpack.c.bf16 %v16840_v10, %v16841_v24  ;;  %4375 = vmatpush1.bf16.msra.mxu0 %v9467_v12  ;;  %v579_v35 = vpop.f32.mrb[24].mxu0  ;;  %4827 = vmatpush1.bf16.msra.mxu1 %v9469_v16  ;;  %v9484_v12 = vcombine.high %v1345_v18, %v1349_v14  ;;  %v9486_v10 = vcombine.high %v1346_v33, %v1350_v39  ;;  %v12285_v16 = vld [vmem:[%s16793_s3 + $0x700] sm:$0xff]  ;;  %v12353_v39 = vsub.s32 2, %v11870_v51 }
 0x129   :  { %17126 = vst [vmem:[#allocation42_spill] sm:$0xff] %v12280_v30  ;;  %v581_v38 = vpop.f32.mrb[25].mxu0  ;;  %4376 = vmatprep.subr.bf16.mxu0 %v9476_v37  ;;  %4828 = vmatprep.subr.bf16.mxu1 %v9478_v25  ;;  %v12302_v25 = vld [vmem:[%s16793_s3 + $0x708] sm:$0xff]  ;;  %v12310_v37 = vadd.f32 %v579_v35, %v11889_v55  ;;  %v12324_v35 = vrot.slane %v11878_v34, %v12272_v42  ;;  %v12333_v14 = vld [vmem:[%s16793_s3 + $0x740] sm:$0xff] }
 0x12a   :  { %17123 = vst [vmem:[#allocation40_spill] sm:$0xff] %v12268_v8  ;;  %v12290_v57 = vadd.f32 %v581_v38, %v11885_v54  ;;  %v583_v21 = vpop.f32.mrb[26].mxu0  ;;  %4325 = vmatprep.mubr.bf16.mxu0 %v12268_v8  ;;  %4777 = vmatprep.mubr.bf16.mxu1 %v12268_v8  ;;  %v1358_v38 = vld [vmem:[%s16793_s3 + $0x728] sm:$0xff]  ;;  %v9492_v52 = vcombine.high %v12285_v16, %v12297_v61  ;;  %17131 = vst [vmem:[#allocation47_spill] sm:$0xff] %v12353_v39 }
 0x12b   :  { %17128 = vst [vmem:[#allocation44_spill] sm:$0xff] %v12310_v37  ;;  %v12313_v24 = vadd.f32 %v583_v21, %v11889_v55  ;;  %v585_v29 = vpop.f32.mrb[27].mxu0  ;;  %4326 = vmatmul.mubr.bf16.gmra.mrb[84].mxu0 %v12280_v30  ;;  %4778 = vmatmul.mubr.bf16.gmra.mrb[84].mxu1 %v12280_v30  ;;  %v9494_v18 = vcombine.high %v12302_v25, %v1358_v38 }
 0x12c   :  { %17127 = vst [vmem:[#allocation43_spill] sm:$0xff] %v12290_v57  ;;  %v12320_v58 = vadd.f32 %v585_v29, %v11885_v54  ;;  %4377 = vmatpush1.bf16.msra.mxu0 %v9475_v50  ;;  %4829 = vmatpush1.bf16.msra.mxu1 %v9477_v4  ;;  %v16856_v33 = vmax.f32 %v12290_v57, 0.0  ;;  %v1365_v29 = vld [vmem:[%s16793_s3 + $0x760] sm:$0xff]  ;;  %v1366_v50 = vld [vmem:[%s16793_s3 + $0x768] sm:$0xff]  ;;  %v9493_v21 = vcombine.low %v12302_v25, %v1358_v38  ;;  %v17136_v25 = vmax.f32 %v12310_v37, 0.0 }
 0x12d   :  { %17129 = vst [vmem:[#allocation45_spill] sm:$0xff] %v12313_v24  ;;  %4378 = vmatprep.subr.bf16.mxu0 %v9484_v12  ;;  %4830 = vmatprep.subr.bf16.mxu1 %v9486_v10  ;;  %v12343_v10 = vld [vmem:[%s16793_s3 + $0x748] sm:$0xff]  ;;  %v9491_v12 = vcombine.low %v12285_v16, %v12297_v61  ;;  %v12363_v4 = vadd.f32 %v11938_v17, %v12324_v35  ;;  %v12369_v61 = vpop.f32.mrb[24].mxu1  ;;  %v17137_v38 = vmax.f32 %v12313_v24, 0.0 }
 0x12e   :  { %17130 = vst [vmem:[#allocation46_spill] sm:$0xff] %v12320_v58  ;;  %v17132_v42 = vmax.f32 %v12320_v58, 0.0  ;;  %v12367_v16 = vadd.f32 %v11964_v26, %v12324_v35  ;;  %v9502_v17 = vcombine.high %v12343_v10, %v1366_v50  ;;  %v12382_v26 = vld [vmem:[%s16793_s3 + $0x780] sm:$0xff] }
 0x12f   :  { %17134 = vst [vmem:[#allocation49_spill] sm:$0xff] %v12363_v4  ;;  %v12375_v58 = vpack.c.bf16 %v17137_v38, %v17136_v25  ;;  %v1370_v25 = vld [vmem:[%s16793_s3 + $0x788] sm:$0xff] }
 0x130   :  { %v12359_v53 = vpack.c.bf16 %v17132_v42, %v16856_v33  ;;  %4379 = vmatpush1.bf16.msra.mxu0 %v9483_v5  ;;  %v589_v30 = vpop.f32.mrb[28].mxu0  ;;  %4831 = vmatpush1.bf16.msra.mxu1 %v9485_v59  ;;  %17135 = vst [vmem:[#allocation50_spill] sm:$0xff] %v12367_v16  ;;  %v9500_v59 = vcombine.high %v12333_v14, %v1365_v29  ;;  %v12384_v5 = vpop.f32.mrb[25].mxu1  ;;  %v1374_v38 = vld [vmem:[%s16793_s3 + $0x7a8] sm:$0xff] }
 0x131   :  { %17138 = vst [vmem:[#allocation51_spill] sm:$0xff] %v12375_v58  ;;  %v591_v42 = vpop.f32.mrb[29].mxu0  ;;  %4380 = vmatprep.subr.bf16.mxu0 %v9492_v52  ;;  %4832 = vmatprep.subr.bf16.mxu1 %v9494_v18  ;;  %v9499_v52 = vcombine.low %v12333_v14, %v1365_v29  ;;  %v1373_v18 = vld [vmem:[%s16793_s3 + $0x7a0] sm:$0xff]  ;;  %v12404_v57 = vadd.f32 %v589_v30, %v11889_v55 }
 0x132   :  { %17133 = vst [vmem:[#allocation48_spill] sm:$0xff] %v12359_v53  ;;  %v12387_v33 = vadd.f32 %v591_v42, %v11885_v54  ;;  %v593_v24 = vpop.f32.mrb[30].mxu0  ;;  %4335 = vmatprep.mubr.bf16.mxu0 %v12359_v53  ;;  %4787 = vmatprep.mubr.bf16.mxu1 %v12359_v53  ;;  %v12401_v42 = vpop.f32.mrb[26].mxu1  ;;  %v12413_v29 = vrot.slane %v11878_v34, %v12353_v39  ;;  %v12431_v34 = vld [vmem:[%s16793_s3 + $0x7e0] sm:$0xff] }
 0x133   :  { %17140 = vst [vmem:[#allocation53_spill] sm:$0xff] %v12404_v57  ;;  %v12407_v37 = vadd.f32 %v593_v24, %v11889_v55  ;;  %v595_v14 = vpop.f32.mrb[31].mxu0  ;;  %4336 = vmatmul.mubr.bf16.gmra.mrb[88].mxu0 %v12375_v58  ;;  %4788 = vmatmul.mubr.bf16.gmra.mrb[88].mxu1 %v12375_v58  ;;  %v12415_v53 = vpop.f32.mrb[27].mxu1  ;;  %v9501_v55 = vcombine.low %v12343_v10, %v1366_v50  ;;  %v12426_v58 = vld [vmem:[%s16793_s3 + $0x7c0] sm:$0xff] }
 0x134   :  { %17139 = vst [vmem:[#allocation52_spill] sm:$0xff] %v12387_v33  ;;  %v12418_v8 = vadd.f32 %v595_v14, %v11885_v54  ;;  %4381 = vmatpush1.bf16.msra.mxu0 %v9491_v12  ;;  %4833 = vmatpush1.bf16.msra.mxu1 %v9493_v21  ;;  %v9508_v21 = vcombine.high %v12382_v26, %v1373_v18  ;;  %v16872_v10 = vmax.f32 %v12387_v33, 0.0  ;;  %v1382_v54 = vld [vmem:[%s16793_s3 + $0x7e8] sm:$0xff]  ;;  %v12467_v24 = vpop.f32.mrb[28].mxu1 }
 0x135   :  { %17141 = vst [vmem:[#allocation54_spill] sm:$0xff] %v12407_v37  ;;  %4382 = vmatprep.subr.bf16.mxu0 %v9500_v59  ;;  %4834 = vmatprep.subr.bf16.mxu1 %v9502_v17  ;;  %v9510_v12 = vcombine.high %v1370_v25, %v1374_v38  ;;  %v9507_v14 = vcombine.low %v12382_v26, %v1373_v18  ;;  %v1378_v17 = vld [vmem:[%s16793_s3 + $0x7c8] sm:$0xff]  ;;  %v17146_v18 = vmax.f32 %v12363_v4, 0.0 }
 0x136   :  { %17142 = vst [vmem:[#allocation55_spill] sm:$0xff] %v12418_v8  ;;  %v16871_v50 = vmax.f32 %v12418_v8, 0.0  ;;  %v12441_v30 = vadd.f32 %v11925_v11, %v12413_v29  ;;  %v9509_v39 = vcombine.low %v1370_v25, %v1374_v38  ;;  %v9516_v59 = vcombine.high %v12426_v58, %v12431_v34 }
 0x137   :  { %v12459_v11 = vadd.f32 %v11954_v23, %v12413_v29  ;;  %v17147_v25 = vmax.f32 %v12367_v16, 0.0  ;;  %v17149_v8 = vmax.f32 %v12404_v57, 0.0  ;;  %v12479_v23 = vadd.f32 %v12012_v56, %v12324_v35  ;;  %v1389_v56 = vld [vmem:[%s16793_s3 + $0x820] sm:$0xff] }
 0x138   :  { %17143 = vst [vmem:[#allocation56_spill] sm:$0xff] %v12441_v30  ;;  %v12455_v26 = vpack.c.bf16 %v16871_v50, %v16872_v10  ;;  %4383 = vmatpush1.bf16.msra.mxu0 %v9499_v52  ;;  %4835 = vmatpush1.bf16.msra.mxu1 %v9501_v55  ;;  %v12469_v7 = vpop.f32.mrb[32].mxu0  ;;  %v17150_v50 = vmax.f32 %v12407_v37, 0.0  ;;  %v12483_v52 = vadd.f32 %v12038_v13, %v12324_v35  ;;  %v12488_v55 = vld [vmem:[%s16793_s3 + $0x800] sm:$0xff]  ;;  %v1386_v13 = vld [vmem:[%s16793_s3 + $0x808] sm:$0xff]  ;;  %v17154_v57 = vmax.f32 %v12441_v30, 0.0 }
 0x139   :  { %17145 = vst [vmem:[#allocation58_spill] sm:$0xff] %v12459_v11  ;;  %v12465_v38 = vpack.c.bf16 %v17147_v25, %v17146_v18  ;;  %4384 = vmatprep.subr.bf16.mxu0 %v9508_v21  ;;  %4836 = vmatprep.subr.bf16.mxu1 %v9510_v12  ;;  %17152 = vst [vmem:[#allocation61_spill] sm:$0xff] %v12479_v23  ;;  %v12490_v18 = vpop.f32.mrb[29].mxu1  ;;  %v12492_v25 = vpop.f32.mrb[33].mxu0  ;;  %v1390_v21 = vld [vmem:[%s16793_s3 + $0x828] sm:$0xff]  ;;  %v16886_v16 = vmax.f32 %v12459_v11, 0.0  ;;  %v9515_v4 = vcombine.low %v12426_v58, %v12431_v34 }
 0x13a   :  { %17144 = vst [vmem:[#allocation57_spill] sm:$0xff] %v12455_v26  ;;  %v12475_v10 = vpack.c.bf16 %v17150_v50, %v17149_v8  ;;  %17153 = vst [vmem:[#allocation62_spill] sm:$0xff] %v12483_v52  ;;  %4345 = vmatprep.mubr.bf16.mxu0 %v12455_v26  ;;  %4797 = vmatprep.mubr.bf16.mxu1 %v12455_v26  ;;  %v9518_v8 = vcombine.high %v1378_v17, %v1382_v54  ;;  %v12505_v12 = vpop.f32.mrb[30].mxu1  ;;  %v12507_v50 = vpop.f32.mrb[34].mxu0  ;;  %v17158_v30 = vmax.f32 %v12479_v23, 0.0 }
 0x13b   :  { %17148 = vst [vmem:[#allocation59_spill] sm:$0xff] %v12465_v38  ;;  %v12511_v37 = vpop.f32.mrb[31].mxu1  ;;  %v12513_v33 = vpop.f32.mrb[35].mxu0  ;;  %v9517_v26 = vcombine.low %v1378_v17, %v1382_v54  ;;  %v9524_v58 = vcombine.high %v12488_v55, %v1389_v56  ;;  %v9526_v34 = vcombine.high %v1386_v13, %v1390_v21  ;;  %v9523_v54 = vcombine.low %v12488_v55, %v1389_v56 }
 0x13c   :  { %17151 = vst [vmem:[#allocation60_spill] sm:$0xff] %v12475_v10  ;;  %4346 = vmatmul.mubr.bf16.gmra.mrb[92].mxu0 %v12475_v10  ;;  %4798 = vmatmul.mubr.bf16.gmra.mrb[92].mxu1 %v12475_v10  ;;  %v12527_v10 = vld [vmem:[%s16793_s3 + $0x860] sm:$0xff]  ;;  %v12551_v55 = vadd.f32 %v11999_v47, %v12413_v29  ;;  %v12555_v56 = vadd.f32 %v12028_v6, %v12413_v29  ;;  %v17159_v11 = vmax.f32 %v12483_v52, 0.0 }
 0x13d   :  { %4385 = vmatpush1.bf16.msra.mxu0 %v9507_v14  ;;  %4837 = vmatpush1.bf16.msra.mxu1 %v9509_v39  ;;  %v9525_v14 = vcombine.low %v1386_v13, %v1390_v21  ;;  %v9532_v17 = vcombine.high %v12522_v40, %v12527_v10  ;;  %v1398_v39 = vld [vmem:[%s16793_s3 + $0x868] sm:$0xff]  ;;  %v12559_v21 = vpop.f32.mrb[32].mxu1  ;;  %v12569_v47 = vadd.f32 %v12080_v60, %v12324_v35 }
 0x13e   :  { %4386 = vmatprep.subr.bf16.mxu0 %v9516_v59  ;;  %4388 = vmatprep.mubr.bf16.mxu0 %v12465_v38  ;;  %v1394_v59 = vld [vmem:[%s16793_s3 + $0x848] sm:$0xff]  ;;  %17156 = vst [vmem:[#allocation64_spill] sm:$0xff] %v12551_v55  ;;  %17157 = vst [vmem:[#allocation65_spill] sm:$0xff] %v12555_v56  ;;  %v12573_v6 = vadd.f32 %v12106_v19, %v12324_v35  ;;  %v9531_v31 = vcombine.low %v12522_v40, %v12527_v10 }
 0x13f   :  { %4838 = vmatprep.subr.bf16.mxu1 %v9518_v8  ;;  %4840 = vmatprep.mubr.bf16.mxu1 %v12465_v38  ;;  %v12547_v8 = vpack.c.bf16 %v16886_v16, %v17154_v57  ;;  %v12565_v57 = vpack.c.bf16 %v17159_v11, %v17158_v30  ;;  %17161 = vst [vmem:[#allocation67_spill] sm:$0xff] %v12569_v47  ;;  %v12580_v16 = vpop.f32.mrb[33].mxu1  ;;  %v1405_v11 = vld [vmem:[%s16793_s3 + $0x8a0] sm:$0xff]  ;;  %v1402_v60 = vld [vmem:[%s16793_s3 + $0x888] sm:$0xff]  ;;  %v17164_v38 = vmax.f32 %v12555_v56, 0.0 }
 0x140   :  { %v12557_v13 = vpop.f32.mrb[36].mxu0  ;;  %17162 = vst [vmem:[#allocation68_spill] sm:$0xff] %v12573_v6  ;;  %v9534_v30 = vcombine.high %v1394_v59, %v1398_v39  ;;  %v1406_v19 = vld [vmem:[%s16793_s3 + $0x8a8] sm:$0xff]  ;;  %v9533_v48 = vcombine.low %v1394_v59, %v1398_v39  ;;  %v17170_v56 = vmax.f32 %v12573_v6, 0.0 }
 0x141   :  { %17155 = vst [vmem:[#allocation63_spill] sm:$0xff] %v12547_v8  ;;  %4387 = vmatpush1.bf16.msra.mxu0 %v9515_v4  ;;  %4839 = vmatpush1.bf16.msra.mxu1 %v9517_v26  ;;  %17160 = vst [vmem:[#allocation66_spill] sm:$0xff] %v12565_v57  ;;  %v1401_v4 = vld [vmem:[%s16793_s3 + $0x880] sm:$0xff]  ;;  %v12578_v26 = vpop.f32.mrb[37].mxu0  ;;  %v9542_v40 = vcombine.high %v1402_v60, %v1406_v19  ;;  %v9541_v39 = vcombine.low %v1402_v60, %v1406_v19  ;;  %v17169_v19 = vmax.f32 %v12569_v47, 0.0 }
 0x142   :  { %4469 = vmatprep.subr.bf16.mxu0 %v9524_v58  ;;  %4921 = vmatprep.subr.bf16.mxu1 %v9526_v34  ;;  %v12591_v58 = vpop.f32.mrb[38].mxu0  ;;  %v12593_v34 = vpop.f32.mrb[34].mxu1  ;;  %v9539_v10 = vcombine.low %v1401_v4, %v1405_v11 }
 0x143   :  { %v12597_v52 = vpop.f32.mrb[39].mxu0  ;;  %v12599_v23 = vpop.f32.mrb[35].mxu1 }
 0x144   :  { %4389 = vmatmul.mubr.bf16.vlgmr.msra.gmra.mrb[64].mxu0 %v12547_v8  ;;  %4841 = vmatmul.mubr.bf16.vlgmr.msra.gmra.mrb[64].mxu1 %v12547_v8  ;;  %v12613_v8 = vld [vmem:[%s16793_s3 + $0x8e0] sm:$0xff]  ;;  %v12643_v60 = vpop.f32.mrb[36].mxu1 }
 0x145   :  { %4470 = vmatpush1.bf16.msra.mxu0 %v9523_v54  ;;  %4922 = vmatpush1.bf16.msra.mxu1 %v9525_v14  ;;  %v9540_v14 = vcombine.high %v1401_v4, %v1405_v11  ;;  %v9548_v59 = vcombine.high %v12608_v36, %v12613_v8  ;;  %v17163_v54 = vmax.f32 %v12551_v55, 0.0  ;;  %v12635_v4 = vadd.f32 %v12067_v46, %v12413_v29 }
 0x146   :  { %4471 = vmatprep.subr.bf16.mxu0 %v9532_v17  ;;  %4398 = vmatprep.mubr.bf16.mxu0 %v12565_v57  ;;  %v1414_v17 = vld [vmem:[%s16793_s3 + $0x8e8] sm:$0xff]  ;;  %17168 = vst [vmem:[#allocation72_spill] sm:$0xff] %v12643_v60  ;;  %v12653_v46 = vadd.f32 %v12148_v32, %v12324_v35  ;;  %v9547_v44 = vcombine.low %v12608_v36, %v12613_v8 }
 0x147   :  { %4850 = vmatprep.mubr.bf16.mxu1 %v12565_v57  ;;  %4923 = vmatprep.subr.bf16.mxu1 %v9534_v30  ;;  %v12631_v3 = vpack.c.bf16 %v17164_v38, %v17163_v54  ;;  %17166 = vst [vmem:[#allocation70_spill] sm:$0xff] %v12635_v4  ;;  %v12639_v30 = vadd.f32 %v12096_v20, %v12413_v29  ;;  %v12664_v54 = vpop.f32.mrb[37].mxu1  ;;  %v1418_v32 = vld [vmem:[%s16793_s3 + $0x908] sm:$0xff] }
 0x148   :  { %v12641_v11 = vpop.f32.mrb[40].mxu0  ;;  %v12649_v38 = vpack.c.bf16 %v17170_v56, %v17169_v19  ;;  %17172 = vst [vmem:[#allocation74_spill] sm:$0xff] %v12653_v46  ;;  %v12657_v20 = vadd.f32 %v12174_v43, %v12324_v35  ;;  %v9550_v56 = vcombine.high %v1410_v0, %v1414_v17  ;;  %v1422_v43 = vld [vmem:[%s16793_s3 + $0x928] sm:$0xff]  ;;  %v12677_v19 = vpop.f32.mrb[38].mxu1  ;;  %v9549_v22 = vcombine.low %v1410_v0, %v1414_v17 }
 0x149   :  { %17165 = vst [vmem:[#allocation69_spill] sm:$0xff] %v12631_v3  ;;  %17167 = vst [vmem:[#allocation71_spill] sm:$0xff] %v12639_v30  ;;  %4472 = vmatpush1.bf16.msra.mxu0 %v9531_v31  ;;  %4924 = vmatpush1.bf16.msra.mxu1 %v9533_v48  ;;  %v1417_v48 = vld [vmem:[%s16793_s3 + $0x900] sm:$0xff]  ;;  %v12662_v31 = vpop.f32.mrb[41].mxu0  ;;  %v12683_v47 = vpop.f32.mrb[39].mxu1  ;;  %v9558_v36 = vcombine.high %v1418_v32, %v1422_v43  ;;  %v9557_v8 = vcombine.low %v1418_v32, %v1422_v43  ;;  %v1426_v57 = vld [vmem:[%s16793_s3 + $0x948] sm:$0xff] }
 0x14a   :  { %17171 = vst [vmem:[#allocation73_spill] sm:$0xff] %v12649_v38  ;;  %4473 = vmatprep.subr.bf16.mxu0 %v9540_v14  ;;  %4925 = vmatprep.subr.bf16.mxu1 %v9542_v40  ;;  %17173 = vst [vmem:[#allocation75_spill] sm:$0xff] %v12657_v20  ;;  %v1421_v14 = vld [vmem:[%s16793_s3 + $0x920] sm:$0xff]  ;;  %v12675_v40 = vpop.f32.mrb[42].mxu0  ;;  %v17176_v55 = vmax.f32 %v12639_v30, 0.0  ;;  %v12727_v32 = vpop.f32.mrb[40].mxu1 }
 0x14b   :  { %17174 = vst [vmem:[#allocation76_spill] sm:$0xff] %v12677_v19  ;;  %v12681_v6 = vpop.f32.mrb[43].mxu0  ;;  %v9555_v0 = vcombine.low %v1417_v48, %v1421_v14  ;;  %17180 = vst [vmem:[#allocation80_spill] sm:$0xff] %v12727_v32  ;;  %v17181_v43 = vmax.f32 %v12653_v46, 0.0  ;;  %v17182_v30 = vmax.f32 %v12657_v20, 0.0 }
 0x14c   :  { %4399 = vmatmul.mubr.bf16.gmra.mrb[68].mxu0 %v12631_v3  ;;  %4851 = vmatmul.mubr.bf16.gmra.mrb[68].mxu1 %v12631_v3  ;;  %v12697_v3 = vld [vmem:[%s16793_s3 + $0x960] sm:$0xff] }
 0x14d   :  { %4474 = vmatpush1.bf16.msra.mxu0 %v9539_v10  ;;  %4926 = vmatpush1.bf16.msra.mxu1 %v9541_v39  ;;  %v9556_v39 = vcombine.high %v1417_v48, %v1421_v14  ;;  %v9564_v17 = vcombine.high %v12692_v9, %v12697_v3  ;;  %v17175_v10 = vmax.f32 %v12635_v4, 0.0  ;;  %v12719_v48 = vadd.f32 %v12135_v2, %v12413_v29 }
 0x14e   :  { %4475 = vmatprep.subr.bf16.mxu0 %v9548_v59  ;;  %4408 = vmatprep.mubr.bf16.mxu0 %v12649_v38  ;;  %v1430_v59 = vld [vmem:[%s16793_s3 + $0x968] sm:$0xff]  ;;  %v12737_v2 = vadd.f32 %v12216_v49, %v12324_v35  ;;  %v9563_v32 = vcombine.low %v12692_v9, %v12697_v3 }
 0x14f   :  { %4860 = vmatprep.mubr.bf16.mxu1 %v12649_v38  ;;  %4927 = vmatprep.subr.bf16.mxu1 %v9550_v56  ;;  %v12715_v19 = vpack.c.bf16 %v17176_v55, %v17175_v10  ;;  %17178 = vst [vmem:[#allocation78_spill] sm:$0xff] %v12719_v48  ;;  %v12723_v56 = vadd.f32 %v12164_v1, %v12413_v29  ;;  %v12748_v10 = vpop.f32.mrb[41].mxu1  ;;  %v1434_v49 = vld [vmem:[%s16793_s3 + $0x988] sm:$0xff] }
 0x150   :  { %v12725_v14 = vpop.f32.mrb[44].mxu0  ;;  %v12733_v55 = vpack.c.bf16 %v17182_v30, %v17181_v43  ;;  %17184 = vst [vmem:[#allocation82_spill] sm:$0xff] %v12737_v2  ;;  %17186 = vst [vmem:[#allocation84_spill] sm:$0xff] %v12748_v10  ;;  %v9566_v30 = vcombine.high %v1426_v57, %v1430_v59  ;;  %v12761_v43 = vpop.f32.mrb[42].mxu1  ;;  %v9565_v10 = vcombine.low %v1426_v57, %v1430_v59  ;;  %v1442_v38 = vld [vmem:[%s16793_s3 + $0x9c8] sm:$0xff] }
 0x151   :  { %17177 = vst [vmem:[#allocation77_spill] sm:$0xff] %v12715_v19  ;;  %17179 = vst [vmem:[#allocation79_spill] sm:$0xff] %v12723_v56  ;;  %4476 = vmatpush1.bf16.msra.mxu0 %v9547_v44  ;;  %4928 = vmatpush1.bf16.msra.mxu1 %v9549_v22  ;;  %v12741_v44 = vadd.f32 %v12242_v41, %v12324_v35  ;;  %v1433_v22 = vld [vmem:[%s16793_s3 + $0x980] sm:$0xff]  ;;  %v12746_v1 = vpop.f32.mrb[45].mxu0  ;;  %v1438_v41 = vld [vmem:[%s16793_s3 + $0x9a8] sm:$0xff]  ;;  %v12767_v46 = vpop.f32.mrb[43].mxu1 }
 0x152   :  { %17183 = vst [vmem:[#allocation81_spill] sm:$0xff] %v12733_v55  ;;  %4477 = vmatprep.subr.bf16.mxu0 %v9556_v39  ;;  %4929 = vmatprep.subr.bf16.mxu1 %v9558_v36  ;;  %v1437_v39 = vld [vmem:[%s16793_s3 + $0x9a0] sm:$0xff]  ;;  %v12759_v36 = vpop.f32.mrb[46].mxu0  ;;  %17187 = vst [vmem:[#allocation85_spill] sm:$0xff] %v12761_v43  ;;  %v9574_v9 = vcombine.high %v1434_v49, %v1438_v41  ;;  %v9573_v57 = vcombine.low %v1434_v49, %v1438_v41  ;;  %v17190_v4 = vmax.f32 %v12723_v56, 0.0  ;;  %v12811_v49 = vpop.f32.mrb[44].mxu1 }
 0x153   :  { %17185 = vst [vmem:[#allocation83_spill] sm:$0xff] %v12741_v44  ;;  %v12765_v20 = vpop.f32.mrb[47].mxu0  ;;  %17188 = vst [vmem:[#allocation86_spill] sm:$0xff] %v12767_v46  ;;  %v12776_v43 = vld [vmem:[%s16793_s3 + $0x9c0] sm:$0xff]  ;;  %v9571_v3 = vcombine.low %v1433_v22, %v1437_v39  ;;  %v17195_v41 = vmax.f32 %v12737_v2, 0.0  ;;  %v17196_v56 = vmax.f32 %v12741_v44, 0.0 }
 0x154   :  { %4409 = vmatmul.mubr.bf16.gmra.mrb[72].mxu0 %v12715_v19  ;;  %4861 = vmatmul.mubr.bf16.gmra.mrb[72].mxu1 %v12715_v19  ;;  %v12781_v19 = vld [vmem:[%s16793_s3 + $0x9e0] sm:$0xff]  ;;  %17194 = vst [vmem:[#allocation90_spill] sm:$0xff] %v12811_v49 }
 0x155   :  { %4478 = vmatpush1.bf16.msra.mxu0 %v9555_v0  ;;  %4930 = vmatpush1.bf16.msra.mxu1 %v9557_v8  ;;  %v9572_v8 = vcombine.high %v1433_v22, %v1437_v39  ;;  %v9580_v59 = vcombine.high %v12776_v43, %v12781_v19  ;;  %v17189_v0 = vmax.f32 %v12719_v48, 0.0  ;;  %v12803_v22 = vadd.f32 %v12203_v45, %v12413_v29 }
 0x156   :  { %4479 = vmatprep.subr.bf16.mxu0 %v9564_v17  ;;  %4418 = vmatprep.mubr.bf16.mxu0 %v12733_v55  ;;  %v1446_v17 = vld [vmem:[%s16793_s3 + $0x9e8] sm:$0xff]  ;;  %v12821_v45 = vadd.f32 %v12287_v62, %v12324_v35  ;;  %v9579_v49 = vcombine.low %v12776_v43, %v12781_v19 }
 0x157   :  { %4870 = vmatprep.mubr.bf16.mxu1 %v12733_v55  ;;  %4931 = vmatprep.subr.bf16.mxu1 %v9566_v30  ;;  %v12799_v46 = vpack.c.bf16 %v17190_v4, %v17189_v0  ;;  %17192 = vst [vmem:[#allocation88_spill] sm:$0xff] %v12803_v22  ;;  %v12807_v30 = vadd.f32 %v12232_v28, %v12413_v29  ;;  %v12832_v0 = vpop.f32.mrb[45].mxu1  ;;  %v1450_v62 = vld [vmem:[%s16793_s3 + $0xa08] sm:$0xff] }
 0x158   :  { %v12809_v39 = vpop.f32.mrb[48].mxu0  ;;  %v12817_v4 = vpack.c.bf16 %v17196_v56, %v17195_v41  ;;  %17198 = vst [vmem:[#allocation92_spill] sm:$0xff] %v12821_v45  ;;  %v12825_v28 = vadd.f32 %v12317_v27, %v12324_v35  ;;  %17200 = vst [vmem:[#allocation94_spill] sm:$0xff] %v12832_v0  ;;  %v9582_v56 = vcombine.high %v1442_v38, %v1446_v17  ;;  %v1454_v27 = vld [vmem:[%s16793_s3 + $0xa28] sm:$0xff]  ;;  %v12845_v41 = vpop.f32.mrb[46].mxu1 }
 0x159   :  { %17191 = vst [vmem:[#allocation87_spill] sm:$0xff] %v12799_v46  ;;  %17193 = vst [vmem:[#allocation89_spill] sm:$0xff] %v12807_v30  ;;  %4480 = vmatpush1.bf16.msra.mxu0 %v9563_v32  ;;  %4932 = vmatpush1.bf16.msra.mxu1 %v9565_v10  ;;  %v1449_v32 = vld [vmem:[%s16793_s3 + $0xa00] sm:$0xff]  ;;  %v12830_v10 = vpop.f32.mrb[49].mxu0  ;;  %v12851_v2 = vpop.f32.mrb[47].mxu1  ;;  %v9581_v0 = vcombine.low %v1442_v38, %v1446_v17  ;;  %v9590_v19 = vcombine.high %v1450_v62, %v1454_v27  ;;  %v1458_v55 = vld [vmem:[%s16793_s3 + $0xa48] sm:$0xff] }
 0x15a   :  { %17197 = vst [vmem:[#allocation91_spill] sm:$0xff] %v12817_v4  ;;  %4481 = vmatprep.subr.bf16.mxu0 %v9572_v8  ;;  %4933 = vmatprep.subr.bf16.mxu1 %v9574_v9  ;;  %17199 = vst [vmem:[#allocation93_spill] sm:$0xff] %v12825_v28  ;;  %v1453_v8 = vld [vmem:[%s16793_s3 + $0xa20] sm:$0xff]  ;;  %v12843_v9 = vpop.f32.mrb[50].mxu0  ;;  %v9589_v43 = vcombine.low %v1450_v62, %v1454_v27  ;;  %v17204_v48 = vmax.f32 %v12807_v30, 0.0  ;;  %v12895_v62 = vpop.f32.mrb[48].mxu1 }
 0x15b   :  { %17201 = vst [vmem:[#allocation95_spill] sm:$0xff] %v12845_v41  ;;  %v12849_v44 = vpop.f32.mrb[51].mxu0  ;;  %17202 = vst [vmem:[#allocation96_spill] sm:$0xff] %v12851_v2  ;;  %v12860_v41 = vld [vmem:[%s16793_s3 + $0xa40] sm:$0xff]  ;;  %v9587_v38 = vcombine.low %v1449_v32, %v1453_v8  ;;  %v17209_v27 = vmax.f32 %v12821_v45, 0.0  ;;  %v17210_v30 = vmax.f32 %v12825_v28, 0.0 }
 0x15c   :  { %4419 = vmatmul.mubr.bf16.gmra.mrb[76].mxu0 %v12799_v46  ;;  %4871 = vmatmul.mubr.bf16.gmra.mrb[76].mxu1 %v12799_v46  ;;  %v12865_v46 = vld [vmem:[%s16793_s3 + $0xa60] sm:$0xff]  ;;  %17208 = vst [vmem:[#allocation100_spill] sm:$0xff] %v12895_v62 }
 0x15d   :  { %4482 = vmatpush1.bf16.msra.mxu0 %v9571_v3  ;;  %4934 = vmatpush1.bf16.msra.mxu1 %v9573_v57  ;;  %v9588_v57 = vcombine.high %v1449_v32, %v1453_v8  ;;  %v9596_v17 = vcombine.high %v12860_v41, %v12865_v46  ;;  %v17203_v3 = vmax.f32 %v12803_v22, 0.0  ;;  %v12887_v32 = vadd.f32 %v12274_v63, %v12413_v29 }
 0x15e   :  { %4483 = vmatprep.subr.bf16.mxu0 %v9580_v59  ;;  %4428 = vmatprep.mubr.bf16.mxu0 %v12817_v4  ;;  %v1462_v59 = vld [vmem:[%s16793_s3 + $0xa68] sm:$0xff]  ;;  %v12905_v63 = vadd.f32 %v12384_v5, %v12324_v35  ;;  %v9595_v62 = vcombine.low %v12860_v41, %v12865_v46 }
 0x15f   :  { %4880 = vmatprep.mubr.bf16.mxu1 %v12817_v4  ;;  %4935 = vmatprep.subr.bf16.mxu1 %v9582_v56  ;;  %v12883_v2 = vpack.c.bf16 %v17204_v48, %v17203_v3  ;;  %17206 = vst [vmem:[#allocation98_spill] sm:$0xff] %v12887_v32  ;;  %v12891_v56 = vadd.f32 %v12307_v15, %v12413_v29  ;;  %v12918_v3 = vpop.f32.mrb[49].mxu1  ;;  %v1466_v5 = vld [vmem:[%s16793_s3 + $0xa88] sm:$0xff]  ;;  %v17217_v22 = vmax.f32 %v12887_v32, 0.0 }
 0x160   :  { %v12893_v8 = vpop.f32.mrb[52].mxu0  ;;  %v12901_v48 = vpack.c.bf16 %v17210_v30, %v17209_v27  ;;  %17212 = vst [vmem:[#allocation102_spill] sm:$0xff] %v12905_v63  ;;  %v12909_v15 = vadd.f32 %v12415_v53, %v12324_v35  ;;  %17214 = vst [vmem:[#allocation104_spill] sm:$0xff] %v12918_v3  ;;  %v9598_v30 = vcombine.high %v1458_v55, %v1462_v59  ;;  %v1470_v53 = vld [vmem:[%s16793_s3 + $0xaa8] sm:$0xff]  ;;  %v12931_v27 = vpop.f32.mrb[50].mxu1 }
 0x161   :  { %17205 = vst [vmem:[#allocation97_spill] sm:$0xff] %v12883_v2  ;;  %17207 = vst [vmem:[#allocation99_spill] sm:$0xff] %v12891_v56  ;;  %4484 = vmatpush1.bf16.msra.mxu0 %v9579_v49  ;;  %4936 = vmatpush1.bf16.msra.mxu1 %v9581_v0  ;;  %v12914_v49 = vld [vmem:[%s16793_s3 + $0xa80] sm:$0xff]  ;;  %v12916_v0 = vpop.f32.mrb[53].mxu0  ;;  %v12937_v45 = vpop.f32.mrb[51].mxu1  ;;  %v16944_v4 = vmax.f32 %v12891_v56, 0.0  ;;  %v9597_v3 = vcombine.low %v1458_v55, %v1462_v59  ;;  %v9606_v55 = vcombine.high %v1466_v5, %v1470_v53 }
 0x162   :  { %17211 = vst [vmem:[#allocation101_spill] sm:$0xff] %v12901_v48  ;;  %4485 = vmatprep.subr.bf16.mxu0 %v9588_v57  ;;  %4937 = vmatprep.subr.bf16.mxu1 %v9590_v19  ;;  %17213 = vst [vmem:[#allocation103_spill] sm:$0xff] %v12909_v15  ;;  %v1469_v57 = vld [vmem:[%s16793_s3 + $0xaa0] sm:$0xff]  ;;  %v12929_v19 = vpop.f32.mrb[54].mxu0  ;;  %v17223_v56 = vmax.f32 %v12909_v15, 0.0  ;;  %v1490_v32 = vld [vmem:[%s16793_s3 + $0xb48] sm:$0xff] }
 0x163   :  { %17215 = vst [vmem:[#allocation105_spill] sm:$0xff] %v12931_v27  ;;  %v12935_v28 = vpop.f32.mrb[55].mxu0  ;;  %17216 = vst [vmem:[#allocation106_spill] sm:$0xff] %v12937_v45  ;;  %v12946_v27 = vld [vmem:[%s16793_s3 + $0xac0] sm:$0xff]  ;;  %v9604_v46 = vcombine.high %v12914_v49, %v1469_v57  ;;  %v9603_v41 = vcombine.low %v12914_v49, %v1469_v57  ;;  %v12975_v49 = vadd.f32 %v12369_v61, %v12413_v29 }
 0x164   :  { %4429 = vmatmul.mubr.bf16.gmra.mrb[80].mxu0 %v12883_v2  ;;  %4881 = vmatmul.mubr.bf16.gmra.mrb[80].mxu1 %v12883_v2  ;;  %v12951_v2 = vld [vmem:[%s16793_s3 + $0xae0] sm:$0xff]  ;;  %v12993_v61 = vadd.f32 %v12490_v18, %v12324_v35 }
 0x165   :  { %4486 = vmatpush1.bf16.msra.mxu0 %v9587_v38  ;;  %4938 = vmatpush1.bf16.msra.mxu1 %v9589_v43  ;;  %v9605_v43 = vcombine.low %v1466_v5, %v1470_v53  ;;  %v9612_v59 = vcombine.high %v12946_v27, %v12951_v2  ;;  %v1478_v38 = vld [vmem:[%s16793_s3 + $0xae8] sm:$0xff]  ;;  %17219 = vst [vmem:[#allocation108_spill] sm:$0xff] %v12975_v49  ;;  %v12983_v5 = vpop.f32.mrb[52].mxu1  ;;  %v17222_v53 = vmax.f32 %v12905_v63, 0.0 }
 0x166   :  { %4487 = vmatprep.subr.bf16.mxu0 %v9596_v17  ;;  %4438 = vmatprep.mubr.bf16.mxu0 %v12901_v48  ;;  %v1474_v17 = vld [vmem:[%s16793_s3 + $0xac8] sm:$0xff]  ;;  %17221 = vst [vmem:[#allocation110_spill] sm:$0xff] %v12983_v5  ;;  %17225 = vst [vmem:[#allocation112_spill] sm:$0xff] %v12993_v61  ;;  %v13012_v18 = vpop.f32.mrb[53].mxu1 }
 0x167   :  { %4890 = vmatprep.mubr.bf16.mxu1 %v12901_v48  ;;  %4939 = vmatprep.subr.bf16.mxu1 %v9598_v30  ;;  %v12971_v48 = vpack.c.bf16 %v16944_v4, %v17217_v22  ;;  %v12979_v30 = vadd.f32 %v12401_v42, %v12413_v29  ;;  %v12989_v22 = vpack.c.bf16 %v17223_v56, %v17222_v53  ;;  %v13007_v56 = vld [vmem:[%s16793_s3 + $0xb20] sm:$0xff]  ;;  %v13022_v4 = vpop.f32.mrb[54].mxu1 }
 0x168   :  { %v12981_v57 = vpop.f32.mrb[56].mxu0  ;;  %v12997_v42 = vadd.f32 %v12511_v37, %v12324_v35  ;;  %17227 = vst [vmem:[#allocation114_spill] sm:$0xff] %v13012_v18  ;;  %v1482_v37 = vld [vmem:[%s16793_s3 + $0xb08] sm:$0xff]  ;;  %17228 = vst [vmem:[#allocation115_spill] sm:$0xff] %v13022_v4  ;;  %v13030_v63 = vpop.f32.mrb[55].mxu1  ;;  %v9613_v18 = vcombine.low %v1474_v17, %v1478_v38 }
 0x169   :  { %17218 = vst [vmem:[#allocation107_spill] sm:$0xff] %v12971_v48  ;;  %17220 = vst [vmem:[#allocation109_spill] sm:$0xff] %v12979_v30  ;;  %4488 = vmatpush1.bf16.msra.mxu0 %v9595_v62  ;;  %4940 = vmatpush1.bf16.msra.mxu1 %v9597_v3  ;;  %v13002_v62 = vld [vmem:[%s16793_s3 + $0xb00] sm:$0xff]  ;;  %v1486_v35 = vld [vmem:[%s16793_s3 + $0xb28] sm:$0xff]  ;;  %v9611_v3 = vcombine.low %v12946_v27, %v12951_v2 }
 0x16a   :  { %17224 = vst [vmem:[#allocation111_spill] sm:$0xff] %v12989_v22  ;;  %4489 = vmatprep.subr.bf16.mxu0 %v9604_v46  ;;  %4941 = vmatprep.subr.bf16.mxu1 %v9606_v55  ;;  %17226 = vst [vmem:[#allocation113_spill] sm:$0xff] %v12997_v42  ;;  %v13010_v46 = vpop.f32.mrb[57].mxu0  ;;  %v9614_v55 = vcombine.high %v1474_v17, %v1478_v38  ;;  %v9620_v4 = vcombine.high %v13002_v62, %v13007_v56  ;;  %v13044_v2 = vld [vmem:[%s16793_s3 + $0xb60] sm:$0xff]  ;;  %v17230_v17 = vsub.s32 5, %v11870_v51  ;;  %v13087_v45 = vpop.f32.mrb[56].mxu1 }
 0x16b   :  { %v13020_v53 = vpop.f32.mrb[58].mxu0  ;;  %17229 = vst [vmem:[#allocation116_spill] sm:$0xff] %v13030_v63  ;;  %v9621_v27 = vcombine.low %v1482_v37, %v1486_v35  ;;  %v1494_v63 = vld [vmem:[%s16793_s3 + $0xb68] sm:$0xff]  ;;  %17236 = vst [vmem:[#allocation120_spill] sm:$0xff] %v13087_v45 }
 0x16c   :  { %4439 = vmatmul.mubr.bf16.gmra.mrb[84].mxu0 %v12971_v48  ;;  %4891 = vmatmul.mubr.bf16.gmra.mrb[84].mxu1 %v12971_v48  ;;  %v13028_v15 = vpop.f32.mrb[59].mxu0  ;;  %v13039_v48 = vld [vmem:[%s16793_s3 + $0xb40] sm:$0xff]  ;;  %v9629_v60 = vcombine.low %v1490_v32, %v1494_v63 }
 0x16d   :  { %4490 = vmatpush1.bf16.msra.mxu0 %v9603_v41  ;;  %4942 = vmatpush1.bf16.msra.mxu1 %v9605_v43  ;;  %v9622_v41 = vcombine.high %v1482_v37, %v1486_v35  ;;  %v13052_v43 = vld [vmem:[%s16794_s2] sm:$0xff]  ;;  %v9628_v38 = vcombine.high %v13039_v48, %v13044_v2  ;;  %v9627_v37 = vcombine.low %v13039_v48, %v13044_v2 }
 0x16e   :  { %4491 = vmatprep.subr.bf16.mxu0 %v9612_v59  ;;  %4448 = vmatprep.mubr.bf16.mxu0 %v12989_v22  ;;  %v13057_v5 = vrot.slane %v13052_v43, %v17230_v17  ;;  %v9619_v59 = vcombine.low %v13002_v62, %v13007_v56  ;;  %v17231_v17 = vmax.f32 %v12975_v49, 0.0  ;;  %v13078_v62 = vadd.f32 %v12467_v24, %v12413_v29  ;;  %v1505_v48 = vld [vmem:[%s16793_s3 + $0xbc0] sm:$0xff] }
 0x16f   :  { %4900 = vmatprep.mubr.bf16.mxu1 %v12989_v22  ;;  %4943 = vmatprep.subr.bf16.mxu1 %v9614_v55  ;;  %v17232_v22 = vmax.f32 %v12979_v30, 0.0  ;;  %v13082_v56 = vadd.f32 %v12505_v12, %v12413_v29  ;;  %v17237_v30 = vmax.f32 %v12993_v61, 0.0  ;;  %v1497_v12 = vld [vmem:[%s16793_s3 + $0xb80] sm:$0xff] }
 0x170   :  { %17234 = vst [vmem:[#allocation118_spill] sm:$0xff] %v13078_v62  ;;  %v13085_v35 = vpop.f32.mrb[60].mxu0  ;;  %v13097_v29 = vadd.f32 %v12492_v25, %v13057_v5  ;;  %v13101_v24 = vadd.f32 %v12513_v33, %v13057_v5  ;;  %v1498_v25 = vld [vmem:[%s16793_s3 + $0xb88] sm:$0xff]  ;;  %v1509_v2 = vld [vmem:[%s16793_s3 + $0xbe0] sm:$0xff]  ;;  %v17246_v49 = vmax.f32 %v13078_v62, 0.0 }
 0x171   :  { %v13074_v55 = vpack.c.bf16 %v17232_v22, %v17231_v17  ;;  %17235 = vst [vmem:[#allocation119_spill] sm:$0xff] %v13082_v56  ;;  %4492 = vmatpush1.bf16.msra.mxu0 %v9611_v3  ;;  %4944 = vmatpush1.bf16.msra.mxu1 %v9613_v18  ;;  %v17238_v22 = vmax.f32 %v12997_v42, 0.0  ;;  %v13106_v3 = vpop.f32.mrb[61].mxu0  ;;  %v13108_v18 = vpop.f32.mrb[57].mxu1  ;;  %v1502_v33 = vld [vmem:[%s16793_s3 + $0xba8] sm:$0xff] }
 0x172   :  { %4493 = vmatprep.subr.bf16.mxu0 %v9620_v4  ;;  %4945 = vmatprep.subr.bf16.mxu1 %v9622_v41  ;;  %17240 = vst [vmem:[#allocation122_spill] sm:$0xff] %v13097_v29  ;;  %17241 = vst [vmem:[#allocation123_spill] sm:$0xff] %v13101_v24  ;;  %v1501_v4 = vld [vmem:[%s16793_s3 + $0xba0] sm:$0xff]  ;;  %v13119_v41 = vpop.f32.mrb[62].mxu0  ;;  %v9638_v45 = vcombine.high %v1498_v25, %v1502_v33 }
 0x173   :  { %17233 = vst [vmem:[#allocation117_spill] sm:$0xff] %v13074_v55  ;;  %v13093_v17 = vpack.c.bf16 %v17238_v22, %v17237_v30  ;;  %17242 = vst [vmem:[#allocation124_spill] sm:$0xff] %v13108_v18  ;;  %v9630_v30 = vcombine.high %v1490_v32, %v1494_v63  ;;  %v13121_v22 = vpop.f32.mrb[58].mxu1  ;;  %v13127_v42 = vpop.f32.mrb[63].mxu0  ;;  %v17245_v18 = vsub.s32 4, %v11870_v51  ;;  %v9635_v32 = vcombine.low %v1497_v12, %v1501_v4 }
 0x174   :  { %17243 = vst [vmem:[#allocation125_spill] sm:$0xff] %v13121_v22  ;;  %4449 = vmatmul.mubr.bf16.gmra.mrb[88].mxu0 %v13074_v55  ;;  %4901 = vmatmul.mubr.bf16.gmra.mrb[88].mxu1 %v13074_v55  ;;  %v13129_v61 = vpop.f32.mrb[59].mxu1  ;;  %v9637_v63 = vcombine.low %v1498_v25, %v1502_v33  ;;  %v1506_v55 = vld [vmem:[%s16793_s3 + $0xbc8] sm:$0xff]  ;;  %v17251_v25 = vmax.f32 %v13097_v29, 0.0  ;;  %v17252_v33 = vmax.f32 %v13101_v24, 0.0  ;;  %v9643_v24 = vcombine.low %v1505_v48, %v1509_v2 }
 0x175   :  { %17239 = vst [vmem:[#allocation121_spill] sm:$0xff] %v13093_v17  ;;  %17244 = vst [vmem:[#allocation126_spill] sm:$0xff] %v13129_v61  ;;  %4494 = vmatpush1.bf16.msra.mxu0 %v9619_v59  ;;  %4946 = vmatpush1.bf16.msra.mxu1 %v9621_v27  ;;  %v13136_v22 = vrot.slane %v13052_v43, %v17245_v18  ;;  %v9636_v59 = vcombine.high %v1497_v12, %v1501_v4  ;;  %v17247_v27 = vmax.f32 %v13082_v56, 0.0  ;;  %v13168_v4 = vpop.f32.mrb[60].mxu1  ;;  %v1521_v56 = vld [vmem:[%s16793_s3 + $0xc40] sm:$0xff] }
 0x176   :  { %4495 = vmatprep.subr.bf16.mxu0 %v9628_v38  ;;  %4458 = vmatprep.mubr.bf16.mxu0 %v13093_v17  ;;  %v9644_v18 = vcombine.high %v1505_v48, %v1509_v2  ;;  %v1510_v38 = vld [vmem:[%s16793_s3 + $0xbe8] sm:$0xff]  ;;  %v13174_v62 = vpack.c.bf16 %v17252_v33, %v17251_v25 }
 0x177   :  { %4910 = vmatprep.mubr.bf16.mxu1 %v13093_v17  ;;  %4947 = vmatprep.subr.bf16.mxu1 %v9630_v30  ;;  %v13158_v61 = vpack.c.bf16 %v17247_v27, %v17246_v49  ;;  %v13162_v30 = vadd.f32 %v12469_v7, %v13136_v22  ;;  %v13166_v12 = vadd.f32 %v12507_v50, %v13136_v22  ;;  %v13187_v49 = vpop.f32.mrb[61].mxu1  ;;  %v1517_v27 = vld [vmem:[%s16793_s3 + $0xc20] sm:$0xff] }
 0x178   :  { %v13178_v7 = vadd.f32 %v12578_v26, %v13057_v5  ;;  %v13182_v50 = vadd.f32 %v12597_v52, %v13057_v5  ;;  %v1514_v26 = vld [vmem:[%s16793_s3 + $0xc08] sm:$0xff]  ;;  %v9645_v29 = vcombine.low %v1506_v55, %v1510_v38  ;;  %v1525_v17 = vld [vmem:[%s16793_s3 + $0xc60] sm:$0xff] }
 0x179   :  { %17248 = vst [vmem:[#allocation127_spill] sm:$0xff] %v13158_v61  ;;  %17249 = vst [vmem:[#allocation128_spill] sm:$0xff] %v13162_v30  ;;  %4496 = vmatpush1.bf16.msra.mxu0 %v9627_v37  ;;  %4948 = vmatpush1.bf16.msra.mxu1 %v9629_v60  ;;  %v1513_v60 = vld [vmem:[%s16793_s3 + $0xc00] sm:$0xff]  ;;  %v9646_v37 = vcombine.high %v1506_v55, %v1510_v38  ;;  %v1518_v52 = vld [vmem:[%s16793_s3 + $0xc28] sm:$0xff]  ;;  %v9660_v2 = vcombine.high %v1521_v56, %v1525_v17  ;;  %v17255_v38 = vmax.f32 %v13162_v30, 0.0 }
 0x17a   :  { %17250 = vst [vmem:[#allocation129_spill] sm:$0xff] %v13166_v12  ;;  %4497 = vmatprep.subr.bf16.mxu0 %v9636_v59  ;;  %4949 = vmatprep.subr.bf16.mxu1 %v9638_v45  ;;  %17253 = vst [vmem:[#allocation130_spill] sm:$0xff] %v13178_v7  ;;  %v13198_v45 = vpop.f32.mrb[62].mxu1  ;;  %v9652_v33 = vcombine.high %v1513_v60, %v1517_v27  ;;  %v9651_v55 = vcombine.low %v1513_v60, %v1517_v27  ;;  %v17256_v25 = vmax.f32 %v13166_v12, 0.0  ;;  %v14778_v12 = vld [vmem:[%s16793_s3 + $0xe38] sm:$0xff] }
 0x17b   :  { %17254 = vst [vmem:[#allocation131_spill] sm:$0xff] %v13182_v50  ;;  %v13202_v59 = vpop.f32.mrb[63].mxu1  ;;  %v9653_v48 = vcombine.low %v1514_v26, %v1518_v52  ;;  %v13234_v60 = vadd.f32 %v12591_v58, %v13136_v22  ;;  %v17259_v27 = vmax.f32 %v13178_v7, 0.0  ;;  %v1529_v58 = vld [vmem:[%s16793_s3 + $0xc80] sm:$0xff] }
 0x17c   :  { %4459 = vmatmul.mubr.bf16.gmra.mrb[92].mxu0 %v13158_v61  ;;  %4911 = vmatmul.mubr.bf16.gmra.mrb[92].mxu1 %v13158_v61  ;;  %v13226_v61 = vpack.c.bf16 %v17256_v25, %v17255_v38  ;;  %v13244_v25 = vadd.f32 %v12662_v31, %v13057_v5  ;;  %v1534_v31 = vld [vmem:[%s16793_s3 + $0xca8] sm:$0xff]  ;;  %v9659_v38 = vcombine.low %v1521_v56, %v1525_v17 }
 0x17d   :  { %4498 = vmatpush1.bf16.msra.mxu0 %v9635_v32  ;;  %4950 = vmatpush1.bf16.msra.mxu1 %v9637_v63  ;;  %v9654_v32 = vcombine.high %v1514_v26, %v1518_v52  ;;  %v1522_v63 = vld [vmem:[%s16793_s3 + $0xc48] sm:$0xff]  ;;  %17258 = vst [vmem:[#allocation133_spill] sm:$0xff] %v13234_v60  ;;  %v17260_v26 = vmax.f32 %v13182_v50, 0.0  ;;  %v1541_v50 = vld [vmem:[%s16793_s3 + $0xce0] sm:$0xff] }
 0x17e   :  { %4499 = vmatprep.subr.bf16.mxu0 %v9644_v18  ;;  %4501 = vmatprep.mubr.bf16.mxu0 %v13174_v62  ;;  %v1526_v18 = vld [vmem:[%s16793_s3 + $0xc68] sm:$0xff]  ;;  %17261 = vst [vmem:[#allocation134_spill] sm:$0xff] %v13244_v25 }
 0x17f   :  { %4951 = vmatprep.subr.bf16.mxu1 %v9646_v37  ;;  %4953 = vmatprep.mubr.bf16.mxu1 %v13174_v62  ;;  %v13230_v37 = vadd.f32 %v12557_v13, %v13136_v22  ;;  %v13240_v52 = vpack.c.bf16 %v17260_v26, %v17259_v27  ;;  %v13248_v13 = vadd.f32 %v12681_v6, %v13057_v5  ;;  %v1537_v26 = vld [vmem:[%s16793_s3 + $0xcc0] sm:$0xff]  ;;  %v17264_v6 = vmax.f32 %v13234_v60, 0.0 }
 0x180   :  { %v9661_v27 = vcombine.low %v1522_v63, %v1526_v18 }
 0x181   :  { %17257 = vst [vmem:[#allocation132_spill] sm:$0xff] %v13230_v37  ;;  %4500 = vmatpush1.bf16.msra.mxu0 %v9643_v24  ;;  %4952 = vmatpush1.bf16.msra.mxu1 %v9645_v29  ;;  %17262 = vst [vmem:[#allocation135_spill] sm:$0xff] %v13248_v13  ;;  %v9662_v29 = vcombine.high %v1522_v63, %v1526_v18  ;;  %v1533_v24 = vld [vmem:[%s16793_s3 + $0xca0] sm:$0xff]  ;;  %v1538_v63 = vld [vmem:[%s16793_s3 + $0xcc8] sm:$0xff]  ;;  %v17263_v18 = vmax.f32 %v13230_v37, 0.0 }
 0x182   :  { %4582 = vmatprep.subr.bf16.mxu0 %v9652_v33  ;;  %5034 = vmatprep.subr.bf16.mxu1 %v9654_v32  ;;  %v1530_v33 = vld [vmem:[%s16793_s3 + $0xc88] sm:$0xff]  ;;  %v9668_v32 = vcombine.high %v1529_v58, %v1533_v24  ;;  %v9667_v56 = vcombine.low %v1529_v58, %v1533_v24  ;;  %v13294_v58 = vadd.f32 %v12675_v40, %v13136_v22  ;;  %v17267_v24 = vmax.f32 %v13244_v25, 0.0  ;;  %v1545_v40 = vld [vmem:[%s16793_s3 + $0xd00] sm:$0xff] }
 0x183   :  { %v9669_v17 = vcombine.low %v1530_v33, %v1534_v31  ;;  %v13286_v7 = vpack.c.bf16 %v17264_v6, %v17263_v18  ;;  %v13304_v6 = vadd.f32 %v12746_v1, %v13057_v5  ;;  %v1550_v1 = vld [vmem:[%s16793_s3 + $0xd28] sm:$0xff]  ;;  %v9675_v18 = vcombine.low %v1537_v26, %v1541_v50 }
 0x184   :  { %4502 = vmatmul.mubr.bf16.vlgmr.msra.gmra.mrb[64].mxu0 %v13226_v61  ;;  %4954 = vmatmul.mubr.bf16.vlgmr.msra.gmra.mrb[64].mxu1 %v13226_v61  ;;  %17266 = vst [vmem:[#allocation137_spill] sm:$0xff] %v13294_v58  ;;  %v17390_v37 = vld [vmem:[#allocation120_spill] sm:$0xff] }
 0x185   :  { %4583 = vmatpush1.bf16.msra.mxu0 %v9651_v55  ;;  %5035 = vmatpush1.bf16.msra.mxu1 %v9653_v48  ;;  %v9670_v55 = vcombine.high %v1530_v33, %v1534_v31  ;;  %v9676_v48 = vcombine.high %v1537_v26, %v1541_v50  ;;  %v17268_v33 = vmax.f32 %v13248_v13, 0.0  ;;  %17269 = vst [vmem:[#allocation138_spill] sm:$0xff] %v13304_v6  ;;  %v1557_v13 = vld [vmem:[%s16793_s3 + $0xd60] sm:$0xff] }
 0x186   :  { %4584 = vmatprep.subr.bf16.mxu0 %v9660_v2  ;;  %4511 = vmatprep.mubr.bf16.mxu0 %v13240_v52  ;;  %v1542_v2 = vld [vmem:[%s16793_s3 + $0xce8] sm:$0xff] }
 0x187   :  { %4963 = vmatprep.mubr.bf16.mxu1 %v13240_v52  ;;  %5036 = vmatprep.subr.bf16.mxu1 %v9662_v29  ;;  %v13290_v29 = vadd.f32 %v12641_v11, %v13136_v22  ;;  %v13300_v31 = vpack.c.bf16 %v17268_v33, %v17267_v24  ;;  %v13308_v11 = vadd.f32 %v12765_v20, %v13057_v5  ;;  %v1553_v33 = vld [vmem:[%s16793_s3 + $0xd40] sm:$0xff]  ;;  %v17272_v20 = vmax.f32 %v13294_v58, 0.0 }
 0x188   :  { %v9677_v24 = vcombine.low %v1538_v63, %v1542_v2 }
 0x189   :  { %17265 = vst [vmem:[#allocation136_spill] sm:$0xff] %v13290_v29  ;;  %4585 = vmatpush1.bf16.msra.mxu0 %v9659_v38  ;;  %5037 = vmatpush1.bf16.msra.mxu1 %v9661_v27  ;;  %17270 = vst [vmem:[#allocation139_spill] sm:$0xff] %v13308_v11  ;;  %v9678_v38 = vcombine.high %v1538_v63, %v1542_v2  ;;  %v1549_v27 = vld [vmem:[%s16793_s3 + $0xd20] sm:$0xff]  ;;  %v1554_v63 = vld [vmem:[%s16793_s3 + $0xd48] sm:$0xff]  ;;  %v17271_v2 = vmax.f32 %v13290_v29, 0.0 }
 0x18a   :  { %4586 = vmatprep.subr.bf16.mxu0 %v9668_v32  ;;  %5038 = vmatprep.subr.bf16.mxu1 %v9670_v55  ;;  %v1546_v32 = vld [vmem:[%s16793_s3 + $0xd08] sm:$0xff]  ;;  %v9684_v55 = vcombine.high %v1545_v40, %v1549_v27  ;;  %v9683_v50 = vcombine.low %v1545_v40, %v1549_v27  ;;  %v13354_v40 = vadd.f32 %v12759_v36, %v13136_v22  ;;  %v17275_v27 = vmax.f32 %v13304_v6, 0.0  ;;  %v1561_v36 = vld [vmem:[%s16793_s3 + $0xd80] sm:$0xff] }
 0x18b   :  { %v9685_v26 = vcombine.low %v1546_v32, %v1550_v1  ;;  %v13346_v25 = vpack.c.bf16 %v17272_v20, %v17271_v2  ;;  %v13364_v20 = vadd.f32 %v12830_v10, %v13057_v5  ;;  %v1566_v10 = vld [vmem:[%s16793_s3 + $0xda8] sm:$0xff]  ;;  %v9691_v2 = vcombine.low %v1553_v33, %v1557_v13  ;;  %v17348_v29 = vld [vmem:[#allocation90_spill] sm:$0xff] }
 0x18c   :  { %4512 = vmatmul.mubr.bf16.gmra.mrb[68].mxu0 %v13286_v7  ;;  %4964 = vmatmul.mubr.bf16.gmra.mrb[68].mxu1 %v13286_v7  ;;  %17274 = vst [vmem:[#allocation141_spill] sm:$0xff] %v13354_v40 }
 0x18d   :  { %4587 = vmatpush1.bf16.msra.mxu0 %v9667_v56  ;;  %5039 = vmatpush1.bf16.msra.mxu1 %v9669_v17  ;;  %v9686_v56 = vcombine.high %v1546_v32, %v1550_v1  ;;  %v9692_v17 = vcombine.high %v1553_v33, %v1557_v13  ;;  %v17276_v32 = vmax.f32 %v13308_v11, 0.0  ;;  %17277 = vst [vmem:[#allocation142_spill] sm:$0xff] %v13364_v20  ;;  %v1573_v11 = vld [vmem:[%s16793_s3 + $0xde0] sm:$0xff] }
 0x18e   :  { %4588 = vmatprep.subr.bf16.mxu0 %v9676_v48  ;;  %4521 = vmatprep.mubr.bf16.mxu0 %v13300_v31  ;;  %v1558_v48 = vld [vmem:[%s16793_s3 + $0xd68] sm:$0xff] }
 0x18f   :  { %4973 = vmatprep.mubr.bf16.mxu1 %v13300_v31  ;;  %5040 = vmatprep.subr.bf16.mxu1 %v9678_v38  ;;  %v13350_v38 = vadd.f32 %v12725_v14, %v13136_v22  ;;  %v13360_v1 = vpack.c.bf16 %v17276_v32, %v17275_v27  ;;  %v13368_v14 = vadd.f32 %v12849_v44, %v13057_v5  ;;  %v1569_v32 = vld [vmem:[%s16793_s3 + $0xdc0] sm:$0xff]  ;;  %v17280_v44 = vmax.f32 %v13354_v40, 0.0 }
 0x190   :  { %v9693_v27 = vcombine.low %v1554_v63, %v1558_v48 }
 0x191   :  { %17273 = vst [vmem:[#allocation140_spill] sm:$0xff] %v13350_v38  ;;  %4589 = vmatpush1.bf16.msra.mxu0 %v9675_v18  ;;  %5041 = vmatpush1.bf16.msra.mxu1 %v9677_v24  ;;  %17278 = vst [vmem:[#allocation143_spill] sm:$0xff] %v13368_v14  ;;  %v9694_v18 = vcombine.high %v1554_v63, %v1558_v48  ;;  %v1565_v24 = vld [vmem:[%s16793_s3 + $0xda0] sm:$0xff]  ;;  %v1570_v63 = vld [vmem:[%s16793_s3 + $0xdc8] sm:$0xff]  ;;  %v17279_v48 = vmax.f32 %v13350_v38, 0.0 }
 0x192   :  { %4590 = vmatprep.subr.bf16.mxu0 %v9684_v55  ;;  %5042 = vmatprep.subr.bf16.mxu1 %v9686_v56  ;;  %v1562_v55 = vld [vmem:[%s16793_s3 + $0xd88] sm:$0xff]  ;;  %v9700_v56 = vcombine.high %v1561_v36, %v1565_v24  ;;  %v9699_v13 = vcombine.low %v1561_v36, %v1565_v24  ;;  %v13414_v36 = vadd.f32 %v12843_v9, %v13136_v22  ;;  %v17283_v24 = vmax.f32 %v13364_v20, 0.0  ;;  %v1577_v9 = vld [vmem:[%s16793_s3 + $0xe00] sm:$0xff] }
 0x193   :  { %v9701_v33 = vcombine.low %v1562_v55, %v1566_v10  ;;  %v13406_v6 = vpack.c.bf16 %v17280_v44, %v17279_v48  ;;  %v13424_v44 = vadd.f32 %v12916_v0, %v13057_v5  ;;  %v1582_v0 = vld [vmem:[%s16793_s3 + $0xe28] sm:$0xff]  ;;  %v9707_v48 = vcombine.low %v1569_v32, %v1573_v11 }
 0x194   :  { %4522 = vmatmul.mubr.bf16.gmra.mrb[72].mxu0 %v13346_v25  ;;  %4974 = vmatmul.mubr.bf16.gmra.mrb[72].mxu1 %v13346_v25  ;;  %17282 = vst [vmem:[#allocation145_spill] sm:$0xff] %v13414_v36 }
 0x195   :  { %4591 = vmatpush1.bf16.msra.mxu0 %v9683_v50  ;;  %5043 = vmatpush1.bf16.msra.mxu1 %v9685_v26  ;;  %v9702_v50 = vcombine.high %v1562_v55, %v1566_v10  ;;  %v9708_v26 = vcombine.high %v1569_v32, %v1573_v11  ;;  %v17284_v55 = vmax.f32 %v13368_v14, 0.0  ;;  %17285 = vst [vmem:[#allocation146_spill] sm:$0xff] %v13424_v44  ;;  %v1589_v14 = vld [vmem:[%s16793_s3 + $0xe60] sm:$0xff] }
 0x196   :  { %4592 = vmatprep.subr.bf16.mxu0 %v9692_v17  ;;  %4531 = vmatprep.mubr.bf16.mxu0 %v13360_v1  ;;  %v1574_v17 = vld [vmem:[%s16793_s3 + $0xde8] sm:$0xff] }
 0x197   :  { %4983 = vmatprep.mubr.bf16.mxu1 %v13360_v1  ;;  %5044 = vmatprep.subr.bf16.mxu1 %v9694_v18  ;;  %v13410_v18 = vadd.f32 %v12809_v39, %v13136_v22  ;;  %v13420_v10 = vpack.c.bf16 %v17284_v55, %v17283_v24  ;;  %v13428_v39 = vadd.f32 %v12935_v28, %v13057_v5  ;;  %v1585_v55 = vld [vmem:[%s16793_s3 + $0xe40] sm:$0xff]  ;;  %v17288_v28 = vmax.f32 %v13414_v36, 0.0 }
 0x198   :  { %v9709_v24 = vcombine.low %v1570_v63, %v1574_v17 }
 0x199   :  { %17281 = vst [vmem:[#allocation144_spill] sm:$0xff] %v13410_v18  ;;  %4593 = vmatpush1.bf16.msra.mxu0 %v9691_v2  ;;  %5045 = vmatpush1.bf16.msra.mxu1 %v9693_v27  ;;  %17286 = vst [vmem:[#allocation147_spill] sm:$0xff] %v13428_v39  ;;  %v9710_v2 = vcombine.high %v1570_v63, %v1574_v17  ;;  %v1581_v27 = vld [vmem:[%s16793_s3 + $0xe20] sm:$0xff]  ;;  %v1586_v63 = vld [vmem:[%s16793_s3 + $0xe48] sm:$0xff]  ;;  %v17287_v17 = vmax.f32 %v13410_v18, 0.0 }
 0x19a   :  { %4594 = vmatprep.subr.bf16.mxu0 %v9700_v56  ;;  %5046 = vmatprep.subr.bf16.mxu1 %v9702_v50  ;;  %v1578_v56 = vld [vmem:[%s16793_s3 + $0xe08] sm:$0xff]  ;;  %v9716_v50 = vcombine.high %v1577_v9, %v1581_v27  ;;  %v9715_v11 = vcombine.low %v1577_v9, %v1581_v27  ;;  %v13474_v9 = vadd.f32 %v12929_v19, %v13136_v22  ;;  %v17291_v27 = vmax.f32 %v13424_v44, 0.0  ;;  %v1593_v19 = vld [vmem:[%s16793_s3 + $0xe80] sm:$0xff] }
 0x19b   :  { %v9717_v32 = vcombine.low %v1578_v56, %v1582_v0  ;;  %v13466_v20 = vpack.c.bf16 %v17288_v28, %v17287_v17  ;;  %v13484_v28 = vadd.f32 %v13010_v46, %v13057_v5  ;;  %v1598_v46 = vld [vmem:[%s16793_s3 + $0xea8] sm:$0xff]  ;;  %v9723_v17 = vcombine.low %v1585_v55, %v1589_v14 }
 0x19c   :  { %4532 = vmatmul.mubr.bf16.gmra.mrb[76].mxu0 %v13406_v6  ;;  %4984 = vmatmul.mubr.bf16.gmra.mrb[76].mxu1 %v13406_v6  ;;  %17290 = vst [vmem:[#allocation149_spill] sm:$0xff] %v13474_v9  ;;  %v17334_v18 = vld [vmem:[#allocation80_spill] sm:$0xff] }
 0x19d   :  { %4595 = vmatpush1.bf16.msra.mxu0 %v9699_v13  ;;  %5047 = vmatpush1.bf16.msra.mxu1 %v9701_v33  ;;  %v9718_v13 = vcombine.high %v1578_v56, %v1582_v0  ;;  %v9724_v33 = vcombine.high %v1585_v55, %v1589_v14  ;;  %v17292_v56 = vmax.f32 %v13428_v39, 0.0  ;;  %17293 = vst [vmem:[#allocation150_spill] sm:$0xff] %v13484_v28  ;;  %v1605_v39 = vld [vmem:[%s16793_s3 + $0xee0] sm:$0xff] }
 0x19e   :  { %4596 = vmatprep.subr.bf16.mxu0 %v9708_v26  ;;  %4541 = vmatprep.mubr.bf16.mxu0 %v13420_v10  ;;  %v1590_v26 = vld [vmem:[%s16793_s3 + $0xe68] sm:$0xff] }
 0x19f   :  { %4993 = vmatprep.mubr.bf16.mxu1 %v13420_v10  ;;  %5048 = vmatprep.subr.bf16.mxu1 %v9710_v2  ;;  %v13470_v2 = vadd.f32 %v12893_v8, %v13136_v22  ;;  %v13480_v0 = vpack.c.bf16 %v17292_v56, %v17291_v27  ;;  %v13488_v8 = vadd.f32 %v13028_v15, %v13057_v5  ;;  %v1601_v56 = vld [vmem:[%s16793_s3 + $0xec0] sm:$0xff]  ;;  %v17296_v15 = vmax.f32 %v13474_v9, 0.0  ;;  %v1159_v9 = vld [vmem:[%s16793_s3 + $0xf0] sm:$0xff] }
 0x1a0   :  { %v9725_v27 = vcombine.low %v1586_v63, %v1590_v26 }
 0x1a1   :  { %17289 = vst [vmem:[#allocation148_spill] sm:$0xff] %v13470_v2  ;;  %4597 = vmatpush1.bf16.msra.mxu0 %v9707_v48  ;;  %5049 = vmatpush1.bf16.msra.mxu1 %v9709_v24  ;;  %17294 = vst [vmem:[#allocation151_spill] sm:$0xff] %v13488_v8  ;;  %v9726_v48 = vcombine.high %v1586_v63, %v1590_v26  ;;  %v1597_v24 = vld [vmem:[%s16793_s3 + $0xea0] sm:$0xff]  ;;  %v1602_v63 = vld [vmem:[%s16793_s3 + $0xec8] sm:$0xff]  ;;  %v17295_v26 = vmax.f32 %v13470_v2, 0.0 }
 0x1a2   :  { %4598 = vmatprep.subr.bf16.mxu0 %v9716_v50  ;;  %5050 = vmatprep.subr.bf16.mxu1 %v9718_v13  ;;  %v1594_v50 = vld [vmem:[%s16793_s3 + $0xe88] sm:$0xff]  ;;  %v9732_v13 = vcombine.high %v1593_v19, %v1597_v24  ;;  %v9731_v14 = vcombine.low %v1593_v19, %v1597_v24  ;;  %v13534_v19 = vadd.f32 %v13020_v53, %v13136_v22  ;;  %v16977_v24 = vsub.s32 7, %v11870_v51 }
 0x1a3   :  { %v9733_v55 = vcombine.low %v1594_v50, %v1598_v46  ;;  %v13526_v44 = vpack.c.bf16 %v17296_v15, %v17295_v26  ;;  %v13549_v53 = vadd.f32 %v13127_v42, %v13057_v5  ;;  %v1609_v15 = vld [vmem:[%s16793_s3 + $0xf00] sm:$0xff] }
 0x1a4   :  { %4542 = vmatmul.mubr.bf16.gmra.mrb[80].mxu0 %v13466_v20  ;;  %4994 = vmatmul.mubr.bf16.gmra.mrb[80].mxu1 %v13466_v20  ;;  %17298 = vst [vmem:[#allocation153_spill] sm:$0xff] %v13534_v19 }
 0x1a5   :  { %4599 = vmatpush1.bf16.msra.mxu0 %v9715_v11  ;;  %5051 = vmatpush1.bf16.msra.mxu1 %v9717_v32  ;;  %v9734_v11 = vcombine.high %v1594_v50, %v1598_v46  ;;  %v9740_v32 = vcombine.high %v1601_v56, %v1605_v39  ;;  %v17299_v50 = vmax.f32 %v13484_v28, 0.0  ;;  %v17300_v46 = vmax.f32 %v13488_v8, 0.0  ;;  %17302 = vst [vmem:[#allocation155_spill] sm:$0xff] %v13549_v53  ;;  %v1618_v8 = vld [vmem:[%s16793_s3 + $0xf48] sm:$0xff] }
 0x1a6   :  { %4600 = vmatprep.subr.bf16.mxu0 %v9724_v33  ;;  %4551 = vmatprep.mubr.bf16.mxu0 %v13480_v0  ;;  %v1606_v33 = vld [vmem:[%s16793_s3 + $0xee8] sm:$0xff] }
 0x1a7   :  { %5003 = vmatprep.mubr.bf16.mxu1 %v13480_v0  ;;  %5052 = vmatprep.subr.bf16.mxu1 %v9726_v48  ;;  %v13530_v48 = vadd.f32 %v12981_v57, %v13136_v22  ;;  %v13541_v2 = vpack.c.bf16 %v17300_v46, %v17299_v50  ;;  %v13545_v57 = vadd.f32 %v13106_v3, %v13057_v5  ;;  %v1614_v3 = vld [vmem:[%s16793_s3 + $0xf28] sm:$0xff]  ;;  %v1617_v46 = vld [vmem:[%s16793_s3 + $0xf40] sm:$0xff] }
 0x1a8   :  { %v9739_v5 = vcombine.low %v1601_v56, %v1605_v39  ;;  %v9741_v26 = vcombine.low %v1602_v63, %v1606_v33  ;;  %v13570_v50 = vrot.slane %v13052_v43, %v16977_v24  ;;  %v1621_v39 = vld [vmem:[%s16793_s3 + $0xf60] sm:$0xff]  ;;  %v17304_v56 = vmax.f32 %v13534_v19, 0.0 }
 0x1a9   :  { %17297 = vst [vmem:[#allocation152_spill] sm:$0xff] %v13530_v48  ;;  %4601 = vmatpush1.bf16.msra.mxu0 %v9723_v17  ;;  %5053 = vmatpush1.bf16.msra.mxu1 %v9725_v27  ;;  %17301 = vst [vmem:[#allocation154_spill] sm:$0xff] %v13545_v57  ;;  %v9742_v17 = vcombine.high %v1602_v63, %v1606_v33  ;;  %v1613_v27 = vld [vmem:[%s16793_s3 + $0xf20] sm:$0xff]  ;;  %v9756_v42 = vcombine.high %v1617_v46, %v1621_v39 }
 0x1aa   :  { %4602 = vmatprep.subr.bf16.mxu0 %v9732_v13  ;;  %5054 = vmatprep.subr.bf16.mxu1 %v9734_v11  ;;  %v1610_v13 = vld [vmem:[%s16793_s3 + $0xf08] sm:$0xff]  ;;  %v9747_v33 = vcombine.low %v1609_v15, %v1613_v27  ;;  %v16987_v11 = vsub.s32 6, %v11870_v51  ;;  %v17439_v51 = vld [vmem:[#allocation41_spill] sm:$0xff] }
 0x1ab   :  { %v9750_v63 = vcombine.high %v1610_v13, %v1614_v3  ;;  %v9749_v24 = vcombine.low %v1610_v13, %v1614_v3  ;;  %v13609_v13 = vadd.f32 %v13119_v41, %v13136_v22  ;;  %v17309_v3 = vmax.f32 %v13545_v57, 0.0  ;;  %v1626_v41 = vld [vmem:[%s16793_s3 + $0xf88] sm:$0xff] }
 0x1ac   :  { %4552 = vmatmul.mubr.bf16.gmra.mrb[84].mxu0 %v13526_v44  ;;  %5004 = vmatmul.mubr.bf16.gmra.mrb[84].mxu1 %v13526_v44 }
 0x1ad   :  { %4603 = vmatpush1.bf16.msra.mxu0 %v9731_v14  ;;  %5055 = vmatpush1.bf16.msra.mxu1 %v9733_v55  ;;  %v9748_v55 = vcombine.high %v1609_v15, %v1613_v27  ;;  %v17303_v14 = vmax.f32 %v13530_v48, 0.0  ;;  %v13597_v15 = vadd.f32 %v12580_v16, %v13570_v50  ;;  %v13605_v27 = vadd.f32 %v13085_v35, %v13136_v22  ;;  %v1625_v16 = vld [vmem:[%s16793_s3 + $0xf80] sm:$0xff]  ;;  %v1630_v22 = vld [vmem:[%s16793_s3 + $0xfa8] sm:$0xff]  ;;  %v1155_v48 = vld [vmem:[%s16793_s3 + $0xd0] sm:$0xff] }
 0x1ae   :  { %4604 = vmatprep.subr.bf16.mxu0 %v9740_v32  ;;  %4561 = vmatprep.mubr.bf16.mxu0 %v13541_v2  ;;  %v1622_v32 = vld [vmem:[%s16793_s3 + $0xf68] sm:$0xff]  ;;  %17308 = vst [vmem:[#allocation159_spill] sm:$0xff] %v13609_v13  ;;  %v1629_v35 = vld [vmem:[%s16793_s3 + $0xfa0] sm:$0xff]  ;;  %v9766_v19 = vcombine.high %v1626_v41, %v1630_v22 }
 0x1af   :  { %5013 = vmatprep.mubr.bf16.mxu1 %v13541_v2  ;;  %5056 = vmatprep.subr.bf16.mxu1 %v9742_v17  ;;  %v13593_v28 = vpack.c.bf16 %v17304_v56, %v17303_v14  ;;  %17305 = vst [vmem:[#allocation156_spill] sm:$0xff] %v13597_v15  ;;  %v13601_v17 = vadd.f32 %v12599_v23, %v13570_v50  ;;  %17307 = vst [vmem:[#allocation158_spill] sm:$0xff] %v13605_v27  ;;  %v16986_v14 = vmax.f32 %v13597_v15, 0.0 }
 0x1b0   :  { %v9758_v23 = vcombine.high %v1618_v8, %v1622_v32  ;;  %v13634_v56 = vrot.slane %v13052_v43, %v16987_v11  ;;  %v9764_v57 = vcombine.high %v1625_v16, %v1629_v35  ;;  %v1633_v43 = vld [vmem:[%s16793_s3 + $0xfc0] sm:$0xff] }
 0x1b1   :  { %4605 = vmatpush1.bf16.msra.mxu0 %v9739_v5  ;;  %5057 = vmatpush1.bf16.msra.mxu1 %v9741_v26  ;;  %17306 = vst [vmem:[#allocation157_spill] sm:$0xff] %v13601_v17  ;;  %v17310_v5 = vmax.f32 %v13549_v53, 0.0  ;;  %v16983_v53 = vmax.f32 %v13609_v13, 0.0 }
 0x1b2   :  { %4606 = vmatprep.subr.bf16.mxu0 %v9748_v55  ;;  %5058 = vmatprep.subr.bf16.mxu1 %v9750_v63  ;;  %v9755_v55 = vcombine.low %v1617_v46, %v1621_v39  ;;  %v9757_v63 = vcombine.low %v1618_v8, %v1622_v32  ;;  %v13650_v8 = vadd.f32 %v12559_v21, %v13634_v56  ;;  %v1634_v39 = vld [vmem:[%s16793_s3 + $0xfc8] sm:$0xff] }
 0x1b3   :  { %v13615_v26 = vpack.c.bf16 %v17310_v5, %v17309_v3  ;;  %v16985_v3 = vmax.f32 %v13601_v17, 0.0  ;;  %v16984_v5 = vmax.f32 %v13605_v27, 0.0  ;;  %v9763_v46 = vcombine.low %v1625_v16, %v1629_v35 }
 0x1b4   :  { %4562 = vmatmul.mubr.bf16.gmra.mrb[88].mxu0 %v13593_v28  ;;  %5014 = vmatmul.mubr.bf16.gmra.mrb[88].mxu1 %v13593_v28  ;;  %17312 = vst [vmem:[#allocation161_spill] sm:$0xff] %v13650_v8  ;;  %v9765_v32 = vcombine.low %v1626_v41, %v1630_v22  ;;  %v13680_v35 = vadd.f32 %v12683_v47, %v13570_v50  ;;  %v1131_v41 = vld [vmem:[%s16793_s3 + $0x10] sm:$0xff]  ;;  %v16989_v47 = vmax.f32 %v13650_v8, 0.0  ;;  %v14773_v8 = vld [vmem:[%s16793_s3 + $0xe18] sm:$0xff] }
 0x1b5   :  { %17311 = vst [vmem:[#allocation160_spill] sm:$0xff] %v13615_v26  ;;  %4607 = vmatpush1.bf16.msra.mxu0 %v9747_v33  ;;  %5059 = vmatpush1.bf16.msra.mxu1 %v9749_v24  ;;  %v1637_v24 = vld [vmem:[%s16793_s3 + $0xfe0] sm:$0xff]  ;;  %v1638_v33 = vld [vmem:[%s16793_s3 + $0xfe8] sm:$0xff]  ;;  %v13666_v21 = vpack.c.bf16 %v16985_v3, %v16986_v14  ;;  %v13672_v16 = vpack.c.bf16 %v16983_v53, %v16984_v5 }
 0x1b6   :  { %4608 = vmatprep.subr.bf16.mxu0 %v9756_v42  ;;  %4571 = vmatprep.mubr.bf16.mxu0 %v13615_v26  ;;  %v13654_v42 = vadd.f32 %v12593_v34, %v13634_v56  ;;  %v9772_v34 = vcombine.high %v1633_v43, %v1637_v24  ;;  %17317 = vst [vmem:[#allocation166_spill] sm:$0xff] %v13680_v35  ;;  %v17322_v5 = vld [vmem:[#allocation76_spill] sm:$0xff] }
 0x1b7   :  { %5023 = vmatprep.mubr.bf16.mxu1 %v13615_v26  ;;  %5060 = vmatprep.subr.bf16.mxu1 %v9758_v23  ;;  %17314 = vst [vmem:[#allocation163_spill] sm:$0xff] %v13666_v21  ;;  %17315 = vst [vmem:[#allocation164_spill] sm:$0xff] %v13672_v16  ;;  %v13676_v23 = vadd.f32 %v12664_v54, %v13570_v50  ;;  %v9774_v22 = vcombine.high %v1634_v39, %v1638_v33  ;;  %v1136_v54 = vld [vmem:[%s16793_s3 + $0x38] sm:$0xff] }
 0x1b8   :  { %17313 = vst [vmem:[#allocation162_spill] sm:$0xff] %v13654_v42  ;;  %v9773_v53 = vcombine.low %v1634_v39, %v1638_v33  ;;  %v13726_v13 = vadd.f32 %v17322_v5, %v13634_v56 }
 0x1b9   :  { %4609 = vmatpush1.bf16.msra.mxu0 %v9755_v55  ;;  %5061 = vmatpush1.bf16.msra.mxu1 %v9757_v63  ;;  %17316 = vst [vmem:[#allocation165_spill] sm:$0xff] %v13676_v23  ;;  %v1135_v55 = vld [vmem:[%s16793_s3 + $0x30] sm:$0xff]  ;;  %v9771_v63 = vcombine.low %v1633_v43, %v1637_v24  ;;  %v17318_v43 = vmax.f32 %v13654_v42, 0.0 }
 0x1ba   :  { %4610 = vmatprep.subr.bf16.mxu0 %v9764_v57  ;;  %5062 = vmatprep.subr.bf16.mxu1 %v9766_v19  ;;  %v1132_v19 = vld [vmem:[%s16793_s3 + $0x18] sm:$0xff]  ;;  %v9272_v14 = vcombine.high %v1131_v41, %v1135_v55  ;;  %v1139_v57 = vld [vmem:[%s16793_s3 + $0x50] sm:$0xff]  ;;  %v9271_v39 = vcombine.low %v1131_v41, %v1135_v55  ;;  %17323 = vst [vmem:[#allocation76_spill] sm:$0xff] %v13726_v13  ;;  %v17324_v55 = vmax.f32 %v13676_v23, 0.0 }
 0x1bb   :  { %v9274_v11 = vcombine.high %v1132_v19, %v1136_v54  ;;  %v13712_v24 = vpack.c.bf16 %v17318_v43, %v16989_v47  ;;  %v9273_v33 = vcombine.low %v1132_v19, %v1136_v54  ;;  %v17325_v19 = vmax.f32 %v13680_v35, 0.0  ;;  %v17327_v43 = vld [vmem:[#allocation84_spill] sm:$0xff] }
 0x1bc   :  { %4572 = vmatmul.mubr.bf16.gmra.mrb[92].mxu0 %v13672_v16  ;;  %5024 = vmatmul.mubr.bf16.gmra.mrb[92].mxu1 %v13672_v16  ;;  %v13736_v47 = vadd.f32 %v17327_v43, %v13570_v50 }
 0x1bd   :  { %4611 = vmatpush1.bf16.msra.mxu0 %v9763_v46  ;;  %5063 = vmatpush1.bf16.msra.mxu1 %v9765_v32  ;;  %v1143_v46 = vld [vmem:[%s16793_s3 + $0x70] sm:$0xff]  ;;  %17319 = vst [vmem:[#allocation167_spill] sm:$0xff] %v13712_v24  ;;  %v1140_v32 = vld [vmem:[%s16793_s3 + $0x58] sm:$0xff]  ;;  %v13732_v54 = vpack.c.bf16 %v17325_v19, %v17324_v55  ;;  %v17332_v55 = vmax.f32 %v13726_v13, 0.0 }
 0x1be   :  { %4612 = vmatprep.subr.bf16.mxu0 %v9772_v34  ;;  %4614 = vmatprep.mubr.bf16.mxu0 %v13666_v21  ;;  %v1144_v34 = vld [vmem:[%s16793_s3 + $0x78] sm:$0xff]  ;;  %v9280_v41 = vcombine.high %v1139_v57, %v1143_v46  ;;  %17328 = vst [vmem:[#allocation84_spill] sm:$0xff] %v13736_v47  ;;  %v9279_v43 = vcombine.low %v1139_v57, %v1143_v46  ;;  %v17362_v13 = vld [vmem:[#allocation100_spill] sm:$0xff] }
 0x1bf   :  { %5064 = vmatprep.subr.bf16.mxu1 %v9774_v22  ;;  %5066 = vmatprep.mubr.bf16.mxu1 %v13666_v21  ;;  %v17320_v22 = vld [vmem:[#allocation72_spill] sm:$0xff]  ;;  %17326 = vst [vmem:[#allocation168_spill] sm:$0xff] %v13732_v54  ;;  %v9282_v5 = vcombine.high %v1140_v32, %v1144_v34 }
 0x1c0   :  { %v13722_v3 = vadd.f32 %v17320_v22, %v13634_v56  ;;  %v17329_v22 = vld [vmem:[#allocation86_spill] sm:$0xff] }
 0x1c1   :  { %4613 = vmatpush1.bf16.msra.mxu0 %v9771_v63  ;;  %5065 = vmatpush1.bf16.msra.mxu1 %v9773_v53  ;;  %v13740_v27 = vadd.f32 %v17329_v22, %v13570_v50  ;;  %v1147_v53 = vld [vmem:[%s16793_s3 + $0x90] sm:$0xff]  ;;  %v9281_v22 = vcombine.low %v1140_v32, %v1144_v34  ;;  %v1156_v32 = vld [vmem:[%s16793_s3 + $0xd8] sm:$0xff] }
 0x1c2   :  { %17321 = vst [vmem:[#allocation72_spill] sm:$0xff] %v13722_v3  ;;  %5147 = vmatprep.subr.bf16.mxu0 %v9272_v14  ;;  %5599 = vmatprep.subr.bf16.mxu1 %v9274_v11  ;;  %v1151_v63 = vld [vmem:[%s16793_s3 + $0xb0] sm:$0xff]  ;;  %v1148_v11 = vld [vmem:[%s16793_s3 + $0x98] sm:$0xff] }
 0x1c3   :  { %17330 = vst [vmem:[#allocation86_spill] sm:$0xff] %v13740_v27  ;;  %v1152_v14 = vld [vmem:[%s16793_s3 + $0xb8] sm:$0xff]  ;;  %v9288_v19 = vcombine.high %v1147_v53, %v1151_v63  ;;  %v9287_v57 = vcombine.low %v1147_v53, %v1151_v63 }
 0x1c4   :  { %4615 = vmatmul.mubr.bf16.vlgmr.msra.gmra.mrb[64].mxu0 %v13712_v24  ;;  %5067 = vmatmul.mubr.bf16.vlgmr.msra.gmra.mrb[64].mxu1 %v13712_v24  ;;  %v9289_v46 = vcombine.low %v1148_v11, %v1152_v14  ;;  %v1160_v34 = vld [vmem:[%s16793_s3 + $0xf8] sm:$0xff] }
 0x1c5   :  { %5148 = vmatpush1.bf16.msra.mxu0 %v9271_v39  ;;  %5600 = vmatpush1.bf16.msra.mxu1 %v9273_v33  ;;  %v9290_v39 = vcombine.high %v1148_v11, %v1152_v14  ;;  %v9296_v33 = vcombine.high %v1155_v48, %v1159_v9  ;;  %v17336_v53 = vld [vmem:[#allocation85_spill] sm:$0xff]  ;;  %v17338_v11 = vmax.f32 %v13736_v47, 0.0  ;;  %v17339_v14 = vmax.f32 %v13740_v27, 0.0 }
 0x1c6   :  { %5149 = vmatprep.subr.bf16.mxu0 %v9280_v41  ;;  %4624 = vmatprep.mubr.bf16.mxu0 %v13732_v54  ;;  %v17331_v41 = vmax.f32 %v13722_v3, 0.0  ;;  %v13786_v63 = vadd.f32 %v17336_v53, %v13634_v56  ;;  %v1167_v53 = vld [vmem:[%s16793_s3 + $0x130] sm:$0xff]  ;;  %v17376_v3 = vld [vmem:[#allocation110_spill] sm:$0xff] }
 0x1c7   :  { %5076 = vmatprep.mubr.bf16.mxu1 %v13732_v54  ;;  %5601 = vmatprep.subr.bf16.mxu1 %v9282_v5  ;;  %v13782_v5 = vadd.f32 %v17334_v18, %v13634_v56  ;;  %v13792_v40 = vpack.c.bf16 %v17339_v14, %v17338_v11  ;;  %v17343_v18 = vld [vmem:[#allocation96_spill] sm:$0xff] }
 0x1c8   :  { %v13778_v36 = vpack.c.bf16 %v17332_v55, %v17331_v41  ;;  %17337 = vst [vmem:[#allocation85_spill] sm:$0xff] %v13786_v63  ;;  %v17341_v55 = vld [vmem:[#allocation94_spill] sm:$0xff]  ;;  %v13800_v38 = vadd.f32 %v17343_v18, %v13570_v50  ;;  %v9297_v18 = vcombine.low %v1156_v32, %v1160_v34  ;;  %v1171_v27 = vld [vmem:[%s16793_s3 + $0x150] sm:$0xff]  ;;  %v17346_v11 = vmax.f32 %v13786_v63, 0.0 }
 0x1c9   :  { %17335 = vst [vmem:[#allocation80_spill] sm:$0xff] %v13782_v5  ;;  %5150 = vmatpush1.bf16.msra.mxu0 %v9279_v43  ;;  %5602 = vmatpush1.bf16.msra.mxu1 %v9281_v22  ;;  %17340 = vst [vmem:[#allocation170_spill] sm:$0xff] %v13792_v40  ;;  %v13796_v41 = vadd.f32 %v17341_v55, %v13570_v50  ;;  %v1163_v43 = vld [vmem:[%s16793_s3 + $0x110] sm:$0xff]  ;;  %v9298_v22 = vcombine.high %v1156_v32, %v1160_v34  ;;  %v1172_v32 = vld [vmem:[%s16793_s3 + $0x158] sm:$0xff]  ;;  %v17345_v34 = vmax.f32 %v13782_v5, 0.0 }
 0x1ca   :  { %17333 = vst [vmem:[#allocation169_spill] sm:$0xff] %v13778_v36  ;;  %5151 = vmatprep.subr.bf16.mxu0 %v9288_v19  ;;  %5603 = vmatprep.subr.bf16.mxu1 %v9290_v39  ;;  %17344 = vst [vmem:[#allocation96_spill] sm:$0xff] %v13800_v38  ;;  %v1164_v19 = vld [vmem:[%s16793_s3 + $0x118] sm:$0xff]  ;;  %v9295_v55 = vcombine.low %v1155_v48, %v1159_v9  ;;  %v1175_v47 = vld [vmem:[%s16793_s3 + $0x170] sm:$0xff]  ;;  %v9304_v14 = vcombine.high %v1163_v43, %v1167_v53 }
 0x1cb   :  { %17342 = vst [vmem:[#allocation94_spill] sm:$0xff] %v13796_v41  ;;  %v1168_v39 = vld [vmem:[%s16793_s3 + $0x138] sm:$0xff]  ;;  %v9303_v9 = vcombine.low %v1163_v43, %v1167_v53  ;;  %v13838_v58 = vpack.c.bf16 %v17346_v11, %v17345_v34  ;;  %v17350_v43 = vld [vmem:[#allocation95_spill] sm:$0xff]  ;;  %v17355_v11 = vld [vmem:[#allocation104_spill] sm:$0xff] }
 0x1cc   :  { %4625 = vmatmul.mubr.bf16.gmra.mrb[68].mxu0 %v13778_v36  ;;  %5077 = vmatmul.mubr.bf16.gmra.mrb[68].mxu1 %v13778_v36  ;;  %v9305_v48 = vcombine.low %v1164_v19, %v1168_v39  ;;  %v13846_v53 = vadd.f32 %v17350_v43, %v13634_v56  ;;  %v13856_v34 = vadd.f32 %v17355_v11, %v13570_v50  ;;  %v1183_v43 = vld [vmem:[%s16793_s3 + $0x1b0] sm:$0xff] }
 0x1cd   :  { %5152 = vmatpush1.bf16.msra.mxu0 %v9287_v57  ;;  %5604 = vmatpush1.bf16.msra.mxu1 %v9289_v46  ;;  %v9306_v57 = vcombine.high %v1164_v19, %v1168_v39  ;;  %v9312_v46 = vcombine.high %v1171_v27, %v1175_v47  ;;  %17347 = vst [vmem:[#allocation171_spill] sm:$0xff] %v13838_v58  ;;  %v17352_v19 = vmax.f32 %v13796_v41, 0.0  ;;  %v17353_v39 = vmax.f32 %v13800_v38, 0.0  ;;  %v1187_v38 = vld [vmem:[%s16793_s3 + $0x1d0] sm:$0xff] }
 0x1ce   :  { %5153 = vmatprep.subr.bf16.mxu0 %v9296_v33  ;;  %4634 = vmatprep.mubr.bf16.mxu0 %v13792_v40  ;;  %v1176_v33 = vld [vmem:[%s16793_s3 + $0x178] sm:$0xff]  ;;  %17351 = vst [vmem:[#allocation95_spill] sm:$0xff] %v13846_v53  ;;  %17356 = vst [vmem:[#allocation104_spill] sm:$0xff] %v13856_v34  ;;  %v9311_v11 = vcombine.low %v1171_v27, %v1175_v47  ;;  %v1191_v41 = vld [vmem:[%s16793_s3 + $0x1f0] sm:$0xff] }
 0x1cf   :  { %5086 = vmatprep.mubr.bf16.mxu1 %v13792_v40  ;;  %5605 = vmatprep.subr.bf16.mxu1 %v9298_v22  ;;  %v13842_v22 = vadd.f32 %v17348_v29, %v13634_v56  ;;  %v13852_v35 = vpack.c.bf16 %v17353_v39, %v17352_v19  ;;  %v17357_v29 = vld [vmem:[#allocation106_spill] sm:$0xff]  ;;  %v17360_v19 = vmax.f32 %v13846_v53, 0.0 }
 0x1d0   :  { %v13860_v63 = vadd.f32 %v17357_v29, %v13570_v50  ;;  %v9313_v29 = vcombine.low %v1172_v32, %v1176_v33 }
 0x1d1   :  { %17349 = vst [vmem:[#allocation90_spill] sm:$0xff] %v13842_v22  ;;  %5154 = vmatpush1.bf16.msra.mxu0 %v9295_v55  ;;  %5606 = vmatpush1.bf16.msra.mxu1 %v9297_v18  ;;  %17354 = vst [vmem:[#allocation172_spill] sm:$0xff] %v13852_v35  ;;  %v1179_v55 = vld [vmem:[%s16793_s3 + $0x190] sm:$0xff]  ;;  %v9314_v18 = vcombine.high %v1172_v32, %v1176_v33  ;;  %v1188_v32 = vld [vmem:[%s16793_s3 + $0x1d8] sm:$0xff]  ;;  %v17359_v33 = vmax.f32 %v13842_v22, 0.0 }
 0x1d2   :  { %5155 = vmatprep.subr.bf16.mxu0 %v9304_v14  ;;  %5607 = vmatprep.subr.bf16.mxu1 %v9306_v57  ;;  %17358 = vst [vmem:[#allocation106_spill] sm:$0xff] %v13860_v63  ;;  %v1180_v14 = vld [vmem:[%s16793_s3 + $0x198] sm:$0xff]  ;;  %v9320_v39 = vcombine.high %v1179_v55, %v1183_v43  ;;  %v9319_v27 = vcombine.low %v1179_v55, %v1183_v43 }
 0x1d3   :  { %v1184_v57 = vld [vmem:[%s16793_s3 + $0x1b8] sm:$0xff]  ;;  %v13898_v5 = vpack.c.bf16 %v17360_v19, %v17359_v33 }
 0x1d4   :  { %4635 = vmatmul.mubr.bf16.gmra.mrb[72].mxu0 %v13838_v58  ;;  %5087 = vmatmul.mubr.bf16.gmra.mrb[72].mxu1 %v13838_v58  ;;  %v9321_v47 = vcombine.low %v1180_v14, %v1184_v57  ;;  %v17364_v55 = vld [vmem:[#allocation105_spill] sm:$0xff]  ;;  %v17369_v19 = vld [vmem:[#allocation114_spill] sm:$0xff] }
 0x1d5   :  { %5156 = vmatpush1.bf16.msra.mxu0 %v9303_v9  ;;  %5608 = vmatpush1.bf16.msra.mxu1 %v9305_v48  ;;  %v9322_v9 = vcombine.high %v1180_v14, %v1184_v57  ;;  %v9328_v48 = vcombine.high %v1187_v38, %v1191_v41  ;;  %17361 = vst [vmem:[#allocation173_spill] sm:$0xff] %v13898_v5  ;;  %v17366_v14 = vmax.f32 %v13856_v34, 0.0  ;;  %v17367_v57 = vmax.f32 %v13860_v63, 0.0  ;;  %v1203_v63 = vld [vmem:[%s16793_s3 + $0x250] sm:$0xff] }
 0x1d6   :  { %5157 = vmatprep.subr.bf16.mxu0 %v9312_v46  ;;  %4644 = vmatprep.mubr.bf16.mxu0 %v13852_v35  ;;  %v1192_v46 = vld [vmem:[%s16793_s3 + $0x1f8] sm:$0xff]  ;;  %v13906_v43 = vadd.f32 %v17364_v55, %v13634_v56  ;;  %v13916_v33 = vadd.f32 %v17369_v19, %v13570_v50  ;;  %v1199_v55 = vld [vmem:[%s16793_s3 + $0x230] sm:$0xff]  ;;  %v9327_v19 = vcombine.low %v1187_v38, %v1191_v41 }
 0x1d7   :  { %5096 = vmatprep.mubr.bf16.mxu1 %v13852_v35  ;;  %5609 = vmatprep.subr.bf16.mxu1 %v9314_v18  ;;  %v13902_v18 = vadd.f32 %v17362_v13, %v13634_v56  ;;  %v13912_v23 = vpack.c.bf16 %v17367_v57, %v17366_v14  ;;  %v17371_v13 = vld [vmem:[#allocation116_spill] sm:$0xff] }
 0x1d8   :  { %17365 = vst [vmem:[#allocation105_spill] sm:$0xff] %v13906_v43  ;;  %17370 = vst [vmem:[#allocation114_spill] sm:$0xff] %v13916_v33  ;;  %v13920_v53 = vadd.f32 %v17371_v13, %v13570_v50  ;;  %v9329_v13 = vcombine.low %v1188_v32, %v1192_v46  ;;  %v1207_v34 = vld [vmem:[%s16793_s3 + $0x270] sm:$0xff]  ;;  %v17374_v14 = vmax.f32 %v13906_v43, 0.0 }
 0x1d9   :  { %17363 = vst [vmem:[#allocation100_spill] sm:$0xff] %v13902_v18  ;;  %5158 = vmatpush1.bf16.msra.mxu0 %v9311_v11  ;;  %5610 = vmatpush1.bf16.msra.mxu1 %v9313_v29  ;;  %17368 = vst [vmem:[#allocation174_spill] sm:$0xff] %v13912_v23  ;;  %v1195_v11 = vld [vmem:[%s16793_s3 + $0x210] sm:$0xff]  ;;  %v9330_v29 = vcombine.high %v1188_v32, %v1192_v46  ;;  %v1204_v32 = vld [vmem:[%s16793_s3 + $0x258] sm:$0xff]  ;;  %v17373_v46 = vmax.f32 %v13902_v18, 0.0 }
 0x1da   :  { %5159 = vmatprep.subr.bf16.mxu0 %v9320_v39  ;;  %5611 = vmatprep.subr.bf16.mxu1 %v9322_v9  ;;  %17372 = vst [vmem:[#allocation116_spill] sm:$0xff] %v13920_v53  ;;  %v1196_v39 = vld [vmem:[%s16793_s3 + $0x218] sm:$0xff]  ;;  %v9336_v57 = vcombine.high %v1195_v11, %v1199_v55  ;;  %v9335_v38 = vcombine.low %v1195_v11, %v1199_v55  ;;  %v17378_v11 = vld [vmem:[#allocation115_spill] sm:$0xff]  ;;  %v14926_v58 = vld [vmem:[%s16793_s3 + $0xf70] sm:$0xff] }
 0x1db   :  { %v1200_v9 = vld [vmem:[%s16793_s3 + $0x238] sm:$0xff]  ;;  %v13958_v22 = vpack.c.bf16 %v17374_v14, %v17373_v46  ;;  %v13966_v55 = vadd.f32 %v17378_v11, %v13634_v56  ;;  %v17383_v14 = vld [vmem:[#allocation124_spill] sm:$0xff] }
 0x1dc   :  { %4645 = vmatmul.mubr.bf16.gmra.mrb[76].mxu0 %v13898_v5  ;;  %5097 = vmatmul.mubr.bf16.gmra.mrb[76].mxu1 %v13898_v5  ;;  %v9337_v41 = vcombine.low %v1196_v39, %v1200_v9  ;;  %v13976_v46 = vadd.f32 %v17383_v14, %v13570_v50  ;;  %v1215_v11 = vld [vmem:[%s16793_s3 + $0x2b0] sm:$0xff]  ;;  %v9343_v14 = vcombine.low %v1203_v63, %v1207_v34 }
 0x1dd   :  { %5160 = vmatpush1.bf16.msra.mxu0 %v9319_v27  ;;  %5612 = vmatpush1.bf16.msra.mxu1 %v9321_v47  ;;  %v9338_v27 = vcombine.high %v1196_v39, %v1200_v9  ;;  %v9344_v47 = vcombine.high %v1203_v63, %v1207_v34  ;;  %17375 = vst [vmem:[#allocation175_spill] sm:$0xff] %v13958_v22  ;;  %17379 = vst [vmem:[#allocation115_spill] sm:$0xff] %v13966_v55  ;;  %v17380_v39 = vmax.f32 %v13916_v33, 0.0  ;;  %v1223_v33 = vld [vmem:[%s16793_s3 + $0x2f0] sm:$0xff] }
 0x1de   :  { %5161 = vmatprep.subr.bf16.mxu0 %v9328_v48  ;;  %4654 = vmatprep.mubr.bf16.mxu0 %v13912_v23  ;;  %v1208_v48 = vld [vmem:[%s16793_s3 + $0x278] sm:$0xff]  ;;  %v17381_v9 = vmax.f32 %v13920_v53, 0.0  ;;  %17384 = vst [vmem:[#allocation124_spill] sm:$0xff] %v13976_v46  ;;  %v1219_v53 = vld [vmem:[%s16793_s3 + $0x2d0] sm:$0xff] }
 0x1df   :  { %5106 = vmatprep.mubr.bf16.mxu1 %v13912_v23  ;;  %5613 = vmatprep.subr.bf16.mxu1 %v9330_v29  ;;  %v13962_v29 = vadd.f32 %v17376_v3, %v13634_v56  ;;  %v17385_v3 = vld [vmem:[#allocation126_spill] sm:$0xff]  ;;  %v14876_v5 = vld [vmem:[%s16793_s3 + $0xf10] sm:$0xff] }
 0x1e0   :  { %v13972_v60 = vpack.c.bf16 %v17381_v9, %v17380_v39  ;;  %v13980_v43 = vadd.f32 %v17385_v3, %v13570_v50  ;;  %v9345_v3 = vcombine.low %v1204_v32, %v1208_v48  ;;  %v17388_v39 = vmax.f32 %v13966_v55, 0.0  ;;  %v1235_v55 = vld [vmem:[%s16793_s3 + $0x350] sm:$0xff]  ;;  %v14906_v23 = vld [vmem:[%s16793_s3 + $0xf38] sm:$0xff] }
 0x1e1   :  { %17377 = vst [vmem:[#allocation110_spill] sm:$0xff] %v13962_v29  ;;  %5162 = vmatpush1.bf16.msra.mxu0 %v9327_v19  ;;  %5614 = vmatpush1.bf16.msra.mxu1 %v9329_v13  ;;  %v1211_v19 = vld [vmem:[%s16793_s3 + $0x290] sm:$0xff]  ;;  %v9346_v13 = vcombine.high %v1204_v32, %v1208_v48  ;;  %v1220_v32 = vld [vmem:[%s16793_s3 + $0x2d8] sm:$0xff]  ;;  %v17387_v48 = vmax.f32 %v13962_v29, 0.0  ;;  %v17437_v29 = vld [vmem:[#allocation47_spill] sm:$0xff] }
 0x1e2   :  { %17382 = vst [vmem:[#allocation176_spill] sm:$0xff] %v13972_v60  ;;  %5163 = vmatprep.subr.bf16.mxu0 %v9336_v57  ;;  %5615 = vmatprep.subr.bf16.mxu1 %v9338_v27  ;;  %17386 = vst [vmem:[#allocation126_spill] sm:$0xff] %v13980_v43  ;;  %v1212_v57 = vld [vmem:[%s16793_s3 + $0x298] sm:$0xff]  ;;  %v9352_v9 = vcombine.high %v1211_v19, %v1215_v11  ;;  %v9351_v63 = vcombine.low %v1211_v19, %v1215_v11 }
 0x1e3   :  { %v1216_v27 = vld [vmem:[%s16793_s3 + $0x2b8] sm:$0xff]  ;;  %v14018_v18 = vpack.c.bf16 %v17388_v39, %v17387_v48  ;;  %v14036_v39 = vadd.f32 %v13187_v49, %v13570_v50  ;;  %v1231_v48 = vld [vmem:[%s16793_s3 + $0x330] sm:$0xff] }
 0x1e4   :  { %4655 = vmatmul.mubr.bf16.gmra.mrb[80].mxu0 %v13958_v22  ;;  %5107 = vmatmul.mubr.bf16.gmra.mrb[80].mxu1 %v13958_v22  ;;  %v9353_v34 = vcombine.low %v1212_v57, %v1216_v27  ;;  %v17392_v19 = vld [vmem:[#allocation125_spill] sm:$0xff] }
 0x1e5   :  { %5164 = vmatpush1.bf16.msra.mxu0 %v9335_v38  ;;  %5616 = vmatpush1.bf16.msra.mxu1 %v9337_v41  ;;  %v9354_v38 = vcombine.high %v1212_v57, %v1216_v27  ;;  %v9360_v41 = vcombine.high %v1219_v53, %v1223_v33  ;;  %17389 = vst [vmem:[#allocation177_spill] sm:$0xff] %v14018_v18  ;;  %v17394_v57 = vmax.f32 %v13976_v46, 0.0  ;;  %v17395_v27 = vmax.f32 %v13980_v43, 0.0  ;;  %v1232_v49 = vld [vmem:[%s16793_s3 + $0x338] sm:$0xff] }
 0x1e6   :  { %5165 = vmatprep.subr.bf16.mxu0 %v9344_v47  ;;  %4664 = vmatprep.mubr.bf16.mxu0 %v13972_v60  ;;  %v1224_v47 = vld [vmem:[%s16793_s3 + $0x2f8] sm:$0xff]  ;;  %v14026_v11 = vadd.f32 %v17392_v19, %v13634_v56  ;;  %17397 = vst [vmem:[#allocation179_spill] sm:$0xff] %v14036_v39 }
 0x1e7   :  { %5116 = vmatprep.mubr.bf16.mxu1 %v13972_v60  ;;  %5617 = vmatprep.subr.bf16.mxu1 %v9346_v13  ;;  %v14022_v13 = vadd.f32 %v17390_v37, %v13634_v56  ;;  %v14032_v17 = vpack.c.bf16 %v17395_v27, %v17394_v57  ;;  %v14040_v37 = vadd.f32 %v13202_v59, %v13570_v50  ;;  %v17024_v57 = vmax.f32 %v14036_v39, 0.0  ;;  %v14848_v60 = vld [vmem:[%s16793_s3 + $0xed0] sm:$0xff]  ;;  %v14901_v22 = vld [vmem:[%s16793_s3 + $0xf18] sm:$0xff] }
 0x1e8   :  { %17393 = vst [vmem:[#allocation125_spill] sm:$0xff] %v14026_v11  ;;  %v17025_v50 = vmax.f32 %v14026_v11, 0.0  ;;  %v9361_v19 = vcombine.low %v1220_v32, %v1224_v47  ;;  %v17436_v11 = vld [vmem:[#allocation5_spill] sm:$0xff] }
 0x1e9   :  { %17391 = vst [vmem:[#allocation120_spill] sm:$0xff] %v14022_v13  ;;  %5166 = vmatpush1.bf16.msra.mxu0 %v9343_v14  ;;  %5618 = vmatpush1.bf16.msra.mxu1 %v9345_v3  ;;  %17396 = vst [vmem:[#allocation178_spill] sm:$0xff] %v14032_v17  ;;  %v1227_v14 = vld [vmem:[%s16793_s3 + $0x310] sm:$0xff]  ;;  %v9362_v3 = vcombine.high %v1220_v32, %v1224_v47  ;;  %v17026_v59 = vmax.f32 %v14022_v13, 0.0  ;;  %v17023_v27 = vmax.f32 %v14040_v37, 0.0 }
 0x1ea   :  { %5167 = vmatprep.subr.bf16.mxu0 %v9352_v9  ;;  %5619 = vmatprep.subr.bf16.mxu1 %v9354_v38  ;;  %17398 = vst [vmem:[#allocation180_spill] sm:$0xff] %v14040_v37  ;;  %v1228_v9 = vld [vmem:[%s16793_s3 + $0x318] sm:$0xff]  ;;  %v9359_v38 = vcombine.low %v1219_v53, %v1223_v33  ;;  %v9368_v43 = vcombine.high %v1227_v14, %v1231_v48 }
 0x1eb   :  { %v9370_v46 = vcombine.high %v1228_v9, %v1232_v49  ;;  %v9367_v53 = vcombine.low %v1227_v14, %v1231_v48  ;;  %v1236_v33 = vld [vmem:[%s16793_s3 + $0x358] sm:$0xff]  ;;  %v9369_v32 = vcombine.low %v1228_v9, %v1232_v49  ;;  %v14082_v14 = vadd.f32 %v13168_v4, %v13634_v56  ;;  %v1243_v9 = vld [vmem:[%s16793_s3 + $0x390] sm:$0xff] }
 0x1ec   :  { %4665 = vmatmul.mubr.bf16.gmra.mrb[84].mxu0 %v14018_v18  ;;  %5117 = vmatmul.mubr.bf16.gmra.mrb[84].mxu1 %v14018_v18  ;;  %v14092_v48 = vpack.c.bf16 %v17023_v27, %v17024_v57  ;;  %v1247_v4 = vld [vmem:[%s16793_s3 + $0x3b0] sm:$0xff] }
 0x1ed   :  { %5168 = vmatpush1.bf16.msra.mxu0 %v9351_v63  ;;  %5620 = vmatpush1.bf16.msra.mxu1 %v9353_v34  ;;  %v1239_v63 = vld [vmem:[%s16793_s3 + $0x370] sm:$0xff]  ;;  %v1240_v34 = vld [vmem:[%s16793_s3 + $0x378] sm:$0xff]  ;;  %17400 = vst [vmem:[#allocation182_spill] sm:$0xff] %v14082_v14  ;;  %v9384_v27 = vcombine.high %v1243_v9, %v1247_v4 }
 0x1ee   :  { %5169 = vmatprep.subr.bf16.mxu0 %v9360_v41  ;;  %4674 = vmatprep.mubr.bf16.mxu0 %v14032_v17  ;;  %v14078_v41 = vpack.c.bf16 %v17025_v50, %v17026_v59  ;;  %v9376_v47 = vcombine.high %v1235_v55, %v1239_v63  ;;  %17402 = vst [vmem:[#allocation184_spill] sm:$0xff] %v14092_v48  ;;  %v1251_v50 = vld [vmem:[%s16793_s3 + $0x3d0] sm:$0xff] }
 0x1ef   :  { %5126 = vmatprep.mubr.bf16.mxu1 %v14032_v17  ;;  %5621 = vmatprep.subr.bf16.mxu1 %v9362_v3  ;;  %v14086_v3 = vadd.f32 %v13198_v45, %v13634_v56  ;;  %v9378_v49 = vcombine.high %v1236_v33, %v1240_v34  ;;  %v1244_v45 = vld [vmem:[%s16793_s3 + $0x398] sm:$0xff]  ;;  %v1259_v59 = vld [vmem:[%s16793_s3 + $0x410] sm:$0xff] }
 0x1f0   :  { %17399 = vst [vmem:[#allocation181_spill] sm:$0xff] %v14078_v41  ;;  %v1248_v56 = vld [vmem:[%s16793_s3 + $0x3b8] sm:$0xff] }
 0x1f1   :  { %5170 = vmatpush1.bf16.msra.mxu0 %v9359_v38  ;;  %5622 = vmatpush1.bf16.msra.mxu1 %v9361_v19  ;;  %17401 = vst [vmem:[#allocation183_spill] sm:$0xff] %v14086_v3  ;;  %v17028_v38 = vmax.f32 %v14082_v14, 0.0  ;;  %v17027_v19 = vmax.f32 %v14086_v3, 0.0  ;;  %v9386_v57 = vcombine.high %v1244_v45, %v1248_v56  ;;  %v14744_v3 = vld [vmem:[%s16793_s3 + $0xdd8] sm:$0xff]  ;;  %v14754_v14 = vld [vmem:[%s16793_s3 + $0xe10] sm:$0xff] }
 0x1f2   :  { %5171 = vmatprep.subr.bf16.mxu0 %v9368_v43  ;;  %5623 = vmatprep.subr.bf16.mxu1 %v9370_v46  ;;  %v9375_v43 = vcombine.low %v1235_v55, %v1239_v63  ;;  %v9377_v46 = vcombine.low %v1236_v33, %v1240_v34  ;;  %v1255_v55 = vld [vmem:[%s16793_s3 + $0x3f0] sm:$0xff]  ;;  %v1252_v63 = vld [vmem:[%s16793_s3 + $0x3d8] sm:$0xff]  ;;  %v9383_v33 = vcombine.low %v1243_v9, %v1247_v4 }
 0x1f3   :  { %v14128_v34 = vpack.c.bf16 %v17027_v19, %v17028_v38  ;;  %v17404_v9 = vld [vmem:[#allocation10_spill] sm:$0xff]  ;;  %v9391_v4 = vcombine.low %v1251_v50, %v1255_v55  ;;  %v1267_v19 = vld [vmem:[%s16793_s3 + $0x450] sm:$0xff] }
 0x1f4   :  { %4675 = vmatmul.mubr.bf16.gmra.mrb[88].mxu0 %v14078_v41  ;;  %5127 = vmatmul.mubr.bf16.gmra.mrb[88].mxu1 %v14078_v41  ;;  %v1271_v38 = vld [vmem:[%s16793_s3 + $0x470] sm:$0xff]  ;;  %v14807_v41 = vld [vmem:[%s16793_s3 + $0xe78] sm:$0xff] }
 0x1f5   :  { %5172 = vmatpush1.bf16.msra.mxu0 %v9367_v53  ;;  %5624 = vmatpush1.bf16.msra.mxu1 %v9369_v32  ;;  %v1256_v53 = vld [vmem:[%s16793_s3 + $0x3f8] sm:$0xff]  ;;  %17403 = vst [vmem:[#allocation185_spill] sm:$0xff] %v14128_v34  ;;  %v9385_v32 = vcombine.low %v1244_v45, %v1248_v56 }
 0x1f6   :  { %5173 = vmatprep.subr.bf16.mxu0 %v9376_v47  ;;  %4684 = vmatprep.mubr.bf16.mxu0 %v14092_v48  ;;  %v9392_v47 = vcombine.high %v1251_v50, %v1255_v55  ;;  %v9393_v45 = vcombine.low %v1252_v63, %v1256_v53  ;;  %v1268_v50 = vld [vmem:[%s16793_s3 + $0x458] sm:$0xff] }
 0x1f7   :  { %5136 = vmatprep.mubr.bf16.mxu1 %v14092_v48  ;;  %5625 = vmatprep.subr.bf16.mxu1 %v9378_v49  ;;  %v9394_v49 = vcombine.high %v1252_v63, %v1256_v53  ;;  %v1272_v55 = vld [vmem:[%s16793_s3 + $0x478] sm:$0xff]  ;;  %v9408_v53 = vcombine.high %v1267_v19, %v1271_v38 }
 0x1f8   :  { %v14802_v48 = vld [vmem:[%s16793_s3 + $0xe58] sm:$0xff] }
 0x1f9   :  { %5174 = vmatpush1.bf16.msra.mxu0 %v9375_v43  ;;  %5626 = vmatpush1.bf16.msra.mxu1 %v9377_v46  ;;  %v1263_v43 = vld [vmem:[%s16793_s3 + $0x430] sm:$0xff]  ;;  %v14830_v17 = vld [vmem:[%s16793_s3 + $0xe98] sm:$0xff] }
 0x1fa   :  { %5175 = vmatprep.subr.bf16.mxu0 %v9384_v27  ;;  %5627 = vmatprep.subr.bf16.mxu1 %v9386_v57  ;;  %v1260_v27 = vld [vmem:[%s16793_s3 + $0x418] sm:$0xff]  ;;  %v9400_v56 = vcombine.high %v1259_v59, %v1263_v43 }
 0x1fb   :  { %v1264_v57 = vld [vmem:[%s16793_s3 + $0x438] sm:$0xff] }
 0x1fc   :  { %4685 = vmatmul.mubr.bf16.gmra.mrb[92].mxu0 %v14128_v34  ;;  %5137 = vmatmul.mubr.bf16.gmra.mrb[92].mxu1 %v14128_v34  ;;  %v9402_v46 = vcombine.high %v1260_v27, %v1264_v57  ;;  %v9401_v63 = vcombine.low %v1260_v27, %v1264_v57  ;;  %v1276_v27 = vld [vmem:[%s16793_s3 + $0x498] sm:$0xff] }
 0x1fd   :  { %5176 = vmatpush1.bf16.msra.mxu0 %v9383_v33  ;;  %5179 = vmatprep.mubr.bf16.mxu0 %v17404_v9  ;;  %v9399_v33 = vcombine.low %v1259_v59, %v1263_v43  ;;  %v1279_v59 = vld [vmem:[%s16793_s3 + $0x4b0] sm:$0xff]  ;;  %v9407_v43 = vcombine.low %v1267_v19, %v1271_v38  ;;  %v1280_v57 = vld [vmem:[%s16793_s3 + $0x4b8] sm:$0xff] }
 0x1fe   :  { %5628 = vmatpush1.bf16.msra.mxu1 %v9385_v32  ;;  %5631 = vmatprep.mubr.bf16.mxu1 %v17404_v9  ;;  %v1275_v32 = vld [vmem:[%s16793_s3 + $0x490] sm:$0xff] }
 0x1ff   :  { %5177 = vmatprep.subr.bf16.mxu0 %v9392_v47  ;;  %5629 = vmatprep.subr.bf16.mxu1 %v9394_v49  ;;  %v17405_v47 = vld [vmem:[#allocation11_spill] sm:$0xff]  ;;  %v9410_v49 = vcombine.high %v1268_v50, %v1272_v55  ;;  %v17406_v9 = vld [vmem:[#allocation16_spill] sm:$0xff] }
 0x200   :  { %v1283_v38 = vld [vmem:[%s16793_s3 + $0x4d0] sm:$0xff]  ;;  %17442 = vst [vmem:[#allocation11_spill] sm:$0xff] %v14926_v58 }
 0x201   :  { %5178 = vmatpush1.bf16.msra.mxu0 %v9391_v4  ;;  %v9416_v4 = vcombine.high %v1275_v32, %v1279_v59  ;;  %v1287_v19 = vld [vmem:[%s16793_s3 + $0x4f0] sm:$0xff] }
 0x202   :  { %5630 = vmatpush1.bf16.msra.mxu1 %v9393_v45  ;;  %5260 = vmatprep.subr.bf16.mxu0 %v9400_v56  ;;  %v9409_v45 = vcombine.low %v1268_v50, %v1272_v55  ;;  %v9418_v56 = vcombine.high %v1276_v27, %v1280_v57  ;;  %v1288_v50 = vld [vmem:[%s16793_s3 + $0x4f8] sm:$0xff]  ;;  %v9417_v55 = vcombine.low %v1276_v27, %v1280_v57 }
 0x203   :  { %5712 = vmatprep.subr.bf16.mxu1 %v9402_v46  ;;  %v9415_v46 = vcombine.low %v1275_v32, %v1279_v59  ;;  %v1295_v32 = vld [vmem:[%s16793_s3 + $0x530] sm:$0xff]  ;;  %v1296_v27 = vld [vmem:[%s16793_s3 + $0x538] sm:$0xff] }
 0x204   :  { %5180 = vmatmul.mubr.bf16.vlgmr.msra.gmra.mrb[96].mxu0 %v17405_v47  ;;  %v17407_v59 = vld [vmem:[#allocation17_spill] sm:$0xff]  ;;  %v17408_v57 = vld [vmem:[#allocation22_spill] sm:$0xff] }
 0x205   :  { %5261 = vmatpush1.bf16.msra.mxu0 %v9399_v33  ;;  %5632 = vmatmul.mubr.bf16.vlgmr.msra.gmra.mrb[96].mxu1 %v17405_v47  ;;  %v1284_v33 = vld [vmem:[%s16793_s3 + $0x4d8] sm:$0xff] }
 0x206   :  { %5189 = vmatprep.mubr.bf16.mxu0 %v17406_v9  ;;  %5641 = vmatprep.mubr.bf16.mxu1 %v17406_v9  ;;  %v9426_v47 = vcombine.high %v1284_v33, %v1288_v50 }
 0x207   :  { %5713 = vmatpush1.bf16.msra.mxu1 %v9401_v63  ;;  %5262 = vmatprep.subr.bf16.mxu0 %v9408_v53  ;;  %v9424_v63 = vcombine.high %v1283_v38, %v1287_v19  ;;  %v1291_v53 = vld [vmem:[%s16793_s3 + $0x510] sm:$0xff] }
 0x208   :  { %5714 = vmatprep.subr.bf16.mxu1 %v9410_v49  ;;  %v9423_v49 = vcombine.low %v1283_v38, %v1287_v19  ;;  %v9432_v9 = vcombine.high %v1291_v53, %v1295_v32  ;;  %v1303_v38 = vld [vmem:[%s16793_s3 + $0x570] sm:$0xff]  ;;  %v9431_v19 = vcombine.low %v1291_v53, %v1295_v32  ;;  %v17409_v32 = vld [vmem:[#allocation23_spill] sm:$0xff] }
 0x209   :  { %5263 = vmatpush1.bf16.msra.mxu0 %v9407_v43  ;;  %v1292_v43 = vld [vmem:[%s16793_s3 + $0x518] sm:$0xff]  ;;  %v1311_v53 = vld [vmem:[%s16793_s3 + $0x5b0] sm:$0xff] }
 0x20a   :  { %5264 = vmatprep.subr.bf16.mxu0 %v9416_v4  ;;  %v9425_v4 = vcombine.low %v1284_v33, %v1288_v50  ;;  %v1304_v33 = vld [vmem:[%s16793_s3 + $0x578] sm:$0xff]  ;;  %v9433_v50 = vcombine.low %v1292_v43, %v1296_v27 }
 0x20b   :  { %5715 = vmatpush1.bf16.msra.mxu1 %v9409_v45  ;;  %v9434_v45 = vcombine.high %v1292_v43, %v1296_v27  ;;  %v1312_v43 = vld [vmem:[%s16793_s3 + $0x5b8] sm:$0xff]  ;;  %v17410_v27 = vld [vmem:[#allocation28_spill] sm:$0xff] }
 0x20c   :  { %5190 = vmatmul.mubr.bf16.gmra.mrb[100].mxu0 %v17407_v59  ;;  %5716 = vmatprep.subr.bf16.mxu1 %v9418_v56  ;;  %v1299_v56 = vld [vmem:[%s16793_s3 + $0x550] sm:$0xff] }
 0x20d   :  { %5265 = vmatpush1.bf16.msra.mxu0 %v9415_v46  ;;  %5642 = vmatmul.mubr.bf16.gmra.mrb[100].mxu1 %v17407_v59  ;;  %v1300_v46 = vld [vmem:[%s16793_s3 + $0x558] sm:$0xff] }
 0x20e   :  { %5199 = vmatprep.mubr.bf16.mxu0 %v17408_v57  ;;  %5651 = vmatprep.mubr.bf16.mxu1 %v17408_v57  ;;  %v9442_v59 = vcombine.high %v1300_v46, %v1304_v33 }
 0x20f   :  { %5717 = vmatpush1.bf16.msra.mxu1 %v9417_v55  ;;  %5266 = vmatprep.subr.bf16.mxu0 %v9424_v63  ;;  %v9440_v55 = vcombine.high %v1299_v56, %v1303_v38  ;;  %v1307_v63 = vld [vmem:[%s16793_s3 + $0x590] sm:$0xff] }
 0x210   :  { %5718 = vmatprep.subr.bf16.mxu1 %v9426_v47  ;;  %v9439_v47 = vcombine.low %v1299_v56, %v1303_v38  ;;  %v9448_v57 = vcombine.high %v1307_v63, %v1311_v53  ;;  %v1319_v56 = vld [vmem:[%s16793_s3 + $0x5f0] sm:$0xff]  ;;  %v9447_v38 = vcombine.low %v1307_v63, %v1311_v53 }
 0x211   :  { %5267 = vmatpush1.bf16.msra.mxu0 %v9423_v49  ;;  %v1308_v49 = vld [vmem:[%s16793_s3 + $0x598] sm:$0xff]  ;;  %v1327_v63 = vld [vmem:[%s16793_s3 + $0x630] sm:$0xff] }
 0x212   :  { %5268 = vmatprep.subr.bf16.mxu0 %v9432_v9  ;;  %v9441_v9 = vcombine.low %v1300_v46, %v1304_v33  ;;  %v1320_v46 = vld [vmem:[%s16793_s3 + $0x5f8] sm:$0xff]  ;;  %v9449_v33 = vcombine.low %v1308_v49, %v1312_v43 }
 0x213   :  { %5719 = vmatpush1.bf16.msra.mxu1 %v9425_v4  ;;  %v9450_v4 = vcombine.high %v1308_v49, %v1312_v43  ;;  %v17411_v53 = vld [vmem:[#allocation29_spill] sm:$0xff]  ;;  %v17412_v43 = vld [vmem:[#allocation34_spill] sm:$0xff] }
 0x214   :  { %5200 = vmatmul.mubr.bf16.gmra.mrb[104].mxu0 %v17409_v32  ;;  %5720 = vmatprep.subr.bf16.mxu1 %v9434_v45  ;;  %v1315_v45 = vld [vmem:[%s16793_s3 + $0x5d0] sm:$0xff]  ;;  %v1328_v49 = vld [vmem:[%s16793_s3 + $0x638] sm:$0xff] }
 0x215   :  { %5269 = vmatpush1.bf16.msra.mxu0 %v9431_v19  ;;  %5652 = vmatmul.mubr.bf16.gmra.mrb[104].mxu1 %v17409_v32  ;;  %v1316_v19 = vld [vmem:[%s16793_s3 + $0x5d8] sm:$0xff] }
 0x216   :  { %5209 = vmatprep.mubr.bf16.mxu0 %v17410_v27  ;;  %5661 = vmatprep.mubr.bf16.mxu1 %v17410_v27  ;;  %v9458_v32 = vcombine.high %v1316_v19, %v1320_v46 }
 0x217   :  { %5721 = vmatpush1.bf16.msra.mxu1 %v9433_v50  ;;  %5270 = vmatprep.subr.bf16.mxu0 %v9440_v55  ;;  %v9456_v50 = vcombine.high %v1315_v45, %v1319_v56  ;;  %v1323_v55 = vld [vmem:[%s16793_s3 + $0x610] sm:$0xff] }
 0x218   :  { %5722 = vmatprep.subr.bf16.mxu1 %v9442_v59  ;;  %v9455_v59 = vcombine.low %v1315_v45, %v1319_v56  ;;  %v9464_v27 = vcombine.high %v1323_v55, %v1327_v63  ;;  %v1335_v45 = vld [vmem:[%s16793_s3 + $0x670] sm:$0xff]  ;;  %v9463_v56 = vcombine.low %v1323_v55, %v1327_v63  ;;  %v17413_v63 = vld [vmem:[#allocation35_spill] sm:$0xff] }
 0x219   :  { %5271 = vmatpush1.bf16.msra.mxu0 %v9439_v47  ;;  %v1324_v47 = vld [vmem:[%s16793_s3 + $0x618] sm:$0xff]  ;;  %v1343_v55 = vld [vmem:[%s16793_s3 + $0x6b0] sm:$0xff] }
 0x21a   :  { %5272 = vmatprep.subr.bf16.mxu0 %v9448_v57  ;;  %v9457_v57 = vcombine.low %v1316_v19, %v1320_v46  ;;  %v1336_v19 = vld [vmem:[%s16793_s3 + $0x678] sm:$0xff]  ;;  %v9465_v46 = vcombine.low %v1324_v47, %v1328_v49 }
 0x21b   :  { %5723 = vmatpush1.bf16.msra.mxu1 %v9441_v9  ;;  %v9466_v9 = vcombine.high %v1324_v47, %v1328_v49  ;;  %v1344_v47 = vld [vmem:[%s16793_s3 + $0x6b8] sm:$0xff]  ;;  %v17414_v49 = vld [vmem:[#allocation40_spill] sm:$0xff] }
 0x21c   :  { %5210 = vmatmul.mubr.bf16.gmra.mrb[108].mxu0 %v17411_v53  ;;  %5724 = vmatprep.subr.bf16.mxu1 %v9450_v4  ;;  %v1331_v4 = vld [vmem:[%s16793_s3 + $0x650] sm:$0xff] }
 0x21d   :  { %5273 = vmatpush1.bf16.msra.mxu0 %v9447_v38  ;;  %5662 = vmatmul.mubr.bf16.gmra.mrb[108].mxu1 %v17411_v53  ;;  %v1332_v38 = vld [vmem:[%s16793_s3 + $0x658] sm:$0xff] }
 0x21e   :  { %5219 = vmatprep.mubr.bf16.mxu0 %v17412_v43  ;;  %5671 = vmatprep.mubr.bf16.mxu1 %v17412_v43  ;;  %v9474_v53 = vcombine.high %v1332_v38, %v1336_v19 }
 0x21f   :  { %5725 = vmatpush1.bf16.msra.mxu1 %v9449_v33  ;;  %5274 = vmatprep.subr.bf16.mxu0 %v9456_v50  ;;  %v9472_v33 = vcombine.high %v1331_v4, %v1335_v45  ;;  %v1339_v50 = vld [vmem:[%s16793_s3 + $0x690] sm:$0xff] }
 0x220   :  { %5726 = vmatprep.subr.bf16.mxu1 %v9458_v32  ;;  %v9471_v32 = vcombine.low %v1331_v4, %v1335_v45  ;;  %v9480_v43 = vcombine.high %v1339_v50, %v1343_v55  ;;  %v1351_v4 = vld [vmem:[%s16793_s3 + $0x6f0] sm:$0xff]  ;;  %v9479_v45 = vcombine.low %v1339_v50, %v1343_v55  ;;  %v17415_v55 = vld [vmem:[#allocation42_spill] sm:$0xff] }
 0x221   :  { %5275 = vmatpush1.bf16.msra.mxu0 %v9455_v59  ;;  %v1340_v59 = vld [vmem:[%s16793_s3 + $0x698] sm:$0xff]  ;;  %v1359_v50 = vld [vmem:[%s16793_s3 + $0x730] sm:$0xff] }
 0x222   :  { %5276 = vmatprep.subr.bf16.mxu0 %v9464_v27  ;;  %v9473_v27 = vcombine.low %v1332_v38, %v1336_v19  ;;  %v1352_v38 = vld [vmem:[%s16793_s3 + $0x6f8] sm:$0xff]  ;;  %v9481_v19 = vcombine.low %v1340_v59, %v1344_v47 }
 0x223   :  { %5727 = vmatpush1.bf16.msra.mxu1 %v9457_v57  ;;  %v9482_v57 = vcombine.high %v1340_v59, %v1344_v47  ;;  %v1360_v59 = vld [vmem:[%s16793_s3 + $0x738] sm:$0xff]  ;;  %v17416_v47 = vld [vmem:[#allocation48_spill] sm:$0xff] }
 0x224   :  { %5220 = vmatmul.mubr.bf16.gmra.mrb[112].mxu0 %v17413_v63  ;;  %5728 = vmatprep.subr.bf16.mxu1 %v9466_v9  ;;  %v1347_v9 = vld [vmem:[%s16793_s3 + $0x6d0] sm:$0xff] }
 0x225   :  { %5277 = vmatpush1.bf16.msra.mxu0 %v9463_v56  ;;  %5672 = vmatmul.mubr.bf16.gmra.mrb[112].mxu1 %v17413_v63  ;;  %v1348_v56 = vld [vmem:[%s16793_s3 + $0x6d8] sm:$0xff] }
 0x226   :  { %5229 = vmatprep.mubr.bf16.mxu0 %v17414_v49  ;;  %5681 = vmatprep.mubr.bf16.mxu1 %v17414_v49  ;;  %v9490_v63 = vcombine.high %v1348_v56, %v1352_v38 }
 0x227   :  { %5729 = vmatpush1.bf16.msra.mxu1 %v9465_v46  ;;  %5278 = vmatprep.subr.bf16.mxu0 %v9472_v33  ;;  %v9488_v46 = vcombine.high %v1347_v9, %v1351_v4  ;;  %v1355_v33 = vld [vmem:[%s16793_s3 + $0x710] sm:$0xff] }
 0x228   :  { %5730 = vmatprep.subr.bf16.mxu1 %v9474_v53  ;;  %v9487_v53 = vcombine.low %v1347_v9, %v1351_v4  ;;  %v9496_v49 = vcombine.high %v1355_v33, %v1359_v50  ;;  %v1367_v9 = vld [vmem:[%s16793_s3 + $0x770] sm:$0xff]  ;;  %v9495_v4 = vcombine.low %v1355_v33, %v1359_v50  ;;  %v17417_v50 = vld [vmem:[#allocation51_spill] sm:$0xff] }
 0x229   :  { %5279 = vmatpush1.bf16.msra.mxu0 %v9471_v32  ;;  %v1356_v32 = vld [vmem:[%s16793_s3 + $0x718] sm:$0xff]  ;;  %v1375_v33 = vld [vmem:[%s16793_s3 + $0x7b0] sm:$0xff] }
 0x22a   :  { %5280 = vmatprep.subr.bf16.mxu0 %v9480_v43  ;;  %v9489_v43 = vcombine.low %v1348_v56, %v1352_v38  ;;  %v1368_v56 = vld [vmem:[%s16793_s3 + $0x778] sm:$0xff]  ;;  %v9497_v38 = vcombine.low %v1356_v32, %v1360_v59 }
 0x22b   :  { %5731 = vmatpush1.bf16.msra.mxu1 %v9473_v27  ;;  %v9498_v27 = vcombine.high %v1356_v32, %v1360_v59  ;;  %v1376_v32 = vld [vmem:[%s16793_s3 + $0x7b8] sm:$0xff] }
 0x22c   :  { %5230 = vmatmul.mubr.bf16.gmra.mrb[116].mxu0 %v17415_v55  ;;  %5732 = vmatprep.subr.bf16.mxu1 %v9482_v57  ;;  %v1363_v57 = vld [vmem:[%s16793_s3 + $0x750] sm:$0xff] }
 0x22d   :  { %5281 = vmatpush1.bf16.msra.mxu0 %v9479_v45  ;;  %5682 = vmatmul.mubr.bf16.gmra.mrb[116].mxu1 %v17415_v55  ;;  %v1364_v45 = vld [vmem:[%s16793_s3 + $0x758] sm:$0xff] }
 0x22e   :  { %5239 = vmatprep.mubr.bf16.mxu0 %v17416_v47  ;;  %5691 = vmatprep.mubr.bf16.mxu1 %v17416_v47  ;;  %v9506_v55 = vcombine.high %v1364_v45, %v1368_v56  ;;  %v17418_v59 = vld [vmem:[#allocation57_spill] sm:$0xff] }
 0x22f   :  { %5733 = vmatpush1.bf16.msra.mxu1 %v9481_v19  ;;  %5282 = vmatprep.subr.bf16.mxu0 %v9488_v46  ;;  %v9504_v19 = vcombine.high %v1363_v57, %v1367_v9  ;;  %v1371_v46 = vld [vmem:[%s16793_s3 + $0x790] sm:$0xff] }
 0x230   :  { %5734 = vmatprep.subr.bf16.mxu1 %v9490_v63  ;;  %v9503_v63 = vcombine.low %v1363_v57, %v1367_v9  ;;  %v9512_v47 = vcombine.high %v1371_v46, %v1375_v33  ;;  %v1383_v57 = vld [vmem:[%s16793_s3 + $0x7f0] sm:$0xff]  ;;  %v9511_v9 = vcombine.low %v1371_v46, %v1375_v33 }
 0x231   :  { %5283 = vmatpush1.bf16.msra.mxu0 %v9487_v53  ;;  %v1372_v53 = vld [vmem:[%s16793_s3 + $0x798] sm:$0xff]  ;;  %v1391_v46 = vld [vmem:[%s16793_s3 + $0x830] sm:$0xff] }
 0x232   :  { %5284 = vmatprep.subr.bf16.mxu0 %v9496_v49  ;;  %v9505_v49 = vcombine.low %v1364_v45, %v1368_v56  ;;  %v1384_v45 = vld [vmem:[%s16793_s3 + $0x7f8] sm:$0xff]  ;;  %v9513_v56 = vcombine.low %v1372_v53, %v1376_v32  ;;  %v17419_v33 = vld [vmem:[#allocation60_spill] sm:$0xff] }
 0x233   :  { %5735 = vmatpush1.bf16.msra.mxu1 %v9489_v43  ;;  %v9514_v43 = vcombine.high %v1372_v53, %v1376_v32  ;;  %v1392_v53 = vld [vmem:[%s16793_s3 + $0x838] sm:$0xff]  ;;  %v17420_v32 = vld [vmem:[#allocation59_spill] sm:$0xff] }
 0x234   :  { %5240 = vmatmul.mubr.bf16.gmra.mrb[120].mxu0 %v17417_v50  ;;  %5736 = vmatprep.subr.bf16.mxu1 %v9498_v27  ;;  %v1379_v27 = vld [vmem:[%s16793_s3 + $0x7d0] sm:$0xff] }
 0x235   :  { %5285 = vmatpush1.bf16.msra.mxu0 %v9495_v4  ;;  %5692 = vmatmul.mubr.bf16.gmra.mrb[120].mxu1 %v17417_v50  ;;  %v1380_v4 = vld [vmem:[%s16793_s3 + $0x7d8] sm:$0xff] }
 0x236   :  { %5249 = vmatprep.mubr.bf16.mxu0 %v17418_v59  ;;  %5701 = vmatprep.mubr.bf16.mxu1 %v17418_v59  ;;  %v9522_v50 = vcombine.high %v1380_v4, %v1384_v45 }
 0x237   :  { %5737 = vmatpush1.bf16.msra.mxu1 %v9497_v38  ;;  %5286 = vmatprep.subr.bf16.mxu0 %v9504_v19  ;;  %v9520_v38 = vcombine.high %v1379_v27, %v1383_v57  ;;  %v1387_v19 = vld [vmem:[%s16793_s3 + $0x810] sm:$0xff] }
 0x238   :  { %5738 = vmatprep.subr.bf16.mxu1 %v9506_v55  ;;  %v9519_v55 = vcombine.low %v1379_v27, %v1383_v57  ;;  %v9528_v59 = vcombine.high %v1387_v19, %v1391_v46  ;;  %v9527_v57 = vcombine.low %v1387_v19, %v1391_v46  ;;  %v1407_v19 = vld [vmem:[%s16793_s3 + $0x8b0] sm:$0xff]  ;;  %v17421_v46 = vld [vmem:[#allocation63_spill] sm:$0xff] }
 0x239   :  { %5287 = vmatpush1.bf16.msra.mxu0 %v9503_v63  ;;  %v1388_v63 = vld [vmem:[%s16793_s3 + $0x818] sm:$0xff] }
 0x23a   :  { %5288 = vmatprep.subr.bf16.mxu0 %v9512_v47  ;;  %v9521_v47 = vcombine.low %v1380_v4, %v1384_v45  ;;  %v9530_v27 = vcombine.high %v1388_v63, %v1392_v53  ;;  %v1400_v4 = vld [vmem:[%s16793_s3 + $0x878] sm:$0xff] }
 0x23b   :  { %5739 = vmatpush1.bf16.msra.mxu1 %v9505_v49  ;;  %v1395_v49 = vld [vmem:[%s16793_s3 + $0x850] sm:$0xff] }
 0x23c   :  { %5250 = vmatmul.mubr.bf16.gmra.mrb[124].mxu0 %v17419_v33  ;;  %5740 = vmatprep.subr.bf16.mxu1 %v9514_v43  ;;  %v1399_v43 = vld [vmem:[%s16793_s3 + $0x870] sm:$0xff] }
 0x23d   :  { %5289 = vmatpush1.bf16.msra.mxu0 %v9511_v9  ;;  %5702 = vmatmul.mubr.bf16.gmra.mrb[124].mxu1 %v17419_v33  ;;  %v1396_v9 = vld [vmem:[%s16793_s3 + $0x858] sm:$0xff]  ;;  %v9536_v45 = vcombine.high %v1395_v49, %v1399_v43 }
 0x23e   :  { %5292 = vmatprep.mubr.bf16.mxu0 %v17420_v32  ;;  %5744 = vmatprep.mubr.bf16.mxu1 %v17420_v32  ;;  %v9538_v33 = vcombine.high %v1396_v9, %v1400_v4 }
 0x23f   :  { %5741 = vmatpush1.bf16.msra.mxu1 %v9513_v56  ;;  %5290 = vmatprep.subr.bf16.mxu0 %v9520_v38  ;;  %v9529_v56 = vcombine.low %v1388_v63, %v1392_v53  ;;  %v1403_v38 = vld [vmem:[%s16793_s3 + $0x890] sm:$0xff]  ;;  %v9535_v63 = vcombine.low %v1395_v49, %v1399_v43  ;;  %v1408_v53 = vld [vmem:[%s16793_s3 + $0x8b8] sm:$0xff]  ;;  %v9537_v49 = vcombine.low %v1396_v9, %v1400_v4 }
 0x240   :  { %5742 = vmatprep.subr.bf16.mxu1 %v9522_v50  ;;  %v1404_v50 = vld [vmem:[%s16793_s3 + $0x898] sm:$0xff]  ;;  %v9544_v32 = vcombine.high %v1403_v38, %v1407_v19  ;;  %v1423_v9 = vld [vmem:[%s16793_s3 + $0x930] sm:$0xff] }
 0x241   :  { %5291 = vmatpush1.bf16.msra.mxu0 %v9519_v55  ;;  %v17422_v55 = vld [vmem:[#allocation66_spill] sm:$0xff]  ;;  %v9546_v43 = vcombine.high %v1404_v50, %v1408_v53 }
 0x242   :  { %5373 = vmatprep.subr.bf16.mxu0 %v9528_v59  ;;  %v1411_v59 = vld [vmem:[%s16793_s3 + $0x8d0] sm:$0xff] }
 0x243   :  { %5743 = vmatpush1.bf16.msra.mxu1 %v9521_v47  ;;  %v1415_v47 = vld [vmem:[%s16793_s3 + $0x8f0] sm:$0xff] }
 0x244   :  { %5293 = vmatmul.mubr.bf16.vlgmr.msra.gmra.mrb[96].mxu0 %v17421_v46  ;;  %5825 = vmatprep.subr.bf16.mxu1 %v9530_v27  ;;  %v1412_v27 = vld [vmem:[%s16793_s3 + $0x8d8] sm:$0xff]  ;;  %v9552_v4 = vcombine.high %v1411_v59, %v1415_v47  ;;  %v9551_v37 = vcombine.low %v1411_v59, %v1415_v47 }
 0x245   :  { %5374 = vmatpush1.bf16.msra.mxu0 %v9527_v57  ;;  %5302 = vmatprep.mubr.bf16.mxu0 %v17422_v55  ;;  %v1416_v57 = vld [vmem:[%s16793_s3 + $0x8f8] sm:$0xff] }
 0x246   :  { %5745 = vmatmul.mubr.bf16.vlgmr.msra.gmra.mrb[96].mxu1 %v17421_v46  ;;  %5375 = vmatprep.subr.bf16.mxu0 %v9536_v45  ;;  %v9543_v45 = vcombine.low %v1403_v38, %v1407_v19  ;;  %v1419_v46 = vld [vmem:[%s16793_s3 + $0x910] sm:$0xff]  ;;  %v1420_v38 = vld [vmem:[%s16793_s3 + $0x918] sm:$0xff] }
 0x247   :  { %5754 = vmatprep.mubr.bf16.mxu1 %v17422_v55  ;;  %5826 = vmatpush1.bf16.msra.mxu1 %v9529_v56  ;;  %v9545_v56 = vcombine.low %v1404_v50, %v1408_v53  ;;  %v9554_v55 = vcombine.high %v1412_v27, %v1416_v57  ;;  %v1424_v19 = vld [vmem:[%s16793_s3 + $0x938] sm:$0xff]  ;;  %v1427_v50 = vld [vmem:[%s16793_s3 + $0x950] sm:$0xff] }
 0x248   :  { %5827 = vmatprep.subr.bf16.mxu1 %v9538_v33  ;;  %v17423_v33 = vld [vmem:[#allocation69_spill] sm:$0xff] }
 0x249   :  { %5376 = vmatpush1.bf16.msra.mxu0 %v9535_v63  ;;  %v17424_v63 = vld [vmem:[#allocation73_spill] sm:$0xff] }
 0x24a   :  { %5377 = vmatprep.subr.bf16.mxu0 %v9544_v32  ;;  %v1431_v53 = vld [vmem:[%s16793_s3 + $0x970] sm:$0xff]  ;;  %v9560_v32 = vcombine.high %v1419_v46, %v1423_v9  ;;  %v1428_v59 = vld [vmem:[%s16793_s3 + $0x958] sm:$0xff] }
 0x24b   :  { %5828 = vmatpush1.bf16.msra.mxu1 %v9537_v49  ;;  %v9553_v49 = vcombine.low %v1412_v27, %v1416_v57  ;;  %v1432_v47 = vld [vmem:[%s16793_s3 + $0x978] sm:$0xff]  ;;  %v1439_v27 = vld [vmem:[%s16793_s3 + $0x9b0] sm:$0xff]  ;;  %v9568_v57 = vcombine.high %v1427_v50, %v1431_v53 }
 0x24c   :  { %5303 = vmatmul.mubr.bf16.gmra.mrb[100].mxu0 %v17423_v33  ;;  %5829 = vmatprep.subr.bf16.mxu1 %v9546_v43  ;;  %v9562_v43 = vcombine.high %v1420_v38, %v1424_v19 }
 0x24d   :  { %5378 = vmatpush1.bf16.msra.mxu0 %v9543_v45  ;;  %5312 = vmatprep.mubr.bf16.mxu0 %v17424_v63  ;;  %v9559_v45 = vcombine.low %v1419_v46, %v1423_v9  ;;  %v1436_v46 = vld [vmem:[%s16793_s3 + $0x998] sm:$0xff] }
 0x24e   :  { %5755 = vmatmul.mubr.bf16.gmra.mrb[100].mxu1 %v17423_v33  ;;  %5379 = vmatprep.subr.bf16.mxu0 %v9552_v4  ;;  %v1435_v4 = vld [vmem:[%s16793_s3 + $0x990] sm:$0xff]  ;;  %v1440_v9 = vld [vmem:[%s16793_s3 + $0x9b8] sm:$0xff] }
 0x24f   :  { %5764 = vmatprep.mubr.bf16.mxu1 %v17424_v63  ;;  %5830 = vmatpush1.bf16.msra.mxu1 %v9545_v56  ;;  %v9561_v56 = vcombine.low %v1420_v38, %v1424_v19  ;;  %v17425_v33 = vld [vmem:[#allocation77_spill] sm:$0xff]  ;;  %v9576_v38 = vcombine.high %v1435_v4, %v1439_v27  ;;  %v9569_v19 = vcombine.low %v1428_v59, %v1432_v47 }
 0x250   :  { %5831 = vmatprep.subr.bf16.mxu1 %v9554_v55  ;;  %v9570_v55 = vcombine.high %v1428_v59, %v1432_v47  ;;  %v17426_v63 = vld [vmem:[#allocation81_spill] sm:$0xff]  ;;  %v9575_v59 = vcombine.low %v1435_v4, %v1439_v27 }
 0x251   :  { %5380 = vmatpush1.bf16.msra.mxu0 %v9551_v37  ;;  %v9567_v37 = vcombine.low %v1427_v50, %v1431_v53  ;;  %v1443_v50 = vld [vmem:[%s16793_s3 + $0x9d0] sm:$0xff]  ;;  %v1452_v27 = vld [vmem:[%s16793_s3 + $0xa18] sm:$0xff] }
 0x252   :  { %5381 = vmatprep.subr.bf16.mxu0 %v9560_v32  ;;  %v1447_v53 = vld [vmem:[%s16793_s3 + $0x9f0] sm:$0xff]  ;;  %v1444_v32 = vld [vmem:[%s16793_s3 + $0x9d8] sm:$0xff] }
 0x253   :  { %5832 = vmatpush1.bf16.msra.mxu1 %v9553_v49  ;;  %v9578_v49 = vcombine.high %v1436_v46, %v1440_v9  ;;  %v1451_v47 = vld [vmem:[%s16793_s3 + $0xa10] sm:$0xff]  ;;  %v9583_v4 = vcombine.low %v1443_v50, %v1447_v53 }
 0x254   :  { %5313 = vmatmul.mubr.bf16.gmra.mrb[104].mxu0 %v17425_v33  ;;  %5833 = vmatprep.subr.bf16.mxu1 %v9562_v43  ;;  %v1448_v43 = vld [vmem:[%s16793_s3 + $0x9f8] sm:$0xff] }
 0x255   :  { %5382 = vmatpush1.bf16.msra.mxu0 %v9559_v45  ;;  %5322 = vmatprep.mubr.bf16.mxu0 %v17426_v63  ;;  %v1455_v45 = vld [vmem:[%s16793_s3 + $0xa30] sm:$0xff] }
 0x256   :  { %5765 = vmatmul.mubr.bf16.gmra.mrb[104].mxu1 %v17425_v33  ;;  %5383 = vmatprep.subr.bf16.mxu0 %v9568_v57  ;;  %v9584_v57 = vcombine.high %v1443_v50, %v1447_v53  ;;  %v17427_v33 = vld [vmem:[#allocation87_spill] sm:$0xff]  ;;  %v1460_v50 = vld [vmem:[%s16793_s3 + $0xa58] sm:$0xff] }
 0x257   :  { %5774 = vmatprep.mubr.bf16.mxu1 %v17426_v63  ;;  %5834 = vmatpush1.bf16.msra.mxu1 %v9561_v56  ;;  %v9577_v56 = vcombine.low %v1436_v46, %v1440_v9  ;;  %v17428_v63 = vld [vmem:[#allocation91_spill] sm:$0xff]  ;;  %v9592_v46 = vcombine.high %v1451_v47, %v1455_v45  ;;  %v9585_v9 = vcombine.low %v1444_v32, %v1448_v43 }
 0x258   :  { %5835 = vmatprep.subr.bf16.mxu1 %v9570_v55  ;;  %v9586_v55 = vcombine.high %v1444_v32, %v1448_v43  ;;  %v9591_v32 = vcombine.low %v1451_v47, %v1455_v45  ;;  %v1467_v43 = vld [vmem:[%s16793_s3 + $0xa90] sm:$0xff]  ;;  %v1468_v45 = vld [vmem:[%s16793_s3 + $0xa98] sm:$0xff] }
 0x259   :  { %5384 = vmatpush1.bf16.msra.mxu0 %v9567_v37  ;;  %v1456_v37 = vld [vmem:[%s16793_s3 + $0xa38] sm:$0xff] }
 0x25a   :  { %5385 = vmatprep.subr.bf16.mxu0 %v9576_v38  ;;  %v1459_v38 = vld [vmem:[%s16793_s3 + $0xa50] sm:$0xff]  ;;  %v9594_v53 = vcombine.high %v1452_v27, %v1456_v37 }
 0x25b   :  { %5836 = vmatpush1.bf16.msra.mxu1 %v9569_v19  ;;  %v1463_v19 = vld [vmem:[%s16793_s3 + $0xa70] sm:$0xff] }
 0x25c   :  { %5323 = vmatmul.mubr.bf16.gmra.mrb[108].mxu0 %v17427_v33  ;;  %5837 = vmatprep.subr.bf16.mxu1 %v9578_v49  ;;  %v1464_v49 = vld [vmem:[%s16793_s3 + $0xa78] sm:$0xff]  ;;  %v9599_v47 = vcombine.low %v1459_v38, %v1463_v19 }
 0x25d   :  { %5386 = vmatpush1.bf16.msra.mxu0 %v9575_v59  ;;  %5332 = vmatprep.mubr.bf16.mxu0 %v17428_v63  ;;  %v1471_v59 = vld [vmem:[%s16793_s3 + $0xab0] sm:$0xff] }
 0x25e   :  { %5775 = vmatmul.mubr.bf16.gmra.mrb[108].mxu1 %v17427_v33  ;;  %5387 = vmatprep.subr.bf16.mxu0 %v9584_v57  ;;  %v9600_v57 = vcombine.high %v1459_v38, %v1463_v19  ;;  %v17429_v33 = vld [vmem:[#allocation97_spill] sm:$0xff] }
 0x25f   :  { %5784 = vmatprep.mubr.bf16.mxu1 %v17428_v63  ;;  %5838 = vmatpush1.bf16.msra.mxu1 %v9577_v56  ;;  %v9593_v56 = vcombine.low %v1452_v27, %v1456_v37  ;;  %v17430_v63 = vld [vmem:[#allocation101_spill] sm:$0xff]  ;;  %v9608_v27 = vcombine.high %v1467_v43, %v1471_v59  ;;  %v9601_v37 = vcombine.low %v1460_v50, %v1464_v49 }
 0x260   :  { %5839 = vmatprep.subr.bf16.mxu1 %v9586_v55  ;;  %v9602_v55 = vcombine.high %v1460_v50, %v1464_v49  ;;  %v1476_v38 = vld [vmem:[%s16793_s3 + $0xad8] sm:$0xff]  ;;  %v9607_v50 = vcombine.low %v1467_v43, %v1471_v59  ;;  %v1483_v49 = vld [vmem:[%s16793_s3 + $0xb10] sm:$0xff] }
 0x261   :  { %5388 = vmatpush1.bf16.msra.mxu0 %v9583_v4  ;;  %v1472_v4 = vld [vmem:[%s16793_s3 + $0xab8] sm:$0xff] }
 0x262   :  { %5389 = vmatprep.subr.bf16.mxu0 %v9592_v46  ;;  %v1475_v46 = vld [vmem:[%s16793_s3 + $0xad0] sm:$0xff]  ;;  %v9610_v19 = vcombine.high %v1468_v45, %v1472_v4  ;;  %v1484_v59 = vld [vmem:[%s16793_s3 + $0xb18] sm:$0xff] }
 0x263   :  { %5840 = vmatpush1.bf16.msra.mxu1 %v9585_v9  ;;  %v1479_v9 = vld [vmem:[%s16793_s3 + $0xaf0] sm:$0xff] }
 0x264   :  { %5333 = vmatmul.mubr.bf16.gmra.mrb[112].mxu0 %v17429_v33  ;;  %5841 = vmatprep.subr.bf16.mxu1 %v9594_v53  ;;  %v1480_v53 = vld [vmem:[%s16793_s3 + $0xaf8] sm:$0xff]  ;;  %v9615_v43 = vcombine.low %v1475_v46, %v1479_v9 }
 0x265   :  { %5390 = vmatpush1.bf16.msra.mxu0 %v9591_v32  ;;  %5342 = vmatprep.mubr.bf16.mxu0 %v17430_v63  ;;  %v1487_v32 = vld [vmem:[%s16793_s3 + $0xb30] sm:$0xff] }
 0x266   :  { %5785 = vmatmul.mubr.bf16.gmra.mrb[112].mxu1 %v17429_v33  ;;  %5391 = vmatprep.subr.bf16.mxu0 %v9600_v57  ;;  %v9616_v57 = vcombine.high %v1475_v46, %v1479_v9  ;;  %v17431_v33 = vld [vmem:[#allocation107_spill] sm:$0xff]  ;;  %v1492_v46 = vld [vmem:[%s16793_s3 + $0xb58] sm:$0xff] }
 0x267   :  { %5794 = vmatprep.mubr.bf16.mxu1 %v17430_v63  ;;  %5842 = vmatpush1.bf16.msra.mxu1 %v9593_v56  ;;  %v9609_v56 = vcombine.low %v1468_v45, %v1472_v4  ;;  %v17432_v63 = vld [vmem:[#allocation111_spill] sm:$0xff]  ;;  %v9624_v45 = vcombine.high %v1483_v49, %v1487_v32  ;;  %v9617_v4 = vcombine.low %v1476_v38, %v1480_v53 }
 0x268   :  { %5843 = vmatprep.subr.bf16.mxu1 %v9602_v55  ;;  %v9618_v55 = vcombine.high %v1476_v38, %v1480_v53  ;;  %v9623_v38 = vcombine.low %v1483_v49, %v1487_v32  ;;  %v1499_v53 = vld [vmem:[%s16793_s3 + $0xb90] sm:$0xff]  ;;  %v1500_v32 = vld [vmem:[%s16793_s3 + $0xb98] sm:$0xff] }
 0x269   :  { %5392 = vmatpush1.bf16.msra.mxu0 %v9599_v47  ;;  %v1488_v47 = vld [vmem:[%s16793_s3 + $0xb38] sm:$0xff] }
 0x26a   :  { %5393 = vmatprep.subr.bf16.mxu0 %v9608_v27  ;;  %v1491_v27 = vld [vmem:[%s16793_s3 + $0xb50] sm:$0xff]  ;;  %v9626_v9 = vcombine.high %v1484_v59, %v1488_v47 }
 0x26b   :  { %5844 = vmatpush1.bf16.msra.mxu1 %v9601_v37  ;;  %v1495_v37 = vld [vmem:[%s16793_s3 + $0xb70] sm:$0xff] }
 0x26c   :  { %5343 = vmatmul.mubr.bf16.gmra.mrb[116].mxu0 %v17431_v33  ;;  %5845 = vmatprep.subr.bf16.mxu1 %v9610_v19  ;;  %v1496_v19 = vld [vmem:[%s16793_s3 + $0xb78] sm:$0xff]  ;;  %v9631_v49 = vcombine.low %v1491_v27, %v1495_v37 }
 0x26d   :  { %5394 = vmatpush1.bf16.msra.mxu0 %v9607_v50  ;;  %5352 = vmatprep.mubr.bf16.mxu0 %v17432_v63  ;;  %v1503_v50 = vld [vmem:[%s16793_s3 + $0xbb0] sm:$0xff] }
 0x26e   :  { %5795 = vmatmul.mubr.bf16.gmra.mrb[116].mxu1 %v17431_v33  ;;  %5395 = vmatprep.subr.bf16.mxu0 %v9616_v57  ;;  %v9632_v57 = vcombine.high %v1491_v27, %v1495_v37  ;;  %v17433_v33 = vld [vmem:[#allocation117_spill] sm:$0xff] }
 0x26f   :  { %5804 = vmatprep.mubr.bf16.mxu1 %v17432_v63  ;;  %5846 = vmatpush1.bf16.msra.mxu1 %v9609_v56  ;;  %v9625_v56 = vcombine.low %v1484_v59, %v1488_v47  ;;  %v17434_v63 = vld [vmem:[#allocation121_spill] sm:$0xff]  ;;  %v9640_v59 = vcombine.high %v1499_v53, %v1503_v50  ;;  %v9633_v47 = vcombine.low %v1492_v46, %v1496_v19 }
 0x270   :  { %5847 = vmatprep.subr.bf16.mxu1 %v9618_v55  ;;  %v9634_v55 = vcombine.high %v1492_v46, %v1496_v19  ;;  %v1508_v27 = vld [vmem:[%s16793_s3 + $0xbd8] sm:$0xff]  ;;  %v9639_v46 = vcombine.low %v1499_v53, %v1503_v50  ;;  %v1515_v19 = vld [vmem:[%s16793_s3 + $0xc10] sm:$0xff] }
 0x271   :  { %5396 = vmatpush1.bf16.msra.mxu0 %v9615_v43  ;;  %v1504_v43 = vld [vmem:[%s16793_s3 + $0xbb8] sm:$0xff] }
 0x272   :  { %5397 = vmatprep.subr.bf16.mxu0 %v9624_v45  ;;  %v1507_v45 = vld [vmem:[%s16793_s3 + $0xbd0] sm:$0xff]  ;;  %v9642_v37 = vcombine.high %v1500_v32, %v1504_v43  ;;  %v1516_v50 = vld [vmem:[%s16793_s3 + $0xc18] sm:$0xff] }
 0x273   :  { %5848 = vmatpush1.bf16.msra.mxu1 %v9617_v4  ;;  %v1511_v4 = vld [vmem:[%s16793_s3 + $0xbf0] sm:$0xff] }
 0x274   :  { %5353 = vmatmul.mubr.bf16.gmra.mrb[120].mxu0 %v17433_v33  ;;  %5849 = vmatprep.subr.bf16.mxu1 %v9626_v9  ;;  %v1512_v9 = vld [vmem:[%s16793_s3 + $0xbf8] sm:$0xff]  ;;  %v9647_v53 = vcombine.low %v1507_v45, %v1511_v4 }
 0x275   :  { %5398 = vmatpush1.bf16.msra.mxu0 %v9623_v38  ;;  %5362 = vmatprep.mubr.bf16.mxu0 %v17434_v63  ;;  %v1519_v38 = vld [vmem:[%s16793_s3 + $0xc30] sm:$0xff] }
 0x276   :  { %5805 = vmatmul.mubr.bf16.gmra.mrb[120].mxu1 %v17433_v33  ;;  %5399 = vmatprep.subr.bf16.mxu0 %v9632_v57  ;;  %v9648_v57 = vcombine.high %v1507_v45, %v1511_v4  ;;  %v17435_v33 = vld [vmem:[#allocation127_spill] sm:$0xff]  ;;  %v1528_v4 = vld [vmem:[%s16793_s3 + $0xc78] sm:$0xff] }
 0x277   :  { %5814 = vmatprep.mubr.bf16.mxu1 %v17434_v63  ;;  %5850 = vmatpush1.bf16.msra.mxu1 %v9625_v56  ;;  %v9641_v56 = vcombine.low %v1500_v32, %v1504_v43  ;;  %v1520_v63 = vld [vmem:[%s16793_s3 + $0xc38] sm:$0xff]  ;;  %v9649_v32 = vcombine.low %v1508_v27, %v1512_v9  ;;  %v1523_v43 = vld [vmem:[%s16793_s3 + $0xc50] sm:$0xff] }
 0x278   :  { %5851 = vmatprep.subr.bf16.mxu1 %v9634_v55  ;;  %v9650_v55 = vcombine.high %v1508_v27, %v1512_v9  ;;  %v9658_v45 = vcombine.high %v1516_v50, %v1520_v63  ;;  %v1531_v27 = vld [vmem:[%s16793_s3 + $0xc90] sm:$0xff] }
 0x279   :  { %5400 = vmatpush1.bf16.msra.mxu0 %v9631_v49  ;;  %v9656_v49 = vcombine.high %v1515_v19, %v1519_v38 }
 0x27a   :  { %5401 = vmatprep.subr.bf16.mxu0 %v9640_v59  ;;  %v1527_v59 = vld [vmem:[%s16793_s3 + $0xc70] sm:$0xff] }
 0x27b   :  { %5852 = vmatpush1.bf16.msra.mxu1 %v9633_v47  ;;  %v1524_v47 = vld [vmem:[%s16793_s3 + $0xc58] sm:$0xff]  ;;  %v9664_v9 = vcombine.high %v1523_v43, %v1527_v59 }
 0x27c   :  { %5363 = vmatmul.mubr.bf16.gmra.mrb[124].mxu0 %v17435_v33  ;;  %5853 = vmatprep.subr.bf16.mxu1 %v9642_v37  ;;  %v1535_v37 = vld [vmem:[%s16793_s3 + $0xcb0] sm:$0xff] }
 0x27d   :  { %5402 = vmatpush1.bf16.msra.mxu0 %v9639_v46  ;;  %5405 = vmatprep.mubr.bf16.mxu0 %v13174_v62  ;;  %v9657_v46 = vcombine.low %v1516_v50, %v1520_v63  ;;  %v9665_v50 = vcombine.low %v1524_v47, %v1528_v4  ;;  %v14639_v63 = vld [vmem:[%s16793_s3 + $0xcd8] sm:$0xff] }
 0x27e   :  { %5815 = vmatmul.mubr.bf16.gmra.mrb[124].mxu1 %v17435_v33  ;;  %5403 = vmatprep.subr.bf16.mxu0 %v9648_v57  ;;  %v9666_v57 = vcombine.high %v1524_v47, %v1528_v4  ;;  %v14627_v33 = vld [vmem:[%s16793_s3 + $0xcd0] sm:$0xff]  ;;  %v9671_v47 = vcombine.low %v1531_v27, %v1535_v37 }
 0x27f   :  { %5854 = vmatpush1.bf16.msra.mxu1 %v9641_v56  ;;  %5857 = vmatprep.mubr.bf16.mxu1 %v13174_v62  ;;  %v9655_v62 = vcombine.low %v1515_v19, %v1519_v38  ;;  %v14616_v19 = vld [vmem:[%s16793_s3 + $0xc98] sm:$0xff]  ;;  %v9663_v56 = vcombine.low %v1523_v43, %v1527_v59  ;;  %v14674_v4 = vld [vmem:[%s16793_s3 + $0xd50] sm:$0xff] }
 0x280   :  { %5855 = vmatprep.subr.bf16.mxu1 %v9650_v55  ;;  %v14621_v38 = vld [vmem:[%s16793_s3 + $0xcb8] sm:$0xff]  ;;  %v14632_v55 = vld [vmem:[%s16793_s3 + $0xcf0] sm:$0xff] }
 0x281   :  { %5404 = vmatpush1.bf16.msra.mxu0 %v9647_v53  ;;  %v9672_v53 = vcombine.high %v1531_v27, %v1535_v37  ;;  %v14661_v43 = vld [vmem:[%s16793_s3 + $0xd18] sm:$0xff]  ;;  %v9673_v27 = vcombine.low %v14616_v19, %v14621_v38  ;;  %v9679_v37 = vcombine.low %v14627_v33, %v14632_v55 }
 0x282   :  { %5486 = vmatprep.subr.bf16.mxu0 %v9656_v49  ;;  %v14644_v49 = vld [vmem:[%s16793_s3 + $0xcf8] sm:$0xff] }
 0x283   :  { %5856 = vmatpush1.bf16.msra.mxu1 %v9649_v32  ;;  %v9674_v32 = vcombine.high %v14616_v19, %v14621_v38  ;;  %v14666_v59 = vld [vmem:[%s16793_s3 + $0xd38] sm:$0xff]  ;;  %v14705_v19 = vld [vmem:[%s16793_s3 + $0xdb0] sm:$0xff]  ;;  %v9681_v38 = vcombine.low %v14639_v63, %v14644_v49 }
 0x284   :  { %5406 = vmatmul.mubr.bf16.vlgmr.msra.gmra.mrb[96].mxu0 %v13226_v61  ;;  %5938 = vmatprep.subr.bf16.mxu1 %v9658_v45  ;;  %v1641_v45 = vld [vmem:[%s16796_s4] sm:$0xff]  ;;  %v9690_v39 = vcombine.high %v14661_v43, %v14666_v59 }
 0x285   :  { %5487 = vmatpush1.bf16.msra.mxu0 %v9655_v62  ;;  %5415 = vmatprep.mubr.bf16.mxu0 %v13240_v52  ;;  %v14679_v62 = vld [vmem:[%s16793_s3 + $0xd70] sm:$0xff]  ;;  %v14763_v13 = vrot.slane %v1641_v45, %v17436_v11  ;;  %v14766_v15 = vrot.slane %v1641_v45, %v17437_v29  ;;  %v14797_v34 = vrot.slane %v1641_v45, %v17439_v51 }
 0x286   :  { %5858 = vmatmul.mubr.bf16.vlgmr.msra.gmra.mrb[96].mxu1 %v13226_v61  ;;  %5488 = vmatprep.subr.bf16.mxu0 %v9664_v9  ;;  %v14649_v61 = vld [vmem:[%s16793_s3 + $0xd10] sm:$0xff]  ;;  %v9680_v9 = vcombine.high %v14627_v33, %v14632_v55  ;;  %v9682_v33 = vcombine.high %v14639_v63, %v14644_v49  ;;  %v9696_v42 = vcombine.high %v14674_v4, %v14679_v62 }
 0x287   :  { %5867 = vmatprep.mubr.bf16.mxu1 %v13240_v52  ;;  %5939 = vmatpush1.bf16.msra.mxu1 %v9657_v46  ;;  %v14654_v52 = vld [vmem:[%s16793_s3 + $0xd30] sm:$0xff]  ;;  %v14690_v46 = vld [vmem:[%s16793_s3 + $0xd58] sm:$0xff] }
 0x288   :  { %5940 = vmatprep.subr.bf16.mxu1 %v9666_v57  ;;  %v14695_v57 = vld [vmem:[%s16793_s3 + $0xd78] sm:$0xff]  ;;  %v14732_v63 = vld [vmem:[%s16793_s3 + $0xdf0] sm:$0xff]  ;;  %v9688_v49 = vcombine.high %v14649_v61, %v14654_v52  ;;  %v17441_v35 = vcombine.low %v14649_v61, %v14654_v52 }
 0x289   :  { %5489 = vmatpush1.bf16.msra.mxu0 %v9663_v56  ;;  %v14700_v56 = vld [vmem:[%s16793_s3 + $0xd90] sm:$0xff]  ;;  %v9698_v29 = vcombine.high %v14690_v46, %v14695_v57 }
 0x28a   :  { %5490 = vmatprep.subr.bf16.mxu0 %v9672_v53  ;;  %v14717_v53 = vld [vmem:[%s16793_s3 + $0xd98] sm:$0xff]  ;;  %v14759_v55 = vld [vmem:[%s16793_s3 + $0xe30] sm:$0xff]  ;;  %v17453_v16 = vcombine.low %v14700_v56, %v14705_v19 }
 0x28b   :  { %5941 = vmatpush1.bf16.msra.mxu1 %v9665_v50  ;;  %v14722_v50 = vld [vmem:[%s16793_s3 + $0xdb8] sm:$0xff]  ;;  %v17438_v11 = vld [vmem:[#allocation4_spill] sm:$0xff] }
 0x28c   :  { %5416 = vmatmul.mubr.bf16.gmra.mrb[100].mxu0 %v13286_v7  ;;  %5942 = vmatprep.subr.bf16.mxu1 %v9674_v32  ;;  %v14727_v32 = vld [vmem:[%s16793_s3 + $0xdd0] sm:$0xff]  ;;  %v14794_v30 = vrot.slane %v1641_v45, %v17438_v11  ;;  %v14863_v11 = vld [vmem:[%s16793_s3 + $0xef8] sm:$0xff] }
 0x28d   :  { %5491 = vmatpush1.bf16.msra.mxu0 %v9671_v47  ;;  %5425 = vmatprep.mubr.bf16.mxu0 %v13300_v31  ;;  %v14749_v47 = vld [vmem:[%s16793_s3 + $0xdf8] sm:$0xff]  ;;  %v14817_v45 = vld [vmem:[%s16793_s3 + $0xeb0] sm:$0xff] }
 0x28e   :  { %5868 = vmatmul.mubr.bf16.gmra.mrb[100].mxu1 %v13286_v7  ;;  %5492 = vmatprep.subr.bf16.mxu0 %v9680_v9  ;;  %v14783_v7 = vld [vmem:[%s16793_s3 + $0xe50] sm:$0xff] }
 0x28f   :  { %v14788_v9 = vld [vmem:[%s16793_s3 + $0xe70] sm:$0xff]  ;;  %5877 = vmatprep.mubr.bf16.mxu1 %v13300_v31  ;;  %5943 = vmatpush1.bf16.msra.mxu1 %v9673_v27  ;;  %v14858_v27 = vld [vmem:[%s16793_s3 + $0xed8] sm:$0xff] }
 0x290   :  { %v14812_v31 = vld [vmem:[%s16793_s3 + $0xe90] sm:$0xff]  ;;  %5944 = vmatprep.subr.bf16.mxu1 %v9682_v33  ;;  %v14835_v33 = vld [vmem:[%s16793_s3 + $0xeb8] sm:$0xff] }
 0x291   :  { %5493 = vmatpush1.bf16.msra.mxu0 %v9679_v37  ;;  %v14853_v37 = vld [vmem:[%s16793_s3 + $0xef0] sm:$0xff] }
 0x292   :  { %5494 = vmatprep.subr.bf16.mxu0 %v9688_v49  ;;  %v14881_v49 = vld [vmem:[%s16793_s3 + $0xf30] sm:$0xff] }
 0x293   :  { %5945 = vmatpush1.bf16.msra.mxu1 %v9681_v38  ;;  %v17443_v38 = vcombine.low %v14661_v43, %v14666_v59  ;;  %v17445_v43 = vcombine.low %v14674_v4, %v14679_v62  ;;  %v17446_v4 = vcombine.high %v14700_v56, %v14705_v19  ;;  %v17463_v19 = vld [vmem:[#allocation9_spill] sm:$0xff] }
 0x294   :  { %5426 = vmatmul.mubr.bf16.gmra.mrb[104].mxu0 %v13346_v25  ;;  %5946 = vmatprep.subr.bf16.mxu1 %v9690_v39  ;;  %v14911_v39 = vld [vmem:[%s16793_s3 + $0xf50] sm:$0xff] }
 0x295   :  { %17440 = vst [vmem:[#allocation10_spill] sm:$0xff] %v14911_v39  ;;  %5495 = vmatpush1.bf16.msra.mxu0 %v17441_v35  ;;  %5435 = vmatprep.mubr.bf16.mxu0 %v13360_v1  ;;  %v17447_v35 = vcombine.low %v14690_v46, %v14695_v57  ;;  %v17449_v46 = vld [vmem:[#allocation7_spill] sm:$0xff]  ;;  %v17456_v39 = vld [vmem:[#allocation8_spill] sm:$0xff] }
 0x296   :  { %5878 = vmatmul.mubr.bf16.gmra.mrb[104].mxu1 %v13346_v25  ;;  %5496 = vmatprep.subr.bf16.mxu0 %v9696_v42  ;;  %v17450_v57 = vmax.f32 %v17449_v46, 0.0  ;;  %v17457_v26 = vmax.f32 %v17456_v39, 0.0 }
 0x297   :  { %5887 = vmatprep.mubr.bf16.mxu1 %v13360_v1  ;;  %5947 = vmatpush1.bf16.msra.mxu1 %v17443_v38  ;;  %v4616_v18 = vpop.f32.mrb[64].mxu0  ;;  %v5068_v51 = vpop.f32.mrb[64].mxu1  ;;  %v14954_v38 = vld [vmem:[%s16793_s3 + $0xf58] sm:$0xff] }
 0x298   :  { %v10052_v61 = vadd.f32 %v4616_v18, %v14763_v13  ;;  %v10084_v52 = vadd.f32 %v5068_v51, %v14766_v15  ;;  %v4618_v1 = vpop.f32.mrb[65].mxu0  ;;  %v5070_v40 = vpop.f32.mrb[65].mxu1  ;;  %5948 = vmatprep.subr.bf16.mxu1 %v9698_v29  ;;  %v14959_v18 = vld [vmem:[%s16793_s3 + $0xf78] sm:$0xff] }
 0x299   :  { %17444 = vst [vmem:[#allocation16_spill] sm:$0xff] %v14959_v18  ;;  %v10053_v51 = vadd.f32 %v4618_v1, %v14794_v30  ;;  %v10085_v29 = vadd.f32 %v5070_v40, %v14797_v34  ;;  %5497 = vmatpush1.bf16.msra.mxu0 %v17445_v43  ;;  %v4620_v42 = vpop.f32.mrb[66].mxu0  ;;  %v5072_v59 = vpop.f32.mrb[66].mxu1  ;;  %v17458_v18 = vld [vmem:[#allocation58_spill] sm:$0xff] }
 0x29a   :  { %v6051_v36 = vmax.f32 %v10052_v61, 0.0  ;;  %v6053_v54 = vmax.f32 %v10084_v52, 0.0  ;;  %v10054_v24 = vadd.f32 %v4620_v42, %v14763_v13  ;;  %v10086_v1 = vadd.f32 %v5072_v59, %v14766_v15  ;;  %v4622_v21 = vpop.f32.mrb[67].mxu0  ;;  %v5074_v40 = vpop.f32.mrb[67].mxu1  ;;  %5498 = vmatprep.subr.bf16.mxu0 %v17446_v4 }
 0x29b   :  { %v6052_v62 = vmax.f32 %v10053_v51, 0.0  ;;  %v6054_v43 = vmax.f32 %v10085_v29, 0.0  ;;  %5949 = vmatpush1.bf16.msra.mxu1 %v17447_v35  ;;  %v10055_v25 = vadd.f32 %v4622_v21, %v14794_v30  ;;  %v10087_v61 = vadd.f32 %v5074_v40, %v14797_v34  ;;  %v17451_v21 = vld [vmem:[#allocation56_spill] sm:$0xff] }
 0x29c   :  { %v6059_v52 = vmax.f32 %v10054_v24, 0.0  ;;  %v6061_v42 = vmax.f32 %v10086_v1, 0.0  ;;  %5436 = vmatmul.mubr.bf16.gmra.mrb[108].mxu0 %v13406_v6  ;;  %v17448_v59 = vcombine.high %v14717_v53, %v14722_v50  ;;  %v6179_v35 = vadd.f32 %v6051_v36, %v17450_v57 }
 0x29d   :  { %v17452_v4 = vmax.f32 %v17451_v21, 0.0  ;;  %v6060_v24 = vmax.f32 %v10055_v25, 0.0  ;;  %v6062_v1 = vmax.f32 %v10087_v61, 0.0  ;;  %5499 = vmatpush1.bf16.msra.mxu0 %v17453_v16  ;;  %5445 = vmatprep.mubr.bf16.mxu0 %v13420_v10  ;;  %v17459_v46 = vmax.f32 %v17458_v18, 0.0  ;;  %v17461_v25 = vld [vmem:[#allocation49_spill] sm:$0xff]  ;;  %v17465_v21 = vld [vmem:[#allocation50_spill] sm:$0xff] }
 0x29e   :  { %5950 = vmatprep.subr.bf16.mxu1 %v17448_v59  ;;  %v17454_v59 = vld [vmem:[#allocation6_spill] sm:$0xff]  ;;  %v6187_v29 = vadd.f32 %v6059_v52, %v17457_v26  ;;  %5888 = vmatmul.mubr.bf16.gmra.mrb[108].mxu1 %v13406_v6  ;;  %v17462_v56 = vmax.f32 %v17461_v25, 0.0  ;;  %v17464_v61 = vmax.f32 %v17463_v19, 0.0  ;;  %v17467_v26 = vcombine.low %v14717_v53, %v14722_v50  ;;  %v15033_v53 = vld [vmem:[%s16793_s3 + $0xfb0] sm:$0xff] }
 0x29f   :  { %v6181_v40 = vadd.f32 %v6053_v54, %v17452_v4  ;;  %v17455_v58 = vmax.f32 %v17454_v59, 0.0  ;;  %v6189_v36 = vadd.f32 %v6061_v42, %v17459_v46  ;;  %v17460_v54 = vcombine.high %v14727_v32, %v14732_v63  ;;  %5897 = vmatprep.mubr.bf16.mxu1 %v13420_v10  ;;  %v4626_v6 = vpop.f32.mrb[68].mxu0  ;;  %v5078_v39 = vpop.f32.mrb[68].mxu1  ;;  %v15028_v10 = vld [vmem:[%s16793_s3 + $0xf90] sm:$0xff] }
 0x2a0   :  { %v6182_v16 = vadd.f32 %v6054_v43, %v17462_v56  ;;  %v6188_v57 = vadd.f32 %v6060_v24, %v17464_v61  ;;  %5951 = vmatpush1.bf16.msra.mxu1 %v17467_v26  ;;  %v15016_v18 = vpack.c.bf16 %v6187_v29, %v6179_v35  ;;  %v10056_v43 = vadd.f32 %v4626_v6, %v14763_v13  ;;  %v4628_v4 = vpop.f32.mrb[69].mxu0  ;;  %v5080_v24 = vpop.f32.mrb[69].mxu1 }
 0x2a1   :  { %v6180_v51 = vadd.f32 %v6052_v62, %v17455_v58  ;;  %5500 = vmatprep.subr.bf16.mxu0 %v17460_v54  ;;  %v17466_v58 = vmax.f32 %v17465_v21, 0.0  ;;  %v15018_v52 = vpack.c.bf16 %v6189_v36, %v6181_v40  ;;  %v10088_v42 = vadd.f32 %v5078_v39, %v14766_v15  ;;  %v4630_v40 = vpop.f32.mrb[70].mxu0  ;;  %v5082_v59 = vpop.f32.mrb[70].mxu1 }
 0x2a2   :  { %v10057_v50 = vadd.f32 %v4628_v4, %v14794_v30  ;;  %v10089_v29 = vadd.f32 %v5080_v24, %v14797_v34  ;;  %v17469_v35 = vcombine.low %v14727_v32, %v14732_v63  ;;  %v6067_v54 = vmax.f32 %v10056_v43, 0.0  ;;  %v4632_v61 = vpop.f32.mrb[71].mxu0  ;;  %v5084_v21 = vpop.f32.mrb[71].mxu1  ;;  %v17475_v4 = vld [vmem:[#allocation64_spill] sm:$0xff] }
 0x2a3   :  { %v6190_v62 = vadd.f32 %v6062_v1, %v17466_v58  ;;  %v17468_v1 = vcombine.high %v14744_v3, %v14749_v47  ;;  %v15040_v46 = vpack.c.bf16 %v6188_v57, %v6180_v51  ;;  %v6069_v25 = vmax.f32 %v10088_v42, 0.0 }
 0x2a4   :  { %5501 = vmatpush1.bf16.msra.mxu0 %v17469_v35  ;;  %v10058_v56 = vadd.f32 %v4630_v40, %v14763_v13  ;;  %v10090_v19 = vadd.f32 %v5082_v59, %v14766_v15  ;;  %v17470_v58 = vcombine.high %v14754_v14, %v14759_v55  ;;  %v6068_v32 = vmax.f32 %v10057_v50, 0.0  ;;  %v17478_v40 = vld [vmem:[#allocation12_spill] sm:$0xff] }
 0x2a5   :  { %5952 = vmatprep.subr.bf16.mxu1 %v17468_v1  ;;  %v15042_v36 = vpack.c.bf16 %v6190_v62, %v6182_v16  ;;  %v6070_v63 = vmax.f32 %v10089_v29, 0.0  ;;  %v17471_v51 = vcombine.low %v14744_v3, %v14749_v47  ;;  %v10059_v16 = vadd.f32 %v4632_v61, %v14794_v30  ;;  %5446 = vmatmul.mubr.bf16.gmra.mrb[112].mxu0 %v13466_v20  ;;  %v17473_v3 = vld [vmem:[#allocation13_spill] sm:$0xff] }
 0x2a6   :  { %5502 = vmatprep.subr.bf16.mxu0 %v17470_v58  ;;  %v10091_v57 = vadd.f32 %v5084_v21, %v14797_v34  ;;  %v6075_v62 = vmax.f32 %v10058_v56, 0.0  ;;  %v6077_v26 = vmax.f32 %v10090_v19, 0.0  ;;  %v17472_v6 = vcombine.high %v14773_v8, %v14778_v12  ;;  %5455 = vmatprep.mubr.bf16.mxu0 %v13480_v0  ;;  %v17480_v19 = vld [vmem:[#allocation14_spill] sm:$0xff]  ;;  %v17482_v58 = vld [vmem:[#allocation65_spill] sm:$0xff] }
 0x2a7   :  { %5953 = vmatpush1.bf16.msra.mxu1 %v17471_v51  ;;  %v9767_v39 = vcombine.low %v15028_v10, %v15033_v53  ;;  %v9768_v43 = vcombine.high %v15028_v10, %v15033_v53  ;;  %v17474_v47 = vmax.f32 %v17473_v3, 0.0  ;;  %v17476_v24 = vmax.f32 %v17475_v4, 0.0  ;;  %v17559_v10 = vld [vmem:[#allocation82_spill] sm:$0xff] }
 0x2a8   :  { %5954 = vmatprep.subr.bf16.mxu1 %v17472_v6  ;;  %v6076_v50 = vmax.f32 %v10059_v16, 0.0  ;;  %v6078_v29 = vmax.f32 %v10091_v57, 0.0  ;;  %v17477_v35 = vcombine.low %v14754_v14, %v14759_v55  ;;  %v17479_v59 = vmax.f32 %v17478_v40, 0.0  ;;  %5898 = vmatmul.mubr.bf16.gmra.mrb[112].mxu1 %v13466_v20  ;;  %v17485_v16 = vld [vmem:[#allocation61_spill] sm:$0xff]  ;;  %v17487_v57 = vld [vmem:[#allocation15_spill] sm:$0xff]  ;;  %v4636_v20 = vpop.f32.mrb[72].mxu0 }
 0x2a9   :  { %v6195_v42 = vadd.f32 %v6067_v54, %v17474_v47  ;;  %v6197_v1 = vadd.f32 %v6069_v25, %v17476_v24  ;;  %v17481_v61 = vmax.f32 %v17480_v19, 0.0  ;;  %v17483_v51 = vmax.f32 %v17482_v58, 0.0  ;;  %v17489_v47 = vld [vmem:[#allocation62_spill] sm:$0xff]  ;;  %5907 = vmatprep.mubr.bf16.mxu1 %v13480_v0  ;;  %v4638_v40 = vpop.f32.mrb[73].mxu0 }
 0x2aa   :  { %5503 = vmatpush1.bf16.msra.mxu0 %v17477_v35  ;;  %v6196_v56 = vadd.f32 %v6068_v32, %v17479_v59  ;;  %v17484_v25 = vcombine.high %v14783_v7, %v14788_v9  ;;  %v17486_v14 = vmax.f32 %v17485_v16, 0.0  ;;  %v17488_v6 = vmax.f32 %v17487_v57, 0.0  ;;  %v15098_v0 = vld [vmem:[%s16793_s3 + $0xf98] sm:$0xff]  ;;  %v4640_v58 = vpop.f32.mrb[74].mxu0 }
 0x2ab   :  { %v6203_v21 = vadd.f32 %v6075_v62, %v17481_v61  ;;  %v6205_v54 = vadd.f32 %v6077_v26, %v17483_v51  ;;  %v17490_v32 = vmax.f32 %v17489_v47, 0.0  ;;  %v17491_v62 = vcombine.low %v14773_v8, %v14778_v12  ;;  %v5088_v26 = vpop.f32.mrb[72].mxu1  ;;  %v15103_v12 = vld [vmem:[%s16793_s3 + $0xfb8] sm:$0xff] }
 0x2ac   :  { %5504 = vmatprep.subr.bf16.mxu0 %v17484_v25  ;;  %v6198_v55 = vadd.f32 %v6070_v63, %v17486_v14  ;;  %v6204_v3 = vadd.f32 %v6076_v50, %v17488_v6  ;;  %v10060_v24 = vadd.f32 %v4636_v20, %v14763_v13  ;;  %v10092_v35 = vadd.f32 %v5088_v26, %v14766_v15  ;;  %v5090_v63 = vpop.f32.mrb[73].mxu1 }
 0x2ad   :  { %v6206_v4 = vadd.f32 %v6078_v29, %v17490_v32  ;;  %5955 = vmatpush1.bf16.msra.mxu1 %v17491_v62  ;;  %v17492_v50 = vcombine.high %v14802_v48, %v14807_v41  ;;  %v15105_v8 = vpack.c.bf16 %v6203_v21, %v6195_v42  ;;  %v15107_v29 = vpack.c.bf16 %v6205_v54, %v6197_v1  ;;  %v5092_v51 = vpop.f32.mrb[74].mxu1  ;;  %v4642_v21 = vpop.f32.mrb[75].mxu0 }
 0x2ae   :  { %v10061_v59 = vadd.f32 %v4638_v40, %v14794_v30  ;;  %v10093_v19 = vadd.f32 %v5090_v63, %v14797_v34  ;;  %v17493_v61 = vcombine.low %v14783_v7, %v14788_v9  ;;  %v15114_v25 = vpack.c.bf16 %v6204_v3, %v6196_v56  ;;  %v5094_v54 = vpop.f32.mrb[75].mxu1  ;;  %5456 = vmatmul.mubr.bf16.gmra.mrb[116].mxu0 %v13526_v44 }
 0x2af   :  { %5956 = vmatprep.subr.bf16.mxu1 %v17492_v50  ;;  %v15116_v16 = vpack.c.bf16 %v6206_v4, %v6198_v55  ;;  %v6083_v14 = vmax.f32 %v10060_v24, 0.0  ;;  %v6085_v57 = vmax.f32 %v10092_v35, 0.0  ;;  %v10062_v42 = vadd.f32 %v4640_v58, %v14763_v13  ;;  %v17499_v24 = vld [vmem:[#allocation70_spill] sm:$0xff]  ;;  %5465 = vmatprep.mubr.bf16.mxu0 %v13541_v2 }
 0x2b0   :  { %5505 = vmatpush1.bf16.msra.mxu0 %v17493_v61  ;;  %v10094_v1 = vadd.f32 %v5092_v51, %v14766_v15  ;;  %v17494_v6 = vcombine.high %v14812_v31, %v14817_v45  ;;  %v6084_v7 = vmax.f32 %v10061_v59, 0.0  ;;  %v6086_v9 = vmax.f32 %v10093_v19, 0.0  ;;  %v17502_v19 = vld [vmem:[#allocation18_spill] sm:$0xff]  ;;  %v17504_v51 = vld [vmem:[#allocation20_spill] sm:$0xff]  ;;  %5908 = vmatmul.mubr.bf16.gmra.mrb[116].mxu1 %v13526_v44  ;;  %v4646_v44 = vpop.f32.mrb[76].mxu0 }
 0x2b1   :  { %v17495_v56 = vcombine.low %v14802_v48, %v14807_v41  ;;  %v10063_v55 = vadd.f32 %v4642_v21, %v14794_v30  ;;  %v10095_v3 = vadd.f32 %v5094_v54, %v14797_v34  ;;  %v6091_v47 = vmax.f32 %v10062_v42, 0.0  ;;  %v17497_v41 = vld [vmem:[#allocation19_spill] sm:$0xff]  ;;  %5917 = vmatprep.mubr.bf16.mxu1 %v13541_v2  ;;  %v15172_v2 = vld [vmem:[%s16793_s3 + $0xfd0] sm:$0xff] }
 0x2b2   :  { %5506 = vmatprep.subr.bf16.mxu0 %v17494_v6  ;;  %v6093_v32 = vmax.f32 %v10094_v1, 0.0  ;;  %v17496_v4 = vcombine.high %v14830_v17, %v14835_v33  ;;  %v9769_v62 = vcombine.low %v15098_v0, %v15103_v12  ;;  %v9770_v20 = vcombine.high %v15098_v0, %v15103_v12  ;;  %v17506_v21 = vld [vmem:[#allocation71_spill] sm:$0xff]  ;;  %v10826_v0 = vld [vmem:[%s16795_s5 + $0xc] ss:$16 sps:$4 sm:$0xff]  }
 0x2b3   :  { %5957 = vmatpush1.bf16.msra.mxu1 %v17495_v56  ;;  %v17498_v48 = vmax.f32 %v17497_v41, 0.0  ;;  %v17500_v35 = vmax.f32 %v17499_v24, 0.0  ;;  %v6092_v63 = vmax.f32 %v10063_v55, 0.0  ;;  %v6094_v50 = vmax.f32 %v10095_v3, 0.0  ;;  %v17509_v6 = vld [vmem:[#allocation67_spill] sm:$0xff]  ;;  %v17511_v56 = vld [vmem:[#allocation21_spill] sm:$0xff] }
 0x2b4   :  { %5958 = vmatprep.subr.bf16.mxu1 %v17496_v4  ;;  %v17501_v59 = vcombine.low %v14812_v31, %v14817_v45  ;;  %v17503_v61 = vmax.f32 %v17502_v19, 0.0  ;;  %v17505_v42 = vmax.f32 %v17504_v51, 0.0  ;;  %v17507_v54 = vmax.f32 %v17506_v21, 0.0  ;;  %v17513_v4 = vld [vmem:[#allocation68_spill] sm:$0xff]  ;;  %v10829_v12 = vld [vmem:[%s16795_s5 + $0x24] ss:$16 sps:$4 sm:$0xff]  }
 0x2b5   :  { %v6211_v26 = vadd.f32 %v6083_v14, %v17498_v48  ;;  %v6213_v40 = vadd.f32 %v6085_v57, %v17500_v35  ;;  %v17508_v57 = vcombine.high %v14848_v60, %v14853_v37  ;;  %v17510_v31 = vmax.f32 %v17509_v6, 0.0  ;;  %v4648_v35 = vpop.f32.mrb[77].mxu0 }
 0x2b6   :  { %5507 = vmatpush1.bf16.msra.mxu0 %v17501_v59  ;;  %v6212_v58 = vadd.f32 %v6084_v7, %v17503_v61  ;;  %v6219_v1 = vadd.f32 %v6091_v47, %v17505_v42  ;;  %v6221_v14 = vadd.f32 %v6093_v32, %v17507_v54  ;;  %v17512_v55 = vmax.f32 %v17511_v56, 0.0  ;;  %v5098_v32 = vpop.f32.mrb[76].mxu1  ;;  %v4650_v51 = vpop.f32.mrb[78].mxu0 }
 0x2b7   :  { %5508 = vmatprep.subr.bf16.mxu0 %v17508_v57  ;;  %v6214_v45 = vadd.f32 %v6086_v9, %v17510_v31  ;;  %v17514_v7 = vmax.f32 %v17513_v4, 0.0  ;;  %v17515_v47 = vcombine.low %v14830_v17, %v14835_v33  ;;  %v10064_v48 = vadd.f32 %v4646_v44, %v14763_v13  ;;  %v5100_v9 = vpop.f32.mrb[77].mxu1  ;;  %v15177_v17 = vld [vmem:[%s16793_s3 + $0xff0] sm:$0xff]  ;;  %5466 = vmatmul.mubr.bf16.gmra.mrb[120].mxu0 %v13593_v28  ;;  %v17523_v44 = vld [vmem:[#allocation78_spill] sm:$0xff] }
 0x2b8   :  { %v6220_v3 = vadd.f32 %v6092_v63, %v17512_v55  ;;  %v10096_v24 = vadd.f32 %v5098_v32, %v14766_v15  ;;  %v17516_v63 = vcombine.high %v14858_v27, %v14863_v11  ;;  %v15179_v33 = vpack.c.bf16 %v6219_v1, %v6211_v26  ;;  %v5102_v42 = vpop.f32.mrb[78].mxu1  ;;  %v4652_v1 = vpop.f32.mrb[79].mxu0  ;;  %5918 = vmatmul.mubr.bf16.gmra.mrb[120].mxu1 %v13593_v28 }
 0x2b9   :  { %v6222_v41 = vadd.f32 %v6094_v50, %v17514_v7  ;;  %5959 = vmatpush1.bf16.msra.mxu1 %v17515_v47  ;;  %v15181_v50 = vpack.c.bf16 %v6221_v14, %v6213_v40  ;;  %v10065_v59 = vadd.f32 %v4648_v35, %v14794_v30  ;;  %v10097_v19 = vadd.f32 %v5100_v9, %v14797_v34  ;;  %v5104_v14 = vpop.f32.mrb[79].mxu1  ;;  %v4656_v28 = vpop.f32.mrb[80].mxu0 }
 0x2ba   :  { %5960 = vmatprep.subr.bf16.mxu1 %v17516_v63  ;;  %v17517_v61 = vcombine.low %v14848_v60, %v14853_v37  ;;  %v15188_v21 = vpack.c.bf16 %v6220_v3, %v6212_v58  ;;  %v6099_v57 = vmax.f32 %v10064_v48, 0.0  ;;  %v6101_v6 = vmax.f32 %v10096_v24, 0.0  ;;  %v17526_v63 = vld [vmem:[#allocation160_spill] sm:$0xff] }
 0x2bb   :  { %v15190_v54 = vpack.c.bf16 %v6222_v41, %v6214_v45  ;;  %v10066_v26 = vadd.f32 %v4650_v51, %v14763_v13  ;;  %v10098_v40 = vadd.f32 %v5102_v42, %v14766_v15  ;;  %v17518_v31 = vcombine.high %v14876_v5, %v14881_v49  ;;  %5475 = vmatprep.mubr.bf16.mxu0 %v17526_v63  ;;  %v17529_v51 = vld [vmem:[#allocation26_spill] sm:$0xff] }
 0x2bc   :  { %5509 = vmatpush1.bf16.msra.mxu0 %v17517_v61  ;;  %v6100_v60 = vmax.f32 %v10065_v59, 0.0  ;;  %v6102_v37 = vmax.f32 %v10097_v19, 0.0  ;;  %v17519_v58 = vcombine.low %v14858_v27, %v14863_v11  ;;  %v10067_v45 = vadd.f32 %v4652_v1, %v14794_v30  ;;  %v17521_v11 = vld [vmem:[#allocation25_spill] sm:$0xff]  ;;  %v17527_v59 = vld [vmem:[#allocation24_spill] sm:$0xff]  ;;  %5927 = vmatprep.mubr.bf16.mxu1 %v17526_v63 }
 0x2bd   :  { %5510 = vmatprep.subr.bf16.mxu0 %v17518_v31  ;;  %v10099_v56 = vadd.f32 %v5104_v14, %v14797_v34  ;;  %v6107_v55 = vmax.f32 %v10066_v26, 0.0  ;;  %v6109_v3 = vmax.f32 %v10098_v40, 0.0  ;;  %v17520_v4 = vcombine.high %v14901_v22, %v14906_v23  ;;  %v17531_v40 = vld [vmem:[#allocation79_spill] sm:$0xff] }
 0x2be   :  { %5961 = vmatpush1.bf16.msra.mxu1 %v17519_v58  ;;  %v9775_v7 = vcombine.low %v15172_v2, %v15177_v17  ;;  %v9776_v41 = vcombine.high %v15172_v2, %v15177_v17  ;;  %v17522_v27 = vmax.f32 %v17521_v11, 0.0  ;;  %v17524_v32 = vmax.f32 %v17523_v44, 0.0  ;;  %v17534_v14 = vld [vmem:[#allocation11_spill] sm:$0xff]  ;;  %v17536_v58 = vld [vmem:[#allocation74_spill] sm:$0xff] }
 0x2bf   :  { %5962 = vmatprep.subr.bf16.mxu1 %v17520_v4  ;;  %v6108_v24 = vmax.f32 %v10067_v45, 0.0  ;;  %v6110_v35 = vmax.f32 %v10099_v56, 0.0  ;;  %v17525_v9 = vcombine.low %v14876_v5, %v14881_v49  ;;  %v17528_v19 = vmax.f32 %v17527_v59, 0.0  ;;  %v17538_v45 = vld [vmem:[#allocation27_spill] sm:$0xff]  ;;  %v17543_v59 = vld [vmem:[#allocation16_spill] sm:$0xff] }
 0x2c0   :  { %v6227_v47 = vadd.f32 %v6099_v57, %v17522_v27  ;;  %v6229_v48 = vadd.f32 %v6101_v6, %v17524_v32  ;;  %v17530_v42 = vmax.f32 %v17529_v51, 0.0  ;;  %v17532_v1 = vmax.f32 %v17531_v40, 0.0  ;;  %v17533_v6 = vld [vmem:[#allocation10_spill] sm:$0xff]  ;;  %v17540_v11 = vld [vmem:[#allocation75_spill] sm:$0xff] }
 0x2c1   :  { %5511 = vmatpush1.bf16.msra.mxu0 %v17525_v9  ;;  %v6228_v61 = vadd.f32 %v6100_v60, %v17528_v19  ;;  %v17535_v31 = vcombine.high %v17533_v6, %v17534_v14  ;;  %v17537_v5 = vmax.f32 %v17536_v58, 0.0  ;;  %v17539_v56 = vmax.f32 %v17538_v45, 0.0  ;;  %v4658_v9 = vpop.f32.mrb[81].mxu0  ;;  %v10832_v2 = vld [vmem:[%s16795_s5 + $0x2c] ss:$16 sps:$4 sm:$0xff]  }
 0x2c2   :  { %v6235_v26 = vadd.f32 %v6107_v55, %v17530_v42  ;;  %v6237_v57 = vadd.f32 %v6109_v3, %v17532_v1  ;;  %v17541_v60 = vmax.f32 %v17540_v11, 0.0  ;;  %v17542_v55 = vcombine.low %v14901_v22, %v14906_v23  ;;  %v5108_v3 = vpop.f32.mrb[80].mxu1  ;;  %v15251_v23 = vld [vmem:[%s16793_s3 + $0xff8] sm:$0xff]  ;;  %v4660_v40 = vpop.f32.mrb[82].mxu0 }
 0x2c3   :  { %5512 = vmatprep.subr.bf16.mxu0 %v17535_v31  ;;  %v6230_v49 = vadd.f32 %v6102_v37, %v17537_v5  ;;  %v6236_v4 = vadd.f32 %v6108_v24, %v17539_v56  ;;  %v10068_v44 = vadd.f32 %v4656_v28, %v14763_v13  ;;  %v10100_v32 = vadd.f32 %v5108_v3, %v14766_v15  ;;  %v5110_v37 = vpop.f32.mrb[81].mxu1  ;;  %v17550_v3 = vld [vmem:[#allocation88_spill] sm:$0xff] }
 0x2c4   :  { %v6238_v27 = vadd.f32 %v6110_v35, %v17541_v60  ;;  %5963 = vmatpush1.bf16.msra.mxu1 %v17542_v55  ;;  %v17544_v24 = vcombine.high %v14954_v38, %v17543_v59  ;;  %v15246_v35 = vld [vmem:[%s16793_s3 + $0xfd8] sm:$0xff]  ;;  %v15253_v22 = vpack.c.bf16 %v6235_v26, %v6227_v47  ;;  %v15255_v63 = vpack.c.bf16 %v6237_v57, %v6229_v48  ;;  %v5112_v1 = vpop.f32.mrb[82].mxu1  ;;  %v4662_v26 = vpop.f32.mrb[83].mxu0  ;;  %v17547_v60 = vld [vmem:[#allocation164_spill] sm:$0xff] }
 0x2c5   :  { %v10069_v19 = vadd.f32 %v4658_v9, %v14794_v30  ;;  %v10101_v51 = vadd.f32 %v5110_v37, %v14797_v34  ;;  %v17545_v42 = vcombine.low %v17533_v6, %v17534_v14  ;;  %v15262_v31 = vpack.c.bf16 %v6236_v4, %v6228_v61  ;;  %v5114_v57 = vpop.f32.mrb[83].mxu1  ;;  %5476 = vmatmul.mubr.bf16.gmra.mrb[124].mxu0 %v17547_v60 }
 0x2c6   :  { %5964 = vmatprep.subr.bf16.mxu1 %v17544_v24  ;;  %v15264_v58 = vpack.c.bf16 %v6238_v27, %v6230_v49  ;;  %v6115_v5 = vmax.f32 %v10068_v44, 0.0  ;;  %v6117_v45 = vmax.f32 %v10100_v32, 0.0  ;;  %v10070_v47 = vadd.f32 %v4660_v40, %v14763_v13  ;;  %v17553_v24 = vld [vmem:[#allocation30_spill] sm:$0xff]  ;;  %v17557_v40 = vld [vmem:[#allocation89_spill] sm:$0xff]  ;;  %5928 = vmatmul.mubr.bf16.gmra.mrb[124].mxu1 %v17547_v60 }
 0x2c7   :  { %5513 = vmatpush1.bf16.msra.mxu0 %v17545_v42  ;;  %v10102_v48 = vadd.f32 %v5112_v1, %v14766_v15  ;;  %v6116_v6 = vmax.f32 %v10069_v19, 0.0  ;;  %v6118_v14 = vmax.f32 %v10101_v51, 0.0  ;;  %v17546_v61 = vcombine.low %v14954_v38, %v17543_v59  ;;  %v17548_v38 = vld [vmem:[#allocation31_spill] sm:$0xff]  ;;  %v17555_v19 = vld [vmem:[#allocation32_spill] sm:$0xff] }
 0x2c8   :  { %5514 = vmatprep.subr.bf16.mxu0 %v9768_v43  ;;  %v10071_v49 = vadd.f32 %v4662_v26, %v14794_v30  ;;  %v10103_v56 = vadd.f32 %v5114_v57, %v14797_v34  ;;  %v6123_v4 = vmax.f32 %v10070_v47, 0.0  ;;  %v9777_v43 = vcombine.low %v15246_v35, %v15251_v23  ;;  %v17552_v59 = vld [vmem:[#allocation163_spill] sm:$0xff] }
 0x2c9   :  { %5965 = vmatpush1.bf16.msra.mxu1 %v17546_v61  ;;  %v6125_v11 = vmax.f32 %v10102_v48, 0.0  ;;  %v9778_v27 = vcombine.high %v15246_v35, %v15251_v23  ;;  %v17549_v55 = vmax.f32 %v17548_v38, 0.0  ;;  %v17551_v44 = vmax.f32 %v17550_v3, 0.0  ;;  %5518 = vmatprep.mubr.bf16.mxu0 %v17552_v59  ;;  %v17563_v26 = vld [vmem:[#allocation83_spill] sm:$0xff]  ;;  %v4666_v61 = vpop.f32.mrb[84].mxu0 }
 0x2ca   :  { %5966 = vmatprep.subr.bf16.mxu1 %v9770_v20  ;;  %v6124_v9 = vmax.f32 %v10071_v49, 0.0  ;;  %v6126_v37 = vmax.f32 %v10103_v56, 0.0  ;;  %v10823_v20 = vld [vmem:[%s16795_s5 + $0x4] ss:$16 sps:$4 sm:$0xff]   ;;  %v17554_v35 = vmax.f32 %v17553_v24, 0.0  ;;  %v17556_v51 = vmax.f32 %v17555_v19, 0.0  ;;  %5970 = vmatprep.mubr.bf16.mxu1 %v17552_v59 }
 0x2cb   :  { %v6243_v28 = vadd.f32 %v6115_v5, %v17549_v55  ;;  %v6245_v32 = vadd.f32 %v6117_v45, %v17551_v44  ;;  %5515 = vmatpush1.bf16.msra.mxu0 %v9767_v39  ;;  %v17558_v1 = vmax.f32 %v17557_v40, 0.0  ;;  %v17560_v53 = vmax.f32 %v17559_v10, 0.0  ;;  %v17561_v45 = vld [vmem:[#allocation33_spill] sm:$0xff]  ;;  %v5118_v49 = vpop.f32.mrb[84].mxu1 }
 0x2cc   :  { %v6244_v23 = vadd.f32 %v6116_v6, %v17554_v35  ;;  %v6251_v42 = vadd.f32 %v6123_v4, %v17556_v51  ;;  %5516 = vmatprep.subr.bf16.mxu0 %v9776_v41  ;;  %v17562_v47 = vmax.f32 %v17561_v45, 0.0  ;;  %v17564_v57 = vmax.f32 %v17563_v26, 0.0  ;;  %v10821_v41 = vld [vmem:[%s16795_s5] ss:$16 sps:$4 sm:$0xff]   ;;  %v4668_v4 = vpop.f32.mrb[85].mxu0 }
 0x2cd   :  { %v6253_v5 = vadd.f32 %v6125_v11, %v17558_v1  ;;  %v6246_v39 = vadd.f32 %v6118_v14, %v17560_v53  ;;  %5967 = vmatpush1.bf16.msra.mxu1 %v9769_v62  ;;  %v10072_v14 = vadd.f32 %v4666_v61, %v14763_v13  ;;  %v10104_v56 = vadd.f32 %v5118_v49, %v14766_v15  ;;  %v5120_v11 = vpop.f32.mrb[85].mxu1  ;;  %v10824_v44 = vld [vmem:[%s16795_s5 + $0x8] ss:$16 sps:$4 sm:$0xff]  }
 0x2ce   :  { %v6252_v48 = vadd.f32 %v6124_v9, %v17562_v47  ;;  %v6254_v6 = vadd.f32 %v6126_v37, %v17564_v57  ;;  %5968 = vmatprep.subr.bf16.mxu1 %v9778_v27  ;;  %v15326_v62 = vpack.c.bf16 %v6251_v42, %v6243_v28  ;;  %v10073_v38 = vadd.f32 %v4668_v4, %v14794_v30  ;;  %v4670_v27 = vpop.f32.mrb[86].mxu0  ;;  %v5122_v3 = vpop.f32.mrb[86].mxu1  ;;  %v10827_v42 = vld [vmem:[%s16795_s5 + $0x20] ss:$16 sps:$4 sm:$0xff]  }
 0x2cf   :  { %v15328_v60 = vpack.c.bf16 %v6253_v5, %v6245_v32  ;;  %v10105_v55 = vadd.f32 %v5120_v11, %v14797_v34  ;;  %5517 = vmatpush1.bf16.msra.mxu0 %v9775_v7  ;;  %v6131_v32 = vmax.f32 %v10072_v14, 0.0  ;;  %v6133_v37 = vmax.f32 %v10104_v56, 0.0  ;;  %v4672_v35 = vpop.f32.mrb[87].mxu0  ;;  %v5124_v19 = vpop.f32.mrb[87].mxu1  ;;  %v17565_v5 = vld [vmem:[#allocation167_spill] sm:$0xff]  ;;  %v17566_v10 = vld [vmem:[#allocation37_spill] sm:$0xff] }
 0x2d0   :  { %v15338_v9 = vpack.c.bf16 %v6252_v48, %v6244_v23  ;;  %v15340_v28 = vpack.c.bf16 %v6254_v6, %v6246_v39  ;;  %v10074_v59 = vadd.f32 %v4670_v27, %v14763_v13  ;;  %v10106_v24 = vadd.f32 %v5122_v3, %v14766_v15  ;;  %7929 = vmatprep.subr.bf16.mxu0 %v10823_v20  ;;  %v10835_v20 = vld [vmem:[%s16795_s5 + $0x44] ss:$16 sps:$4 sm:$0xff]   ;;  %v17568_v39 = vld [vmem:[#allocation98_spill] sm:$0xff]  ;;  %v17570_v57 = vld [vmem:[#allocation168_spill] sm:$0xff] }
 0x2d1   :  { %v6132_v17 = vmax.f32 %v10073_v38, 0.0  ;;  %v6134_v7 = vmax.f32 %v10105_v55, 0.0  ;;  %5969 = vmatpush1.bf16.msra.mxu1 %v9777_v43  ;;  %v10075_v23 = vadd.f32 %v4672_v35, %v14794_v30  ;;  %v10107_v51 = vadd.f32 %v5124_v19, %v14797_v34  ;;  %v10830_v6 = vld [vmem:[%s16795_s5 + $0x28] ss:$16 sps:$4 sm:$0xff]  }
 0x2d2   :  { %v6139_v40 = vmax.f32 %v10074_v59, 0.0  ;;  %v6141_v1 = vmax.f32 %v10106_v24, 0.0  ;;  %5519 = vmatmul.mubr.bf16.vlgmr.msra.gmra.mrb[96].mxu0 %v17565_v5  ;;  %8381 = vmatprep.subr.bf16.mxu1 %v10826_v0  ;;  %v17567_v53 = vmax.f32 %v17566_v10, 0.0  ;;  %v17569_v45 = vmax.f32 %v17568_v39, 0.0  ;;  %v17571_v61 = vld [vmem:[#allocation36_spill] sm:$0xff]  ;;  %v17573_v56 = vld [vmem:[#allocation38_spill] sm:$0xff] }
 0x2d3   :  { %v6140_v48 = vmax.f32 %v10075_v23, 0.0  ;;  %v6142_v26 = vmax.f32 %v10107_v51, 0.0  ;;  %5528 = vmatprep.mubr.bf16.mxu0 %v17570_v57  ;;  %7930 = vmatpush1.bf16.msra.mxu0 %v10821_v41  ;;  %v17572_v49 = vmax.f32 %v17571_v61, 0.0  ;;  %v17574_v4 = vmax.f32 %v17573_v56, 0.0  ;;  %v17575_v0 = vld [vmem:[#allocation99_spill] sm:$0xff]  ;;  %v17577_v27 = vld [vmem:[#allocation92_spill] sm:$0xff] }
 0x2d4   :  { %v6259_v43 = vadd.f32 %v6131_v32, %v17567_v53  ;;  %v6261_v47 = vadd.f32 %v6133_v37, %v17569_v45  ;;  %v17576_v38 = vmax.f32 %v17575_v0, 0.0  ;;  %5971 = vmatmul.mubr.bf16.vlgmr.msra.gmra.mrb[96].mxu1 %v17565_v5  ;;  %7931 = vmatprep.subr.bf16.mxu0 %v10829_v12  ;;  %v10838_v41 = vld [vmem:[%s16795_s5 + $0x4c] ss:$16 sps:$4 sm:$0xff]   ;;  %v17578_v3 = vmax.f32 %v17577_v27, 0.0  ;;  %v17579_v37 = vld [vmem:[#allocation39_spill] sm:$0xff]  ;;  %v17581_v35 = vld [vmem:[#allocation93_spill] sm:$0xff] }
 0x2d5   :  { %v6260_v14 = vadd.f32 %v6132_v17, %v17572_v49  ;;  %v6267_v11 = vadd.f32 %v6139_v40, %v17574_v4  ;;  %v17580_v59 = vmax.f32 %v17579_v37, 0.0  ;;  %v17582_v19 = vmax.f32 %v17581_v35, 0.0  ;;  %5980 = vmatprep.mubr.bf16.mxu1 %v17570_v57  ;;  %8382 = vmatpush1.bf16.msra.mxu1 %v10824_v44  ;;  %v4676_v23 = vpop.f32.mrb[88].mxu0  ;;  %v5128_v51 = vpop.f32.mrb[88].mxu1  ;;  %v10833_v12 = vld [vmem:[%s16795_s5 + $0x40] ss:$16 sps:$4 sm:$0xff]  }
 0x2d6   :  { %v6269_v55 = vadd.f32 %v6141_v1, %v17576_v38  ;;  %v6262_v32 = vadd.f32 %v6134_v7, %v17578_v3  ;;  %v10076_v40 = vadd.f32 %v4676_v23, %v14763_v13  ;;  %v10108_v1 = vadd.f32 %v5128_v51, %v14766_v15  ;;  %v4678_v7 = vpop.f32.mrb[89].mxu0  ;;  %v5130_v5 = vpop.f32.mrb[89].mxu1  ;;  %8383 = vmatprep.subr.bf16.mxu1 %v10832_v2  ;;  %v10841_v10 = vld [vmem:[%s16795_s5 + $0x64] ss:$16 sps:$4 sm:$0xff]   ;;  %v10836_v57 = vld [vmem:[%s16795_s5 + $0x48] ss:$16 sps:$4 sm:$0xff]  }
 0x2d7   :  { %v6268_v24 = vadd.f32 %v6140_v48, %v17580_v59  ;;  %v6270_v17 = vadd.f32 %v6142_v26, %v17582_v19  ;;  %v15389_v53 = vpack.c.bf16 %v6267_v11, %v6259_v43  ;;  %v10077_v39 = vadd.f32 %v4678_v7, %v14794_v30  ;;  %v4680_v48 = vpop.f32.mrb[90].mxu0  ;;  %v5132_v26 = vpop.f32.mrb[90].mxu1  ;;  %7932 = vmatpush1.bf16.msra.mxu0 %v10827_v42  ;;  %v10844_v42 = vld [vmem:[%s16795_s5 + $0x6c] ss:$16 sps:$4 sm:$0xff]  }
 0x2d8   :  { %v15391_v44 = vpack.c.bf16 %v6269_v55, %v6261_v47  ;;  %v10109_v45 = vadd.f32 %v5130_v5, %v14797_v34  ;;  %v6147_v49 = vmax.f32 %v10076_v40, 0.0  ;;  %v6149_v43 = vmax.f32 %v10108_v1, 0.0  ;;  %v4682_v4 = vpop.f32.mrb[91].mxu0  ;;  %v5134_v11 = vpop.f32.mrb[91].mxu1  ;;  %7933 = vmatprep.subr.bf16.mxu0 %v10835_v20  ;;  %v17584_v37 = vld [vmem:[#allocation44_spill] sm:$0xff]  ;;  %v17588_v51 = vld [vmem:[#allocation170_spill] sm:$0xff] }
 0x2d9   :  { %v15398_v2 = vpack.c.bf16 %v6268_v24, %v6260_v14  ;;  %v15400_v61 = vpack.c.bf16 %v6270_v17, %v6262_v32  ;;  %v10078_v47 = vadd.f32 %v4680_v48, %v14763_v13  ;;  %v10110_v56 = vadd.f32 %v5132_v26, %v14766_v15  ;;  %8384 = vmatpush1.bf16.msra.mxu1 %v10830_v6  ;;  %v17583_v32 = vld [vmem:[#allocation169_spill] sm:$0xff]  ;;  %v17586_v20 = vld [vmem:[#allocation108_spill] sm:$0xff]  ;;  %v17589_v40 = vld [vmem:[#allocation43_spill] sm:$0xff] }
 0x2da   :  { %v6148_v0 = vmax.f32 %v10077_v39, 0.0  ;;  %v6150_v38 = vmax.f32 %v10109_v45, 0.0  ;;  %v10079_v14 = vadd.f32 %v4682_v4, %v14794_v30  ;;  %v10111_v55 = vadd.f32 %v5134_v11, %v14797_v34  ;;  %5529 = vmatmul.mubr.bf16.gmra.mrb[100].mxu0 %v17583_v32  ;;  %8385 = vmatprep.subr.bf16.mxu1 %v10838_v41  ;;  %v10839_v6 = vld [vmem:[%s16795_s5 + $0x60] ss:$16 sps:$4 sm:$0xff]  }
 0x2db   :  { %v6155_v27 = vmax.f32 %v10078_v47, 0.0  ;;  %v6157_v3 = vmax.f32 %v10110_v56, 0.0  ;;  %v17585_v59 = vmax.f32 %v17584_v37, 0.0  ;;  %v17587_v35 = vmax.f32 %v17586_v20, 0.0  ;;  %5538 = vmatprep.mubr.bf16.mxu0 %v17588_v51  ;;  %7934 = vmatpush1.bf16.msra.mxu0 %v10833_v12  ;;  %v17591_v5 = vld [vmem:[#allocation45_spill] sm:$0xff]  ;;  %v17597_v56 = vld [vmem:[#allocation46_spill] sm:$0xff] }
 0x2dc   :  { %v6156_v17 = vmax.f32 %v10079_v14, 0.0  ;;  %v6158_v23 = vmax.f32 %v10111_v55, 0.0  ;;  %v17590_v1 = vmax.f32 %v17589_v40, 0.0  ;;  %v17592_v41 = vmax.f32 %v17591_v5, 0.0  ;;  %v17593_v45 = vld [vmem:[#allocation109_spill] sm:$0xff]  ;;  %5981 = vmatmul.mubr.bf16.gmra.mrb[100].mxu1 %v17583_v32  ;;  %7935 = vmatprep.subr.bf16.mxu0 %v10841_v10 }
 0x2dd   :  { %v6275_v24 = vadd.f32 %v6147_v49, %v17585_v59  ;;  %v6277_v19 = vadd.f32 %v6149_v43, %v17587_v35  ;;  %v17594_v48 = vmax.f32 %v17593_v45, 0.0  ;;  %v10847_v12 = vld [vmem:[%s16795_s5 + $0x84] ss:$16 sps:$4 sm:$0xff]   ;;  %v17595_v49 = vld [vmem:[#allocation102_spill] sm:$0xff]  ;;  %v17598_v4 = vmax.f32 %v17597_v56, 0.0  ;;  %5990 = vmatprep.mubr.bf16.mxu1 %v17588_v51  ;;  %8386 = vmatpush1.bf16.msra.mxu1 %v10836_v57 }
 0x2de   :  { %v6276_v7 = vadd.f32 %v6148_v0, %v17590_v1  ;;  %v6283_v39 = vadd.f32 %v6155_v27, %v17592_v41  ;;  %v17596_v43 = vmax.f32 %v17595_v49, 0.0  ;;  %v17599_v0 = vld [vmem:[#allocation103_spill] sm:$0xff]  ;;  %v4686_v27 = vpop.f32.mrb[92].mxu0  ;;  %8387 = vmatprep.subr.bf16.mxu1 %v10844_v42  ;;  %v10850_v20 = vld [vmem:[%s16795_s5 + $0x8c] ss:$16 sps:$4 sm:$0xff]  }
 0x2df   :  { %v6285_v26 = vadd.f32 %v6157_v3, %v17594_v48  ;;  %v6284_v11 = vadd.f32 %v6156_v17, %v17598_v4  ;;  %v17600_v14 = vmax.f32 %v17599_v0, 0.0  ;;  %v5138_v3 = vpop.f32.mrb[92].mxu1  ;;  %v10842_v10 = vld [vmem:[%s16795_s5 + $0x68] ss:$16 sps:$4 sm:$0xff]   ;;  %v10080_v32 = vadd.f32 %v4686_v27, %v14763_v13  ;;  %7936 = vmatpush1.bf16.msra.mxu0 %v10839_v6  ;;  %v10845_v1 = vld [vmem:[%s16795_s5 + $0x80] ss:$16 sps:$4 sm:$0xff]  }
 0x2e0   :  { %v6278_v47 = vadd.f32 %v6150_v38, %v17596_v43  ;;  %v10112_v37 = vadd.f32 %v5138_v3, %v14766_v15  ;;  %v4688_v38 = vpop.f32.mrb[93].mxu0  ;;  %v5140_v59 = vpop.f32.mrb[93].mxu1  ;;  %v15443_v35 = vpack.c.bf16 %v6283_v39, %v6275_v24  ;;  %7937 = vmatprep.subr.bf16.mxu0 %v10847_v12  ;;  %v10853_v6 = vld [vmem:[%s16795_s5 + $0xa4] ss:$16 sps:$4 sm:$0xff]   ;;  %v10856_v12 = vld [vmem:[%s16795_s5 + $0xac] ss:$16 sps:$4 sm:$0xff]  }
 0x2e1   :  { %v6286_v55 = vadd.f32 %v6158_v23, %v17600_v14  ;;  %v15445_v57 = vpack.c.bf16 %v6285_v26, %v6277_v19  ;;  %v10081_v17 = vadd.f32 %v4688_v38, %v14794_v30  ;;  %v10113_v23 = vadd.f32 %v5140_v59, %v14797_v34  ;;  %v4690_v51 = vpop.f32.mrb[94].mxu0  ;;  %v5142_v40 = vpop.f32.mrb[94].mxu1  ;;  %8388 = vmatpush1.bf16.msra.mxu1 %v10842_v10  ;;  %v17601_v56 = vld [vmem:[#allocation171_spill] sm:$0xff]  ;;  %v17602_v4 = vld [vmem:[#allocation53_spill] sm:$0xff]  ;;  %v17604_v14 = vld [vmem:[#allocation118_spill] sm:$0xff] }
 0x2e2   :  { %v15452_v42 = vpack.c.bf16 %v6284_v11, %v6276_v7  ;;  %v6163_v41 = vmax.f32 %v10080_v32, 0.0  ;;  %v6165_v24 = vmax.f32 %v10112_v37, 0.0  ;;  %v10082_v19 = vadd.f32 %v4690_v51, %v14763_v13  ;;  %v4692_v45 = vpop.f32.mrb[95].mxu0  ;;  %v5144_v48 = vpop.f32.mrb[95].mxu1  ;;  %v10848_v13 = vld [vmem:[%s16795_s5 + $0x88] ss:$16 sps:$4 sm:$0xff]   ;;  %5539 = vmatmul.mubr.bf16.gmra.mrb[104].mxu0 %v17601_v56  ;;  %8389 = vmatprep.subr.bf16.mxu1 %v10850_v20 }
 0x2e3   :  { %v15454_v5 = vpack.c.bf16 %v6286_v55, %v6278_v47  ;;  %v10114_v39 = vadd.f32 %v5142_v40, %v14766_v15  ;;  %v6164_v26 = vmax.f32 %v10081_v17, 0.0  ;;  %v6166_v49 = vmax.f32 %v10113_v23, 0.0  ;;  %v17606_v3 = vld [vmem:[#allocation172_spill] sm:$0xff]  ;;  %7938 = vmatpush1.bf16.msra.mxu0 %v10845_v1  ;;  %v17609_v59 = vld [vmem:[#allocation54_spill] sm:$0xff]  ;;  %v17611_v23 = vld [vmem:[#allocation119_spill] sm:$0xff] }
 0x2e4   :  { %v10083_v7 = vadd.f32 %v4692_v45, %v14794_v30  ;;  %v10115_v43 = vadd.f32 %v5144_v48, %v14797_v34  ;;  %v6171_v47 = vmax.f32 %v10082_v19, 0.0  ;;  %v17603_v11 = vmax.f32 %v17602_v4, 0.0  ;;  %5548 = vmatprep.mubr.bf16.mxu0 %v17606_v3  ;;  %v10851_v10 = vld [vmem:[%s16795_s5 + $0xa0] ss:$16 sps:$4 sm:$0xff]   ;;  %5991 = vmatmul.mubr.bf16.gmra.mrb[104].mxu1 %v17601_v56  ;;  %v10859_v1 = vld [vmem:[%s16795_s5 + $0xc4] ss:$16 sps:$4 sm:$0xff]  }
 0x2e5   :  { %v6173_v15 = vmax.f32 %v10114_v39, 0.0  ;;  %v17605_v30 = vmax.f32 %v17604_v14, 0.0  ;;  %v17607_v32 = vld [vmem:[#allocation52_spill] sm:$0xff]  ;;  %v17610_v20 = vmax.f32 %v17609_v59, 0.0  ;;  %v17612_v51 = vmax.f32 %v17611_v23, 0.0  ;;  %7939 = vmatprep.subr.bf16.mxu0 %v10853_v6  ;;  %v17615_v39 = vld [vmem:[#allocation55_spill] sm:$0xff]  ;;  %6000 = vmatprep.mubr.bf16.mxu1 %v17606_v3 }
 0x2e6   :  { %v6291_v0 = vadd.f32 %v6163_v41, %v17603_v11  ;;  %v6172_v34 = vmax.f32 %v10083_v7, 0.0  ;;  %v6174_v27 = vmax.f32 %v10115_v43, 0.0  ;;  %v17608_v37 = vmax.f32 %v17607_v32, 0.0  ;;  %v17613_v41 = vld [vmem:[#allocation112_spill] sm:$0xff]  ;;  %8390 = vmatpush1.bf16.msra.mxu1 %v10848_v13  ;;  %v10877_v32 = vld [vmem:[%s16795_s5 + $0x124] ss:$16 sps:$4 sm:$0xff]  }
 0x2e7   :  { %v6293_v55 = vadd.f32 %v6165_v24, %v17605_v30  ;;  %v6299_v17 = vadd.f32 %v6171_v47, %v17610_v20  ;;  %v6301_v40 = vadd.f32 %v6173_v15, %v17612_v51  ;;  %v17614_v24 = vmax.f32 %v17613_v41, 0.0  ;;  %v10854_v6 = vld [vmem:[%s16795_s5 + $0xa8] ss:$16 sps:$4 sm:$0xff]   ;;  %8391 = vmatprep.subr.bf16.mxu1 %v10856_v12  ;;  %v10862_v47 = vld [vmem:[%s16795_s5 + $0xcc] ss:$16 sps:$4 sm:$0xff]   ;;  %7940 = vmatpush1.bf16.msra.mxu0 %v10851_v10 }
 0x2e8   :  { %v6292_v38 = vadd.f32 %v6164_v26, %v17608_v37  ;;  %v17616_v45 = vmax.f32 %v17615_v39, 0.0  ;;  %v17617_v26 = vld [vmem:[#allocation113_spill] sm:$0xff]  ;;  %7941 = vmatprep.subr.bf16.mxu0 %v10859_v1  ;;  %v10868_v14 = vld [vmem:[%s16795_s5 + $0xec] ss:$16 sps:$4 sm:$0xff]  }
 0x2e9   :  { %v6294_v19 = vadd.f32 %v6166_v49, %v17614_v24  ;;  %v17618_v7 = vmax.f32 %v17617_v26, 0.0  ;;  %v15501_v15 = vpack.c.bf16 %v6299_v17, %v6291_v0  ;;  %v15503_v49 = vpack.c.bf16 %v6301_v40, %v6293_v55  ;;  %v10857_v56 = vld [vmem:[%s16795_s5 + $0xc0] ss:$16 sps:$4 sm:$0xff]   ;;  %v10865_v12 = vld [vmem:[%s16795_s5 + $0xe4] ss:$16 sps:$4 sm:$0xff]  }
 0x2ea   :  { %v6300_v48 = vadd.f32 %v6172_v34, %v17616_v45  ;;  %8392 = vmatpush1.bf16.msra.mxu1 %v10854_v6  ;;  %v10860_v11 = vld [vmem:[%s16795_s5 + $0xc8] ss:$16 sps:$4 sm:$0xff]   ;;  %v10863_v55 = vld [vmem:[%s16795_s5 + $0xe0] ss:$16 sps:$4 sm:$0xff]   ;;  %v10871_v34 = vld [vmem:[%s16795_s5 + $0x104] ss:$16 sps:$4 sm:$0xff]  }
 0x2eb   :  { %v6302_v43 = vadd.f32 %v6174_v27, %v17618_v7  ;;  %v17619_v0 = vld [vmem:[#allocation173_spill] sm:$0xff]  ;;  %8393 = vmatprep.subr.bf16.mxu1 %v10862_v47  ;;  %v17620_v30 = vld [vmem:[#allocation174_spill] sm:$0xff]  ;;  %7942 = vmatpush1.bf16.msra.mxu0 %v10857_v56  ;;  %v17622_v20 = vld [vmem:[#allocation176_spill] sm:$0xff] }
 0x2ec   :  { %v15508_v4 = vpack.c.bf16 %v6300_v48, %v6292_v38  ;;  %5549 = vmatmul.mubr.bf16.gmra.mrb[108].mxu0 %v17619_v0  ;;  %6001 = vmatmul.mubr.bf16.gmra.mrb[108].mxu1 %v17619_v0  ;;  %v10866_v27 = vld [vmem:[%s16795_s5 + $0xe8] ss:$16 sps:$4 sm:$0xff]   ;;  %v10874_v3 = vld [vmem:[%s16795_s5 + $0x10c] ss:$16 sps:$4 sm:$0xff]   ;;  %v10869_v10 = vld [vmem:[%s16795_s5 + $0x100] ss:$16 sps:$4 sm:$0xff]  }
 0x2ed   :  { %v15510_v13 = vpack.c.bf16 %v6302_v43, %v6294_v19  ;;  %5558 = vmatprep.mubr.bf16.mxu0 %v17620_v30  ;;  %7943 = vmatprep.subr.bf16.mxu0 %v10865_v12  ;;  %v10872_v37 = vld [vmem:[%s16795_s5 + $0x108] ss:$16 sps:$4 sm:$0xff]   ;;  %v10880_v59 = vld [vmem:[%s16795_s5 + $0x12c] ss:$16 sps:$4 sm:$0xff]   ;;  %v10875_v17 = vld [vmem:[%s16795_s5 + $0x120] ss:$16 sps:$4 sm:$0xff]  }
 0x2ee   :  { %6010 = vmatprep.mubr.bf16.mxu1 %v17620_v30  ;;  %8394 = vmatpush1.bf16.msra.mxu1 %v10860_v11  ;;  %v17621_v38 = vld [vmem:[#allocation175_spill] sm:$0xff]  ;;  %v10886_v40 = vld [vmem:[%s16795_s5 + $0x14c] ss:$16 sps:$4 sm:$0xff]   ;;  %v17623_v19 = vld [vmem:[#allocation177_spill] sm:$0xff] }
 0x2ef   :  { %8395 = vmatprep.subr.bf16.mxu1 %v10868_v14  ;;  %7944 = vmatpush1.bf16.msra.mxu0 %v10863_v55  ;;  %v10883_v23 = vld [vmem:[%s16795_s5 + $0x144] ss:$16 sps:$4 sm:$0xff]   ;;  %v10878_v51 = vld [vmem:[%s16795_s5 + $0x128] ss:$16 sps:$4 sm:$0xff]   ;;  %v10881_v1 = vld [vmem:[%s16795_s5 + $0x140] ss:$16 sps:$4 sm:$0xff]  }
 0x2f0   :  { %7945 = vmatprep.subr.bf16.mxu0 %v10871_v34  ;;  %v10889_v41 = vld [vmem:[%s16795_s5 + $0x164] ss:$16 sps:$4 sm:$0xff]   ;;  %v10884_v24 = vld [vmem:[%s16795_s5 + $0x148] ss:$16 sps:$4 sm:$0xff]   ;;  %v10892_v39 = vld [vmem:[%s16795_s5 + $0x16c] ss:$16 sps:$4 sm:$0xff]  }
 0x2f1   :  { %v17624_v45 = vld [vmem:[#allocation178_spill] sm:$0xff]  ;;  %v10895_v26 = vld [vmem:[%s16795_s5 + $0x184] ss:$16 sps:$4 sm:$0xff]   ;;  %v17626_v0 = vld [vmem:[#allocation184_spill] sm:$0xff] }
 0x2f2   :  { %8396 = vmatpush1.bf16.msra.mxu1 %v10866_v27  ;;  %v10887_v48 = vld [vmem:[%s16795_s5 + $0x160] ss:$16 sps:$4 sm:$0xff]   ;;  %v10890_v7 = vld [vmem:[%s16795_s5 + $0x168] ss:$16 sps:$4 sm:$0xff]   ;;  %v10898_v43 = vld [vmem:[%s16795_s5 + $0x18c] ss:$16 sps:$4 sm:$0xff]  }
 0x2f3   :  { %8397 = vmatprep.subr.bf16.mxu1 %v10874_v3  ;;  %7946 = vmatpush1.bf16.msra.mxu0 %v10869_v10  ;;  %v10893_v6 = vld [vmem:[%s16795_s5 + $0x180] ss:$16 sps:$4 sm:$0xff]   ;;  %v10901_v47 = vld [vmem:[%s16795_s5 + $0x1a4] ss:$16 sps:$4 sm:$0xff]   ;;  %v10896_v56 = vld [vmem:[%s16795_s5 + $0x188] ss:$16 sps:$4 sm:$0xff]  }
 0x2f4   :  { %5559 = vmatmul.mubr.bf16.gmra.mrb[112].mxu0 %v17621_v38  ;;  %6011 = vmatmul.mubr.bf16.gmra.mrb[112].mxu1 %v17621_v38  ;;  %v17625_v12 = vld [vmem:[#allocation181_spill] sm:$0xff]  ;;  %v10904_v11 = vld [vmem:[%s16795_s5 + $0x1ac] ss:$16 sps:$4 sm:$0xff]  }
 0x2f5   :  { %5568 = vmatprep.mubr.bf16.mxu0 %v17622_v20  ;;  %7947 = vmatprep.subr.bf16.mxu0 %v10877_v32  ;;  %v10899_v14 = vld [vmem:[%s16795_s5 + $0x1a0] ss:$16 sps:$4 sm:$0xff]   ;;  %v10907_v30 = vld [vmem:[%s16795_s5 + $0x1c4] ss:$16 sps:$4 sm:$0xff]   ;;  %v10902_v55 = vld [vmem:[%s16795_s5 + $0x1a8] ss:$16 sps:$4 sm:$0xff]  }
 0x2f6   :  { %6020 = vmatprep.mubr.bf16.mxu1 %v17622_v20  ;;  %8398 = vmatpush1.bf16.msra.mxu1 %v10872_v37  ;;  %v10910_v34 = vld [vmem:[%s16795_s5 + $0x1cc] ss:$16 sps:$4 sm:$0xff]   ;;  %v10905_v27 = vld [vmem:[%s16795_s5 + $0x1c0] ss:$16 sps:$4 sm:$0xff]   ;;  %v10913_v3 = vld [vmem:[%s16795_s5 + $0x1e4] ss:$16 sps:$4 sm:$0xff]  }
 0x2f7   :  { %8399 = vmatprep.subr.bf16.mxu1 %v10880_v59  ;;  %7948 = vmatpush1.bf16.msra.mxu0 %v10875_v17  ;;  %v10908_v10 = vld [vmem:[%s16795_s5 + $0x1c8] ss:$16 sps:$4 sm:$0xff]   ;;  %v10916_v37 = vld [vmem:[%s16795_s5 + $0x1ec] ss:$16 sps:$4 sm:$0xff]   ;;  %v10911_v38 = vld [vmem:[%s16795_s5 + $0x1e0] ss:$16 sps:$4 sm:$0xff]  }
 0x2f8   :  { %7949 = vmatprep.subr.bf16.mxu0 %v10883_v23  ;;  %v17627_v32 = vld [vmem:[#allocation185_spill] sm:$0xff]  ;;  %v10922_v17 = vld [vmem:[%s16795_s5 + $0x20c] ss:$16 sps:$4 sm:$0xff]  }
 0x2f9   :  { %v10919_v59 = vld [vmem:[%s16795_s5 + $0x204] ss:$16 sps:$4 sm:$0xff]   ;;  %v10914_v20 = vld [vmem:[%s16795_s5 + $0x1e8] ss:$16 sps:$4 sm:$0xff]   ;;  %v10917_v23 = vld [vmem:[%s16795_s5 + $0x200] ss:$16 sps:$4 sm:$0xff]  }
 0x2fa   :  { %8400 = vmatpush1.bf16.msra.mxu1 %v10878_v51  ;;  %v10925_v51 = vld [vmem:[%s16795_s5 + $0x224] ss:$16 sps:$4 sm:$0xff]  }
 0x2fb   :  { %8401 = vmatprep.subr.bf16.mxu1 %v10886_v40  ;;  %7950 = vmatpush1.bf16.msra.mxu0 %v10881_v1  ;;  %v10928_v40 = vld [vmem:[%s16795_s5 + $0x22c] ss:$16 sps:$4 sm:$0xff]   ;;  %v10923_v1 = vld [vmem:[%s16795_s5 + $0x220] ss:$16 sps:$4 sm:$0xff]  }
 0x2fc   :  { %5569 = vmatmul.mubr.bf16.gmra.mrb[116].mxu0 %v17623_v19  ;;  %6021 = vmatmul.mubr.bf16.gmra.mrb[116].mxu1 %v17623_v19  ;;  %v10934_v19 = vld [vmem:[%s16795_s5 + $0x24c] ss:$16 sps:$4 sm:$0xff]  }
 0x2fd   :  { %5578 = vmatprep.mubr.bf16.mxu0 %v17624_v45  ;;  %7951 = vmatprep.subr.bf16.mxu0 %v10889_v41  ;;  %v10931_v41 = vld [vmem:[%s16795_s5 + $0x244] ss:$16 sps:$4 sm:$0xff]  }
 0x2fe   :  { %6030 = vmatprep.mubr.bf16.mxu1 %v17624_v45  ;;  %8402 = vmatpush1.bf16.msra.mxu1 %v10884_v24  ;;  %v10926_v24 = vld [vmem:[%s16795_s5 + $0x228] ss:$16 sps:$4 sm:$0xff]   ;;  %v10940_v45 = vld [vmem:[%s16795_s5 + $0x26c] ss:$16 sps:$4 sm:$0xff]  }
 0x2ff   :  { %8403 = vmatprep.subr.bf16.mxu1 %v10892_v39  ;;  %7952 = vmatpush1.bf16.msra.mxu0 %v10887_v48  ;;  %v10932_v39 = vld [vmem:[%s16795_s5 + $0x248] ss:$16 sps:$4 sm:$0xff]   ;;  %v10935_v48 = vld [vmem:[%s16795_s5 + $0x260] ss:$16 sps:$4 sm:$0xff]  }
 0x300   :  { %7953 = vmatprep.subr.bf16.mxu0 %v10895_v26  ;;  %v10943_v26 = vld [vmem:[%s16795_s5 + $0x284] ss:$16 sps:$4 sm:$0xff]  }
 0x302   :  { %8404 = vmatpush1.bf16.msra.mxu1 %v10890_v7  ;;  %v10938_v7 = vld [vmem:[%s16795_s5 + $0x268] ss:$16 sps:$4 sm:$0xff]  }
 0x303   :  { %8405 = vmatprep.subr.bf16.mxu1 %v10898_v43  ;;  %7954 = vmatpush1.bf16.msra.mxu0 %v10893_v6  ;;  %v10946_v43 = vld [vmem:[%s16795_s5 + $0x28c] ss:$16 sps:$4 sm:$0xff]   ;;  %v10944_v6 = vld [vmem:[%s16795_s5 + $0x288] ss:$16 sps:$4 sm:$0xff]  }
 0x304   :  { %5579 = vmatmul.mubr.bf16.gmra.mrb[120].mxu0 %v17625_v12  ;;  %6031 = vmatmul.mubr.bf16.gmra.mrb[120].mxu1 %v17625_v12  ;;  %v10955_v12 = vld [vmem:[%s16795_s5 + $0x2c4] ss:$16 sps:$4 sm:$0xff]  }
 0x305   :  { %5588 = vmatprep.mubr.bf16.mxu0 %v17626_v0  ;;  %7955 = vmatprep.subr.bf16.mxu0 %v10901_v47  ;;  %v10952_v47 = vld [vmem:[%s16795_s5 + $0x2ac] ss:$16 sps:$4 sm:$0xff]  }
 0x306   :  { %6040 = vmatprep.mubr.bf16.mxu1 %v17626_v0  ;;  %8406 = vmatpush1.bf16.msra.mxu1 %v10896_v56  ;;  %v10947_v56 = vld [vmem:[%s16795_s5 + $0x2a0] ss:$16 sps:$4 sm:$0xff]   ;;  %v10958_v0 = vld [vmem:[%s16795_s5 + $0x2cc] ss:$16 sps:$4 sm:$0xff]  }
 0x307   :  { %8407 = vmatprep.subr.bf16.mxu1 %v10904_v11  ;;  %7956 = vmatpush1.bf16.msra.mxu0 %v10899_v14  ;;  %v10950_v11 = vld [vmem:[%s16795_s5 + $0x2a8] ss:$16 sps:$4 sm:$0xff]  }
 0x308   :  { %7957 = vmatprep.subr.bf16.mxu0 %v10907_v30  ;;  %v10956_v14 = vld [vmem:[%s16795_s5 + $0x2c8] ss:$16 sps:$4 sm:$0xff]   ;;  %v10964_v30 = vld [vmem:[%s16795_s5 + $0x2ec] ss:$16 sps:$4 sm:$0xff]  }
 0x30a   :  { %8408 = vmatpush1.bf16.msra.mxu1 %v10902_v55  ;;  %v10959_v55 = vld [vmem:[%s16795_s5 + $0x2e0] ss:$16 sps:$4 sm:$0xff]  }
 0x30b   :  { %8409 = vmatprep.subr.bf16.mxu1 %v10910_v34  ;;  %7958 = vmatpush1.bf16.msra.mxu0 %v10905_v27  ;;  %v10967_v34 = vld [vmem:[%s16795_s5 + $0x304] ss:$16 sps:$4 sm:$0xff]   ;;  %v10962_v27 = vld [vmem:[%s16795_s5 + $0x2e8] ss:$16 sps:$4 sm:$0xff]  }
 0x30c   :  { %5589 = vmatmul.mubr.bf16.gmra.mrb[124].mxu0 %v17627_v32  ;;  %6041 = vmatmul.mubr.bf16.gmra.mrb[124].mxu1 %v17627_v32  ;;  %v10976_v32 = vld [vmem:[%s16795_s5 + $0x32c] ss:$16 sps:$4 sm:$0xff]  }
 0x30d   :  { %7961 = vmatprep.mubr.bf16.mxu0 %v15040_v46  ;;  %7959 = vmatprep.subr.bf16.mxu0 %v10913_v3  ;;  %v10970_v3 = vld [vmem:[%s16795_s5 + $0x30c] ss:$16 sps:$4 sm:$0xff]  }
 0x30e   :  { %8410 = vmatpush1.bf16.msra.mxu1 %v10908_v10  ;;  %8413 = vmatprep.mubr.bf16.mxu1 %v15040_v46  ;;  %v10920_v46 = vld [vmem:[%s16795_s5 + $0x208] ss:$16 sps:$4 sm:$0xff]  }
 0x30f   :  { %8411 = vmatprep.subr.bf16.mxu1 %v10916_v37  ;;  %7960 = vmatpush1.bf16.msra.mxu0 %v10911_v38  ;;  %v10968_v10 = vld [vmem:[%s16795_s5 + $0x308] ss:$16 sps:$4 sm:$0xff]   ;;  %v10971_v37 = vld [vmem:[%s16795_s5 + $0x320] ss:$16 sps:$4 sm:$0xff]   ;;  %v10979_v38 = vld [vmem:[%s16795_s5 + $0x344] ss:$16 sps:$4 sm:$0xff]  }
 0x310   :  { %8042 = vmatprep.subr.bf16.mxu0 %v10919_v59  ;;  %v10974_v59 = vld [vmem:[%s16795_s5 + $0x328] ss:$16 sps:$4 sm:$0xff]  }
 0x312   :  { %8412 = vmatpush1.bf16.msra.mxu1 %v10914_v20  ;;  %v10982_v20 = vld [vmem:[%s16795_s5 + $0x34c] ss:$16 sps:$4 sm:$0xff]  }
 0x313   :  { %8494 = vmatprep.subr.bf16.mxu1 %v10922_v17  ;;  %v10980_v17 = vld [vmem:[%s16795_s5 + $0x348] ss:$16 sps:$4 sm:$0xff]  }
 0x314   :  { %7962 = vmatmul.mubr.bf16.vlgmr.msra.gmra.mrb[128].mxu0 %v15016_v18 }
 0x315   :  { %7971 = vmatprep.mubr.bf16.mxu0 %v15114_v25  ;;  %8043 = vmatpush1.bf16.msra.mxu0 %v10917_v23  ;;  %v10988_v23 = vld [vmem:[%s16795_s5 + $0x36c] ss:$16 sps:$4 sm:$0xff]  }
 0x316   :  { %8414 = vmatmul.mubr.bf16.vlgmr.msra.gmra.mrb[128].mxu1 %v15016_v18  ;;  %8044 = vmatprep.subr.bf16.mxu0 %v10925_v51  ;;  %v10929_v18 = vld [vmem:[%s16795_s5 + $0x240] ss:$16 sps:$4 sm:$0xff]  }
 0x317   :  { %8423 = vmatprep.mubr.bf16.mxu1 %v15114_v25  ;;  %8495 = vmatpush1.bf16.msra.mxu1 %v10920_v46  ;;  %v10937_v25 = vld [vmem:[%s16795_s5 + $0x264] ss:$16 sps:$4 sm:$0xff]   ;;  %v10983_v51 = vld [vmem:[%s16795_s5 + $0x360] ss:$16 sps:$4 sm:$0xff]  }
 0x318   :  { %8496 = vmatprep.subr.bf16.mxu1 %v10928_v40  ;;  %v10991_v46 = vld [vmem:[%s16795_s5 + $0x384] ss:$16 sps:$4 sm:$0xff]   ;;  %v10986_v40 = vld [vmem:[%s16795_s5 + $0x368] ss:$16 sps:$4 sm:$0xff]  }
 0x319   :  { %8045 = vmatpush1.bf16.msra.mxu0 %v10923_v1  ;;  %v10994_v1 = vld [vmem:[%s16795_s5 + $0x38c] ss:$16 sps:$4 sm:$0xff]  }
 0x31a   :  { %8046 = vmatprep.subr.bf16.mxu0 %v10931_v41  ;;  %v10992_v41 = vld [vmem:[%s16795_s5 + $0x388] ss:$16 sps:$4 sm:$0xff]  }
 0x31b   :  { %8497 = vmatpush1.bf16.msra.mxu1 %v10926_v24  ;;  %v11000_v24 = vld [vmem:[%s16795_s5 + $0x3ac] ss:$16 sps:$4 sm:$0xff]  }
 0x31c   :  { %7972 = vmatmul.mubr.bf16.gmra.mrb[132].mxu0 %v15105_v8  ;;  %8498 = vmatprep.subr.bf16.mxu1 %v10934_v19  ;;  %v10995_v19 = vld [vmem:[%s16795_s5 + $0x3a0] ss:$16 sps:$4 sm:$0xff]  }
 0x31d   :  { %7981 = vmatprep.mubr.bf16.mxu0 %v15188_v21  ;;  %8047 = vmatpush1.bf16.msra.mxu0 %v10929_v18  ;;  %v11003_v18 = vld [vmem:[%s16795_s5 + $0x3c4] ss:$16 sps:$4 sm:$0xff]  }
 0x31e   :  { %8424 = vmatmul.mubr.bf16.gmra.mrb[132].mxu1 %v15105_v8  ;;  %8048 = vmatprep.subr.bf16.mxu0 %v10937_v25  ;;  %v10941_v8 = vld [vmem:[%s16795_s5 + $0x280] ss:$16 sps:$4 sm:$0xff]   ;;  %v10998_v25 = vld [vmem:[%s16795_s5 + $0x3a8] ss:$16 sps:$4 sm:$0xff]  }
 0x31f   :  { %8433 = vmatprep.mubr.bf16.mxu1 %v15188_v21  ;;  %8499 = vmatpush1.bf16.msra.mxu1 %v10932_v39  ;;  %v10949_v21 = vld [vmem:[%s16795_s5 + $0x2a4] ss:$16 sps:$4 sm:$0xff]   ;;  %v11006_v39 = vld [vmem:[%s16795_s5 + $0x3cc] ss:$16 sps:$4 sm:$0xff]  }
 0x320   :  { %8500 = vmatprep.subr.bf16.mxu1 %v10940_v45  ;;  %v11004_v45 = vld [vmem:[%s16795_s5 + $0x3c8] ss:$16 sps:$4 sm:$0xff]  }
 0x321   :  { %8049 = vmatpush1.bf16.msra.mxu0 %v10935_v48  ;;  %v11012_v48 = vld [vmem:[%s16795_s5 + $0x3ec] ss:$16 sps:$4 sm:$0xff]  }
 0x322   :  { %8050 = vmatprep.subr.bf16.mxu0 %v10943_v26  ;;  %v11007_v26 = vld [vmem:[%s16795_s5 + $0x3e0] ss:$16 sps:$4 sm:$0xff]  }
 0x323   :  { %8501 = vmatpush1.bf16.msra.mxu1 %v10938_v7  ;;  %v11015_v7 = vld [vmem:[%s16795_s5 + $0x404] ss:$16 sps:$4 sm:$0xff]  }
 0x324   :  { %7982 = vmatmul.mubr.bf16.gmra.mrb[136].mxu0 %v15179_v33  ;;  %8502 = vmatprep.subr.bf16.mxu1 %v10946_v43  ;;  %v11010_v43 = vld [vmem:[%s16795_s5 + $0x3e8] ss:$16 sps:$4 sm:$0xff]  }
 0x325   :  { %7991 = vmatprep.mubr.bf16.mxu0 %v15262_v31  ;;  %8051 = vmatpush1.bf16.msra.mxu0 %v10941_v8  ;;  %v11018_v8 = vld [vmem:[%s16795_s5 + $0x40c] ss:$16 sps:$4 sm:$0xff]  }
 0x326   :  { %8434 = vmatmul.mubr.bf16.gmra.mrb[136].mxu1 %v15179_v33  ;;  %8052 = vmatprep.subr.bf16.mxu0 %v10949_v21  ;;  %v10953_v33 = vld [vmem:[%s16795_s5 + $0x2c0] ss:$16 sps:$4 sm:$0xff]   ;;  %v11021_v21 = vld [vmem:[%s16795_s5 + $0x424] ss:$16 sps:$4 sm:$0xff]  }
 0x327   :  { %8443 = vmatprep.mubr.bf16.mxu1 %v15262_v31  ;;  %8503 = vmatpush1.bf16.msra.mxu1 %v10944_v6  ;;  %v10961_v31 = vld [vmem:[%s16795_s5 + $0x2e4] ss:$16 sps:$4 sm:$0xff]   ;;  %v11024_v6 = vld [vmem:[%s16795_s5 + $0x42c] ss:$16 sps:$4 sm:$0xff]  }
 0x328   :  { %8504 = vmatprep.subr.bf16.mxu1 %v10952_v47  ;;  %v11019_v47 = vld [vmem:[%s16795_s5 + $0x420] ss:$16 sps:$4 sm:$0xff]  }
 0x329   :  { %8053 = vmatpush1.bf16.msra.mxu0 %v10947_v56  ;;  %v11027_v56 = vld [vmem:[%s16795_s5 + $0x444] ss:$16 sps:$4 sm:$0xff]  }
 0x32a   :  { %8054 = vmatprep.subr.bf16.mxu0 %v10955_v12  ;;  %v11022_v12 = vld [vmem:[%s16795_s5 + $0x428] ss:$16 sps:$4 sm:$0xff]  }
 0x32b   :  { %8505 = vmatpush1.bf16.msra.mxu1 %v10950_v11  ;;  %v11030_v11 = vld [vmem:[%s16795_s5 + $0x44c] ss:$16 sps:$4 sm:$0xff]  }
 0x32c   :  { %7992 = vmatmul.mubr.bf16.gmra.mrb[140].mxu0 %v15253_v22  ;;  %8506 = vmatprep.subr.bf16.mxu1 %v10958_v0  ;;  %v11028_v0 = vld [vmem:[%s16795_s5 + $0x448] ss:$16 sps:$4 sm:$0xff]  }
 0x32d   :  { %8001 = vmatprep.mubr.bf16.mxu0 %v15338_v9  ;;  %8055 = vmatpush1.bf16.msra.mxu0 %v10953_v33  ;;  %v11036_v33 = vld [vmem:[%s16795_s5 + $0x46c] ss:$16 sps:$4 sm:$0xff]  }
 0x32e   :  { %8444 = vmatmul.mubr.bf16.gmra.mrb[140].mxu1 %v15253_v22  ;;  %8056 = vmatprep.subr.bf16.mxu0 %v10961_v31  ;;  %v10965_v22 = vld [vmem:[%s16795_s5 + $0x300] ss:$16 sps:$4 sm:$0xff]  }
 0x32f   :  { %8453 = vmatprep.mubr.bf16.mxu1 %v15338_v9  ;;  %8507 = vmatpush1.bf16.msra.mxu1 %v10956_v14  ;;  %v10973_v9 = vld [vmem:[%s16795_s5 + $0x324] ss:$16 sps:$4 sm:$0xff]   ;;  %v11031_v31 = vld [vmem:[%s16795_s5 + $0x460] ss:$16 sps:$4 sm:$0xff]  }
 0x330   :  { %8508 = vmatprep.subr.bf16.mxu1 %v10964_v30  ;;  %v11039_v14 = vld [vmem:[%s16795_s5 + $0x484] ss:$16 sps:$4 sm:$0xff]   ;;  %v11034_v30 = vld [vmem:[%s16795_s5 + $0x468] ss:$16 sps:$4 sm:$0xff]  }
 0x331   :  { %8057 = vmatpush1.bf16.msra.mxu0 %v10959_v55  ;;  %v11042_v55 = vld [vmem:[%s16795_s5 + $0x48c] ss:$16 sps:$4 sm:$0xff]  }
 0x332   :  { %8058 = vmatprep.subr.bf16.mxu0 %v10967_v34  ;;  %v11040_v34 = vld [vmem:[%s16795_s5 + $0x488] ss:$16 sps:$4 sm:$0xff]  }
 0x333   :  { %8509 = vmatpush1.bf16.msra.mxu1 %v10962_v27  ;;  %v11048_v27 = vld [vmem:[%s16795_s5 + $0x4ac] ss:$16 sps:$4 sm:$0xff]  }
 0x334   :  { %8002 = vmatmul.mubr.bf16.gmra.mrb[144].mxu0 %v15326_v62  ;;  %8510 = vmatprep.subr.bf16.mxu1 %v10970_v3  ;;  %v11043_v3 = vld [vmem:[%s16795_s5 + $0x4a0] ss:$16 sps:$4 sm:$0xff]  }
 0x335   :  { %8011 = vmatprep.mubr.bf16.mxu0 %v15398_v2  ;;  %8059 = vmatpush1.bf16.msra.mxu0 %v10965_v22  ;;  %v11051_v22 = vld [vmem:[%s16795_s5 + $0x4c4] ss:$16 sps:$4 sm:$0xff]  }
 0x336   :  { %8454 = vmatmul.mubr.bf16.gmra.mrb[144].mxu1 %v15326_v62  ;;  %8060 = vmatprep.subr.bf16.mxu0 %v10973_v9  ;;  %v10977_v62 = vld [vmem:[%s16795_s5 + $0x340] ss:$16 sps:$4 sm:$0xff]   ;;  %v11046_v9 = vld [vmem:[%s16795_s5 + $0x4a8] ss:$16 sps:$4 sm:$0xff]  }
 0x337   :  { %8463 = vmatprep.mubr.bf16.mxu1 %v15398_v2  ;;  %8511 = vmatpush1.bf16.msra.mxu1 %v10968_v10  ;;  %v10985_v2 = vld [vmem:[%s16795_s5 + $0x364] ss:$16 sps:$4 sm:$0xff]   ;;  %v11054_v10 = vld [vmem:[%s16795_s5 + $0x4cc] ss:$16 sps:$4 sm:$0xff]  }
 0x338   :  { %8512 = vmatprep.subr.bf16.mxu1 %v10976_v32  ;;  %v11052_v32 = vld [vmem:[%s16795_s5 + $0x4c8] ss:$16 sps:$4 sm:$0xff]  }
 0x339   :  { %8061 = vmatpush1.bf16.msra.mxu0 %v10971_v37  ;;  %v11060_v37 = vld [vmem:[%s16795_s5 + $0x4ec] ss:$16 sps:$4 sm:$0xff]  }
 0x33a   :  { %8062 = vmatprep.subr.bf16.mxu0 %v10979_v38  ;;  %v11055_v38 = vld [vmem:[%s16795_s5 + $0x4e0] ss:$16 sps:$4 sm:$0xff]  }
 0x33b   :  { %8513 = vmatpush1.bf16.msra.mxu1 %v10974_v59  ;;  %v11063_v59 = vld [vmem:[%s16795_s5 + $0x504] ss:$16 sps:$4 sm:$0xff]  }
 0x33c   :  { %8012 = vmatmul.mubr.bf16.gmra.mrb[148].mxu0 %v15389_v53  ;;  %8514 = vmatprep.subr.bf16.mxu1 %v10982_v20  ;;  %v11058_v20 = vld [vmem:[%s16795_s5 + $0x4e8] ss:$16 sps:$4 sm:$0xff]  }
 0x33d   :  { %8021 = vmatprep.mubr.bf16.mxu0 %v15452_v42  ;;  %8063 = vmatpush1.bf16.msra.mxu0 %v10977_v62  ;;  %v11066_v62 = vld [vmem:[%s16795_s5 + $0x50c] ss:$16 sps:$4 sm:$0xff]  }
 0x33e   :  { %8464 = vmatmul.mubr.bf16.gmra.mrb[148].mxu1 %v15389_v53  ;;  %8064 = vmatprep.subr.bf16.mxu0 %v10985_v2  ;;  %v10989_v53 = vld [vmem:[%s16795_s5 + $0x380] ss:$16 sps:$4 sm:$0xff]   ;;  %v11064_v2 = vld [vmem:[%s16795_s5 + $0x508] ss:$16 sps:$4 sm:$0xff]  }
 0x33f   :  { %8473 = vmatprep.mubr.bf16.mxu1 %v15452_v42  ;;  %8515 = vmatpush1.bf16.msra.mxu1 %v10980_v17  ;;  %v10997_v42 = vld [vmem:[%s16795_s5 + $0x3a4] ss:$16 sps:$4 sm:$0xff]   ;;  %v11072_v17 = vld [vmem:[%s16795_s5 + $0x52c] ss:$16 sps:$4 sm:$0xff]  }
 0x340   :  { %8516 = vmatprep.subr.bf16.mxu1 %v10988_v23  ;;  %v11067_v23 = vld [vmem:[%s16795_s5 + $0x520] ss:$16 sps:$4 sm:$0xff]  }
 0x341   :  { %8065 = vmatpush1.bf16.msra.mxu0 %v10983_v51  ;;  %v11075_v51 = vld [vmem:[%s16795_s5 + $0x544] ss:$16 sps:$4 sm:$0xff]  }
 0x342   :  { %8066 = vmatprep.subr.bf16.mxu0 %v10991_v46  ;;  %v11070_v46 = vld [vmem:[%s16795_s5 + $0x528] ss:$16 sps:$4 sm:$0xff]  }
 0x343   :  { %8517 = vmatpush1.bf16.msra.mxu1 %v10986_v40  ;;  %v11078_v40 = vld [vmem:[%s16795_s5 + $0x54c] ss:$16 sps:$4 sm:$0xff]  }
 0x344   :  { %8022 = vmatmul.mubr.bf16.gmra.mrb[152].mxu0 %v15443_v35  ;;  %8518 = vmatprep.subr.bf16.mxu1 %v10994_v1  ;;  %v11076_v1 = vld [vmem:[%s16795_s5 + $0x548] ss:$16 sps:$4 sm:$0xff]  }
 0x345   :  { %8031 = vmatprep.mubr.bf16.mxu0 %v15508_v4  ;;  %8067 = vmatpush1.bf16.msra.mxu0 %v10989_v53  ;;  %v11084_v53 = vld [vmem:[%s16795_s5 + $0x56c] ss:$16 sps:$4 sm:$0xff]  }
 0x346   :  { %8474 = vmatmul.mubr.bf16.gmra.mrb[152].mxu1 %v15443_v35  ;;  %8068 = vmatprep.subr.bf16.mxu0 %v10997_v42  ;;  %v11001_v35 = vld [vmem:[%s16795_s5 + $0x3c0] ss:$16 sps:$4 sm:$0xff]  }
 0x347   :  { %8483 = vmatprep.mubr.bf16.mxu1 %v15508_v4  ;;  %8519 = vmatpush1.bf16.msra.mxu1 %v10992_v41  ;;  %v11009_v4 = vld [vmem:[%s16795_s5 + $0x3e4] ss:$16 sps:$4 sm:$0xff]   ;;  %v11079_v42 = vld [vmem:[%s16795_s5 + $0x560] ss:$16 sps:$4 sm:$0xff]  }
 0x348   :  { %8520 = vmatprep.subr.bf16.mxu1 %v11000_v24  ;;  %v11087_v41 = vld [vmem:[%s16795_s5 + $0x584] ss:$16 sps:$4 sm:$0xff]   ;;  %v11082_v24 = vld [vmem:[%s16795_s5 + $0x568] ss:$16 sps:$4 sm:$0xff]  }
 0x349   :  { %8069 = vmatpush1.bf16.msra.mxu0 %v10995_v19  ;;  %v11090_v19 = vld [vmem:[%s16795_s5 + $0x58c] ss:$16 sps:$4 sm:$0xff]  }
 0x34a   :  { %8070 = vmatprep.subr.bf16.mxu0 %v11003_v18  ;;  %v11088_v18 = vld [vmem:[%s16795_s5 + $0x588] ss:$16 sps:$4 sm:$0xff]  }
 0x34b   :  { %8521 = vmatpush1.bf16.msra.mxu1 %v10998_v25  ;;  %v11096_v25 = vld [vmem:[%s16795_s5 + $0x5ac] ss:$16 sps:$4 sm:$0xff]  }
 0x34c   :  { %8032 = vmatmul.mubr.bf16.gmra.mrb[156].mxu0 %v15501_v15  ;;  %8522 = vmatprep.subr.bf16.mxu1 %v11006_v39  ;;  %v11091_v39 = vld [vmem:[%s16795_s5 + $0x5a0] ss:$16 sps:$4 sm:$0xff]  }
 0x34d   :  { %8071 = vmatpush1.bf16.msra.mxu0 %v11001_v35  ;;  %8074 = vmatprep.mubr.bf16.mxu0 %v15042_v36  ;;  %v11099_v35 = vld [vmem:[%s16795_s5 + $0x5c4] ss:$16 sps:$4 sm:$0xff]  }
 0x34e   :  { %8484 = vmatmul.mubr.bf16.gmra.mrb[156].mxu1 %v15501_v15  ;;  %8072 = vmatprep.subr.bf16.mxu0 %v11009_v4  ;;  %v11013_v15 = vld [vmem:[%s16795_s5 + $0x400] ss:$16 sps:$4 sm:$0xff]   ;;  %v11094_v4 = vld [vmem:[%s16795_s5 + $0x5a8] ss:$16 sps:$4 sm:$0xff]  }
 0x34f   :  { %8523 = vmatpush1.bf16.msra.mxu1 %v11004_v45  ;;  %8526 = vmatprep.mubr.bf16.mxu1 %v15042_v36  ;;  %v11016_v36 = vld [vmem:[%s16795_s5 + $0x408] ss:$16 sps:$4 sm:$0xff]   ;;  %v11102_v45 = vld [vmem:[%s16795_s5 + $0x5cc] ss:$16 sps:$4 sm:$0xff]  }
 0x350   :  { %8524 = vmatprep.subr.bf16.mxu1 %v11012_v48  ;;  %v11100_v48 = vld [vmem:[%s16795_s5 + $0x5c8] ss:$16 sps:$4 sm:$0xff]  }
 0x351   :  { %8073 = vmatpush1.bf16.msra.mxu0 %v11007_v26  ;;  %v11108_v26 = vld [vmem:[%s16795_s5 + $0x5ec] ss:$16 sps:$4 sm:$0xff]  }
 0x352   :  { %8155 = vmatprep.subr.bf16.mxu0 %v11015_v7  ;;  %v11103_v7 = vld [vmem:[%s16795_s5 + $0x5e0] ss:$16 sps:$4 sm:$0xff]  }
 0x353   :  { %8525 = vmatpush1.bf16.msra.mxu1 %v11010_v43  ;;  %v11111_v43 = vld [vmem:[%s16795_s5 + $0x604] ss:$16 sps:$4 sm:$0xff]  }
 0x354   :  { %8075 = vmatmul.mubr.bf16.vlgmr.msra.gmra.mrb[128].mxu0 %v15018_v52  ;;  %8607 = vmatprep.subr.bf16.mxu1 %v11018_v8  ;;  %v11106_v8 = vld [vmem:[%s16795_s5 + $0x5e8] ss:$16 sps:$4 sm:$0xff]  }
 0x355   :  { %8084 = vmatprep.mubr.bf16.mxu0 %v15116_v16  ;;  %8156 = vmatpush1.bf16.msra.mxu0 %v11013_v15  ;;  %v11114_v15 = vld [vmem:[%s16795_s5 + $0x60c] ss:$16 sps:$4 sm:$0xff]  }
 0x356   :  { %8527 = vmatmul.mubr.bf16.vlgmr.msra.gmra.mrb[128].mxu1 %v15018_v52  ;;  %8157 = vmatprep.subr.bf16.mxu0 %v11021_v21  ;;  %v11025_v52 = vld [vmem:[%s16795_s5 + $0x440] ss:$16 sps:$4 sm:$0xff]  }
 0x357   :  { %8536 = vmatprep.mubr.bf16.mxu1 %v15116_v16  ;;  %8608 = vmatpush1.bf16.msra.mxu1 %v11016_v36  ;;  %v11033_v16 = vld [vmem:[%s16795_s5 + $0x464] ss:$16 sps:$4 sm:$0xff]  }
 0x358   :  { %8609 = vmatprep.subr.bf16.mxu1 %v11024_v6  ;;  %v17628_v21 = vld [vmem:[#allocation3_spill] sm:$0xff] }
 0x359   :  { %8158 = vmatpush1.bf16.msra.mxu0 %v11019_v47  ;;  %v17629_v36 = vsub.s32 4, %v17628_v21  ;;  %v17630_v47 = vsub.s32 5, %v17628_v21 }
 0x35a   :  { %8159 = vmatprep.subr.bf16.mxu0 %v11027_v56 }
 0x35b   :  { %8610 = vmatpush1.bf16.msra.mxu1 %v11022_v12  ;;  %v17631_v12 = vsub.s32 6, %v17628_v21 }
 0x35c   :  { %8085 = vmatmul.mubr.bf16.gmra.mrb[132].mxu0 %v15107_v29  ;;  %8611 = vmatprep.subr.bf16.mxu1 %v11030_v11 }
 0x35d   :  { %8094 = vmatprep.mubr.bf16.mxu0 %v15190_v54  ;;  %8160 = vmatpush1.bf16.msra.mxu0 %v11025_v52 }
 0x35e   :  { %8537 = vmatmul.mubr.bf16.gmra.mrb[132].mxu1 %v15107_v29  ;;  %8161 = vmatprep.subr.bf16.mxu0 %v11033_v16  ;;  %v11037_v29 = vld [vmem:[%s16795_s5 + $0x480] ss:$16 sps:$4 sm:$0xff]   ;;  %v17632_v16 = vsub.s32 7, %v17628_v21 }
 0x35f   :  { %8546 = vmatprep.mubr.bf16.mxu1 %v15190_v54  ;;  %8612 = vmatpush1.bf16.msra.mxu1 %v11028_v0  ;;  %v11045_v54 = vld [vmem:[%s16795_s5 + $0x4a4] ss:$16 sps:$4 sm:$0xff]  }
 0x360   :  { %8613 = vmatprep.subr.bf16.mxu1 %v11036_v33 }
 0x361   :  { %8162 = vmatpush1.bf16.msra.mxu0 %v11031_v31 }
 0x362   :  { %8163 = vmatprep.subr.bf16.mxu0 %v11039_v14 }
 0x363   :  { %8614 = vmatpush1.bf16.msra.mxu1 %v11034_v30 }
 0x364   :  { %8095 = vmatmul.mubr.bf16.gmra.mrb[136].mxu0 %v15181_v50  ;;  %8615 = vmatprep.subr.bf16.mxu1 %v11042_v55 }
 0x365   :  { %8104 = vmatprep.mubr.bf16.mxu0 %v15264_v58  ;;  %8164 = vmatpush1.bf16.msra.mxu0 %v11037_v29 }
 0x366   :  { %8547 = vmatmul.mubr.bf16.gmra.mrb[136].mxu1 %v15181_v50  ;;  %8165 = vmatprep.subr.bf16.mxu0 %v11045_v54  ;;  %v11049_v50 = vld [vmem:[%s16795_s5 + $0x4c0] ss:$16 sps:$4 sm:$0xff]  }
 0x367   :  { %8556 = vmatprep.mubr.bf16.mxu1 %v15264_v58  ;;  %8616 = vmatpush1.bf16.msra.mxu1 %v11040_v34  ;;  %v11057_v58 = vld [vmem:[%s16795_s5 + $0x4e4] ss:$16 sps:$4 sm:$0xff]  }
 0x368   :  { %8617 = vmatprep.subr.bf16.mxu1 %v11048_v27 }
 0x369   :  { %8166 = vmatpush1.bf16.msra.mxu0 %v11043_v3 }
 0x36a   :  { %8167 = vmatprep.subr.bf16.mxu0 %v11051_v22 }
 0x36b   :  { %8618 = vmatpush1.bf16.msra.mxu1 %v11046_v9 }
 0x36c   :  { %8105 = vmatmul.mubr.bf16.gmra.mrb[140].mxu0 %v15255_v63  ;;  %8619 = vmatprep.subr.bf16.mxu1 %v11054_v10 }
 0x36d   :  { %8114 = vmatprep.mubr.bf16.mxu0 %v15340_v28  ;;  %8168 = vmatpush1.bf16.msra.mxu0 %v11049_v50 }
 0x36e   :  { %8557 = vmatmul.mubr.bf16.gmra.mrb[140].mxu1 %v15255_v63  ;;  %8169 = vmatprep.subr.bf16.mxu0 %v11057_v58  ;;  %v11061_v63 = vld [vmem:[%s16795_s5 + $0x500] ss:$16 sps:$4 sm:$0xff]  }
 0x36f   :  { %8566 = vmatprep.mubr.bf16.mxu1 %v15340_v28  ;;  %8620 = vmatpush1.bf16.msra.mxu1 %v11052_v32  ;;  %v11069_v28 = vld [vmem:[%s16795_s5 + $0x524] ss:$16 sps:$4 sm:$0xff]  }
 0x370   :  { %8621 = vmatprep.subr.bf16.mxu1 %v11060_v37 }
 0x371   :  { %8170 = vmatpush1.bf16.msra.mxu0 %v11055_v38 }
 0x372   :  { %8171 = vmatprep.subr.bf16.mxu0 %v11063_v59 }
 0x373   :  { %8622 = vmatpush1.bf16.msra.mxu1 %v11058_v20 }
 0x374   :  { %8115 = vmatmul.mubr.bf16.gmra.mrb[144].mxu0 %v15328_v60  ;;  %8623 = vmatprep.subr.bf16.mxu1 %v11066_v62 }
 0x375   :  { %8124 = vmatprep.mubr.bf16.mxu0 %v15400_v61  ;;  %8172 = vmatpush1.bf16.msra.mxu0 %v11061_v63  ;;  %v17633_v63 = vld [vmem:[#allocation128_spill] sm:$0xff] }
 0x376   :  { %8567 = vmatmul.mubr.bf16.gmra.mrb[144].mxu1 %v15328_v60  ;;  %8173 = vmatprep.subr.bf16.mxu0 %v11069_v28  ;;  %v11073_v60 = vld [vmem:[%s16795_s5 + $0x540] ss:$16 sps:$4 sm:$0xff]   ;;  %v17634_v28 = vmax.f32 %v17633_v63, 0.0 }
 0x377   :  { %8576 = vmatprep.mubr.bf16.mxu1 %v15400_v61  ;;  %8624 = vmatpush1.bf16.msra.mxu1 %v11064_v2  ;;  %v11081_v61 = vld [vmem:[%s16795_s5 + $0x564] ss:$16 sps:$4 sm:$0xff]  }
 0x378   :  { %8625 = vmatprep.subr.bf16.mxu1 %v11072_v17  ;;  %v17635_v17 = vld [vmem:[#allocation129_spill] sm:$0xff] }
 0x379   :  { %8174 = vmatpush1.bf16.msra.mxu0 %v11067_v23  ;;  %v17636_v23 = vmax.f32 %v17635_v17, 0.0 }
 0x37a   :  { %8175 = vmatprep.subr.bf16.mxu0 %v11075_v51 }
 0x37b   :  { %8626 = vmatpush1.bf16.msra.mxu1 %v11070_v46 }
 0x37c   :  { %8125 = vmatmul.mubr.bf16.gmra.mrb[148].mxu0 %v15391_v44  ;;  %8627 = vmatprep.subr.bf16.mxu1 %v11078_v40  ;;  %v17637_v40 = vld [vmem:[#allocation122_spill] sm:$0xff] }
 0x37d   :  { %8134 = vmatprep.mubr.bf16.mxu0 %v15454_v5  ;;  %8176 = vmatpush1.bf16.msra.mxu0 %v11073_v60  ;;  %v17638_v60 = vmax.f32 %v17637_v40, 0.0  ;;  %v17653_v40 = vld [vmem:[#allocation72_spill] sm:$0xff] }
 0x37e   :  { %8577 = vmatmul.mubr.bf16.gmra.mrb[148].mxu1 %v15391_v44  ;;  %8177 = vmatprep.subr.bf16.mxu0 %v11081_v61  ;;  %v11085_v44 = vld [vmem:[%s16795_s5 + $0x580] ss:$16 sps:$4 sm:$0xff]  }
 0x37f   :  { %8586 = vmatprep.mubr.bf16.mxu1 %v15454_v5  ;;  %8628 = vmatpush1.bf16.msra.mxu1 %v11076_v1  ;;  %v11093_v5 = vld [vmem:[%s16795_s5 + $0x5a4] ss:$16 sps:$4 sm:$0xff]  }
 0x380   :  { %8629 = vmatprep.subr.bf16.mxu1 %v11084_v53  ;;  %v17639_v1 = vld [vmem:[#allocation123_spill] sm:$0xff] }
 0x381   :  { %8178 = vmatpush1.bf16.msra.mxu0 %v11079_v42  ;;  %v17640_v53 = vmax.f32 %v17639_v1, 0.0  ;;  %v17655_v1 = vld [vmem:[#allocation130_spill] sm:$0xff] }
 0x382   :  { %8179 = vmatprep.subr.bf16.mxu0 %v11087_v41 }
 0x383   :  { %8630 = vmatpush1.bf16.msra.mxu1 %v11082_v24 }
 0x384   :  { %8135 = vmatmul.mubr.bf16.gmra.mrb[152].mxu0 %v15445_v57  ;;  %8631 = vmatprep.subr.bf16.mxu1 %v11090_v19  ;;  %v17641_v19 = vld [vmem:[#allocation161_spill] sm:$0xff] }
 0x385   :  { %8144 = vmatprep.mubr.bf16.mxu0 %v15510_v13  ;;  %8180 = vmatpush1.bf16.msra.mxu0 %v11085_v44  ;;  %v17642_v44 = vmax.f32 %v17641_v19, 0.0 }
 0x386   :  { %8587 = vmatmul.mubr.bf16.gmra.mrb[152].mxu1 %v15445_v57  ;;  %8181 = vmatprep.subr.bf16.mxu0 %v11093_v5  ;;  %v11097_v57 = vld [vmem:[%s16795_s5 + $0x5c0] ss:$16 sps:$4 sm:$0xff]  }
 0x387   :  { %8596 = vmatprep.mubr.bf16.mxu1 %v15510_v13  ;;  %8632 = vmatpush1.bf16.msra.mxu1 %v11088_v18  ;;  %v11105_v13 = vld [vmem:[%s16795_s5 + $0x5e4] ss:$16 sps:$4 sm:$0xff]  }
 0x388   :  { %8633 = vmatprep.subr.bf16.mxu1 %v11096_v25  ;;  %v17643_v25 = vld [vmem:[#allocation162_spill] sm:$0xff] }
 0x389   :  { %8182 = vmatpush1.bf16.msra.mxu0 %v11091_v39  ;;  %v17644_v39 = vmax.f32 %v17643_v25, 0.0 }
 0x38a   :  { %8183 = vmatprep.subr.bf16.mxu0 %v11099_v35 }
 0x38b   :  { %8634 = vmatpush1.bf16.msra.mxu1 %v11094_v4 }
 0x38c   :  { %8145 = vmatmul.mubr.bf16.gmra.mrb[156].mxu0 %v15503_v49  ;;  %8635 = vmatprep.subr.bf16.mxu1 %v11102_v45 }
 0x38d   :  { %8184 = vmatpush1.bf16.msra.mxu0 %v11097_v57  ;;  %v11109_v57 = vld [vmem:[%s16795_s5 + $0x600] ss:$16 sps:$4 sm:$0xff]  }
 0x38e   :  { %8597 = vmatmul.mubr.bf16.gmra.mrb[156].mxu1 %v15503_v49  ;;  %8185 = vmatprep.subr.bf16.mxu0 %v11105_v13  ;;  %v11270_v49 = vld [vmem:[%s16796_s4] sm:$0xff]  ;;  %v17645_v13 = vld [vmem:[#allocation156_spill] sm:$0xff] }
 0x38f   :  { %8636 = vmatpush1.bf16.msra.mxu1 %v11100_v48  ;;  %v16100_v6 = vrot.slane %v11270_v49, %v17629_v36  ;;  %v16104_v56 = vrot.slane %v11270_v49, %v17630_v47  ;;  %v16108_v11 = vrot.slane %v11270_v49, %v17631_v12  ;;  %v16112_v0 = vrot.slane %v11270_v49, %v17632_v16  ;;  %v11112_v47 = vld [vmem:[%s16795_s5 + $0x608] ss:$16 sps:$4 sm:$0xff]   ;;  %v11117_v12 = vld [vmem:[%s16795_s5 + $0x624] ss:$16 sps:$4 sm:$0xff]  }
 0x390   :  { %8637 = vmatprep.subr.bf16.mxu1 %v11108_v26  ;;  %v17646_v48 = vmax.f32 %v17645_v13, 0.0 }
 0x391   :  { %8186 = vmatpush1.bf16.msra.mxu0 %v11103_v7  ;;  %v17647_v7 = vld [vmem:[#allocation157_spill] sm:$0xff] }
 0x392   :  { %8268 = vmatprep.subr.bf16.mxu0 %v11111_v43  ;;  %v17648_v43 = vmax.f32 %v17647_v7, 0.0  ;;  %v17663_v7 = vld [vmem:[#allocation166_spill] sm:$0xff] }
 0x393   :  { %8638 = vmatpush1.bf16.msra.mxu1 %v11106_v8 }
 0x394   :  { %8720 = vmatprep.subr.bf16.mxu1 %v11114_v15 }
 0x3a5   :  { %v5520_v52 = vpop.f32.mrb[96].mxu0 }
 0x3a6   :  { %v10116_v33 = vadd.f32 %v5520_v52, %v16100_v6  ;;  %v5522_v31 = vpop.f32.mrb[97].mxu0 }
 0x3a7   :  { %v5972_v14 = vpop.f32.mrb[96].mxu1  ;;  %v10117_v30 = vadd.f32 %v5522_v31, %v16104_v56  ;;  %v5524_v55 = vpop.f32.mrb[98].mxu0 }
 0x3a8   :  { %v6055_v29 = vmax.f32 %v10116_v33, 0.0  ;;  %v10148_v54 = vadd.f32 %v5972_v14, %v16108_v11  ;;  %v5974_v34 = vpop.f32.mrb[97].mxu1  ;;  %v10118_v27 = vadd.f32 %v5524_v55, %v16100_v6  ;;  %v5526_v3 = vpop.f32.mrb[99].mxu0  ;;  %v11120_v55 = vld [vmem:[%s16795_s5 + $0x62c] ss:$16 sps:$4 sm:$0xff]  }
 0x3a9   :  { %v6056_v22 = vmax.f32 %v10117_v30, 0.0  ;;  %v10149_v9 = vadd.f32 %v5974_v34, %v16112_v0  ;;  %v5976_v10 = vpop.f32.mrb[98].mxu1  ;;  %v10119_v50 = vadd.f32 %v5526_v3, %v16104_v56 }
 0x3aa   :  { %v6057_v58 = vmax.f32 %v10148_v54, 0.0  ;;  %v6063_v32 = vmax.f32 %v10118_v27, 0.0  ;;  %v10150_v37 = vadd.f32 %v5976_v10, %v16108_v11  ;;  %v5978_v38 = vpop.f32.mrb[99].mxu1  ;;  %v6183_v2 = vadd.f32 %v6055_v29, %v17634_v28  ;;  %v17651_v28 = vld [vmem:[#allocation133_spill] sm:$0xff] }
 0x3ab   :  { %v6058_v59 = vmax.f32 %v10149_v9, 0.0  ;;  %v6064_v20 = vmax.f32 %v10119_v50, 0.0  ;;  %v10151_v62 = vadd.f32 %v5978_v38, %v16112_v0  ;;  %v6184_v61 = vadd.f32 %v6056_v22, %v17638_v60  ;;  %v11115_v38 = vld [vmem:[%s16795_s5 + $0x620] ss:$16 sps:$4 sm:$0xff]  }
 0x3ac   :  { %v6191_v51 = vadd.f32 %v6063_v32, %v17636_v23  ;;  %v6065_v46 = vmax.f32 %v10150_v37, 0.0  ;;  %v6185_v5 = vadd.f32 %v6057_v58, %v17642_v44  ;;  %v17654_v60 = vmax.f32 %v17653_v40, 0.0  ;;  %v11135_v40 = vld [vmem:[%s16795_s5 + $0x684] ss:$16 sps:$4 sm:$0xff]  }
 0x3ad   :  { %v6192_v42 = vadd.f32 %v6064_v20, %v17640_v53  ;;  %v6066_v41 = vmax.f32 %v10151_v62, 0.0  ;;  %v5530_v24 = vpop.f32.mrb[100].mxu0  ;;  %v6186_v26 = vadd.f32 %v6058_v59, %v17646_v48  ;;  %v11118_v59 = vld [vmem:[%s16795_s5 + $0x628] ss:$16 sps:$4 sm:$0xff]   ;;  %v17656_v53 = vmax.f32 %v17655_v1, 0.0 }
 0x3ae   :  { %v6311_v18 = vpack.c.bf16 %v6191_v51, %v6183_v2  ;;  %v6193_v35 = vadd.f32 %v6065_v46, %v17644_v39  ;;  %v10120_v4 = vadd.f32 %v5530_v24, %v16100_v6  ;;  %v5532_v45 = vpop.f32.mrb[101].mxu0  ;;  %v17649_v20 = vld [vmem:[#allocation132_spill] sm:$0xff]  ;;  %v17652_v2 = vmax.f32 %v17651_v28, 0.0  ;;  %v11123_v51 = vld [vmem:[%s16795_s5 + $0x644] ss:$16 sps:$4 sm:$0xff]  }
 0x3af   :  { %v6194_v8 = vadd.f32 %v6066_v41, %v17648_v43  ;;  %v5982_v15 = vpop.f32.mrb[100].mxu1  ;;  %v10121_v49 = vadd.f32 %v5532_v45, %v16104_v56  ;;  %v5534_v21 = vpop.f32.mrb[102].mxu0  ;;  %v6312_v36 = vpack.c.bf16 %v6192_v42, %v6184_v61  ;;  %v17650_v62 = vmax.f32 %v17649_v20, 0.0  ;;  %v11126_v46 = vld [vmem:[%s16795_s5 + $0x64c] ss:$16 sps:$4 sm:$0xff]   ;;  %v17657_v41 = vld [vmem:[#allocation131_spill] sm:$0xff] }
 0x3b0   :  { %v16149_v52 = vpack.c.bf16 %v6193_v35, %v6185_v5  ;;  %v6071_v16 = vmax.f32 %v10120_v4, 0.0  ;;  %v10152_v33 = vadd.f32 %v5982_v15, %v16108_v11  ;;  %v5984_v31 = vpop.f32.mrb[101].mxu1  ;;  %v10122_v14 = vadd.f32 %v5534_v21, %v16100_v6  ;;  %v5536_v30 = vpop.f32.mrb[103].mxu0  ;;  %v17661_v35 = vld [vmem:[#allocation76_spill] sm:$0xff] }
 0x3b1   :  { %v6072_v29 = vmax.f32 %v10121_v49, 0.0  ;;  %v10153_v54 = vadd.f32 %v5984_v31, %v16112_v0  ;;  %v5986_v34 = vpop.f32.mrb[102].mxu1  ;;  %v10123_v27 = vadd.f32 %v5536_v30, %v16104_v56  ;;  %8187 = vmatprep.mubr.bf16.mxu0 %v6312_v36  ;;  %8639 = vmatprep.mubr.bf16.mxu1 %v6312_v36  ;;  %v16158_v3 = vpack.c.bf16 %v6194_v8, %v6186_v26  ;;  %v11121_v48 = vld [vmem:[%s16795_s5 + $0x640] ss:$16 sps:$4 sm:$0xff]  }
 0x3b2   :  { %v6073_v22 = vmax.f32 %v10152_v33, 0.0  ;;  %v6079_v9 = vmax.f32 %v10122_v14, 0.0  ;;  %v10154_v10 = vadd.f32 %v5986_v34, %v16108_v11  ;;  %v5988_v50 = vpop.f32.mrb[103].mxu1  ;;  %8188 = vmatmul.mubr.bf16.vlgmr.msra.gmra.mrb[128].mxu0 %v6311_v18  ;;  %8640 = vmatmul.mubr.bf16.vlgmr.msra.gmra.mrb[128].mxu1 %v6311_v18  ;;  %v6199_v63 = vadd.f32 %v6071_v16, %v17650_v62  ;;  %v17659_v18 = vld [vmem:[#allocation165_spill] sm:$0xff] }
 0x3b3   :  { %v6074_v58 = vmax.f32 %v10153_v54, 0.0  ;;  %v6080_v32 = vmax.f32 %v10123_v27, 0.0  ;;  %v10155_v37 = vadd.f32 %v5988_v50, %v16112_v0  ;;  %8269 = vmatpush1.bf16.msra.mxu0 %v11109_v57  ;;  %8721 = vmatpush1.bf16.msra.mxu1 %v11112_v47  ;;  %v6200_v42 = vadd.f32 %v6072_v29, %v17656_v53  ;;  %v11124_v47 = vld [vmem:[%s16795_s5 + $0x648] ss:$16 sps:$4 sm:$0xff]   ;;  %v11127_v20 = vld [vmem:[%s16795_s5 + $0x660] ss:$16 sps:$4 sm:$0xff]  }
 0x3b4   :  { %v6207_v17 = vadd.f32 %v6079_v9, %v17652_v2  ;;  %v6081_v23 = vmax.f32 %v10154_v10, 0.0  ;;  %8270 = vmatprep.subr.bf16.mxu0 %v11117_v12  ;;  %8722 = vmatprep.subr.bf16.mxu1 %v11120_v55  ;;  %v6201_v61 = vadd.f32 %v6073_v22, %v17654_v60  ;;  %v17658_v24 = vmax.f32 %v17657_v41, 0.0  ;;  %v11129_v12 = vld [vmem:[%s16795_s5 + $0x664] ss:$16 sps:$4 sm:$0xff]   ;;  %v11132_v55 = vld [vmem:[%s16795_s5 + $0x66c] ss:$16 sps:$4 sm:$0xff]  }
 0x3b5   :  { %v6082_v44 = vmax.f32 %v10155_v37, 0.0  ;;  %v5540_v5 = vpop.f32.mrb[104].mxu0  ;;  %v17660_v25 = vmax.f32 %v17659_v18, 0.0  ;;  %v17662_v4 = vmax.f32 %v17661_v35, 0.0  ;;  %v17664_v43 = vmax.f32 %v17663_v7, 0.0 }
 0x3b6   :  { %v6208_v19 = vadd.f32 %v6080_v32, %v17658_v24  ;;  %v10124_v57 = vadd.f32 %v5540_v5, %v16100_v6  ;;  %v5542_v13 = vpop.f32.mrb[105].mxu0  ;;  %v6319_v26 = vpack.c.bf16 %v6207_v17, %v6199_v63  ;;  %v11130_v62 = vld [vmem:[%s16795_s5 + $0x668] ss:$16 sps:$4 sm:$0xff]   ;;  %v11138_v60 = vld [vmem:[%s16795_s5 + $0x68c] ss:$16 sps:$4 sm:$0xff]  }
 0x3b7   :  { %v6202_v39 = vadd.f32 %v6074_v58, %v17660_v25  ;;  %v6209_v45 = vadd.f32 %v6081_v23, %v17662_v4  ;;  %v6210_v8 = vadd.f32 %v6082_v44, %v17664_v43  ;;  %v5992_v15 = vpop.f32.mrb[104].mxu1  ;;  %v10125_v49 = vadd.f32 %v5542_v13, %v16104_v56  ;;  %8271 = vmatpush1.bf16.msra.mxu0 %v11115_v38  ;;  %v5544_v21 = vpop.f32.mrb[106].mxu0  ;;  %v17665_v63 = vld [vmem:[#allocation136_spill] sm:$0xff]  ;;  %v17667_v17 = vld [vmem:[#allocation137_spill] sm:$0xff] }
 0x3b8   :  { %8723 = vmatpush1.bf16.msra.mxu1 %v11118_v59  ;;  %v6320_v36 = vpack.c.bf16 %v6208_v19, %v6200_v42  ;;  %v6087_v16 = vmax.f32 %v10124_v57, 0.0  ;;  %v10156_v33 = vadd.f32 %v5992_v15, %v16108_v11  ;;  %v5994_v31 = vpop.f32.mrb[105].mxu1  ;;  %v10126_v14 = vadd.f32 %v5544_v21, %v16100_v6  ;;  %v5546_v30 = vpop.f32.mrb[107].mxu0  ;;  %8272 = vmatprep.subr.bf16.mxu0 %v11123_v51  ;;  %v17671_v42 = vld [vmem:[#allocation134_spill] sm:$0xff]  ;;  %v17673_v19 = vld [vmem:[#allocation135_spill] sm:$0xff] }
 0x3b9   :  { %8724 = vmatprep.subr.bf16.mxu1 %v11126_v46  ;;  %v16206_v29 = vpack.c.bf16 %v6209_v45, %v6201_v61  ;;  %v6088_v54 = vmax.f32 %v10125_v49, 0.0  ;;  %v10157_v34 = vadd.f32 %v5994_v31, %v16112_v0  ;;  %v5996_v27 = vpop.f32.mrb[106].mxu1  ;;  %v10127_v22 = vadd.f32 %v5546_v30, %v16104_v56  ;;  %v17669_v61 = vld [vmem:[#allocation80_spill] sm:$0xff]  ;;  %v17677_v45 = vld [vmem:[#allocation85_spill] sm:$0xff] }
 0x3ba   :  { %8197 = vmatprep.mubr.bf16.mxu0 %v6320_v36  ;;  %8649 = vmatprep.mubr.bf16.mxu1 %v6320_v36  ;;  %v16210_v9 = vpack.c.bf16 %v6210_v8, %v6202_v39  ;;  %v6089_v10 = vmax.f32 %v10156_v33, 0.0  ;;  %v6095_v50 = vmax.f32 %v10126_v14, 0.0  ;;  %v10158_v58 = vadd.f32 %v5996_v27, %v16108_v11  ;;  %v5998_v32 = vpop.f32.mrb[107].mxu1  ;;  %v17675_v39 = vld [vmem:[#allocation84_spill] sm:$0xff]  ;;  %v17679_v8 = vld [vmem:[#allocation86_spill] sm:$0xff] }
 0x3bb   :  { %8198 = vmatmul.mubr.bf16.gmra.mrb[132].mxu0 %v6319_v26  ;;  %8650 = vmatmul.mubr.bf16.gmra.mrb[132].mxu1 %v6319_v26  ;;  %v6090_v37 = vmax.f32 %v10157_v34, 0.0  ;;  %v6096_v38 = vmax.f32 %v10127_v22, 0.0  ;;  %v10159_v59 = vadd.f32 %v5998_v32, %v16112_v0  ;;  %v17666_v28 = vmax.f32 %v17665_v63, 0.0  ;;  %v11133_v7 = vld [vmem:[%s16795_s5 + $0x680] ss:$16 sps:$4 sm:$0xff]  }
 0x3bc   :  { %8273 = vmatpush1.bf16.msra.mxu0 %v11121_v48  ;;  %8725 = vmatpush1.bf16.msra.mxu1 %v11124_v47  ;;  %v17668_v23 = vmax.f32 %v17667_v17, 0.0  ;;  %v6097_v46 = vmax.f32 %v10158_v58, 0.0  ;;  %v17670_v1 = vmax.f32 %v17669_v61, 0.0  ;;  %v17672_v41 = vmax.f32 %v17671_v42, 0.0  ;;  %v11141_v33 = vld [vmem:[%s16795_s5 + $0x6a4] ss:$16 sps:$4 sm:$0xff]  }
 0x3bd   :  { %v6215_v2 = vadd.f32 %v6087_v16, %v17666_v28  ;;  %8274 = vmatprep.subr.bf16.mxu0 %v11129_v12  ;;  %8726 = vmatprep.subr.bf16.mxu1 %v11132_v55  ;;  %v17674_v44 = vmax.f32 %v17673_v19, 0.0  ;;  %v6098_v18 = vmax.f32 %v10159_v59, 0.0  ;;  %v17676_v35 = vmax.f32 %v17675_v39, 0.0  ;;  %v11136_v16 = vld [vmem:[%s16795_s5 + $0x688] ss:$16 sps:$4 sm:$0xff]  }
 0x3be   :  { %v6223_v51 = vadd.f32 %v6095_v50, %v17668_v23  ;;  %v6217_v53 = vadd.f32 %v6089_v10, %v17670_v1  ;;  %v6216_v24 = vadd.f32 %v6088_v54, %v17672_v41  ;;  %v17678_v57 = vmax.f32 %v17677_v45, 0.0  ;;  %v11144_v34 = vld [vmem:[%s16795_s5 + $0x6ac] ss:$16 sps:$4 sm:$0xff]   ;;  %v11142_v17 = vld [vmem:[%s16795_s5 + $0x6a8] ss:$16 sps:$4 sm:$0xff]  }
 0x3bf   :  { %v6224_v5 = vadd.f32 %v6096_v38, %v17674_v44  ;;  %v5550_v25 = vpop.f32.mrb[108].mxu0  ;;  %v6218_v4 = vadd.f32 %v6090_v37, %v17676_v35  ;;  %v17680_v15 = vmax.f32 %v17679_v8, 0.0  ;;  %v6002_v21 = vpop.f32.mrb[108].mxu1  ;;  %v17681_v23 = vld [vmem:[#allocation140_spill] sm:$0xff]  ;;  %v17685_v41 = vld [vmem:[#allocation90_spill] sm:$0xff] }
 0x3c0   :  { %v6225_v13 = vadd.f32 %v6097_v46, %v17678_v57  ;;  %v10128_v48 = vadd.f32 %v5550_v25, %v16100_v6  ;;  %v5552_v26 = vpop.f32.mrb[109].mxu0  ;;  %v6327_v43 = vpack.c.bf16 %v6223_v51, %v6215_v2  ;;  %8275 = vmatpush1.bf16.msra.mxu0 %v11127_v20  ;;  %8727 = vmatpush1.bf16.msra.mxu1 %v11130_v62  ;;  %v6004_v30 = vpop.f32.mrb[109].mxu1  ;;  %v11139_v2 = vld [vmem:[%s16795_s5 + $0x6a0] ss:$16 sps:$4 sm:$0xff]   ;;  %v17682_v51 = vmax.f32 %v17681_v23, 0.0 }
 0x3c1   :  { %v6226_v49 = vadd.f32 %v6098_v18, %v17680_v15  ;;  %v10129_v36 = vadd.f32 %v5552_v26, %v16104_v56  ;;  %v5554_v47 = vpop.f32.mrb[110].mxu0  ;;  %v6328_v12 = vpack.c.bf16 %v6224_v5, %v6216_v24  ;;  %v10160_v14 = vadd.f32 %v6002_v21, %v16108_v11  ;;  %8276 = vmatprep.subr.bf16.mxu0 %v11135_v40  ;;  %v6006_v50 = vpop.f32.mrb[110].mxu1  ;;  %v17683_v40 = vld [vmem:[#allocation141_spill] sm:$0xff]  ;;  %v11150_v42 = vld [vmem:[%s16795_s5 + $0x6cc] ss:$16 sps:$4 sm:$0xff]   ;;  %v17689_v25 = vld [vmem:[#allocation139_spill] sm:$0xff] }
 0x3c2   :  { %v6103_v31 = vmax.f32 %v10128_v48, 0.0  ;;  %v10130_v55 = vadd.f32 %v5554_v47, %v16100_v6  ;;  %v5556_v54 = vpop.f32.mrb[111].mxu0  ;;  %8728 = vmatprep.subr.bf16.mxu1 %v11138_v60  ;;  %v16258_v27 = vpack.c.bf16 %v6225_v13, %v6217_v53  ;;  %v10161_v10 = vadd.f32 %v6004_v30, %v16112_v0  ;;  %v6008_v20 = vpop.f32.mrb[111].mxu1  ;;  %v11147_v53 = vld [vmem:[%s16795_s5 + $0x6c4] ss:$16 sps:$4 sm:$0xff]   ;;  %v17687_v44 = vld [vmem:[#allocation138_spill] sm:$0xff] }
 0x3c3   :  { %v6104_v22 = vmax.f32 %v10129_v36, 0.0  ;;  %v10131_v58 = vadd.f32 %v5556_v54, %v16104_v56  ;;  %8207 = vmatprep.mubr.bf16.mxu0 %v6328_v12  ;;  %8659 = vmatprep.mubr.bf16.mxu1 %v6328_v12  ;;  %v16262_v32 = vpack.c.bf16 %v6226_v49, %v6218_v4  ;;  %v6105_v37 = vmax.f32 %v10160_v14, 0.0  ;;  %v17691_v57 = vld [vmem:[#allocation94_spill] sm:$0xff]  ;;  %v17693_v26 = vld [vmem:[#allocation95_spill] sm:$0xff]  ;;  %v17695_v36 = vld [vmem:[#allocation96_spill] sm:$0xff] }
 0x3c4   :  { %v6111_v38 = vmax.f32 %v10130_v55, 0.0  ;;  %v10162_v59 = vadd.f32 %v6006_v50, %v16108_v11  ;;  %8208 = vmatmul.mubr.bf16.gmra.mrb[136].mxu0 %v6327_v43  ;;  %8660 = vmatmul.mubr.bf16.gmra.mrb[136].mxu1 %v6327_v43  ;;  %v6106_v62 = vmax.f32 %v10161_v10, 0.0  ;;  %v10163_v28 = vadd.f32 %v6008_v20, %v16112_v0  ;;  %v11145_v49 = vld [vmem:[%s16795_s5 + $0x6c0] ss:$16 sps:$4 sm:$0xff]   ;;  %v11148_v30 = vld [vmem:[%s16795_s5 + $0x6c8] ss:$16 sps:$4 sm:$0xff]  }
 0x3c5   :  { %v6112_v63 = vmax.f32 %v10131_v58, 0.0  ;;  %8277 = vmatpush1.bf16.msra.mxu0 %v11133_v7  ;;  %8729 = vmatpush1.bf16.msra.mxu1 %v11136_v16  ;;  %v6231_v46 = vadd.f32 %v6103_v31, %v17682_v51  ;;  %v17684_v60 = vmax.f32 %v17683_v40, 0.0  ;;  %v17686_v24 = vmax.f32 %v17685_v41, 0.0  ;;  %v11153_v55 = vld [vmem:[%s16795_s5 + $0x6e4] ss:$16 sps:$4 sm:$0xff]  }
 0x3c6   :  { %v6113_v1 = vmax.f32 %v10162_v59, 0.0  ;;  %8278 = vmatprep.subr.bf16.mxu0 %v11141_v33  ;;  %8730 = vmatprep.subr.bf16.mxu1 %v11144_v34  ;;  %v17688_v5 = vmax.f32 %v17687_v44, 0.0  ;;  %v17690_v39 = vmax.f32 %v17689_v25, 0.0  ;;  %v6114_v4 = vmax.f32 %v10163_v28, 0.0  ;;  %v11156_v58 = vld [vmem:[%s16795_s5 + $0x6ec] ss:$16 sps:$4 sm:$0xff]  }
 0x3c7   :  { %v6239_v61 = vadd.f32 %v6111_v38, %v17684_v60  ;;  %v6233_v19 = vadd.f32 %v6105_v37, %v17686_v24  ;;  %v5560_v45 = vpop.f32.mrb[112].mxu0  ;;  %v17692_v13 = vmax.f32 %v17691_v57, 0.0  ;;  %v17694_v7 = vmax.f32 %v17693_v26, 0.0  ;;  %v6012_v16 = vpop.f32.mrb[112].mxu1  ;;  %v11151_v60 = vld [vmem:[%s16795_s5 + $0x6e0] ss:$16 sps:$4 sm:$0xff]  }
 0x3c8   :  { %v6232_v18 = vadd.f32 %v6104_v22, %v17688_v5  ;;  %v6240_v35 = vadd.f32 %v6112_v63, %v17690_v39  ;;  %v10132_v8 = vadd.f32 %v5560_v45, %v16100_v6  ;;  %v5562_v15 = vpop.f32.mrb[113].mxu0  ;;  %v17696_v47 = vmax.f32 %v17695_v36, 0.0  ;;  %v6014_v22 = vpop.f32.mrb[113].mxu1  ;;  %v17699_v41 = vld [vmem:[#allocation145_spill] sm:$0xff]  ;;  %v17701_v25 = vld [vmem:[#allocation100_spill] sm:$0xff] }
 0x3c9   :  { %v6234_v48 = vadd.f32 %v6106_v62, %v17692_v13  ;;  %v6241_v43 = vadd.f32 %v6113_v1, %v17694_v7  ;;  %v6335_v21 = vpack.c.bf16 %v6239_v61, %v6231_v46  ;;  %v10133_v33 = vadd.f32 %v5562_v15, %v16104_v56  ;;  %8279 = vmatpush1.bf16.msra.mxu0 %v11139_v2  ;;  %v5564_v31 = vpop.f32.mrb[114].mxu0  ;;  %v6016_v20 = vpop.f32.mrb[114].mxu1  ;;  %v11154_v61 = vld [vmem:[%s16795_s5 + $0x6e8] ss:$16 sps:$4 sm:$0xff]   ;;  %v11159_v5 = vld [vmem:[%s16795_s5 + $0x704] ss:$16 sps:$4 sm:$0xff]  }
 0x3ca   :  { %v6242_v12 = vadd.f32 %v6114_v4, %v17696_v47  ;;  %8731 = vmatpush1.bf16.msra.mxu1 %v11142_v17  ;;  %v6336_v14 = vpack.c.bf16 %v6240_v35, %v6232_v18  ;;  %v6119_v54 = vmax.f32 %v10132_v8, 0.0  ;;  %v10164_v34 = vadd.f32 %v6012_v16, %v16108_v11  ;;  %v5566_v50 = vpop.f32.mrb[115].mxu0  ;;  %8280 = vmatprep.subr.bf16.mxu0 %v11147_v53  ;;  %v6018_v23 = vpop.f32.mrb[115].mxu1  ;;  %v17697_v1 = vld [vmem:[#allocation144_spill] sm:$0xff]  ;;  %v17703_v4 = vld [vmem:[#allocation142_spill] sm:$0xff]  ;;  %v17705_v13 = vld [vmem:[#allocation143_spill] sm:$0xff] }
 0x3cb   :  { %v10134_v10 = vadd.f32 %v5564_v31, %v16100_v6  ;;  %8732 = vmatprep.subr.bf16.mxu1 %v11150_v42  ;;  %v16310_v37 = vpack.c.bf16 %v6241_v43, %v6233_v19  ;;  %v6120_v38 = vmax.f32 %v10133_v33, 0.0  ;;  %v10165_v59 = vadd.f32 %v6014_v22, %v16112_v0  ;;  %v11162_v18 = vld [vmem:[%s16795_s5 + $0x70c] ss:$16 sps:$4 sm:$0xff]   ;;  %v11157_v33 = vld [vmem:[%s16795_s5 + $0x700] ss:$16 sps:$4 sm:$0xff]  }
 0x3cc   :  { %v10135_v62 = vadd.f32 %v5566_v50, %v16104_v56  ;;  %8217 = vmatprep.mubr.bf16.mxu0 %v6336_v14  ;;  %8669 = vmatprep.mubr.bf16.mxu1 %v6336_v14  ;;  %v16314_v63 = vpack.c.bf16 %v6242_v12, %v6234_v48  ;;  %v6121_v28 = vmax.f32 %v10164_v34, 0.0  ;;  %v10166_v17 = vadd.f32 %v6016_v20, %v16108_v11  ;;  %v17707_v8 = vld [vmem:[#allocation104_spill] sm:$0xff]  ;;  %v17711_v14 = vld [vmem:[#allocation106_spill] sm:$0xff] }
 0x3cd   :  { %v6127_v2 = vmax.f32 %v10134_v10, 0.0  ;;  %8218 = vmatmul.mubr.bf16.gmra.mrb[140].mxu0 %v6335_v21  ;;  %8670 = vmatmul.mubr.bf16.gmra.mrb[140].mxu1 %v6335_v21  ;;  %v6122_v51 = vmax.f32 %v10165_v59, 0.0  ;;  %v10167_v40 = vadd.f32 %v6018_v23, %v16112_v0  ;;  %v17698_v53 = vmax.f32 %v17697_v1, 0.0  ;;  %v17709_v21 = vld [vmem:[#allocation105_spill] sm:$0xff] }
 0x3ce   :  { %v6128_v46 = vmax.f32 %v10135_v62, 0.0  ;;  %8281 = vmatpush1.bf16.msra.mxu0 %v11145_v49  ;;  %8733 = vmatpush1.bf16.msra.mxu1 %v11148_v30  ;;  %v17700_v24 = vmax.f32 %v17699_v41, 0.0  ;;  %v6129_v44 = vmax.f32 %v10166_v17, 0.0  ;;  %v17702_v39 = vmax.f32 %v17701_v25, 0.0  ;;  %v11160_v50 = vld [vmem:[%s16795_s5 + $0x708] ss:$16 sps:$4 sm:$0xff]  }
 0x3cf   :  { %v6247_v42 = vadd.f32 %v6119_v54, %v17698_v53  ;;  %8282 = vmatprep.subr.bf16.mxu0 %v11153_v55  ;;  %8734 = vmatprep.subr.bf16.mxu1 %v11156_v58  ;;  %v17704_v45 = vmax.f32 %v17703_v4, 0.0  ;;  %v17706_v48 = vmax.f32 %v17705_v13, 0.0  ;;  %v6130_v7 = vmax.f32 %v10167_v40, 0.0  ;;  %v5570_v43 = vpop.f32.mrb[116].mxu0  ;;  %v6022_v54 = vpop.f32.mrb[116].mxu1 }
 0x3d0   :  { %v6255_v19 = vadd.f32 %v6127_v2, %v17700_v24  ;;  %v6249_v35 = vadd.f32 %v6121_v28, %v17702_v39  ;;  %v17708_v15 = vmax.f32 %v17707_v8, 0.0  ;;  %v17710_v36 = vmax.f32 %v17709_v21, 0.0  ;;  %v5572_v16 = vpop.f32.mrb[117].mxu0  ;;  %v11165_v58 = vld [vmem:[%s16795_s5 + $0x724] ss:$16 sps:$4 sm:$0xff]   ;;  %v6024_v20 = vpop.f32.mrb[117].mxu1 }
 0x3d1   :  { %v6248_v57 = vadd.f32 %v6120_v38, %v17704_v45  ;;  %v6256_v26 = vadd.f32 %v6128_v46, %v17706_v48  ;;  %v10136_v12 = vadd.f32 %v5570_v43, %v16100_v6  ;;  %v17712_v30 = vmax.f32 %v17711_v14, 0.0  ;;  %v5574_v22 = vpop.f32.mrb[118].mxu0  ;;  %v11168_v2 = vld [vmem:[%s16795_s5 + $0x72c] ss:$16 sps:$4 sm:$0xff]   ;;  %v6026_v46 = vpop.f32.mrb[118].mxu1  ;;  %v17721_v21 = vld [vmem:[#allocation147_spill] sm:$0xff] }
 0x3d2   :  { %v6250_v49 = vadd.f32 %v6122_v51, %v17708_v15  ;;  %v6257_v47 = vadd.f32 %v6129_v44, %v17710_v36  ;;  %v6343_v31 = vpack.c.bf16 %v6255_v19, %v6247_v42  ;;  %v10137_v34 = vadd.f32 %v5572_v16, %v16104_v56  ;;  %8283 = vmatpush1.bf16.msra.mxu0 %v11151_v60  ;;  %v5576_v28 = vpop.f32.mrb[119].mxu0  ;;  %v6028_v42 = vpop.f32.mrb[119].mxu1  ;;  %v11163_v44 = vld [vmem:[%s16795_s5 + $0x720] ss:$16 sps:$4 sm:$0xff]   ;;  %v11171_v13 = vld [vmem:[%s16795_s5 + $0x744] ss:$16 sps:$4 sm:$0xff]  }
 0x3d3   :  { %v6258_v55 = vadd.f32 %v6130_v7, %v17712_v30  ;;  %8735 = vmatpush1.bf16.msra.mxu1 %v11154_v61  ;;  %v6344_v10 = vpack.c.bf16 %v6256_v26, %v6248_v57  ;;  %v6135_v38 = vmax.f32 %v10136_v12, 0.0  ;;  %v10168_v59 = vadd.f32 %v6022_v54, %v16108_v11  ;;  %8284 = vmatprep.subr.bf16.mxu0 %v11159_v5  ;;  %v11166_v5 = vld [vmem:[%s16795_s5 + $0x728] ss:$16 sps:$4 sm:$0xff]   ;;  %v11174_v48 = vld [vmem:[%s16795_s5 + $0x74c] ss:$16 sps:$4 sm:$0xff]  }
 0x3d4   :  { %v10138_v62 = vadd.f32 %v5574_v22, %v16100_v6  ;;  %8736 = vmatprep.subr.bf16.mxu1 %v11162_v18  ;;  %v16362_v17 = vpack.c.bf16 %v6257_v47, %v6249_v35  ;;  %v6136_v23 = vmax.f32 %v10137_v34, 0.0  ;;  %v10169_v51 = vadd.f32 %v6024_v20, %v16112_v0  ;;  %v17713_v18 = vld [vmem:[#allocation148_spill] sm:$0xff]  ;;  %v17715_v35 = vld [vmem:[#allocation149_spill] sm:$0xff]  ;;  %v17717_v26 = vld [vmem:[#allocation110_spill] sm:$0xff] }
 0x3d5   :  { %v10139_v40 = vadd.f32 %v5576_v28, %v16104_v56  ;;  %8227 = vmatprep.mubr.bf16.mxu0 %v6344_v10  ;;  %8679 = vmatprep.mubr.bf16.mxu1 %v6344_v10  ;;  %v16366_v60 = vpack.c.bf16 %v6258_v55, %v6250_v49  ;;  %v6137_v61 = vmax.f32 %v10168_v59, 0.0  ;;  %v10170_v53 = vadd.f32 %v6026_v46, %v16108_v11  ;;  %v17719_v8 = vld [vmem:[#allocation146_spill] sm:$0xff]  ;;  %v17725_v30 = vld [vmem:[#allocation115_spill] sm:$0xff] }
 0x3d6   :  { %v6143_v1 = vmax.f32 %v10138_v62, 0.0  ;;  %8228 = vmatmul.mubr.bf16.gmra.mrb[144].mxu0 %v6343_v31  ;;  %8680 = vmatmul.mubr.bf16.gmra.mrb[144].mxu1 %v6343_v31  ;;  %v6138_v41 = vmax.f32 %v10169_v51, 0.0  ;;  %v10171_v19 = vadd.f32 %v6028_v42, %v16112_v0  ;;  %v17714_v25 = vmax.f32 %v17713_v18, 0.0  ;;  %v11169_v10 = vld [vmem:[%s16795_s5 + $0x740] ss:$16 sps:$4 sm:$0xff]  }
 0x3d7   :  { %v6144_v24 = vmax.f32 %v10139_v40, 0.0  ;;  %8285 = vmatpush1.bf16.msra.mxu0 %v11157_v33  ;;  %8737 = vmatpush1.bf16.msra.mxu1 %v11160_v50  ;;  %v17716_v4 = vmax.f32 %v17715_v35, 0.0  ;;  %v6145_v57 = vmax.f32 %v10170_v53, 0.0  ;;  %v17718_v7 = vmax.f32 %v17717_v26, 0.0  ;;  %v5580_v16 = vpop.f32.mrb[120].mxu0  ;;  %v17723_v33 = vld [vmem:[#allocation114_spill] sm:$0xff] }
 0x3d8   :  { %v6263_v39 = vadd.f32 %v6135_v38, %v17714_v25  ;;  %8286 = vmatprep.subr.bf16.mxu0 %v11165_v58  ;;  %8738 = vmatprep.subr.bf16.mxu1 %v11168_v2  ;;  %v17720_v15 = vmax.f32 %v17719_v8, 0.0  ;;  %v17722_v36 = vmax.f32 %v17721_v21, 0.0  ;;  %v6146_v12 = vmax.f32 %v10171_v19, 0.0  ;;  %v5582_v22 = vpop.f32.mrb[121].mxu0  ;;  %v17727_v58 = vld [vmem:[#allocation116_spill] sm:$0xff]  ;;  %v6032_v20 = vpop.f32.mrb[120].mxu1 }
 0x3d9   :  { %v6271_v45 = vadd.f32 %v6143_v1, %v17716_v4  ;;  %v6265_v43 = vadd.f32 %v6137_v61, %v17718_v7  ;;  %v17724_v31 = vmax.f32 %v17723_v33, 0.0  ;;  %v17726_v55 = vmax.f32 %v17725_v30, 0.0  ;;  %v5584_v28 = vpop.f32.mrb[122].mxu0  ;;  %v11177_v51 = vld [vmem:[%s16795_s5 + $0x764] ss:$16 sps:$4 sm:$0xff]   ;;  %v6034_v61 = vpop.f32.mrb[121].mxu1 }
 0x3da   :  { %v6264_v49 = vadd.f32 %v6136_v23, %v17720_v15  ;;  %v6272_v47 = vadd.f32 %v6144_v24, %v17722_v36  ;;  %v10140_v34 = vadd.f32 %v5580_v16, %v16100_v6  ;;  %v17728_v38 = vmax.f32 %v17727_v58, 0.0  ;;  %v11172_v23 = vld [vmem:[%s16795_s5 + $0x748] ss:$16 sps:$4 sm:$0xff]   ;;  %v5586_v53 = vpop.f32.mrb[123].mxu0  ;;  %v11180_v42 = vld [vmem:[%s16795_s5 + $0x76c] ss:$16 sps:$4 sm:$0xff]  }
 0x3db   :  { %v6266_v14 = vadd.f32 %v6138_v41, %v17724_v31  ;;  %v6273_v54 = vadd.f32 %v6145_v57, %v17726_v55  ;;  %v6351_v50 = vpack.c.bf16 %v6271_v45, %v6263_v39  ;;  %v10141_v62 = vadd.f32 %v5582_v22, %v16104_v56  ;;  %8287 = vmatpush1.bf16.msra.mxu0 %v11163_v44  ;;  %v6036_v44 = vpop.f32.mrb[122].mxu1  ;;  %v11178_v26 = vld [vmem:[%s16795_s5 + $0x768] ss:$16 sps:$4 sm:$0xff]  }
 0x3dc   :  { %v6274_v59 = vadd.f32 %v6146_v12, %v17728_v38  ;;  %8739 = vmatpush1.bf16.msra.mxu1 %v11166_v5  ;;  %v6352_v2 = vpack.c.bf16 %v6272_v47, %v6264_v49  ;;  %v6151_v46 = vmax.f32 %v10140_v34, 0.0  ;;  %v10172_v40 = vadd.f32 %v6032_v20, %v16108_v11  ;;  %8288 = vmatprep.subr.bf16.mxu0 %v11171_v13  ;;  %v6038_v4 = vpop.f32.mrb[123].mxu1  ;;  %v17729_v7 = vld [vmem:[#allocation152_spill] sm:$0xff]  ;;  %v17731_v15 = vld [vmem:[#allocation153_spill] sm:$0xff] }
 0x3dd   :  { %v10142_v1 = vadd.f32 %v5584_v28, %v16100_v6  ;;  %8740 = vmatprep.subr.bf16.mxu1 %v11174_v48  ;;  %v16414_v41 = vpack.c.bf16 %v6273_v54, %v6265_v43  ;;  %v6152_v24 = vmax.f32 %v10141_v62, 0.0  ;;  %v10173_v19 = vadd.f32 %v6034_v61, %v16112_v0  ;;  %v11175_v48 = vld [vmem:[%s16795_s5 + $0x760] ss:$16 sps:$4 sm:$0xff]   ;;  %v11183_v47 = vld [vmem:[%s16795_s5 + $0x784] ss:$16 sps:$4 sm:$0xff]  }
 0x3de   :  { %v10143_v5 = vadd.f32 %v5586_v53, %v16104_v56  ;;  %8237 = vmatprep.mubr.bf16.mxu0 %v6352_v2  ;;  %8689 = vmatprep.mubr.bf16.mxu1 %v6352_v2  ;;  %v16418_v18 = vpack.c.bf16 %v6274_v59, %v6266_v14  ;;  %v6153_v25 = vmax.f32 %v10172_v40, 0.0  ;;  %v10174_v35 = vadd.f32 %v6036_v44, %v16108_v11  ;;  %v11186_v12 = vld [vmem:[%s16795_s5 + $0x78c] ss:$16 sps:$4 sm:$0xff]   ;;  %v17737_v54 = vld [vmem:[#allocation151_spill] sm:$0xff]  ;;  %v17741_v20 = vld [vmem:[#allocation125_spill] sm:$0xff] }
 0x3df   :  { %v6159_v39 = vmax.f32 %v10142_v1, 0.0  ;;  %8238 = vmatmul.mubr.bf16.gmra.mrb[148].mxu0 %v6351_v50  ;;  %8690 = vmatmul.mubr.bf16.gmra.mrb[148].mxu1 %v6351_v50  ;;  %v6154_v45 = vmax.f32 %v10173_v19, 0.0  ;;  %v10175_v13 = vadd.f32 %v6038_v4, %v16112_v0  ;;  %v17730_v43 = vmax.f32 %v17729_v7, 0.0  ;;  %v17733_v16 = vld [vmem:[#allocation120_spill] sm:$0xff]  ;;  %v17735_v14 = vld [vmem:[#allocation150_spill] sm:$0xff]  ;;  %v5590_v50 = vpop.f32.mrb[124].mxu0 }
 0x3e0   :  { %v6160_v57 = vmax.f32 %v10143_v5, 0.0  ;;  %8289 = vmatpush1.bf16.msra.mxu0 %v11169_v10  ;;  %8741 = vmatpush1.bf16.msra.mxu1 %v11172_v23  ;;  %v17732_v49 = vmax.f32 %v17731_v15, 0.0  ;;  %v6161_v36 = vmax.f32 %v10174_v35, 0.0  ;;  %v17734_v33 = vmax.f32 %v17733_v16, 0.0  ;;  %v17739_v58 = vld [vmem:[#allocation124_spill] sm:$0xff]  ;;  %v5592_v23 = vpop.f32.mrb[125].mxu0 }
 0x3e1   :  { %v6279_v8 = vadd.f32 %v6151_v46, %v17730_v43  ;;  %8290 = vmatprep.subr.bf16.mxu0 %v11177_v51  ;;  %8742 = vmatprep.subr.bf16.mxu1 %v11180_v42  ;;  %v17736_v30 = vmax.f32 %v17735_v14, 0.0  ;;  %v17738_v34 = vmax.f32 %v17737_v54, 0.0  ;;  %v6162_v10 = vmax.f32 %v10175_v13, 0.0  ;;  %v11181_v51 = vld [vmem:[%s16795_s5 + $0x780] ss:$16 sps:$4 sm:$0xff]   ;;  %v6042_v53 = vpop.f32.mrb[124].mxu1 }
 0x3e2   :  { %v6287_v21 = vadd.f32 %v6159_v39, %v17732_v49  ;;  %v6281_v31 = vadd.f32 %v6153_v25, %v17734_v33  ;;  %v17740_v38 = vmax.f32 %v17739_v58, 0.0  ;;  %v17742_v62 = vmax.f32 %v17741_v20, 0.0  ;;  %v17743_v40 = vld [vmem:[#allocation126_spill] sm:$0xff]  ;;  %v11189_v5 = vld [vmem:[%s16795_s5 + $0x7a4] ss:$16 sps:$4 sm:$0xff]   ;;  %v6044_v35 = vpop.f32.mrb[125].mxu1 }
 0x3e3   :  { %v6280_v55 = vadd.f32 %v6152_v24, %v17736_v30  ;;  %v6288_v22 = vadd.f32 %v6160_v57, %v17738_v34  ;;  %v10144_v2 = vadd.f32 %v5590_v50, %v16100_v6  ;;  %v17744_v61 = vmax.f32 %v17743_v40, 0.0  ;;  %v5594_v24 = vpop.f32.mrb[126].mxu0  ;;  %v11184_v44 = vld [vmem:[%s16795_s5 + $0x788] ss:$16 sps:$4 sm:$0xff]   ;;  %v11192_v57 = vld [vmem:[%s16795_s5 + $0x7ac] ss:$16 sps:$4 sm:$0xff]  }
 0x3e4   :  { %v6282_v59 = vadd.f32 %v6154_v45, %v17740_v38  ;;  %v6289_v28 = vadd.f32 %v6161_v36, %v17742_v62  ;;  %v6359_v46 = vpack.c.bf16 %v6287_v21, %v6279_v8  ;;  %v10145_v42 = vadd.f32 %v5592_v23, %v16104_v56  ;;  %8291 = vmatpush1.bf16.msra.mxu0 %v11175_v48  ;;  %v5596_v45 = vpop.f32.mrb[127].mxu0  ;;  %v6046_v7 = vpop.f32.mrb[126].mxu1  ;;  %v11190_v16 = vld [vmem:[%s16795_s5 + $0x7a8] ss:$16 sps:$4 sm:$0xff]   ;;  %v11198_v34 = vld [vmem:[%s16795_s5 + $0x7cc] ss:$16 sps:$4 sm:$0xff]  }
 0x3e5   :  { %v6290_v1 = vadd.f32 %v6162_v10, %v17744_v61  ;;  %8743 = vmatpush1.bf16.msra.mxu1 %v11178_v26  ;;  %v6360_v19 = vpack.c.bf16 %v6288_v22, %v6280_v55  ;;  %v6167_v25 = vmax.f32 %v10144_v2, 0.0  ;;  %v10176_v39 = vadd.f32 %v6042_v53, %v16108_v11  ;;  %8292 = vmatprep.subr.bf16.mxu0 %v11183_v47  ;;  %v6048_v21 = vpop.f32.mrb[127].mxu1  ;;  %v17745_v33 = vld [vmem:[#allocation158_spill] sm:$0xff]  ;;  %v17747_v14 = vld [vmem:[#allocation159_spill] sm:$0xff] }
 0x3e6   :  { %v10146_v4 = vadd.f32 %v5594_v24, %v16100_v6  ;;  %8744 = vmatprep.subr.bf16.mxu1 %v11186_v12  ;;  %v16466_v13 = vpack.c.bf16 %v6289_v28, %v6281_v31  ;;  %v6168_v48 = vmax.f32 %v10145_v42, 0.0  ;;  %v10177_v26 = vadd.f32 %v6044_v35, %v16112_v0  ;;  %v17749_v22 = vld [vmem:[#allocation154_spill] sm:$0xff]  ;;  %v17751_v58 = vld [vmem:[#allocation155_spill] sm:$0xff]  ;;  %v17759_v42 = vld [vmem:[#allocation180_spill] sm:$0xff] }
 0x3e7   :  { %v10147_v43 = vadd.f32 %v5596_v45, %v16104_v56  ;;  %8247 = vmatprep.mubr.bf16.mxu0 %v6360_v19  ;;  %8699 = vmatprep.mubr.bf16.mxu1 %v6360_v19  ;;  %v16470_v8 = vpack.c.bf16 %v6290_v1, %v6282_v59  ;;  %v6169_v6 = vmax.f32 %v10176_v39, 0.0  ;;  %v10178_v49 = vadd.f32 %v6046_v7, %v16108_v11  ;;  %v11187_v56 = vld [vmem:[%s16795_s5 + $0x7a0] ss:$16 sps:$4 sm:$0xff]   ;;  %v11201_v35 = vld [vmem:[%s16795_s5 + $0x7e4] ss:$16 sps:$4 sm:$0xff]  }
 0x3e8   :  { %v6175_v15 = vmax.f32 %v10146_v4, 0.0  ;;  %8248 = vmatmul.mubr.bf16.gmra.mrb[152].mxu0 %v6359_v46  ;;  %8700 = vmatmul.mubr.bf16.gmra.mrb[152].mxu1 %v6359_v46  ;;  %v6170_v36 = vmax.f32 %v10177_v26, 0.0  ;;  %v10179_v12 = vadd.f32 %v6048_v21, %v16112_v0  ;;  %v17746_v31 = vmax.f32 %v17745_v33, 0.0  ;;  %v11195_v0 = vld [vmem:[%s16795_s5 + $0x7c4] ss:$16 sps:$4 sm:$0xff]   ;;  %v17753_v62 = vld [vmem:[#allocation182_spill] sm:$0xff] }
 0x3e9   :  { %v6176_v47 = vmax.f32 %v10147_v43, 0.0  ;;  %8293 = vmatpush1.bf16.msra.mxu0 %v11181_v51  ;;  %8745 = vmatpush1.bf16.msra.mxu1 %v11184_v44  ;;  %v17748_v30 = vmax.f32 %v17747_v14, 0.0  ;;  %v6177_v54 = vmax.f32 %v10178_v49, 0.0  ;;  %v17750_v10 = vmax.f32 %v17749_v22, 0.0  ;;  %v17755_v23 = vld [vmem:[#allocation183_spill] sm:$0xff] }
 0x3ea   :  { %v6295_v11 = vadd.f32 %v6167_v25, %v17746_v31  ;;  %8294 = vmatprep.subr.bf16.mxu0 %v11189_v5  ;;  %8746 = vmatprep.subr.bf16.mxu1 %v11192_v57  ;;  %v17752_v38 = vmax.f32 %v17751_v58, 0.0  ;;  %v6178_v20 = vmax.f32 %v10179_v12, 0.0  ;;  %v17754_v28 = vmax.f32 %v17753_v62, 0.0  ;;  %v17757_v61 = vld [vmem:[#allocation179_spill] sm:$0xff]  ;;  %v11204_v4 = vld [vmem:[%s16795_s5 + $0x7ec] ss:$16 sps:$4 sm:$0xff]  }
 0x3eb   :  { %v6303_v55 = vadd.f32 %v6175_v15, %v17748_v30  ;;  %v6296_v50 = vadd.f32 %v6168_v48, %v17750_v10  ;;  %v17756_v51 = vmax.f32 %v17755_v23, 0.0  ;;  %v17758_v1 = vmax.f32 %v17757_v61, 0.0  ;;  %v11193_v5 = vld [vmem:[%s16795_s5 + $0x7c0] ss:$16 sps:$4 sm:$0xff]   ;;  %v11196_v25 = vld [vmem:[%s16795_s5 + $0x7c8] ss:$16 sps:$4 sm:$0xff]  }
 0x3ec   :  { %v6304_v59 = vadd.f32 %v6176_v47, %v17752_v38  ;;  %v6297_v2 = vadd.f32 %v6169_v6, %v17754_v28  ;;  %v17760_v24 = vmax.f32 %v17759_v42, 0.0  ;;  %v11199_v57 = vld [vmem:[%s16795_s5 + $0x7e0] ss:$16 sps:$4 sm:$0xff]   ;;  %v11202_v48 = vld [vmem:[%s16795_s5 + $0x7e8] ss:$16 sps:$4 sm:$0xff]  }
 0x3ed   :  { %v6305_v46 = vadd.f32 %v6177_v54, %v17756_v51  ;;  %v6367_v40 = vpack.c.bf16 %v6303_v55, %v6295_v11  ;;  %v6298_v53 = vadd.f32 %v6170_v36, %v17758_v1  ;;  %8295 = vmatpush1.bf16.msra.mxu0 %v11187_v56  ;;  %8747 = vmatpush1.bf16.msra.mxu1 %v11190_v16 }
 0x3ee   :  { %v6306_v19 = vadd.f32 %v6178_v20, %v17760_v24  ;;  %v6368_v44 = vpack.c.bf16 %v6304_v59, %v6296_v50  ;;  %8296 = vmatprep.subr.bf16.mxu0 %v11195_v0  ;;  %8748 = vmatprep.subr.bf16.mxu1 %v11198_v34 }
 0x3ef   :  { %v6369_v39 = vpack.c.bf16 %v6305_v46, %v6297_v2 }
 0x3f0   :  { %8257 = vmatprep.mubr.bf16.mxu0 %v6368_v44  ;;  %8709 = vmatprep.mubr.bf16.mxu1 %v6368_v44  ;;  %v6370_v45 = vpack.c.bf16 %v6306_v19, %v6298_v53 }
 0x3f1   :  { %8258 = vmatmul.mubr.bf16.gmra.mrb[156].mxu0 %v6367_v40  ;;  %8710 = vmatmul.mubr.bf16.gmra.mrb[156].mxu1 %v6367_v40 }
 0x3f2   :  { %8297 = vmatpush1.bf16.msra.mxu0 %v11193_v5  ;;  %8300 = vmatprep.mubr.bf16.mxu0 %v16158_v3 }
 0x3f3   :  { %8749 = vmatpush1.bf16.msra.mxu1 %v11196_v25  ;;  %8752 = vmatprep.mubr.bf16.mxu1 %v16158_v3  ;;  %v6627_v3 = vld [vmem:[%s16798_s6] sm:$0xf] }
 0x3f4   :  { %8298 = vmatprep.subr.bf16.mxu0 %v11201_v35  ;;  %8750 = vmatprep.subr.bf16.mxu1 %v11204_v4 }
 0x3f6   :  { %8299 = vmatpush1.bf16.msra.mxu0 %v11199_v57 }
 0x3f7   :  { %8751 = vmatpush1.bf16.msra.mxu1 %v11202_v48 }
 0x3f9   :  { %8301 = vmatmul.mubr.bf16.vlgmr.msra.gmra.mrb[128].mxu0 %v16149_v52 }
 0x3fa   :  { %8753 = vmatmul.mubr.bf16.vlgmr.msra.gmra.mrb[128].mxu1 %v16149_v52  ;;  %8310 = vmatprep.mubr.bf16.mxu0 %v16210_v9  ;;  %v14_v52 = vstv %s16797_s8 }
 0x3fb   :  { %8762 = vmatprep.mubr.bf16.mxu1 %v16210_v9  ;;  %15 = vst [vmem:[#allocation2] sm:$0x1] %v14_v52 }
 0x401   :  { %8311 = vmatmul.mubr.bf16.gmra.mrb[132].mxu0 %v16206_v29 }
 0x402   :  { %8763 = vmatmul.mubr.bf16.gmra.mrb[132].mxu1 %v16206_v29  ;;  %8320 = vmatprep.mubr.bf16.mxu0 %v16262_v32  ;;  %v17761_v29 = vld [vmem:[#allocation5_spill] sm:$0xff] }
 0x403   :  { %8772 = vmatprep.mubr.bf16.mxu1 %v16262_v32  ;;  %v16555_v9 = vrot.slane %v6627_v3, %v17761_v29  ;;  %v17762_v32 = vld [vmem:[#allocation47_spill] sm:$0xff] }
 0x409   :  { %8321 = vmatmul.mubr.bf16.gmra.mrb[136].mxu0 %v16258_v27 }
 0x40a   :  { %8773 = vmatmul.mubr.bf16.gmra.mrb[136].mxu1 %v16258_v27  ;;  %8330 = vmatprep.mubr.bf16.mxu0 %v16314_v63  ;;  %v8897_v27 = vld [vmem:[%s16799_s7] sm:$0xf] }
 0x40b   :  { %8782 = vmatprep.mubr.bf16.mxu1 %v16314_v63  ;;  %v17763_v63 = vld [vmem:[#allocation4_spill] sm:$0xff]  ;;  %v16571_v26 = vrot.slane %v8897_v27, %v17761_v29  ;;  %v16579_v47 = vrot.slane %v8897_v27, %v17762_v32 }
 0x40c   :  { %v16576_v15 = vrot.slane %v8897_v27, %v17763_v63 }
 0x411   :  { %8331 = vmatmul.mubr.bf16.gmra.mrb[140].mxu0 %v16310_v37 }
 0x412   :  { %8783 = vmatmul.mubr.bf16.gmra.mrb[140].mxu1 %v16310_v37  ;;  %8340 = vmatprep.mubr.bf16.mxu0 %v16366_v60  ;;  %v16561_v37 = vrot.slane %v6627_v3, %v17762_v32 }
 0x413   :  { %8792 = vmatprep.mubr.bf16.mxu1 %v16366_v60  ;;  %v17764_v60 = vld [vmem:[#allocation41_spill] sm:$0xff] }
 0x414   :  { %v16590_v38 = vrot.slane %v8897_v27, %v17764_v60 }
 0x419   :  { %8341 = vmatmul.mubr.bf16.gmra.mrb[144].mxu0 %v16362_v17 }
 0x41a   :  { %8793 = vmatmul.mubr.bf16.gmra.mrb[144].mxu1 %v16362_v17  ;;  %8350 = vmatprep.mubr.bf16.mxu0 %v16418_v18  ;;  %v16564_v17 = vrot.slane %v6627_v3, %v17763_v63 }
 0x41b   :  { %8802 = vmatprep.mubr.bf16.mxu1 %v16418_v18 }
 0x421   :  { %8351 = vmatmul.mubr.bf16.gmra.mrb[148].mxu0 %v16414_v41 }
 0x422   :  { %8803 = vmatmul.mubr.bf16.gmra.mrb[148].mxu1 %v16414_v41  ;;  %8360 = vmatprep.mubr.bf16.mxu0 %v16470_v8  ;;  %v16567_v41 = vrot.slane %v6627_v3, %v17764_v60 }
 0x423   :  { %8812 = vmatprep.mubr.bf16.mxu1 %v16470_v8 }
 0x429   :  { %8361 = vmatmul.mubr.bf16.gmra.mrb[152].mxu0 %v16466_v13 }
 0x42a   :  { %8813 = vmatmul.mubr.bf16.gmra.mrb[152].mxu1 %v16466_v13  ;;  %8370 = vmatprep.mubr.bf16.mxu0 %v6370_v45 }
 0x42b   :  { %8822 = vmatprep.mubr.bf16.mxu1 %v6370_v45 }
 0x431   :  { %8371 = vmatmul.mubr.bf16.gmra.mrb[156].mxu0 %v6369_v39 }
 0x432   :  { %8823 = vmatmul.mubr.bf16.gmra.mrb[156].mxu1 %v6369_v39 }
 0x4cc   :  { %v8302_v18 = vpop.f32.mrb[128].mxu0 }
 0x4cd   :  { %v10180_v13 = vadd.f32 %v8302_v18, %v16555_v9  ;;  %v8754_v7 = vpop.f32.mrb[128].mxu1  ;;  %v8304_v43 = vpop.f32.mrb[129].mxu0 }
 0x4ce   :  { %v10212_v8 = vadd.f32 %v8754_v7, %v16561_v37  ;;  %v10181_v6 = vadd.f32 %v8304_v43, %v16564_v17  ;;  %v8756_v49 = vpop.f32.mrb[129].mxu1  ;;  %v8306_v21 = vpop.f32.mrb[130].mxu0 }
 0x4cf   :  { %v8833_v36 = vmax.f32 %v10180_v13, 0.0  ;;  %v10213_v12 = vadd.f32 %v8756_v49, %v16567_v41  ;;  %v10182_v56 = vadd.f32 %v8306_v21, %v16555_v9  ;;  %v8758_v16 = vpop.f32.mrb[130].mxu1  ;;  %v8308_v33 = vpop.f32.mrb[131].mxu0 }
 0x4d0   :  { %v8835_v31 = vmax.f32 %v10212_v8, 0.0  ;;  %v8834_v11 = vmax.f32 %v10181_v6, 0.0  ;;  %v10214_v14 = vadd.f32 %v8758_v16, %v16561_v37  ;;  %v10183_v30 = vadd.f32 %v8308_v33, %v16564_v17  ;;  %v8760_v55 = vpop.f32.mrb[131].mxu1 }
 0x4d1   :  { %v8919_v54 = vmul.f32 %v16571_v26, %v8833_v36  ;;  %v8837_v0 = vmax.f32 %v10182_v56, 0.0  ;;  %v10215_v34 = vadd.f32 %v8760_v55, %v16567_v41  ;;  %v8836_v50 = vmax.f32 %v10213_v12, 0.0 }
 0x4d2   :  { %v8920_v22 = vmul.f32 %v16576_v15, %v8834_v11  ;;  %v8838_v10 = vmax.f32 %v10183_v30, 0.0  ;;  %v8921_v59 = vmul.f32 %v16579_v47, %v8835_v31  ;;  %v8839_v20 = vmax.f32 %v10214_v14, 0.0 }
 0x4d3   :  { %v8923_v58 = vmul.f32 %v16571_v26, %v8837_v0  ;;  %v8840_v23 = vmax.f32 %v10215_v34, 0.0  ;;  %v8922_v4 = vmul.f32 %v16590_v38, %v8836_v50 }
 0x4d4   :  { %v8924_v62 = vmul.f32 %v16576_v15, %v8838_v10  ;;  %v8312_v28 = vpop.f32.mrb[132].mxu0  ;;  %v8983_v2 = vadd.f32 %v8920_v22, %v8919_v54  ;;  %v8925_v45 = vmul.f32 %v16579_v47, %v8839_v20 }
 0x4d5   :  { %v10184_v51 = vadd.f32 %v8312_v28, %v16555_v9  ;;  %v8764_v46 = vpop.f32.mrb[132].mxu1  ;;  %v8314_v40 = vpop.f32.mrb[133].mxu0  ;;  %v8926_v60 = vmul.f32 %v16590_v38, %v8840_v23 }
 0x4d6   :  { %v8988_v61 = vadd.f32 %v8924_v62, %v8923_v58  ;;  %v10216_v1 = vadd.f32 %v8764_v46, %v16561_v37  ;;  %v10185_v53 = vadd.f32 %v8314_v40, %v16564_v17  ;;  %v8766_v42 = vpop.f32.mrb[133].mxu1  ;;  %v8316_v24 = vpop.f32.mrb[134].mxu0  ;;  %v8984_v19 = vadd.f32 %v8983_v2, %v8921_v59 }
 0x4d7   :  { %v8841_v44 = vmax.f32 %v10184_v51, 0.0  ;;  %v10217_v5 = vadd.f32 %v8766_v42, %v16567_v41  ;;  %v10186_v25 = vadd.f32 %v8316_v24, %v16555_v9  ;;  %v8768_v39 = vpop.f32.mrb[134].mxu1  ;;  %v8318_v35 = vpop.f32.mrb[135].mxu0 }
 0x4d8   :  { %v8843_v57 = vmax.f32 %v10216_v1, 0.0  ;;  %v8842_v48 = vmax.f32 %v10185_v53, 0.0  ;;  %v10187_v52 = vadd.f32 %v8318_v35, %v16564_v17  ;;  %v8770_v3 = vpop.f32.mrb[135].mxu1  ;;  %v10218_v32 = vadd.f32 %v8768_v39, %v16561_v37 }
 0x4d9   :  { %v8927_v29 = vmul.f32 %v16571_v26, %v8841_v44  ;;  %v8845_v27 = vmax.f32 %v10186_v25, 0.0  ;;  %v10219_v63 = vadd.f32 %v8770_v3, %v16567_v41  ;;  %v8844_v7 = vmax.f32 %v10217_v5, 0.0 }
 0x4da   :  { %v8928_v18 = vmul.f32 %v16576_v15, %v8842_v48  ;;  %v8846_v13 = vmax.f32 %v10187_v52, 0.0  ;;  %v8985_v8 = vadd.f32 %v8984_v19, %v8922_v4  ;;  %v8989_v6 = vadd.f32 %v8988_v61, %v8925_v45 }
 0x4db   :  { %v8931_v43 = vmul.f32 %v16571_v26, %v8845_v27  ;;  %v8929_v49 = vmul.f32 %v16579_v47, %v8843_v57  ;;  %v8847_v56 = vmax.f32 %v10218_v32, 0.0  ;;  %v8848_v16 = vmax.f32 %v10219_v63, 0.0 }
 0x4dc   :  { %v8932_v21 = vmul.f32 %v16576_v15, %v8846_v13  ;;  %v8322_v36 = vpop.f32.mrb[136].mxu0  ;;  %v8993_v12 = vadd.f32 %v8928_v18, %v8927_v29  ;;  %8986 = vadd.xlane.f32.xlu0 %v8985_v8  ;;  %v8990_v14 = vadd.f32 %v8989_v6, %v8926_v60  ;;  %v8930_v62 = vmul.f32 %v16590_v38, %v8844_v7 }
 0x4dd   :  { %v10188_v33 = vadd.f32 %v8322_v36, %v16555_v9  ;;  %v8774_v31 = vpop.f32.mrb[136].mxu1  ;;  %v8324_v11 = vpop.f32.mrb[137].mxu0  ;;  %v8933_v42 = vmul.f32 %v16579_v47, %v8847_v56  ;;  %v8934_v44 = vmul.f32 %v16590_v38, %v8848_v16 }
 0x4de   :  { %v8998_v30 = vadd.f32 %v8932_v21, %v8931_v43  ;;  %v10220_v55 = vadd.f32 %v8774_v31, %v16561_v37  ;;  %v10189_v54 = vadd.f32 %v8324_v11, %v16564_v17  ;;  %v8776_v0 = vpop.f32.mrb[137].mxu1  ;;  %v8326_v34 = vpop.f32.mrb[138].mxu0  ;;  %v8994_v22 = vadd.f32 %v8993_v12, %v8929_v49 }
 0x4df   :  { %v8849_v10 = vmax.f32 %v10188_v33, 0.0  ;;  %v10221_v50 = vadd.f32 %v8776_v0, %v16567_v41  ;;  %v10190_v58 = vadd.f32 %v8326_v34, %v16555_v9  ;;  %v8778_v59 = vpop.f32.mrb[138].mxu1  ;;  %v8328_v20 = vpop.f32.mrb[139].mxu0 }
 0x4e0   :  { %v8851_v28 = vmax.f32 %v10220_v55, 0.0  ;;  %v8850_v2 = vmax.f32 %v10189_v54, 0.0  ;;  %v10222_v23 = vadd.f32 %v8778_v59, %v16561_v37  ;;  %v10191_v51 = vadd.f32 %v8328_v20, %v16564_v17  ;;  %v8780_v46 = vpop.f32.mrb[139].mxu1  ;;  %8991 = vadd.xlane.f32.xlu0 %v8990_v14 }
 0x4e1   :  { %v8935_v40 = vmul.f32 %v16571_v26, %v8849_v10  ;;  %v8852_v61 = vmax.f32 %v10221_v50, 0.0  ;;  %v8853_v1 = vmax.f32 %v10190_v58, 0.0  ;;  %v10223_v53 = vadd.f32 %v8780_v46, %v16567_v41 }
 0x4e2   :  { %v8936_v24 = vmul.f32 %v16576_v15, %v8850_v2  ;;  %v8854_v19 = vmax.f32 %v10191_v51, 0.0  ;;  %v8995_v25 = vadd.f32 %v8994_v22, %v8930_v62  ;;  %v8937_v39 = vmul.f32 %v16579_v47, %v8851_v28 }
 0x4e3   :  { %v8939_v5 = vmul.f32 %v16571_v26, %v8853_v1  ;;  %v8999_v57 = vadd.f32 %v8998_v30, %v8933_v42  ;;  %v8938_v48 = vmul.f32 %v16590_v38, %v8852_v61  ;;  %v8855_v52 = vmax.f32 %v10222_v23, 0.0 }
 0x4e4   :  { %v9003_v35 = vadd.f32 %v8936_v24, %v8935_v40  ;;  %v8940_v4 = vmul.f32 %v16576_v15, %v8854_v19  ;;  %v8332_v45 = vpop.f32.mrb[140].mxu0  ;;  %v8856_v3 = vmax.f32 %v10223_v53, 0.0  ;;  %8996 = vadd.xlane.f32.xlu1 %v8995_v25 }
 0x4e5   :  { %v10192_v29 = vadd.f32 %v8332_v45, %v16555_v9  ;;  %v8784_v27 = vpop.f32.mrb[140].mxu1  ;;  %v8334_v32 = vpop.f32.mrb[141].mxu0  ;;  %v9000_v43 = vadd.f32 %v8999_v57, %v8934_v44  ;;  %v8941_v0 = vmul.f32 %v16579_v47, %v8855_v52 }
 0x4e6   :  { %v9008_v63 = vadd.f32 %v8940_v4, %v8939_v5  ;;  %v10224_v60 = vadd.f32 %v8784_v27, %v16561_v37  ;;  %v10193_v18 = vadd.f32 %v8334_v32, %v16564_v17  ;;  %v8786_v13 = vpop.f32.mrb[141].mxu1  ;;  %v8336_v7 = vpop.f32.mrb[142].mxu0  ;;  %v9004_v12 = vadd.f32 %v9003_v35, %v8937_v39 }
 0x4e7   :  { %v8857_v8 = vmax.f32 %v10192_v29, 0.0  ;;  %v10225_v6 = vadd.f32 %v8786_v13, %v16567_v41  ;;  %v10194_v49 = vadd.f32 %v8336_v7, %v16555_v9  ;;  %v8788_v21 = vpop.f32.mrb[142].mxu1  ;;  %v8338_v36 = vpop.f32.mrb[143].mxu0  ;;  %v8942_v10 = vmul.f32 %v16590_v38, %v8856_v3 }
 0x4e8   :  { %v8859_v56 = vmax.f32 %v10224_v60, 0.0  ;;  %v8858_v16 = vmax.f32 %v10193_v18, 0.0  ;;  %v10226_v33 = vadd.f32 %v8788_v21, %v16561_v37  ;;  %v10195_v31 = vadd.f32 %v8338_v36, %v16564_v17  ;;  %v8790_v11 = vpop.f32.mrb[143].mxu1  ;;  %9001 = vadd.xlane.f32.xlu1 %v9000_v43 }
 0x4e9   :  { %v8943_v14 = vmul.f32 %v16571_v26, %v8857_v8  ;;  %v8860_v30 = vmax.f32 %v10225_v6, 0.0  ;;  %v8861_v55 = vmax.f32 %v10194_v49, 0.0  ;;  %v10227_v54 = vadd.f32 %v8790_v11, %v16567_v41 }
 0x4ea   :  { %v8944_v34 = vmul.f32 %v16576_v15, %v8858_v16  ;;  %v8862_v22 = vmax.f32 %v10195_v31, 0.0  ;;  %v9005_v58 = vadd.f32 %v9004_v12, %v8938_v48  ;;  %v8945_v59 = vmul.f32 %v16579_v47, %v8859_v56 }
 0x4eb   :  { %v8947_v50 = vmul.f32 %v16571_v26, %v8861_v55  ;;  %v9009_v2 = vadd.f32 %v9008_v63, %v8941_v0  ;;  %v8946_v23 = vmul.f32 %v16590_v38, %v8860_v30  ;;  %v8863_v51 = vmax.f32 %v10226_v33, 0.0 }
 0x4ec   :  { %v9013_v20 = vadd.f32 %v8944_v34, %v8943_v14  ;;  %v8948_v62 = vmul.f32 %v16576_v15, %v8862_v22  ;;  %v8342_v28 = vpop.f32.mrb[144].mxu0  ;;  %v8864_v46 = vmax.f32 %v10227_v54, 0.0  ;;  %9006 = vadd.xlane.f32.xlu0 %v9005_v58 }
 0x4ed   :  { %v10196_v40 = vadd.f32 %v8342_v28, %v16555_v9  ;;  %v8794_v61 = vpop.f32.mrb[144].mxu1  ;;  %v8344_v1 = vpop.f32.mrb[145].mxu0  ;;  %v9010_v24 = vadd.f32 %v9009_v2, %v8942_v10  ;;  %v8949_v13 = vmul.f32 %v16579_v47, %v8863_v51 }
 0x4ee   :  { %v9018_v53 = vadd.f32 %v8948_v62, %v8947_v50  ;;  %v10228_v42 = vadd.f32 %v8794_v61, %v16561_v37  ;;  %v10197_v19 = vadd.f32 %v8344_v1, %v16564_v17  ;;  %v8796_v44 = vpop.f32.mrb[145].mxu1  ;;  %v8346_v5 = vpop.f32.mrb[146].mxu0  ;;  %v9014_v57 = vadd.f32 %v9013_v20, %v8945_v59 }
 0x4ef   :  { %v8865_v25 = vmax.f32 %v10196_v40, 0.0  ;;  %v10229_v39 = vadd.f32 %v8796_v44, %v16567_v41  ;;  %v10198_v35 = vadd.f32 %v8346_v5, %v16555_v9  ;;  %v8798_v4 = vpop.f32.mrb[146].mxu1  ;;  %v8348_v45 = vpop.f32.mrb[147].mxu0  ;;  %9011 = vadd.xlane.f32.xlu1 %v9010_v24  ;;  %v8950_v8 = vmul.f32 %v16590_v38, %v8864_v46 }
 0x4f0   :  { %v8867_v48 = vmax.f32 %v10228_v42, 0.0  ;;  %v8866_v52 = vmax.f32 %v10197_v19, 0.0  ;;  %v10230_v3 = vadd.f32 %v8798_v4, %v16561_v37  ;;  %v10199_v29 = vadd.f32 %v8348_v45, %v16564_v17  ;;  %v8800_v27 = vpop.f32.mrb[147].mxu1 }
 0x4f1   :  { %v8951_v32 = vmul.f32 %v16571_v26, %v8865_v25  ;;  %v8868_v63 = vmax.f32 %v10229_v39, 0.0  ;;  %v8869_v60 = vmax.f32 %v10198_v35, 0.0  ;;  %v10231_v18 = vadd.f32 %v8800_v27, %v16567_v41 }
 0x4f2   :  { %v8952_v7 = vmul.f32 %v16576_v15, %v8866_v52  ;;  %v8870_v43 = vmax.f32 %v10199_v29, 0.0  ;;  %v9015_v49 = vadd.f32 %v9014_v57, %v8946_v23  ;;  %v8953_v21 = vmul.f32 %v16579_v47, %v8867_v48 }
 0x4f3   :  { %v8955_v6 = vmul.f32 %v16571_v26, %v8869_v60  ;;  %v9019_v16 = vadd.f32 %v9018_v53, %v8949_v13  ;;  %v8954_v33 = vmul.f32 %v16590_v38, %v8868_v63  ;;  %v8871_v31 = vmax.f32 %v10230_v3, 0.0 }
 0x4f4   :  { %v9023_v36 = vadd.f32 %v8952_v7, %v8951_v32  ;;  %v8956_v12 = vmul.f32 %v16576_v15, %v8870_v43  ;;  %v8352_v56 = vpop.f32.mrb[148].mxu0  ;;  %v8872_v11 = vmax.f32 %v10231_v18, 0.0  ;;  %9016 = vadd.xlane.f32.xlu0 %v9015_v49 }
 0x4f5   :  { %v10200_v14 = vadd.f32 %v8352_v56, %v16555_v9  ;;  %v8804_v30 = vpop.f32.mrb[148].mxu1  ;;  %v8354_v55 = vpop.f32.mrb[149].mxu0  ;;  %v9020_v34 = vadd.f32 %v9019_v16, %v8950_v8  ;;  %v8957_v19 = vmul.f32 %v16579_v47, %v8871_v31 }
 0x4f6   :  { %v9028_v54 = vadd.f32 %v8956_v12, %v8955_v6  ;;  %v10232_v0 = vadd.f32 %v8804_v30, %v16561_v37  ;;  %v10201_v22 = vadd.f32 %v8354_v55, %v16564_v17  ;;  %v8806_v10 = vpop.f32.mrb[149].mxu1  ;;  %v8356_v50 = vpop.f32.mrb[150].mxu0  ;;  %v9024_v2 = vadd.f32 %v9023_v36, %v8953_v21 }
 0x4f7   :  { %v8873_v58 = vmax.f32 %v10200_v14, 0.0  ;;  %v10233_v59 = vadd.f32 %v8806_v10, %v16567_v41  ;;  %v10202_v20 = vadd.f32 %v8356_v50, %v16555_v9  ;;  %v8808_v62 = vpop.f32.mrb[150].mxu1  ;;  %v8358_v28 = vpop.f32.mrb[151].mxu0  ;;  %9021 = vadd.xlane.f32.xlu1 %v9020_v34  ;;  %v8958_v25 = vmul.f32 %v16590_v38, %v8872_v11 }
 0x4f8   :  { %v8875_v23 = vmax.f32 %v10232_v0, 0.0  ;;  %v8874_v51 = vmax.f32 %v10201_v22, 0.0  ;;  %v10234_v46 = vadd.f32 %v8808_v62, %v16561_v37  ;;  %v10203_v40 = vadd.f32 %v8358_v28, %v16564_v17  ;;  %v8810_v61 = vpop.f32.mrb[151].mxu1 }
 0x4f9   :  { %v8959_v1 = vmul.f32 %v16571_v26, %v8873_v58  ;;  %v8876_v53 = vmax.f32 %v10233_v59, 0.0  ;;  %v8877_v42 = vmax.f32 %v10202_v20, 0.0  ;;  %v10235_v24 = vadd.f32 %v8810_v61, %v16567_v41 }
 0x4fa   :  { %v8960_v44 = vmul.f32 %v16576_v15, %v8874_v51  ;;  %v8878_v5 = vmax.f32 %v10203_v40, 0.0  ;;  %v9025_v35 = vadd.f32 %v9024_v2, %v8954_v33  ;;  %v8961_v4 = vmul.f32 %v16579_v47, %v8875_v23 }
 0x4fb   :  { %v8963_v39 = vmul.f32 %v16571_v26, %v8877_v42  ;;  %v9029_v52 = vadd.f32 %v9028_v54, %v8957_v19  ;;  %v8962_v3 = vmul.f32 %v16590_v38, %v8876_v53  ;;  %v8879_v29 = vmax.f32 %v10234_v46, 0.0 }
 0x4fc   :  { %v9033_v45 = vadd.f32 %v8960_v44, %v8959_v1  ;;  %v8964_v57 = vmul.f32 %v16576_v15, %v8878_v5  ;;  %v8362_v48 = vpop.f32.mrb[152].mxu0  ;;  %v8880_v27 = vmax.f32 %v10235_v24, 0.0  ;;  %9026 = vadd.xlane.f32.xlu0 %v9025_v35 }
 0x4fd   :  { %v10204_v32 = vadd.f32 %v8362_v48, %v16555_v9  ;;  %v8814_v63 = vpop.f32.mrb[152].mxu1  ;;  %v8364_v60 = vpop.f32.mrb[153].mxu0  ;;  %v9030_v7 = vadd.f32 %v9029_v52, %v8958_v25  ;;  %v8965_v22 = vmul.f32 %v16579_v47, %v8879_v29 }
 0x4fe   :  { %v9038_v18 = vadd.f32 %v8964_v57, %v8963_v39  ;;  %v10236_v13 = vadd.f32 %v8814_v63, %v16561_v37  ;;  %v10205_v43 = vadd.f32 %v8364_v60, %v16564_v17  ;;  %v8816_v8 = vpop.f32.mrb[153].mxu1  ;;  %v8366_v6 = vpop.f32.mrb[154].mxu0  ;;  %v9034_v16 = vadd.f32 %v9033_v45, %v8961_v4 }
 0x4ff   :  { %v8881_v49 = vmax.f32 %v10204_v32, 0.0  ;;  %v10237_v21 = vadd.f32 %v8816_v8, %v16567_v41  ;;  %v10206_v36 = vadd.f32 %v8366_v6, %v16555_v9  ;;  %v8818_v12 = vpop.f32.mrb[154].mxu1  ;;  %v8368_v56 = vpop.f32.mrb[155].mxu0  ;;  %9031 = vadd.xlane.f32.xlu1 %v9030_v7  ;;  %v8966_v58 = vmul.f32 %v16590_v38, %v8880_v27 }
 0x500   :  { %v8883_v33 = vmax.f32 %v10236_v13, 0.0  ;;  %v8882_v31 = vmax.f32 %v10205_v43, 0.0  ;;  %v10238_v11 = vadd.f32 %v8818_v12, %v16561_v37  ;;  %v10207_v14 = vadd.f32 %v8368_v56, %v16564_v17  ;;  %v8820_v30 = vpop.f32.mrb[155].mxu1 }
 0x501   :  { %v8967_v55 = vmul.f32 %v16571_v26, %v8881_v49  ;;  %v8884_v54 = vmax.f32 %v10237_v21, 0.0  ;;  %v8885_v0 = vmax.f32 %v10206_v36, 0.0  ;;  %v10239_v34 = vadd.f32 %v8820_v30, %v16567_v41 }
 0x502   :  { %v8968_v10 = vmul.f32 %v16576_v15, %v8882_v31  ;;  %v8886_v50 = vmax.f32 %v10207_v14, 0.0  ;;  %v9035_v20 = vadd.f32 %v9034_v16, %v8962_v3  ;;  %v8969_v62 = vmul.f32 %v16579_v47, %v8883_v33 }
 0x503   :  { %v8971_v59 = vmul.f32 %v16571_v26, %v8885_v0  ;;  %v9039_v51 = vadd.f32 %v9038_v18, %v8965_v22  ;;  %v8970_v46 = vmul.f32 %v16590_v38, %v8884_v54  ;;  %v8887_v40 = vmax.f32 %v10238_v11, 0.0  ;;  %v16709_v0 = vld [vmem:[#allocation2] ss:$0 sm:$0xff] }
 0x504   :  { %v9043_v28 = vadd.f32 %v8968_v10, %v8967_v55  ;;  %v8972_v2 = vmul.f32 %v16576_v15, %v8886_v50  ;;  %v8372_v23 = vpop.f32.mrb[156].mxu0  ;;  %v8888_v61 = vmax.f32 %v10239_v34, 0.0  ;;  %9036 = vadd.xlane.f32.xlu0 %v9035_v20 }
 0x505   :  { %v10208_v1 = vadd.f32 %v8372_v23, %v16555_v9  ;;  %v8824_v53 = vpop.f32.mrb[156].mxu1  ;;  %v8374_v42 = vpop.f32.mrb[157].mxu0  ;;  %v9040_v44 = vadd.f32 %v9039_v51, %v8966_v58  ;;  %v8973_v43 = vmul.f32 %v16579_v47, %v8887_v40 }
 0x506   :  { %v9048_v24 = vadd.f32 %v8972_v2, %v8971_v59  ;;  %v10240_v19 = vadd.f32 %v8824_v53, %v16561_v37  ;;  %v10209_v5 = vadd.f32 %v8374_v42, %v16564_v17  ;;  %v8826_v25 = vpop.f32.mrb[157].mxu1  ;;  %v8376_v39 = vpop.f32.mrb[158].mxu0  ;;  %v9044_v52 = vadd.f32 %v9043_v28, %v8969_v62 }
 0x507   :  { %v8889_v35 = vmax.f32 %v10208_v1, 0.0  ;;  %v10241_v4 = vadd.f32 %v8826_v25, %v16567_v41  ;;  %v10210_v45 = vadd.f32 %v8376_v39, %v16555_v9  ;;  %v8828_v57 = vpop.f32.mrb[158].mxu1  ;;  %v8378_v48 = vpop.f32.mrb[159].mxu0  ;;  %9041 = vadd.xlane.f32.xlu1 %v9040_v44  ;;  %v8974_v49 = vmul.f32 %v16590_v38, %v8888_v61 }
 0x508   :  { %v8891_v3 = vmax.f32 %v10240_v19, 0.0  ;;  %v8890_v29 = vmax.f32 %v10209_v5, 0.0  ;;  %v10242_v27 = vadd.f32 %v8828_v57, %v16561_v37  ;;  %v10211_v32 = vadd.f32 %v8378_v48, %v16564_v17  ;;  %v8830_v63 = vpop.f32.mrb[159].mxu1 }
 0x509   :  { %v8975_v60 = vmul.f32 %v16571_v26, %v8889_v35  ;;  %v8892_v18 = vmax.f32 %v10241_v4, 0.0  ;;  %v8893_v13 = vmax.f32 %v10210_v45, 0.0  ;;  %v10243_v7 = vadd.f32 %v8830_v63, %v16567_v41 }
 0x50a   :  { %v8976_v9 = vmul.f32 %v16576_v15, %v8890_v29  ;;  %v8895_v8 = vmax.f32 %v10242_v27, 0.0  ;;  %v8894_v6 = vmax.f32 %v10211_v32, 0.0  ;;  %v8977_v21 = vmul.f32 %v16579_v47, %v8891_v3 }
 0x50b   :  { %v8979_v37 = vmul.f32 %v16571_v26, %v8893_v13  ;;  %v9045_v17 = vadd.f32 %v9044_v52, %v8970_v46  ;;  %v8896_v56 = vmax.f32 %v10243_v7, 0.0  ;;  %v9049_v16 = vadd.f32 %v9048_v24, %v8973_v43 }
 0x50c   :  { %v9053_v36 = vadd.f32 %v8976_v9, %v8975_v60  ;;  %v8980_v12 = vmul.f32 %v16576_v15, %v8894_v6  ;;  %v8978_v41 = vmul.f32 %v16590_v38, %v8892_v18  ;;  %v8981_v33 = vmul.f32 %v16579_v47, %v8895_v8 }
 0x50d   :  { %9046 = vadd.xlane.f32.xlu0 %v9045_v17  ;;  %v9050_v11 = vadd.f32 %v9049_v16, %v8974_v49  ;;  %v8982_v30 = vmul.f32 %v16590_v38, %v8896_v56 }
 0x50e   :  { %v9058_v31 = vadd.f32 %v8980_v12, %v8979_v37  ;;  %v9054_v14 = vadd.f32 %v9053_v36, %v8977_v21 }
 0x50f   :  { %9051 = vadd.xlane.f32.xlu1 %v9050_v11 }
 0x510   :  { %v9055_v55 = vadd.f32 %v9054_v14, %v8978_v41  ;;  %v9059_v54 = vadd.f32 %v9058_v31, %v8981_v33 }
 0x512   :  { %9056 = vadd.xlane.f32.xlu0 %v9055_v55  ;;  %v9060_v26 = vadd.f32 %v9059_v54, %v8982_v30 }
 0x514   :  { %9061 = vadd.xlane.f32.xlu1 %v9060_v26 }
 0x569   :  { %v8987_v15 = vpop.xlane.xlu0 %8986 }
 0x56a   :  { %v9070_v34 = vadd.f32 %v16709_v0, %v8987_v15 }
 0x56c   :  { %v10036_v22 = vmul.f32 -1.442695, %v9070_v34 }
 0x56d   :  { %v8992_v10 = vpop.xlane.xlu0 %8991 }
 0x56e   :  { %11205 = vpow2.f32 %v10036_v22  ;;  %v9071_v47 = vadd.f32 %v16709_v0, %v8992_v10 }
 0x570   :  { %v10037_v50 = vmul.f32 -1.442695, %v9071_v47 }
 0x571   :  { %v8997_v58 = vpop.xlane.xlu1 %8996 }
 0x572   :  { %11207 = vpow2.f32 %v10037_v50  ;;  %v9072_v38 = vadd.f32 %v16709_v0, %v8997_v58 }
 0x574   :  { %v10038_v59 = vmul.f32 -1.442695, %v9072_v38 }
 0x575   :  { %v9002_v20 = vpop.xlane.xlu1 %9001 }
 0x576   :  { %11209 = vpow2.f32 %v10038_v59  ;;  %v9073_v62 = vadd.f32 %v16709_v0, %v9002_v20 }
 0x578   :  { %v11206_v28 = vpop.eup %11205  ;;  %v10039_v2 = vmul.f32 -1.442695, %v9073_v62 }
 0x579   :  { %v9134_v23 = vadd.f32 1.0, %v11206_v28  ;;  %v9007_v51 = vpop.xlane.xlu0 %9006 }
 0x57a   :  { %11211 = vpow2.f32 %v10039_v2  ;;  %v9074_v46 = vadd.f32 %v16709_v0, %v9007_v51 }
 0x57b   :  { %11213 = vrcp.f32 %v9134_v23 }
 0x57c   :  { %v11208_v40 = vpop.eup %11207  ;;  %v10040_v61 = vmul.f32 -1.442695, %v9074_v46  ;;  %v9012_v1 = vpop.xlane.xlu1 %9011 }
 0x57d   :  { %v9135_v53 = vadd.f32 1.0, %v11208_v40  ;;  %v9075_v42 = vadd.f32 %v16709_v0, %v9012_v1 }
 0x57e   :  { %11215 = vpow2.f32 %v10040_v61 }
 0x57f   :  { %11217 = vrcp.f32 %v9135_v53  ;;  %v10041_v24 = vmul.f32 -1.442695, %v9075_v42 }
 0x580   :  { %v11210_v19 = vpop.eup %11209 }
 0x581   :  { %v9136_v44 = vadd.f32 1.0, %v11210_v19  ;;  %11219 = vpow2.f32 %v10041_v24  ;;  %v9017_v5 = vpop.xlane.xlu0 %9016 }
 0x582   :  { %v9076_v25 = vadd.f32 %v16709_v0, %v9017_v5 }
 0x583   :  { %11221 = vrcp.f32 %v9136_v44 }
 0x584   :  { %v11212_v39 = vpop.eup %11211  ;;  %v10042_v35 = vmul.f32 -1.442695, %v9076_v25  ;;  %v9022_v4 = vpop.xlane.xlu1 %9021 }
 0x585   :  { %v11214_v45 = vpop.eup %11213  ;;  %v9137_v57 = vadd.f32 1.0, %v11212_v39  ;;  %v9077_v48 = vadd.f32 %v16709_v0, %v9022_v4 }
 0x586   :  { %9183 = vst.msk [vmem:[%s16800_s9] sm:$0xff] %vm9182_vm0, %v11214_v45  ;;  %11223 = vpow2.f32 %v10042_v35 }
 0x587   :  { %11225 = vrcp.f32 %v9137_v57  ;;  %v10043_v52 = vmul.f32 -1.442695, %v9077_v48 }
 0x588   :  { %v11216_v3 = vpop.eup %11215 }
 0x589   :  { %v11218_v29 = vpop.eup %11217  ;;  %v9138_v27 = vadd.f32 1.0, %v11216_v3  ;;  %11227 = vpow2.f32 %v10043_v52  ;;  %v9027_v32 = vpop.xlane.xlu0 %9026 }
 0x58a   :  { %9184 = vst.msk [vmem:[%s16800_s9 + $0x8] sm:$0xff] %vm9182_vm0, %v11218_v29  ;;  %v9078_v63 = vadd.f32 %v16709_v0, %v9027_v32 }
 0x58b   :  { %v11220_v60 = vpop.eup %11219  ;;  %11229 = vrcp.f32 %v9138_v27 }
 0x58c   :  { %v9139_v18 = vadd.f32 1.0, %v11220_v60  ;;  %v10044_v13 = vmul.f32 -1.442695, %v9078_v63  ;;  %v9032_v7 = vpop.xlane.xlu1 %9031 }
 0x58d   :  { %v11222_v43 = vpop.eup %11221  ;;  %v9079_v9 = vadd.f32 %v16709_v0, %v9032_v7 }
 0x58e   :  { %9185 = vst.msk [vmem:[%s16800_s9 + $0x10] sm:$0xff] %vm9182_vm0, %v11222_v43  ;;  %11231 = vrcp.f32 %v9139_v18 }
 0x58f   :  { %11233 = vpow2.f32 %v10044_v13  ;;  %v10045_v8 = vmul.f32 -1.442695, %v9079_v9 }
 0x590   :  { %v11224_v6 = vpop.eup %11223 }
 0x591   :  { %v11226_v49 = vpop.eup %11225  ;;  %v9140_v21 = vadd.f32 1.0, %v11224_v6  ;;  %11235 = vpow2.f32 %v10045_v8  ;;  %v9037_v37 = vpop.xlane.xlu0 %9036 }
 0x592   :  { %9186 = vst.msk [vmem:[%s16800_s9 + $0x18] sm:$0xff] %vm9182_vm0, %v11226_v49  ;;  %v9080_v17 = vadd.f32 %v16709_v0, %v9037_v37 }
 0x593   :  { %v11228_v36 = vpop.eup %11227  ;;  %11237 = vrcp.f32 %v9140_v21 }
 0x594   :  { %v9141_v12 = vadd.f32 1.0, %v11228_v36  ;;  %v10046_v56 = vmul.f32 -1.442695, %v9080_v17  ;;  %v9042_v16 = vpop.xlane.xlu1 %9041 }
 0x595   :  { %v11230_v41 = vpop.eup %11229  ;;  %v9081_v33 = vadd.f32 %v16709_v0, %v9042_v16 }
 0x596   :  { %9187 = vst.msk [vmem:[%s16800_s9 + $0x20] sm:$0xff] %vm9182_vm0, %v11230_v41  ;;  %11239 = vrcp.f32 %v9141_v12 }
 0x597   :  { %11241 = vpow2.f32 %v10046_v56  ;;  %v10047_v31 = vmul.f32 -1.442695, %v9081_v33 }
 0x598   :  { %v11232_v11 = vpop.eup %11231 }
 0x599   :  { %v11234_v14 = vpop.eup %11233  ;;  %9188 = vst.msk [vmem:[%s16800_s9 + $0x28] sm:$0xff] %vm9182_vm0, %v11232_v11  ;;  %11243 = vpow2.f32 %v10047_v31 }
 0x59a   :  { %v9047_v30 = vpop.xlane.xlu0 %9046  ;;  %v9142_v55 = vadd.f32 1.0, %v11234_v14 }
 0x59b   :  { %v9082_v54 = vadd.f32 %v16709_v0, %v9047_v30  ;;  %v11236_v26 = vpop.eup %11235 }
 0x59c   :  { %11245 = vrcp.f32 %v9142_v55  ;;  %v9143_v15 = vadd.f32 1.0, %v11236_v26  ;;  %v9052_v22 = vpop.xlane.xlu1 %9051 }
 0x59d   :  { %v10048_v34 = vmul.f32 -1.442695, %v9082_v54  ;;  %v11238_v10 = vpop.eup %11237  ;;  %v9083_v47 = vadd.f32 %v16709_v0, %v9052_v22 }
 0x59e   :  { %9189 = vst.msk [vmem:[%s16800_s9 + $0x30] sm:$0xff] %vm9182_vm0, %v11238_v10  ;;  %11247 = vrcp.f32 %v9143_v15 }
 0x59f   :  { %v9057_v50 = vpop.xlane.xlu0 %9056  ;;  %11249 = vpow2.f32 %v10048_v34  ;;  %v10049_v58 = vmul.f32 -1.442695, %v9083_v47 }
 0x5a0   :  { %v9084_v38 = vadd.f32 %v16709_v0, %v9057_v50  ;;  %v11240_v59 = vpop.eup %11239 }
 0x5a1   :  { %v9062_v20 = vpop.xlane.xlu1 %9061  ;;  %v11242_v62 = vpop.eup %11241  ;;  %9190 = vst.msk [vmem:[%s16800_s9 + $0x38] sm:$0xff] %vm9182_vm0, %v11240_v59  ;;  %11251 = vpow2.f32 %v10049_v58 }
 0x5a2   :  { %v10050_v28 = vmul.f32 -1.442695, %v9084_v38  ;;  %v9085_v2 = vadd.f32 %v16709_v0, %v9062_v20  ;;  %v9144_v23 = vadd.f32 1.0, %v11242_v62 }
 0x5a3   :  { %v11244_v51 = vpop.eup %11243 }
 0x5a4   :  { %11253 = vpow2.f32 %v10050_v28  ;;  %v10051_v46 = vmul.f32 -1.442695, %v9085_v2  ;;  %v9145_v40 = vadd.f32 1.0, %v11244_v51 }
 0x5a5   :  { %11255 = vrcp.f32 %v9144_v23 }
 0x5a6   :  { %11257 = vpow2.f32 %v10051_v46  ;;  %v11246_v61 = vpop.eup %11245 }
 0x5a7   :  { %11259 = vrcp.f32 %v9145_v40  ;;  %9191 = vst.msk [vmem:[%s16800_s9 + $0x40] sm:$0xff] %vm9182_vm0, %v11246_v61 }
 0x5a8   :  { %v11248_v1 = vpop.eup %11247 }
 0x5a9   :  { %v11250_v53 = vpop.eup %11249  ;;  %9192 = vst.msk [vmem:[%s16800_s9 + $0x48] sm:$0xff] %vm9182_vm0, %v11248_v1 }
 0x5aa   :  { %v9146_v0 = vadd.f32 1.0, %v11250_v53 }
 0x5ab   :  { %v11252_v42 = vpop.eup %11251 }
 0x5ac   :  { %11261 = vrcp.f32 %v9146_v0  ;;  %v9147_v24 = vadd.f32 1.0, %v11252_v42 }
 0x5ae   :  { %v11254_v19 = vpop.eup %11253  ;;  %11263 = vrcp.f32 %v9147_v24 }
 0x5af   :  { %v11256_v44 = vpop.eup %11255  ;;  %v9148_v5 = vadd.f32 1.0, %v11254_v19 }
 0x5b0   :  { %v11258_v25 = vpop.eup %11257  ;;  %9193 = vst.msk [vmem:[%s16800_s9 + $0x50] sm:$0xff] %vm9182_vm0, %v11256_v44 }
 0x5b1   :  { %v11260_v39 = vpop.eup %11259  ;;  %11265 = vrcp.f32 %v9148_v5  ;;  %v9149_v35 = vadd.f32 1.0, %v11258_v25 }
 0x5b2   :  { %9194 = vst.msk [vmem:[%s16800_s9 + $0x58] sm:$0xff] %vm9182_vm0, %v11260_v39 }
 0x5b3   :  { %11267 = vrcp.f32 %v9149_v35 }
 0x5b6   :  { %v11262_v4 = vpop.eup %11261 }
 0x5b7   :  { %9195 = vst.msk [vmem:[%s16800_s9 + $0x60] sm:$0xff] %vm9182_vm0, %v11262_v4 }
 0x5b8   :  { %v11264_v45 = vpop.eup %11263 }
 0x5b9   :  { %9196 = vst.msk [vmem:[%s16800_s9 + $0x68] sm:$0xff] %vm9182_vm0, %v11264_v45 }
 0x5bb   :  { %v11266_v57 = vpop.eup %11265 }
 0x5bc   :  { %9197 = vst.msk [vmem:[%s16800_s9 + $0x70] sm:$0xff] %vm9182_vm0, %v11266_v57 }
 0x5bd   :  { %v11268_v48 = vpop.eup %11267 }
 0x5be   :  { %9198 = vst.msk [vmem:[%s16800_s9 + $0x78] sm:$0xff] %vm9182_vm0, %v11268_v48 }

</bundles_post_ra>
